<compile_context>
chip_gen: v7x
topology: tpu7x:2x2x1
jax: 0.10.0
libtpu: 0.0.40
codegen_flags: <defaults>
</compile_context>

<pallas_src>
import functools

import jax
import jax.numpy as jnp
from jax.experimental import pallas as pl
from jax.experimental.pallas import tpu as pltpu

LANE = 128          # channel / lane padding target
NUM_CLASSES = 10


# --------------------------------------------------------------------------
# Pallas kernel: Y = act(X @ W [+ residual]) for one M-tile, f32 accumulate.
# --------------------------------------------------------------------------
def _mm_kernel(*refs, relu, has_res):
    if has_res:
        x_ref, w_ref, r_ref, o_ref = refs
    else:
        x_ref, w_ref, o_ref = refs
    acc = jnp.dot(x_ref[...], w_ref[...], preferred_element_type=jnp.float32)
    if has_res:
        acc = acc + r_ref[...].astype(jnp.float32)
    if relu:
        acc = jnp.maximum(acc, 0.0)
    o_ref[...] = acc.astype(o_ref.dtype)


def matmul_act(x, w, residual=None, relu=False, out_dtype=jnp.bfloat16):
    """x:(M,K) @ w:(K,N) [+ residual:(M,N)], optional ReLU.

    K and N are lane-dense (multiples of 128) by construction; M is never
    padded.  Uses a single grid step, or 2 parallel steps when M >= 256 so
    both v7x TensorCores are used.
    """
    M, K = x.shape
    Kw, N = w.shape
    assert K == Kw, (K, Kw)

    if M >= 256 and M % 16 == 0:
        n_tiles = 2
    else:
        n_tiles = 1
    tm = M // n_tiles

    x = x.astype(jnp.bfloat16)
    w = w.astype(jnp.bfloat16)
    args = [x, w]
    in_specs = [
        pl.BlockSpec((tm, K), lambda i: (i, 0)),
        pl.BlockSpec((K, N), lambda i: (0, 0)),
    ]
    if residual is not None:
        args.append(residual.astype(jnp.bfloat16))
        in_specs.append(pl.BlockSpec((tm, N), lambda i: (i, 0)))

    kernel = functools.partial(_mm_kernel, relu=relu,
                               has_res=residual is not None)
    return pl.pallas_call(
        kernel,
        out_shape=jax.ShapeDtypeStruct((M, N), out_dtype),
        grid=(n_tiles,),
        in_specs=in_specs,
        out_specs=pl.BlockSpec((tm, N), lambda i: (i, 0)),
        compiler_params=pltpu.CompilerParams(
            dimension_semantics=("parallel",)),
    )(*args)


# --------------------------------------------------------------------------
# Conv glue: im2col patch extraction in XLA (static strides), matmul in Pallas.
# --------------------------------------------------------------------------
def conv2d_nhwc(x, w_mat, ksize, stride, padding, relu=False, residual=None):
    """x:(B,H,W,C) NHWC, w_mat:(ksize*ksize*C_pad, Cout_pad) -> NHWC output."""
    B, H, W, C = x.shape
    KH = KW = ksize
    Ho = (H + 2 * padding - KH) // stride + 1
    Wo = (W + 2 * padding - KW) // stride + 1

    if padding:
        x = jnp.pad(x, ((0, 0), (padding, padding), (padding, padding), (0, 0)))

    taps = []
    for kh in range(KH):
        for kw in range(KW):
            taps.append(
                x[:, kh:kh + Ho * stride:stride, kw:kw + Wo * stride:stride, :])
    patches = taps[0] if len(taps) == 1 else jnp.concatenate(taps, axis=-1)

    M = B * Ho * Wo
    xm = patches.reshape(M, KH * KW * C)
    K_rows = w_mat.shape[0]
    if xm.shape[1] < K_rows:                     # only conv1: 27 -> 128
        xm = jnp.pad(xm, ((0, 0), (0, K_rows - xm.shape[1])))
    assert xm.shape[1] == K_rows

    N = w_mat.shape[1]
    rm = residual.reshape(M, N) if residual is not None else None
    out = matmul_act(xm, w_mat, residual=rm, relu=relu)
    return out.reshape(B, Ho, Wo, N)


def basic_block(x, blk, stride):
    out = conv2d_nhwc(x, blk["conv_a"], ksize=3, stride=stride, padding=1,
                      relu=True)
    if "shortcut" in blk:
        shortcut = conv2d_nhwc(x, blk["shortcut"], ksize=1, stride=stride,
                               padding=0)
    else:
        shortcut = x
    # conv_b + residual add + ReLU fused in one Pallas epilogue.
    out = conv2d_nhwc(out, blk["conv_b"], ksize=3, stride=1, padding=1,
                      relu=True, residual=shortcut)
    return out


def resnet_qnn_forward(prep, x_nchw):
    # quant_inp: treated as identity (see TODO(synk) above).
    x = jnp.transpose(x_nchw, (0, 2, 3, 1)).astype(jnp.bfloat16)  # NCHW->NHWC
    out = conv2d_nhwc(x, prep["conv1"], ksize=3, stride=1, padding=1,
                      relu=True)                                  # conv1+relu1
    for blocks in prep["layers"]:                                 # layer1..3
        for bi, blk in enumerate(blocks):
            stride = 2 if bi == 0 else 1      # static: _make_layer(stride=2)
            out = basic_block(out, blk, stride)
    # avg_pool2d(4) + view + linear, folded into one lane-dense Pallas matmul.
    B, H, W, C = out.shape
    flat = out.reshape(B, H * W * C)
    logits = matmul_act(flat, prep["pool_linear"], out_dtype=jnp.float32)
    return logits[:, :NUM_CLASSES]


# --------------------------------------------------------------------------
# Parameter construction (PyTorch OIHW shapes) and TPU-friendly preparation.
# --------------------------------------------------------------------------
def init_params(key, channel=8, num_blocks=(1, 1, 1), num_classes=NUM_CLASSES):
    keys = iter(jax.random.split(key, 64))

    def conv_w(cout, cin, k):
        return 0.1 * jax.random.normal(next(keys), (cout, cin, k, k),
                                       jnp.float32)

    params = {"conv1": conv_w(channel, 3, 3)}
    in_planes = channel
    layers = []
    for mult, nb in zip((1, 2, 4), num_blocks):
        planes = channel * mult
        strides = [2] + [1] * (nb - 1)
        blocks = []
        for s in strides:
            blk = {"conv_a": conv_w(planes, in_planes, 3),
                   "conv_b": conv_w(planes, planes, 3)}
            if s != 1 or in_planes != planes:
                blk["shortcut"] = conv_w(planes, in_planes, 1)
            blocks.append(blk)
            in_planes = planes
        layers.append(blocks)
    params["layers"] = layers
    params["linear"] = 0.1 * jax.random.normal(
        next(keys), (num_classes, channel * 4), jnp.float32)
    return params


def _pad_to(x, axis, mult):
    pad = (-x.shape[axis]) % mult
    if pad == 0:
        return x
    widths = [(0, 0)] * x.ndim
    widths[axis] = (0, pad)
    return jnp.pad(x, widths)


def _prep_conv(w_oihw, act_cin):
    """OIHW -> lane-dense bf16 matrix (KH*KW*act_cin -> pad128, Cout -> 128)."""
    w = jnp.transpose(w_oihw, (2, 3, 1, 0)).astype(jnp.float32)   # HWIO
    KH, KW, Cin, Cout = w.shape
    if act_cin > Cin:                         # match padded-channel activation
        w = jnp.pad(w, ((0, 0), (0, 0), (0, act_cin - Cin), (0, 0)))
    wm = w.reshape(KH * KW * act_cin, Cout)
    wm = _pad_to(wm, 0, LANE)                 # K rows  (conv1: 27 -> 128)
    wm = _pad_to(wm, 1, LANE)                 # Cout    (8/16/32 -> 128)
    return wm.astype(jnp.bfloat16)


def _prep_pool_linear(w_lin, spatial):
    """(10, C) linear with 1/spatial mean folded in -> (spatial*128, 128)."""
    num_classes, C = w_lin.shape
    wT = jnp.transpose(w_lin).astype(jnp.float32) / float(spatial)   # (C, 10)
    wT = jnp.pad(wT, ((0, LANE - C), (0, LANE - num_classes)))       # (128,128)
    return jnp.tile(wT, (spatial, 1)).astype(jnp.bfloat16)


def prepare_params(params, input_hw=32):
    prep = {"conv1": _prep_conv(params["conv1"], act_cin=3)}
    layers = []
    for blocks in params["layers"]:
        pblocks = []
        for blk in blocks:
            pb = {"conv_a": _prep_conv(blk["conv_a"], act_cin=LANE),
                  "conv_b": _prep_conv(blk["conv_b"], act_cin=LANE)}
            if "shortcut" in blk:
                pb["shortcut"] = _prep_conv(blk["shortcut"], act_cin=LANE)
            pblocks.append(pb)
        layers.append(pblocks)
    prep["layers"] = layers
    # Final feature map is (input_hw / 8)^2 spatial positions (3 stride-2
    # stages); matches F.avg_pool2d(out, 4) exactly when input_hw == 32.
    final_hw = input_hw // 8
    prep["pool_linear"] = _prep_pool_linear(params["linear"],
                                            spatial=final_hw * final_hw)
    return prep


# --------------------------------------------------------------------------
if __name__ == "__main__":
    key = jax.random.PRNGKey(0)
    k_param, k_in = jax.random.split(key)

    channel = 8
    params = init_params(k_param, channel=channel, num_blocks=(1, 1, 1))
    prep = prepare_params(params, input_hw=32)

    # CIFAR-like input implied by forward (3 stride-2 layers + avg_pool2d(4)):
    x = jax.random.normal(k_in, (2, 3, 32, 32), jnp.float32)   # NCHW like torch

    logits = jax.jit(resnet_qnn_forward)(prep, x)
    logits = jax.block_until_ready(logits)
    assert logits.shape == (2, NUM_CLASSES)
    print("KERNEL_OK")
</pallas_src>

<mosaic_0001>
module attributes {stable_mosaic.version = 11 : i64} {
  func.func @_mm_kernel(%arg0: i32, %arg1: memref<1024x128xbf16, #tpu.memory_space<vmem>>, %arg2: memref<128x128xbf16, #tpu.memory_space<vmem>>, %arg3: memref<1024x128xbf16, #tpu.memory_space<vmem>>) attributes {dimension_semantics = [#tpu.dimension_semantics<parallel>], iteration_bounds = array<i64: 2>, scalar_prefetch = 0 : i64, scratch_operands = 0 : i64, tpu.core_type = #tpu.core_type<tc>, window_params = [{transform_indices = @transform_0, window_bounds = array<i64: 1024, 128>}, {pipeline_mode = #tpu.pipeline_mode<synchronous>, transform_indices = @transform_1, window_bounds = array<i64: 128, 128>}, {transform_indices = @transform_2, window_bounds = array<i64: 1024, 128>}]} {
    %c0 = arith.constant 0 : index
    %c0_0 = arith.constant 0 : index
    %0 = vector.load %arg1[%c0, %c0_0] : memref<1024x128xbf16, #tpu.memory_space<vmem>>, vector<1024x128xbf16>
    %c0_1 = arith.constant 0 : index
    %c0_2 = arith.constant 0 : index
    %1 = vector.load %arg2[%c0_1, %c0_2] : memref<128x128xbf16, #tpu.memory_space<vmem>>, vector<128x128xbf16>
    %cst = arith.constant dense<0.000000e+00> : vector<1024x128xf32>
    %2 = tpu.matmul %0, %1, %cst {dimension_numbers = #tpu.dot_dimension_numbers<[1], [0], [0], [1], [0, 0, 1, 1], [], []>} : vector<1024x128xbf16>, vector<128x128xbf16>, vector<1024x128xf32> -> vector<1024x128xf32>
    %cst_3 = arith.constant 0.000000e+00 : f32
    %3 = vector.broadcast %cst_3 : f32 to vector<1024x128xf32>
    %4 = arith.maximumf %2, %3 : vector<1024x128xf32>
    %5 = arith.truncf %4 : vector<1024x128xf32> to vector<1024x128xbf16>
    %c0_4 = arith.constant 0 : index
    %c0_5 = arith.constant 0 : index
    %6 = vector.load %arg3[%c0_4, %c0_5] : memref<1024x128xbf16, #tpu.memory_space<vmem>>, vector<1024x128xbf16>
    tpu.vector_store %arg3[%c0_4, %c0_5], %5 {strides = array<i32>} : memref<1024x128xbf16, #tpu.memory_space<vmem>>, vector<1024x128xbf16>,
    return
  }
  func.func @transform_0(%arg0: i32) -> (i32, i32) {
    %c0_i32 = arith.constant 0 : i32
    %c0_i32_0 = arith.constant 0 : i32
    return %arg0, %c0_i32 : i32, i32
  }
  func.func @transform_1(%arg0: i32) -> (i32, i32) {
    %c0_i32 = arith.constant 0 : i32
    %c0_i32_0 = arith.constant 0 : i32
    %c0_i32_1 = arith.constant 0 : i32
    return %c0_i32, %c0_i32_0 : i32, i32
  }
  func.func @transform_2(%arg0: i32) -> (i32, i32) {
    %c0_i32 = arith.constant 0 : i32
    %c0_i32_0 = arith.constant 0 : i32
    return %arg0, %c0_i32 : i32, i32
  }
}

module attributes {stable_mosaic.version = 11 : i64} {
  func.func @_mm_kernel(%arg0: i32, %arg1: memref<256x128xbf16, #tpu.memory_space<vmem>>, %arg2: memref<128x128xbf16, #tpu.memory_space<vmem>>, %arg3: memref<256x128xbf16, #tpu.memory_space<vmem>>) attributes {dimension_semantics = [#tpu.dimension_semantics<parallel>], iteration_bounds = array<i64: 2>, scalar_prefetch = 0 : i64, scratch_operands = 0 : i64, tpu.core_type = #tpu.core_type<tc>, window_params = [{transform_indices = @transform_0, window_bounds = array<i64: 256, 128>}, {pipeline_mode = #tpu.pipeline_mode<synchronous>, transform_indices = @transform_1, window_bounds = array<i64: 128, 128>}, {transform_indices = @transform_2, window_bounds = array<i64: 256, 128>}]} {
    %c0 = arith.constant 0 : index
    %c0_0 = arith.constant 0 : index
    %0 = vector.load %arg1[%c0, %c0_0] : memref<256x128xbf16, #tpu.memory_space<vmem>>, vector<256x128xbf16>
    %c0_1 = arith.constant 0 : index
    %c0_2 = arith.constant 0 : index
    %1 = vector.load %arg2[%c0_1, %c0_2] : memref<128x128xbf16, #tpu.memory_space<vmem>>, vector<128x128xbf16>
    %cst = arith.constant dense<0.000000e+00> : vector<256x128xf32>
    %2 = tpu.matmul %0, %1, %cst {dimension_numbers = #tpu.dot_dimension_numbers<[1], [0], [0], [1], [0, 0, 1, 1], [], []>} : vector<256x128xbf16>, vector<128x128xbf16>, vector<256x128xf32> -> vector<256x128xf32>
    %3 = arith.truncf %2 : vector<256x128xf32> to vector<256x128xbf16>
    %c0_3 = arith.constant 0 : index
    %c0_4 = arith.constant 0 : index
    %4 = vector.load %arg3[%c0_3, %c0_4] : memref<256x128xbf16, #tpu.memory_space<vmem>>, vector<256x128xbf16>
    tpu.vector_store %arg3[%c0_3, %c0_4], %3 {strides = array<i32>} : memref<256x128xbf16, #tpu.memory_space<vmem>>, vector<256x128xbf16>,
    return
  }
  func.func @transform_0(%arg0: i32) -> (i32, i32) {
    %c0_i32 = arith.constant 0 : i32
    %c0_i32_0 = arith.constant 0 : i32
    return %arg0, %c0_i32 : i32, i32
  }
  func.func @transform_1(%arg0: i32) -> (i32, i32) {
    %c0_i32 = arith.constant 0 : i32
    %c0_i32_0 = arith.constant 0 : i32
    %c0_i32_1 = arith.constant 0 : i32
    return %c0_i32, %c0_i32_0 : i32, i32
  }
  func.func @transform_2(%arg0: i32) -> (i32, i32) {
    %c0_i32 = arith.constant 0 : i32
    %c0_i32_0 = arith.constant 0 : i32
    return %arg0, %c0_i32 : i32, i32
  }
}

module attributes {stable_mosaic.version = 11 : i64} {
  func.func @_mm_kernel(%arg0: i32, %arg1: memref<256x1152xbf16, #tpu.memory_space<vmem>>, %arg2: memref<1152x128xbf16, #tpu.memory_space<vmem>>, %arg3: memref<256x128xbf16, #tpu.memory_space<vmem>>) attributes {dimension_semantics = [#tpu.dimension_semantics<parallel>], iteration_bounds = array<i64: 2>, scalar_prefetch = 0 : i64, scratch_operands = 0 : i64, tpu.core_type = #tpu.core_type<tc>, window_params = [{transform_indices = @transform_0, window_bounds = array<i64: 256, 1152>}, {pipeline_mode = #tpu.pipeline_mode<synchronous>, transform_indices = @transform_1, window_bounds = array<i64: 1152, 128>}, {transform_indices = @transform_2, window_bounds = array<i64: 256, 128>}]} {
    %c0 = arith.constant 0 : index
    %c0_0 = arith.constant 0 : index
    %0 = vector.load %arg1[%c0, %c0_0] : memref<256x1152xbf16, #tpu.memory_space<vmem>>, vector<256x1152xbf16>
    %c0_1 = arith.constant 0 : index
    %c0_2 = arith.constant 0 : index
    %1 = vector.load %arg2[%c0_1, %c0_2] : memref<1152x128xbf16, #tpu.memory_space<vmem>>, vector<1152x128xbf16>
    %cst = arith.constant dense<0.000000e+00> : vector<256x128xf32>
    %2 = tpu.matmul %0, %1, %cst {dimension_numbers = #tpu.dot_dimension_numbers<[1], [0], [0], [1], [0, 0, 1, 1], [], []>} : vector<256x1152xbf16>, vector<1152x128xbf16>, vector<256x128xf32> -> vector<256x128xf32>
    %cst_3 = arith.constant 0.000000e+00 : f32
    %3 = vector.broadcast %cst_3 : f32 to vector<256x128xf32>
    %4 = arith.maximumf %2, %3 : vector<256x128xf32>
    %5 = arith.truncf %4 : vector<256x128xf32> to vector<256x128xbf16>
    %c0_4 = arith.constant 0 : index
    %c0_5 = arith.constant 0 : index
    %6 = vector.load %arg3[%c0_4, %c0_5] : memref<256x128xbf16, #tpu.memory_space<vmem>>, vector<256x128xbf16>
    tpu.vector_store %arg3[%c0_4, %c0_5], %5 {strides = array<i32>} : memref<256x128xbf16, #tpu.memory_space<vmem>>, vector<256x128xbf16>,
    return
  }
  func.func @transform_0(%arg0: i32) -> (i32, i32) {
    %c0_i32 = arith.constant 0 : i32
    %c0_i32_0 = arith.constant 0 : i32
    return %arg0, %c0_i32 : i32, i32
  }
  func.func @transform_1(%arg0: i32) -> (i32, i32) {
    %c0_i32 = arith.constant 0 : i32
    %c0_i32_0 = arith.constant 0 : i32
    %c0_i32_1 = arith.constant 0 : i32
    return %c0_i32, %c0_i32_0 : i32, i32
  }
  func.func @transform_2(%arg0: i32) -> (i32, i32) {
    %c0_i32 = arith.constant 0 : i32
    %c0_i32_0 = arith.constant 0 : i32
    return %arg0, %c0_i32 : i32, i32
  }
}

module attributes {stable_mosaic.version = 11 : i64} {
  func.func @_mm_kernel(%arg0: i32, %arg1: memref<128x128xbf16, #tpu.memory_space<vmem>>, %arg2: memref<128x128xbf16, #tpu.memory_space<vmem>>, %arg3: memref<128x128xbf16, #tpu.memory_space<vmem>>) attributes {dimension_semantics = [#tpu.dimension_semantics<parallel>], iteration_bounds = array<i64: 1>, scalar_prefetch = 0 : i64, scratch_operands = 0 : i64, tpu.core_type = #tpu.core_type<tc>, window_params = [{transform_indices = @transform_0, window_bounds = array<i64: 128, 128>}, {pipeline_mode = #tpu.pipeline_mode<synchronous>, transform_indices = @transform_1, window_bounds = array<i64: 128, 128>}, {transform_indices = @transform_2, window_bounds = array<i64: 128, 128>}]} {
    %c0 = arith.constant 0 : index
    %c0_0 = arith.constant 0 : index
    %0 = vector.load %arg1[%c0, %c0_0] : memref<128x128xbf16, #tpu.memory_space<vmem>>, vector<128x128xbf16>
    %c0_1 = arith.constant 0 : index
    %c0_2 = arith.constant 0 : index
    %1 = vector.load %arg2[%c0_1, %c0_2] : memref<128x128xbf16, #tpu.memory_space<vmem>>, vector<128x128xbf16>
    %cst = arith.constant dense<0.000000e+00> : vector<128x128xf32>
    %2 = tpu.matmul %0, %1, %cst {dimension_numbers = #tpu.dot_dimension_numbers<[1], [0], [0], [1], [0, 0, 1, 1], [], []>} : vector<128x128xbf16>, vector<128x128xbf16>, vector<128x128xf32> -> vector<128x128xf32>
    %3 = arith.truncf %2 : vector<128x128xf32> to vector<128x128xbf16>
    %c0_3 = arith.constant 0 : index
    %c0_4 = arith.constant 0 : index
    %4 = vector.load %arg3[%c0_3, %c0_4] : memref<128x128xbf16, #tpu.memory_space<vmem>>, vector<128x128xbf16>
    tpu.vector_store %arg3[%c0_3, %c0_4], %3 {strides = array<i32>} : memref<128x128xbf16, #tpu.memory_space<vmem>>, vector<128x128xbf16>,
    return
  }
  func.func @transform_0(%arg0: i32) -> (i32, i32) {
    %c0_i32 = arith.constant 0 : i32
    %c0_i32_0 = arith.constant 0 : i32
    return %arg0, %c0_i32 : i32, i32
  }
  func.func @transform_1(%arg0: i32) -> (i32, i32) {
    %c0_i32 = arith.constant 0 : i32
    %c0_i32_0 = arith.constant 0 : i32
    %c0_i32_1 = arith.constant 0 : i32
    return %c0_i32, %c0_i32_0 : i32, i32
  }
  func.func @transform_2(%arg0: i32) -> (i32, i32) {
    %c0_i32 = arith.constant 0 : i32
    %c0_i32_0 = arith.constant 0 : i32
    return %arg0, %c0_i32 : i32, i32
  }
}

module attributes {stable_mosaic.version = 11 : i64} {
  func.func @_mm_kernel(%arg0: i32, %arg1: memref<256x1152xbf16, #tpu.memory_space<vmem>>, %arg2: memref<1152x128xbf16, #tpu.memory_space<vmem>>, %arg3: memref<256x128xbf16, #tpu.memory_space<vmem>>, %arg4: memref<256x128xbf16, #tpu.memory_space<vmem>>) attributes {dimension_semantics = [#tpu.dimension_semantics<parallel>], iteration_bounds = array<i64: 2>, scalar_prefetch = 0 : i64, scratch_operands = 0 : i64, tpu.core_type = #tpu.core_type<tc>, window_params = [{transform_indices = @transform_0, window_bounds = array<i64: 256, 1152>}, {pipeline_mode = #tpu.pipeline_mode<synchronous>, transform_indices = @transform_1, window_bounds = array<i64: 1152, 128>}, {transform_indices = @transform_2, window_bounds = array<i64: 256, 128>}, {transform_indices = @transform_3, window_bounds = array<i64: 256, 128>}]} {
    %c0 = arith.constant 0 : index
    %c0_0 = arith.constant 0 : index
    %0 = vector.load %arg1[%c0, %c0_0] : memref<256x1152xbf16, #tpu.memory_space<vmem>>, vector<256x1152xbf16>
    %c0_1 = arith.constant 0 : index
    %c0_2 = arith.constant 0 : index
    %1 = vector.load %arg2[%c0_1, %c0_2] : memref<1152x128xbf16, #tpu.memory_space<vmem>>, vector<1152x128xbf16>
    %cst = arith.constant dense<0.000000e+00> : vector<256x128xf32>
    %2 = tpu.matmul %0, %1, %cst {dimension_numbers = #tpu.dot_dimension_numbers<[1], [0], [0], [1], [0, 0, 1, 1], [], []>} : vector<256x1152xbf16>, vector<1152x128xbf16>, vector<256x128xf32> -> vector<256x128xf32>
    %c0_3 = arith.constant 0 : index
    %c0_4 = arith.constant 0 : index
    %3 = vector.load %arg3[%c0_3, %c0_4] : memref<256x128xbf16, #tpu.memory_space<vmem>>, vector<256x128xbf16>
    %4 = arith.extf %3 : vector<256x128xbf16> to vector<256x128xf32>
    %5 = arith.addf %2, %4 : vector<256x128xf32>
    %cst_5 = arith.constant 0.000000e+00 : f32
    %6 = vector.broadcast %cst_5 : f32 to vector<256x128xf32>
    %7 = arith.maximumf %5, %6 : vector<256x128xf32>
    %8 = arith.truncf %7 : vector<256x128xf32> to vector<256x128xbf16>
    %c0_6 = arith.constant 0 : index
    %c0_7 = arith.constant 0 : index
    %9 = vector.load %arg4[%c0_6, %c0_7] : memref<256x128xbf16, #tpu.memory_space<vmem>>, vector<256x128xbf16>
    tpu.vector_store %arg4[%c0_6, %c0_7], %8 {strides = array<i32>} : memref<256x128xbf16, #tpu.memory_space<vmem>>, vector<256x128xbf16>,
    return
  }
  func.func @transform_0(%arg0: i32) -> (i32, i32) {
    %c0_i32 = arith.constant 0 : i32
    %c0_i32_0 = arith.constant 0 : i32
    return %arg0, %c0_i32 : i32, i32
  }
  func.func @transform_1(%arg0: i32) -> (i32, i32) {
    %c0_i32 = arith.constant 0 : i32
    %c0_i32_0 = arith.constant 0 : i32
    %c0_i32_1 = arith.constant 0 : i32
    return %c0_i32, %c0_i32_0 : i32, i32
  }
  func.func @transform_2(%arg0: i32) -> (i32, i32) {
    %c0_i32 = arith.constant 0 : i32
    %c0_i32_0 = arith.constant 0 : i32
    return %arg0, %c0_i32 : i32, i32
  }
  func.func @transform_3(%arg0: i32) -> (i32, i32) {
    %c0_i32 = arith.constant 0 : i32
    %c0_i32_0 = arith.constant 0 : i32
    return %arg0, %c0_i32 : i32, i32
  }
}

module attributes {stable_mosaic.version = 11 : i64} {
  func.func @_mm_kernel(%arg0: i32, %arg1: memref<128x1152xbf16, #tpu.memory_space<vmem>>, %arg2: memref<1152x128xbf16, #tpu.memory_space<vmem>>, %arg3: memref<128x128xbf16, #tpu.memory_space<vmem>>) attributes {dimension_semantics = [#tpu.dimension_semantics<parallel>], iteration_bounds = array<i64: 1>, scalar_prefetch = 0 : i64, scratch_operands = 0 : i64, tpu.core_type = #tpu.core_type<tc>, window_params = [{transform_indices = @transform_0, window_bounds = array<i64: 128, 1152>}, {pipeline_mode = #tpu.pipeline_mode<synchronous>, transform_indices = @transform_1, window_bounds = array<i64: 1152, 128>}, {transform_indices = @transform_2, window_bounds = array<i64: 128, 128>}]} {
    %c0 = arith.constant 0 : index
    %c0_0 = arith.constant 0 : index
    %0 = vector.load %arg1[%c0, %c0_0] : memref<128x1152xbf16, #tpu.memory_space<vmem>>, vector<128x1152xbf16>
    %c0_1 = arith.constant 0 : index
    %c0_2 = arith.constant 0 : index
    %1 = vector.load %arg2[%c0_1, %c0_2] : memref<1152x128xbf16, #tpu.memory_space<vmem>>, vector<1152x128xbf16>
    %cst = arith.constant dense<0.000000e+00> : vector<128x128xf32>
    %2 = tpu.matmul %0, %1, %cst {dimension_numbers = #tpu.dot_dimension_numbers<[1], [0], [0], [1], [0, 0, 1, 1], [], []>} : vector<128x1152xbf16>, vector<1152x128xbf16>, vector<128x128xf32> -> vector<128x128xf32>
    %cst_3 = arith.constant 0.000000e+00 : f32
    %3 = vector.broadcast %cst_3 : f32 to vector<128x128xf32>
    %4 = arith.maximumf %2, %3 : vector<128x128xf32>
    %5 = arith.truncf %4 : vector<128x128xf32> to vector<128x128xbf16>
    %c0_4 = arith.constant 0 : index
    %c0_5 = arith.constant 0 : index
    %6 = vector.load %arg3[%c0_4, %c0_5] : memref<128x128xbf16, #tpu.memory_space<vmem>>, vector<128x128xbf16>
    tpu.vector_store %arg3[%c0_4, %c0_5], %5 {strides = array<i32>} : memref<128x128xbf16, #tpu.memory_space<vmem>>, vector<128x128xbf16>,
    return
  }
  func.func @transform_0(%arg0: i32) -> (i32, i32) {
    %c0_i32 = arith.constant 0 : i32
    %c0_i32_0 = arith.constant 0 : i32
    return %arg0, %c0_i32 : i32, i32
  }
  func.func @transform_1(%arg0: i32) -> (i32, i32) {
    %c0_i32 = arith.constant 0 : i32
    %c0_i32_0 = arith.constant 0 : i32
    %c0_i32_1 = arith.constant 0 : i32
    return %c0_i32, %c0_i32_0 : i32, i32
  }
  func.func @transform_2(%arg0: i32) -> (i32, i32) {
    %c0_i32 = arith.constant 0 : i32
    %c0_i32_0 = arith.constant 0 : i32
    return %arg0, %c0_i32 : i32, i32
  }
}

module attributes {stable_mosaic.version = 11 : i64} {
  func.func @_mm_kernel(%arg0: i32, %arg1: memref<128x1152xbf16, #tpu.memory_space<vmem>>, %arg2: memref<1152x128xbf16, #tpu.memory_space<vmem>>, %arg3: memref<128x128xbf16, #tpu.memory_space<vmem>>, %arg4: memref<128x128xbf16, #tpu.memory_space<vmem>>) attributes {dimension_semantics = [#tpu.dimension_semantics<parallel>], iteration_bounds = array<i64: 1>, scalar_prefetch = 0 : i64, scratch_operands = 0 : i64, tpu.core_type = #tpu.core_type<tc>, window_params = [{transform_indices = @transform_0, window_bounds = array<i64: 128, 1152>}, {pipeline_mode = #tpu.pipeline_mode<synchronous>, transform_indices = @transform_1, window_bounds = array<i64: 1152, 128>}, {transform_indices = @transform_2, window_bounds = array<i64: 128, 128>}, {transform_indices = @transform_3, window_bounds = array<i64: 128, 128>}]} {
    %c0 = arith.constant 0 : index
    %c0_0 = arith.constant 0 : index
    %0 = vector.load %arg1[%c0, %c0_0] : memref<128x1152xbf16, #tpu.memory_space<vmem>>, vector<128x1152xbf16>
    %c0_1 = arith.constant 0 : index
    %c0_2 = arith.constant 0 : index
    %1 = vector.load %arg2[%c0_1, %c0_2] : memref<1152x128xbf16, #tpu.memory_space<vmem>>, vector<1152x128xbf16>
    %cst = arith.constant dense<0.000000e+00> : vector<128x128xf32>
    %2 = tpu.matmul %0, %1, %cst {dimension_numbers = #tpu.dot_dimension_numbers<[1], [0], [0], [1], [0, 0, 1, 1], [], []>} : vector<128x1152xbf16>, vector<1152x128xbf16>, vector<128x128xf32> -> vector<128x128xf32>
    %c0_3 = arith.constant 0 : index
    %c0_4 = arith.constant 0 : index
    %3 = vector.load %arg3[%c0_3, %c0_4] : memref<128x128xbf16, #tpu.memory_space<vmem>>, vector<128x128xbf16>
    %4 = arith.extf %3 : vector<128x128xbf16> to vector<128x128xf32>
    %5 = arith.addf %2, %4 : vector<128x128xf32>
    %cst_5 = arith.constant 0.000000e+00 : f32
    %6 = vector.broadcast %cst_5 : f32 to vector<128x128xf32>
    %7 = arith.maximumf %5, %6 : vector<128x128xf32>
    %8 = arith.truncf %7 : vector<128x128xf32> to vector<128x128xbf16>
    %c0_6 = arith.constant 0 : index
    %c0_7 = arith.constant 0 : index
    %9 = vector.load %arg4[%c0_6, %c0_7] : memref<128x128xbf16, #tpu.memory_space<vmem>>, vector<128x128xbf16>
    tpu.vector_store %arg4[%c0_6, %c0_7], %8 {strides = array<i32>} : memref<128x128xbf16, #tpu.memory_space<vmem>>, vector<128x128xbf16>,
    return
  }
  func.func @transform_0(%arg0: i32) -> (i32, i32) {
    %c0_i32 = arith.constant 0 : i32
    %c0_i32_0 = arith.constant 0 : i32
    return %arg0, %c0_i32 : i32, i32
  }
  func.func @transform_1(%arg0: i32) -> (i32, i32) {
    %c0_i32 = arith.constant 0 : i32
    %c0_i32_0 = arith.constant 0 : i32
    %c0_i32_1 = arith.constant 0 : i32
    return %c0_i32, %c0_i32_0 : i32, i32
  }
  func.func @transform_2(%arg0: i32) -> (i32, i32) {
    %c0_i32 = arith.constant 0 : i32
    %c0_i32_0 = arith.constant 0 : i32
    return %arg0, %c0_i32 : i32, i32
  }
  func.func @transform_3(%arg0: i32) -> (i32, i32) {
    %c0_i32 = arith.constant 0 : i32
    %c0_i32_0 = arith.constant 0 : i32
    return %arg0, %c0_i32 : i32, i32
  }
}

module attributes {stable_mosaic.version = 11 : i64} {
  func.func @_mm_kernel(%arg0: i32, %arg1: memref<32x128xbf16, #tpu.memory_space<vmem>>, %arg2: memref<128x128xbf16, #tpu.memory_space<vmem>>, %arg3: memref<32x128xbf16, #tpu.memory_space<vmem>>) attributes {dimension_semantics = [#tpu.dimension_semantics<parallel>], iteration_bounds = array<i64: 1>, scalar_prefetch = 0 : i64, scratch_operands = 0 : i64, tpu.core_type = #tpu.core_type<tc>, window_params = [{transform_indices = @transform_0, window_bounds = array<i64: 32, 128>}, {pipeline_mode = #tpu.pipeline_mode<synchronous>, transform_indices = @transform_1, window_bounds = array<i64: 128, 128>}, {transform_indices = @transform_2, window_bounds = array<i64: 32, 128>}]} {
    %c0 = arith.constant 0 : index
    %c0_0 = arith.constant 0 : index
    %0 = vector.load %arg1[%c0, %c0_0] : memref<32x128xbf16, #tpu.memory_space<vmem>>, vector<32x128xbf16>
    %c0_1 = arith.constant 0 : index
    %c0_2 = arith.constant 0 : index
    %1 = vector.load %arg2[%c0_1, %c0_2] : memref<128x128xbf16, #tpu.memory_space<vmem>>, vector<128x128xbf16>
    %cst = arith.constant dense<0.000000e+00> : vector<32x128xf32>
    %2 = tpu.matmul %0, %1, %cst {dimension_numbers = #tpu.dot_dimension_numbers<[1], [0], [0], [1], [0, 0, 1, 1], [], []>} : vector<32x128xbf16>, vector<128x128xbf16>, vector<32x128xf32> -> vector<32x128xf32>
    %3 = arith.truncf %2 : vector<32x128xf32> to vector<32x128xbf16>
    %c0_3 = arith.constant 0 : index
    %c0_4 = arith.constant 0 : index
    %4 = vector.load %arg3[%c0_3, %c0_4] : memref<32x128xbf16, #tpu.memory_space<vmem>>, vector<32x128xbf16>
    tpu.vector_store %arg3[%c0_3, %c0_4], %3 {strides = array<i32>} : memref<32x128xbf16, #tpu.memory_space<vmem>>, vector<32x128xbf16>,
    return
  }
  func.func @transform_0(%arg0: i32) -> (i32, i32) {
    %c0_i32 = arith.constant 0 : i32
    %c0_i32_0 = arith.constant 0 : i32
    return %arg0, %c0_i32 : i32, i32
  }
  func.func @transform_1(%arg0: i32) -> (i32, i32) {
    %c0_i32 = arith.constant 0 : i32
    %c0_i32_0 = arith.constant 0 : i32
    %c0_i32_1 = arith.constant 0 : i32
    return %c0_i32, %c0_i32_0 : i32, i32
  }
  func.func @transform_2(%arg0: i32) -> (i32, i32) {
    %c0_i32 = arith.constant 0 : i32
    %c0_i32_0 = arith.constant 0 : i32
    return %arg0, %c0_i32 : i32, i32
  }
}

module attributes {stable_mosaic.version = 11 : i64} {
  func.func @_mm_kernel(%arg0: i32, %arg1: memref<32x1152xbf16, #tpu.memory_space<vmem>>, %arg2: memref<1152x128xbf16, #tpu.memory_space<vmem>>, %arg3: memref<32x128xbf16, #tpu.memory_space<vmem>>) attributes {dimension_semantics = [#tpu.dimension_semantics<parallel>], iteration_bounds = array<i64: 1>, scalar_prefetch = 0 : i64, scratch_operands = 0 : i64, tpu.core_type = #tpu.core_type<tc>, window_params = [{transform_indices = @transform_0, window_bounds = array<i64: 32, 1152>}, {pipeline_mode = #tpu.pipeline_mode<synchronous>, transform_indices = @transform_1, window_bounds = array<i64: 1152, 128>}, {transform_indices = @transform_2, window_bounds = array<i64: 32, 128>}]} {
    %c0 = arith.constant 0 : index
    %c0_0 = arith.constant 0 : index
    %0 = vector.load %arg1[%c0, %c0_0] : memref<32x1152xbf16, #tpu.memory_space<vmem>>, vector<32x1152xbf16>
    %c0_1 = arith.constant 0 : index
    %c0_2 = arith.constant 0 : index
    %1 = vector.load %arg2[%c0_1, %c0_2] : memref<1152x128xbf16, #tpu.memory_space<vmem>>, vector<1152x128xbf16>
    %cst = arith.constant dense<0.000000e+00> : vector<32x128xf32>
    %2 = tpu.matmul %0, %1, %cst {dimension_numbers = #tpu.dot_dimension_numbers<[1], [0], [0], [1], [0, 0, 1, 1], [], []>} : vector<32x1152xbf16>, vector<1152x128xbf16>, vector<32x128xf32> -> vector<32x128xf32>
    %cst_3 = arith.constant 0.000000e+00 : f32
    %3 = vector.broadcast %cst_3 : f32 to vector<32x128xf32>
    %4 = arith.maximumf %2, %3 : vector<32x128xf32>
    %5 = arith.truncf %4 : vector<32x128xf32> to vector<32x128xbf16>
    %c0_4 = arith.constant 0 : index
    %c0_5 = arith.constant 0 : index
    %6 = vector.load %arg3[%c0_4, %c0_5] : memref<32x128xbf16, #tpu.memory_space<vmem>>, vector<32x128xbf16>
    tpu.vector_store %arg3[%c0_4, %c0_5], %5 {strides = array<i32>} : memref<32x128xbf16, #tpu.memory_space<vmem>>, vector<32x128xbf16>,
    return
  }
  func.func @transform_0(%arg0: i32) -> (i32, i32) {
    %c0_i32 = arith.constant 0 : i32
    %c0_i32_0 = arith.constant 0 : i32
    return %arg0, %c0_i32 : i32, i32
  }
  func.func @transform_1(%arg0: i32) -> (i32, i32) {
    %c0_i32 = arith.constant 0 : i32
    %c0_i32_0 = arith.constant 0 : i32
    %c0_i32_1 = arith.constant 0 : i32
    return %c0_i32, %c0_i32_0 : i32, i32
  }
  func.func @transform_2(%arg0: i32) -> (i32, i32) {
    %c0_i32 = arith.constant 0 : i32
    %c0_i32_0 = arith.constant 0 : i32
    return %arg0, %c0_i32 : i32, i32
  }
}

module attributes {stable_mosaic.version = 11 : i64} {
  func.func @_mm_kernel(%arg0: i32, %arg1: memref<2x2048xbf16, #tpu.memory_space<vmem>>, %arg2: memref<2048x128xbf16, #tpu.memory_space<vmem>>, %arg3: memref<2x128xf32, #tpu.memory_space<vmem>>) attributes {dimension_semantics = [#tpu.dimension_semantics<parallel>], iteration_bounds = array<i64: 1>, scalar_prefetch = 0 : i64, scratch_operands = 0 : i64, tpu.core_type = #tpu.core_type<tc>, window_params = [{transform_indices = @transform_0, window_bounds = array<i64: 2, 2048>}, {pipeline_mode = #tpu.pipeline_mode<synchronous>, transform_indices = @transform_1, window_bounds = array<i64: 2048, 128>}, {transform_indices = @transform_2, window_bounds = array<i64: 2, 128>}]} {
    %c0 = arith.constant 0 : index
    %c0_0 = arith.constant 0 : index
    %0 = vector.load %arg1[%c0, %c0_0] : memref<2x2048xbf16, #tpu.memory_space<vmem>>, vector<2x2048xbf16>
    %c0_1 = arith.constant 0 : index
    %c0_2 = arith.constant 0 : index
    %1 = vector.load %arg2[%c0_1, %c0_2] : memref<2048x128xbf16, #tpu.memory_space<vmem>>, vector<2048x128xbf16>
    %cst = arith.constant dense<0.000000e+00> : vector<2x128xf32>
    %2 = tpu.matmul %0, %1, %cst {dimension_numbers = #tpu.dot_dimension_numbers<[1], [0], [0], [1], [0, 0, 1, 1], [], []>} : vector<2x2048xbf16>, vector<2048x128xbf16>, vector<2x128xf32> -> vector<2x128xf32>
    %c0_3 = arith.constant 0 : index
    %c0_4 = arith.constant 0 : index
    %3 = vector.load %arg3[%c0_3, %c0_4] : memref<2x128xf32, #tpu.memory_space<vmem>>, vector<2x128xf32>
    tpu.vector_store %arg3[%c0_3, %c0_4], %2 {strides = array<i32>} : memref<2x128xf32, #tpu.memory_space<vmem>>, vector<2x128xf32>,
    return
  }
  func.func @transform_0(%arg0: i32) -> (i32, i32) {
    %c0_i32 = arith.constant 0 : i32
    %c0_i32_0 = arith.constant 0 : i32
    return %arg0, %c0_i32 : i32, i32
  }
  func.func @transform_1(%arg0: i32) -> (i32, i32) {
    %c0_i32 = arith.constant 0 : i32
    %c0_i32_0 = arith.constant 0 : i32
    %c0_i32_1 = arith.constant 0 : i32
    return %c0_i32, %c0_i32_0 : i32, i32
  }
  func.func @transform_2(%arg0: i32) -> (i32, i32) {
    %c0_i32 = arith.constant 0 : i32
    %c0_i32_0 = arith.constant 0 : i32
    return %arg0, %c0_i32 : i32, i32
  }
}

module attributes {stable_mosaic.version = 11 : i64} {
  func.func @_mm_kernel(%arg0: i32, %arg1: memref<32x1152xbf16, #tpu.memory_space<vmem>>, %arg2: memref<1152x128xbf16, #tpu.memory_space<vmem>>, %arg3: memref<32x128xbf16, #tpu.memory_space<vmem>>, %arg4: memref<32x128xbf16, #tpu.memory_space<vmem>>) attributes {dimension_semantics = [#tpu.dimension_semantics<parallel>], iteration_bounds = array<i64: 1>, scalar_prefetch = 0 : i64, scratch_operands = 0 : i64, tpu.core_type = #tpu.core_type<tc>, window_params = [{transform_indices = @transform_0, window_bounds = array<i64: 32, 1152>}, {pipeline_mode = #tpu.pipeline_mode<synchronous>, transform_indices = @transform_1, window_bounds = array<i64: 1152, 128>}, {transform_indices = @transform_2, window_bounds = array<i64: 32, 128>}, {transform_indices = @transform_3, window_bounds = array<i64: 32, 128>}]} {
    %c0 = arith.constant 0 : index
    %c0_0 = arith.constant 0 : index
    %0 = vector.load %arg1[%c0, %c0_0] : memref<32x1152xbf16, #tpu.memory_space<vmem>>, vector<32x1152xbf16>
    %c0_1 = arith.constant 0 : index
    %c0_2 = arith.constant 0 : index
    %1 = vector.load %arg2[%c0_1, %c0_2] : memref<1152x128xbf16, #tpu.memory_space<vmem>>, vector<1152x128xbf16>
    %cst = arith.constant dense<0.000000e+00> : vector<32x128xf32>
    %2 = tpu.matmul %0, %1, %cst {dimension_numbers = #tpu.dot_dimension_numbers<[1], [0], [0], [1], [0, 0, 1, 1], [], []>} : vector<32x1152xbf16>, vector<1152x128xbf16>, vector<32x128xf32> -> vector<32x128xf32>
    %c0_3 = arith.constant 0 : index
    %c0_4 = arith.constant 0 : index
    %3 = vector.load %arg3[%c0_3, %c0_4] : memref<32x128xbf16, #tpu.memory_space<vmem>>, vector<32x128xbf16>
    %4 = arith.extf %3 : vector<32x128xbf16> to vector<32x128xf32>
    %5 = arith.addf %2, %4 : vector<32x128xf32>
    %cst_5 = arith.constant 0.000000e+00 : f32
    %6 = vector.broadcast %cst_5 : f32 to vector<32x128xf32>
    %7 = arith.maximumf %5, %6 : vector<32x128xf32>
    %8 = arith.truncf %7 : vector<32x128xf32> to vector<32x128xbf16>
    %c0_6 = arith.constant 0 : index
    %c0_7 = arith.constant 0 : index
    %9 = vector.load %arg4[%c0_6, %c0_7] : memref<32x128xbf16, #tpu.memory_space<vmem>>, vector<32x128xbf16>
    tpu.vector_store %arg4[%c0_6, %c0_7], %8 {strides = array<i32>} : memref<32x128xbf16, #tpu.memory_space<vmem>>, vector<32x128xbf16>,
    return
  }
  func.func @transform_0(%arg0: i32) -> (i32, i32) {
    %c0_i32 = arith.constant 0 : i32
    %c0_i32_0 = arith.constant 0 : i32
    return %arg0, %c0_i32 : i32, i32
  }
  func.func @transform_1(%arg0: i32) -> (i32, i32) {
    %c0_i32 = arith.constant 0 : i32
    %c0_i32_0 = arith.constant 0 : i32
    %c0_i32_1 = arith.constant 0 : i32
    return %c0_i32, %c0_i32_0 : i32, i32
  }
  func.func @transform_2(%arg0: i32) -> (i32, i32) {
    %c0_i32 = arith.constant 0 : i32
    %c0_i32_0 = arith.constant 0 : i32
    return %arg0, %c0_i32 : i32, i32
  }
  func.func @transform_3(%arg0: i32) -> (i32, i32) {
    %c0_i32 = arith.constant 0 : i32
    %c0_i32_0 = arith.constant 0 : i32
    return %arg0, %c0_i32 : i32, i32
  }
}

</mosaic_0001>

<bundles_post_ra>
// kernel: resnet_qnn_forward.13
= control target key start
LH: loop header
LB: loop body
LE: loop exit
PB: predicated region body
PF: predicated region fallthrough
CT: control target
= control target key end

     0   :  { %s1054_s9 = smov 0   ;;  %s1138_s0 = inlined_call_operand.vmem [shape: bf16[512,128], index: 0, kind: input, shape index: {}]   ;;  %s1139_s1 = inlined_call_operand.vmem [shape: bf16[128,128], index: 1, kind: input, shape index: {}]   ;;  %s1140_s2 = inlined_call_operand.vmem [shape: bf16[512,128], index: 2, kind: output, shape index: {}]  }
   0x1 LB: > { %s717_s10 = sadd.s32 4294967295, %s1037_s9   ;;  %p721_p0 = scmp.ge.s32.totalorder %s1037_s9, 1  ;;  %s1037_s9 = sphi %s1054_s9, %s12_s9  }
   0x2   : > { %p113_p1 = scmp.lt.s32.totalorder %s1037_s9, 3 }
   0x4   : > { %p114_p2 = pnand %p721_p0, %p113_p1 }
   0x5   : > { %v1007_v0 = vld [vmem:[%s1139_s1] sm:$0xff] (!%p114_p2)   ;;  %s722_s13 = sshll.u32 (!%p114_p2), %s717_s10, 5  ;;  %v1008_v1 = vld [vmem:[%s1139_s1 + $0x8] sm:$0xff] (!%p114_p2)   ;;  %v1009_v2 = vld [vmem:[%s1139_s1 + $0x10] sm:$0xff] (!%p114_p2)  }
   0x6   : > { %117 = sbr.rel (%p114_p2) target bundleno = 280 (0x118), region = 28  ;;  %p136_p3 = scmp.lt.s32.totalorder (!%p114_p2), %s722_s13, 63  ;;  %935 = vmatprep.subr.bf16.mxu0 (!%p114_p2), %v1007_v0  ;;  %983 = vmatprep.subr.bf16.mxu1 (!%p114_p2), %v1007_v0  ;;  %v1010_v3 = vld [vmem:[%s1139_s1 + $0x18] sm:$0xff] (!%p114_p2)   ;;  %v1011_v6 = vld [vmem:[%s1139_s1 + $0x20] sm:$0xff] (!%p114_p2)   ;;  %v1012_v7 = vld [vmem:[%s1139_s1 + $0x28] sm:$0xff] (!%p114_p2)  }
   0x7   : > { %936 = vmatpush3.bf16.msra.mxu0 (!%p114_p2), %v1007_v0  ;;  %991 = vmatpush3.bf16.msra.mxu1 (!%p114_p2), %v1007_v0  ;;  %v1013_v8 = vld [vmem:[%s1139_s1 + $0x30] sm:$0xff] (!%p114_p2)   ;;  %v1014_v9 = vld [vmem:[%s1139_s1 + $0x38] sm:$0xff] (!%p114_p2)  }
   0x8   : > { %937 = vmatprep.subr.bf16.mxu0 (!%p114_p2), %v1008_v1  ;;  %984 = vmatprep.subr.bf16.mxu1 (!%p114_p2), %v1008_v1 }
   0xb   : > { %938 = vmatpush3.bf16.msra.mxu0 (!%p114_p2), %v1008_v1  ;;  %992 = vmatpush3.bf16.msra.mxu1 (!%p114_p2), %v1008_v1 }
   0xc   : > { %939 = vmatprep.subr.bf16.mxu0 (!%p114_p2), %v1009_v2  ;;  %985 = vmatprep.subr.bf16.mxu1 (!%p114_p2), %v1009_v2 }
   0xd   : > { %s1142_s13 = smov (!%p136_p3, %s722_s13), 63 }
   0xe   : > { %s723_s18 = sshll.u32 %s1142_s13, 2 }
   0xf   : > { %s1079_s21 = scalar_lea.vmem %s1138_s0, %s723_s18  ;;  %940 = vmatpush3.bf16.msra.mxu0 %v1009_v2  ;;  %993 = vmatpush3.bf16.msra.mxu1 %v1009_v2  ;;  %s1117_s6 = scalar_lea.vmem %s1140_s2, %s723_s18 }
  0x10   : > { %v1015_v4 = vld [vmem:[%s1079_s21] sm:$0xff]   ;;  %941 = vmatprep.subr.bf16.mxu0 %v1010_v3  ;;  %986 = vmatprep.subr.bf16.mxu1 %v1010_v3  ;;  %v1017_v10 = vld [vmem:[%s1079_s21 + $0x8] sm:$0xff]   ;;  %v1019_v12 = vld [vmem:[%s1079_s21 + $0x10] sm:$0xff]  }
  0x11   : > { %v1016_v5 = vld [vmem:[%s1079_s21 + $0x40] sm:$0xff]   ;;  %951 = vmatprep.mubr.bf16.mxu0 %v1015_v4  ;;  %v1018_v11 = vld [vmem:[%s1079_s21 + $0x48] sm:$0xff]   ;;  %v1020_v13 = vld [vmem:[%s1079_s21 + $0x50] sm:$0xff]  }
  0x12   : > { %967 = vmatprep.mubr.bf16.mxu1 %v1016_v5  ;;  %v1021_v14 = vld [vmem:[%s1079_s21 + $0x18] sm:$0xff]   ;;  %v1023_v16 = vld [vmem:[%s1079_s21 + $0x20] sm:$0xff]   ;;  %v1025_v18 = vld [vmem:[%s1079_s21 + $0x28] sm:$0xff]  }
  0x13   : > { %942 = vmatpush3.bf16.msra.mxu0 %v1010_v3  ;;  %994 = vmatpush3.bf16.msra.mxu1 %v1010_v3  ;;  %v1022_v15 = vld [vmem:[%s1079_s21 + $0x58] sm:$0xff]   ;;  %v1024_v17 = vld [vmem:[%s1079_s21 + $0x60] sm:$0xff]   ;;  %v1026_v19 = vld [vmem:[%s1079_s21 + $0x68] sm:$0xff]  }
  0x14   : > { %943 = vmatprep.subr.bf16.mxu0 %v1011_v6  ;;  %987 = vmatprep.subr.bf16.mxu1 %v1011_v6  ;;  %v1027_v20 = vld [vmem:[%s1079_s21 + $0x30] sm:$0xff]   ;;  %v1029_v22 = vld [vmem:[%s1079_s21 + $0x38] sm:$0xff]  }
  0x15   : > { %v1028_v21 = vld [vmem:[%s1079_s21 + $0x70] sm:$0xff]   ;;  %v1030_v23 = vld [vmem:[%s1079_s21 + $0x78] sm:$0xff]  }
  0x17   : > { %944 = vmatpush3.bf16.msra.mxu0 %v1011_v6  ;;  %995 = vmatpush3.bf16.msra.mxu1 %v1011_v6 }
  0x18   : > { %945 = vmatprep.subr.bf16.mxu0 %v1012_v7  ;;  %988 = vmatprep.subr.bf16.mxu1 %v1012_v7 }
  0x1b   : > { %946 = vmatpush3.bf16.msra.mxu0 %v1012_v7  ;;  %996 = vmatpush3.bf16.msra.mxu1 %v1012_v7 }
  0x1c   : > { %947 = vmatprep.subr.bf16.mxu0 %v1013_v8  ;;  %989 = vmatprep.subr.bf16.mxu1 %v1013_v8 }
  0x1f   : > { %948 = vmatpush3.bf16.msra.mxu0 %v1013_v8  ;;  %997 = vmatpush3.bf16.msra.mxu1 %v1013_v8 }
  0x20   : > { %949 = vmatprep.subr.bf16.mxu0 %v1014_v9  ;;  %990 = vmatprep.subr.bf16.mxu1 %v1014_v9 }
  0x23   : > { %950 = vmatpush3.bf16.msra.mxu0 %v1014_v9  ;;  %998 = vmatpush3.bf16.msra.mxu1 %v1014_v9 }
  0x26   : > { %952 = vmatmul.mubr.bf16.vlgmr.msra.gmra.mrb[0].mxu0 %v1017_v10  ;;  %968 = vmatmul.mubr.bf16.vlgmr.msra.gmra.mrb[0].mxu1 %v1018_v11 }
  0x27   : > { %955 = vmatprep.mubr.bf16.mxu0 %v1019_v12  ;;  %971 = vmatprep.mubr.bf16.mxu1 %v1020_v13 }
  0x2e   : > { %956 = vmatmul.mubr.bf16.gmra.mrb[4].mxu0 %v1021_v14  ;;  %972 = vmatmul.mubr.bf16.gmra.mrb[4].mxu1 %v1022_v15 }
  0x2f   : > { %959 = vmatprep.mubr.bf16.mxu0 %v1023_v16  ;;  %975 = vmatprep.mubr.bf16.mxu1 %v1024_v17 }
  0x36   : > { %960 = vmatmul.mubr.bf16.gmra.mrb[8].mxu0 %v1025_v18  ;;  %976 = vmatmul.mubr.bf16.gmra.mrb[8].mxu1 %v1026_v19 }
  0x37   : > { %963 = vmatprep.mubr.bf16.mxu0 %v1027_v20  ;;  %979 = vmatprep.mubr.bf16.mxu1 %v1028_v21 }
  0x3e   : > { %964 = vmatmul.mubr.bf16.gmra.mrb[12].mxu0 %v1029_v22  ;;  %980 = vmatmul.mubr.bf16.gmra.mrb[12].mxu1 %v1030_v23 }
  0xf9   : > { %v953_v24 = vpop.f32.mrb[0].mxu0  ;;  %v969_v25 = vpop.f32.mrb[0].mxu1 }
  0xfa   : > { %v374_v26 = vpop.f32.mrb[1].mxu0  ;;  %v438_v27 = vpop.f32.mrb[1].mxu1 }
  0xfb   : > { %v954_v28 = vpop.f32.mrb[2].mxu0  ;;  %v970_v29 = vpop.f32.mrb[2].mxu1 }
  0xfc   : > { %v824_v30 = vpack.c.bf16 %v954_v28, %v953_v24  ;;  %v864_v31 = vpack.c.bf16 %v970_v29, %v969_v25  ;;  %v377_v32 = vpop.f32.mrb[3].mxu0  ;;  %v441_v33 = vpop.f32.mrb[3].mxu1 }
  0xfd   : > { %v819_v34 = vpack.c.bf16 %v377_v32, %v374_v26  ;;  %v859_v35 = vpack.c.bf16 %v441_v33, %v438_v27 }
  0xfe   : > { %896 = vst [vmem:[%s1117_s6 + $0x8] sm:$0xff] %v824_v30   ;;  %904 = vst [vmem:[%s1117_s6 + $0x48] sm:$0xff] %v864_v31  }
  0xff   : > { %820 = vst [vmem:[%s1117_s6] sm:$0xff] %v819_v34   ;;  %903 = vst [vmem:[%s1117_s6 + $0x40] sm:$0xff] %v859_v35  }
 0x101   : > { %v957_v36 = vpop.f32.mrb[4].mxu0  ;;  %v973_v37 = vpop.f32.mrb[4].mxu1 }
 0x102   : > { %v390_v38 = vpop.f32.mrb[5].mxu0  ;;  %v454_v39 = vpop.f32.mrb[5].mxu1 }
 0x103   : > { %v958_v40 = vpop.f32.mrb[6].mxu0  ;;  %v974_v41 = vpop.f32.mrb[6].mxu1 }
 0x104   : > { %v834_v42 = vpack.c.bf16 %v958_v40, %v957_v36  ;;  %v874_v43 = vpack.c.bf16 %v974_v41, %v973_v37  ;;  %v393_v44 = vpop.f32.mrb[7].mxu0  ;;  %v457_v45 = vpop.f32.mrb[7].mxu1 }
 0x105   : > { %v829_v46 = vpack.c.bf16 %v393_v44, %v390_v38  ;;  %v869_v47 = vpack.c.bf16 %v457_v45, %v454_v39 }
 0x106   : > { %898 = vst [vmem:[%s1117_s6 + $0x18] sm:$0xff] %v834_v42   ;;  %906 = vst [vmem:[%s1117_s6 + $0x58] sm:$0xff] %v874_v43  }
 0x107   : > { %897 = vst [vmem:[%s1117_s6 + $0x10] sm:$0xff] %v829_v46   ;;  %905 = vst [vmem:[%s1117_s6 + $0x50] sm:$0xff] %v869_v47  }
 0x109   : > { %v961_v48 = vpop.f32.mrb[8].mxu0  ;;  %v977_v49 = vpop.f32.mrb[8].mxu1 }
 0x10a   : > { %v406_v50 = vpop.f32.mrb[9].mxu0  ;;  %v470_v51 = vpop.f32.mrb[9].mxu1 }
 0x10b   : > { %v962_v52 = vpop.f32.mrb[10].mxu0  ;;  %v978_v53 = vpop.f32.mrb[10].mxu1 }
 0x10c   : > { %v844_v54 = vpack.c.bf16 %v962_v52, %v961_v48  ;;  %v884_v55 = vpack.c.bf16 %v978_v53, %v977_v49  ;;  %v409_v56 = vpop.f32.mrb[11].mxu0  ;;  %v473_v57 = vpop.f32.mrb[11].mxu1 }
 0x10d   : > { %v839_v58 = vpack.c.bf16 %v409_v56, %v406_v50  ;;  %v879_v59 = vpack.c.bf16 %v473_v57, %v470_v51 }
 0x10e   : > { %900 = vst [vmem:[%s1117_s6 + $0x28] sm:$0xff] %v844_v54   ;;  %908 = vst [vmem:[%s1117_s6 + $0x68] sm:$0xff] %v884_v55  }
 0x10f   : > { %899 = vst [vmem:[%s1117_s6 + $0x20] sm:$0xff] %v839_v58   ;;  %907 = vst [vmem:[%s1117_s6 + $0x60] sm:$0xff] %v879_v59  }
 0x111   : > { %v965_v60 = vpop.f32.mrb[12].mxu0  ;;  %v981_v61 = vpop.f32.mrb[12].mxu1 }
 0x112   : > { %v422_v62 = vpop.f32.mrb[13].mxu0  ;;  %v486_v63 = vpop.f32.mrb[13].mxu1 }
 0x113   : > { %v966_v0 = vpop.f32.mrb[14].mxu0  ;;  %v982_v1 = vpop.f32.mrb[14].mxu1 }
 0x114   : > { %v854_v2 = vpack.c.bf16 %v966_v0, %v965_v60  ;;  %v894_v3 = vpack.c.bf16 %v982_v1, %v981_v61  ;;  %v425_v4 = vpop.f32.mrb[15].mxu0  ;;  %v489_v5 = vpop.f32.mrb[15].mxu1 }
 0x115   : > { %v849_v6 = vpack.c.bf16 %v425_v4, %v422_v62  ;;  %v889_v7 = vpack.c.bf16 %v489_v5, %v486_v63 }
 0x116   : > { %902 = vst [vmem:[%s1117_s6 + $0x38] sm:$0xff] %v854_v2   ;;  %910 = vst [vmem:[%s1117_s6 + $0x78] sm:$0xff] %v894_v3  }
 0x117   : > { %901 = vst [vmem:[%s1117_s6 + $0x30] sm:$0xff] %v849_v6   ;;  %909 = vst [vmem:[%s1117_s6 + $0x70] sm:$0xff] %v889_v7  }
 0x118 PF: > { %s12_s9 = sadd.s32 1, %s1037_s9  }
 0x119   : > { %p9_p4 = scmp.ge.s32.totalorder %s12_s9, 4  }
 0x11b   :  { %11 = sbr.rel (!%p9_p4) target bundleno = 1 (0x1), region = 58 }

// kernel: resnet_qnn_forward.11
= control target key start
LH: loop header
LB: loop body
LE: loop exit
PB: predicated region body
PF: predicated region fallthrough
CT: control target
= control target key end

     0   :  { %s3150_s9 = smov 0   ;;  %s3330_s0 = inlined_call_operand.vmem [shape: bf16[2048,128], index: 0, kind: input, shape index: {}]   ;;  %s3331_s1 = inlined_call_operand.vmem [shape: bf16[128,128], index: 1, kind: input, shape index: {}]   ;;  %s3332_s2 = inlined_call_operand.vmem [shape: bf16[2048,128], index: 2, kind: output, shape index: {}]  }
   0x1 LB: > { %s2093_s10 = sadd.s32 4294967295, %s3133_s9   ;;  %p2097_p0 = scmp.ge.s32.totalorder %s3133_s9, 1  ;;  %s3133_s9 = sphi %s3150_s9, %s12_s9  }
   0x2   : > { %p113_p1 = scmp.lt.s32.totalorder %s3133_s9, 3 }
   0x4   : > { %p114_p2 = pnand %p2097_p0, %p113_p1 }
   0x5   : > { %v3055_v0 = vld [vmem:[%s3331_s1] sm:$0xff] (!%p114_p2)   ;;  %s2098_s13 = sshll.u32 (!%p114_p2), %s2093_s10, 7  ;;  %v3056_v1 = vld [vmem:[%s3331_s1 + $0x8] sm:$0xff] (!%p114_p2)   ;;  %v3057_v2 = vld [vmem:[%s3331_s1 + $0x10] sm:$0xff] (!%p114_p2)  }
   0x6   : > { %117 = sbr.rel (%p114_p2) target bundleno = 378 (0x17a), region = 28  ;;  %p136_p3 = scmp.lt.s32.totalorder (!%p114_p2), %s2098_s13, 255  ;;  %2887 = vmatprep.subr.bf16.mxu0 (!%p114_p2), %v3055_v0  ;;  %3031 = vmatprep.subr.bf16.mxu1 (!%p114_p2), %v3055_v0  ;;  %v3058_v3 = vld [vmem:[%s3331_s1 + $0x18] sm:$0xff] (!%p114_p2)   ;;  %v3059_v6 = vld [vmem:[%s3331_s1 + $0x20] sm:$0xff] (!%p114_p2)   ;;  %v3060_v7 = vld [vmem:[%s3331_s1 + $0x28] sm:$0xff] (!%p114_p2)  }
   0x7   : > { %2888 = vmatpush3.bf16.msra.mxu0 (!%p114_p2), %v3055_v0  ;;  %3039 = vmatpush3.bf16.msra.mxu1 (!%p114_p2), %v3055_v0  ;;  %v3061_v8 = vld [vmem:[%s3331_s1 + $0x30] sm:$0xff] (!%p114_p2)   ;;  %v3062_v9 = vld [vmem:[%s3331_s1 + $0x38] sm:$0xff] (!%p114_p2)  }
   0x8   : > { %2889 = vmatprep.subr.bf16.mxu0 (!%p114_p2), %v3056_v1  ;;  %3032 = vmatprep.subr.bf16.mxu1 (!%p114_p2), %v3056_v1 }
   0xb   : > { %2890 = vmatpush3.bf16.msra.mxu0 (!%p114_p2), %v3056_v1  ;;  %3040 = vmatpush3.bf16.msra.mxu1 (!%p114_p2), %v3056_v1 }
   0xc   : > { %2891 = vmatprep.subr.bf16.mxu0 (!%p114_p2), %v3057_v2  ;;  %3033 = vmatprep.subr.bf16.mxu1 (!%p114_p2), %v3057_v2 }
   0xd   : > { %s3334_s13 = smov (!%p136_p3, %s2098_s13), 255 }
   0xe   : > { %s2099_s18 = sshll.u32 %s3334_s13, 2 }
   0xf   : > { %s3175_s21 = scalar_lea.vmem %s3330_s0, %s2099_s18  ;;  %2892 = vmatpush3.bf16.msra.mxu0 %v3057_v2  ;;  %3041 = vmatpush3.bf16.msra.mxu1 %v3057_v2  ;;  %s3261_s6 = scalar_lea.vmem %s3332_s2, %s2099_s18 }
  0x10   : > { %v3063_v4 = vld [vmem:[%s3175_s21] sm:$0xff]   ;;  %2893 = vmatprep.subr.bf16.mxu0 %v3058_v3  ;;  %3034 = vmatprep.subr.bf16.mxu1 %v3058_v3  ;;  %v3065_v10 = vld [vmem:[%s3175_s21 + $0x8] sm:$0xff]   ;;  %v3067_v12 = vld [vmem:[%s3175_s21 + $0x10] sm:$0xff]  }
  0x11   : > { %v3064_v5 = vld [vmem:[%s3175_s21 + $0x100] sm:$0xff]   ;;  %2903 = vmatprep.mubr.bf16.mxu0 %v3063_v4  ;;  %v3066_v11 = vld [vmem:[%s3175_s21 + $0x108] sm:$0xff]   ;;  %v3068_v13 = vld [vmem:[%s3175_s21 + $0x110] sm:$0xff]  }
  0x12   : > { %2967 = vmatprep.mubr.bf16.mxu1 %v3064_v5  ;;  %v3069_v14 = vld [vmem:[%s3175_s21 + $0x18] sm:$0xff]   ;;  %v3071_v16 = vld [vmem:[%s3175_s21 + $0x20] sm:$0xff]   ;;  %v3073_v18 = vld [vmem:[%s3175_s21 + $0x28] sm:$0xff]  }
  0x13   : > { %2894 = vmatpush3.bf16.msra.mxu0 %v3058_v3  ;;  %3042 = vmatpush3.bf16.msra.mxu1 %v3058_v3  ;;  %v3070_v15 = vld [vmem:[%s3175_s21 + $0x118] sm:$0xff]   ;;  %v3072_v17 = vld [vmem:[%s3175_s21 + $0x120] sm:$0xff]   ;;  %v3074_v19 = vld [vmem:[%s3175_s21 + $0x128] sm:$0xff]  }
  0x14   : > { %2895 = vmatprep.subr.bf16.mxu0 %v3059_v6  ;;  %3035 = vmatprep.subr.bf16.mxu1 %v3059_v6  ;;  %v3075_v20 = vld [vmem:[%s3175_s21 + $0x30] sm:$0xff]   ;;  %v3077_v22 = vld [vmem:[%s3175_s21 + $0x38] sm:$0xff]   ;;  %v3079_v24 = vld [vmem:[%s3175_s21 + $0x40] sm:$0xff]  }
  0x15   : > { %v3076_v21 = vld [vmem:[%s3175_s21 + $0x130] sm:$0xff]   ;;  %v3078_v23 = vld [vmem:[%s3175_s21 + $0x138] sm:$0xff]   ;;  %v3080_v25 = vld [vmem:[%s3175_s21 + $0x140] sm:$0xff]  }
  0x16   : > { %v3081_v26 = vld [vmem:[%s3175_s21 + $0x48] sm:$0xff]   ;;  %v3083_v28 = vld [vmem:[%s3175_s21 + $0x50] sm:$0xff]   ;;  %v3085_v30 = vld [vmem:[%s3175_s21 + $0x58] sm:$0xff]  }
  0x17   : > { %2896 = vmatpush3.bf16.msra.mxu0 %v3059_v6  ;;  %3043 = vmatpush3.bf16.msra.mxu1 %v3059_v6  ;;  %v3082_v27 = vld [vmem:[%s3175_s21 + $0x148] sm:$0xff]   ;;  %v3084_v29 = vld [vmem:[%s3175_s21 + $0x150] sm:$0xff]   ;;  %v3086_v31 = vld [vmem:[%s3175_s21 + $0x158] sm:$0xff]  }
  0x18   : > { %2897 = vmatprep.subr.bf16.mxu0 %v3060_v7  ;;  %3036 = vmatprep.subr.bf16.mxu1 %v3060_v7  ;;  %v3087_v32 = vld [vmem:[%s3175_s21 + $0x60] sm:$0xff]   ;;  %v3089_v34 = vld [vmem:[%s3175_s21 + $0x68] sm:$0xff]   ;;  %v3091_v36 = vld [vmem:[%s3175_s21 + $0x70] sm:$0xff]  }
  0x19   : > { %v3088_v33 = vld [vmem:[%s3175_s21 + $0x160] sm:$0xff]   ;;  %v3090_v35 = vld [vmem:[%s3175_s21 + $0x168] sm:$0xff]   ;;  %v3092_v37 = vld [vmem:[%s3175_s21 + $0x170] sm:$0xff]  }
  0x1a   : > { %v3093_v38 = vld [vmem:[%s3175_s21 + $0x78] sm:$0xff]   ;;  %v3095_v40 = vld [vmem:[%s3175_s21 + $0x80] sm:$0xff]   ;;  %v3097_v42 = vld [vmem:[%s3175_s21 + $0x88] sm:$0xff]  }
  0x1b   : > { %2898 = vmatpush3.bf16.msra.mxu0 %v3060_v7  ;;  %3044 = vmatpush3.bf16.msra.mxu1 %v3060_v7  ;;  %v3094_v39 = vld [vmem:[%s3175_s21 + $0x178] sm:$0xff]   ;;  %v3096_v41 = vld [vmem:[%s3175_s21 + $0x180] sm:$0xff]   ;;  %v3098_v43 = vld [vmem:[%s3175_s21 + $0x188] sm:$0xff]  }
  0x1c   : > { %2899 = vmatprep.subr.bf16.mxu0 %v3061_v8  ;;  %3037 = vmatprep.subr.bf16.mxu1 %v3061_v8  ;;  %v3099_v44 = vld [vmem:[%s3175_s21 + $0x90] sm:$0xff]   ;;  %v3101_v46 = vld [vmem:[%s3175_s21 + $0x98] sm:$0xff]   ;;  %v3103_v48 = vld [vmem:[%s3175_s21 + $0xa0] sm:$0xff]  }
  0x1d   : > { %v3100_v45 = vld [vmem:[%s3175_s21 + $0x190] sm:$0xff]   ;;  %v3102_v47 = vld [vmem:[%s3175_s21 + $0x198] sm:$0xff]   ;;  %v3104_v49 = vld [vmem:[%s3175_s21 + $0x1a0] sm:$0xff]  }
  0x1e   : > { %v3105_v50 = vld [vmem:[%s3175_s21 + $0xa8] sm:$0xff]   ;;  %v3107_v52 = vld [vmem:[%s3175_s21 + $0xb0] sm:$0xff]   ;;  %v3109_v54 = vld [vmem:[%s3175_s21 + $0xb8] sm:$0xff]  }
  0x1f   : > { %2900 = vmatpush3.bf16.msra.mxu0 %v3061_v8  ;;  %3045 = vmatpush3.bf16.msra.mxu1 %v3061_v8  ;;  %v3106_v51 = vld [vmem:[%s3175_s21 + $0x1a8] sm:$0xff]   ;;  %v3108_v53 = vld [vmem:[%s3175_s21 + $0x1b0] sm:$0xff]   ;;  %v3110_v55 = vld [vmem:[%s3175_s21 + $0x1b8] sm:$0xff]  }
  0x20   : > { %2901 = vmatprep.subr.bf16.mxu0 %v3062_v9  ;;  %3038 = vmatprep.subr.bf16.mxu1 %v3062_v9  ;;  %v3111_v56 = vld [vmem:[%s3175_s21 + $0xc0] sm:$0xff]   ;;  %v3113_v58 = vld [vmem:[%s3175_s21 + $0xc8] sm:$0xff]   ;;  %v3115_v60 = vld [vmem:[%s3175_s21 + $0xd0] sm:$0xff]  }
  0x21   : > { %v3112_v57 = vld [vmem:[%s3175_s21 + $0x1c0] sm:$0xff]   ;;  %v3114_v59 = vld [vmem:[%s3175_s21 + $0x1c8] sm:$0xff]   ;;  %v3116_v61 = vld [vmem:[%s3175_s21 + $0x1d0] sm:$0xff]  }
  0x22   : > { %v3117_v62 = vld [vmem:[%s3175_s21 + $0xd8] sm:$0xff]   ;;  %v3119_v0 = vld [vmem:[%s3175_s21 + $0xe0] sm:$0xff]   ;;  %v3121_v2 = vld [vmem:[%s3175_s21 + $0xe8] sm:$0xff]  }
  0x23   : > { %2902 = vmatpush3.bf16.msra.mxu0 %v3062_v9  ;;  %3046 = vmatpush3.bf16.msra.mxu1 %v3062_v9  ;;  %v3118_v63 = vld [vmem:[%s3175_s21 + $0x1d8] sm:$0xff]   ;;  %v3120_v1 = vld [vmem:[%s3175_s21 + $0x1e0] sm:$0xff]   ;;  %v3122_v3 = vld [vmem:[%s3175_s21 + $0x1e8] sm:$0xff]  }
  0x24   : > { %v3123_v4 = vld [vmem:[%s3175_s21 + $0xf0] sm:$0xff]   ;;  %v3125_v6 = vld [vmem:[%s3175_s21 + $0xf8] sm:$0xff]  }
  0x25   : > { %v3124_v5 = vld [vmem:[%s3175_s21 + $0x1f0] sm:$0xff]   ;;  %v3126_v7 = vld [vmem:[%s3175_s21 + $0x1f8] sm:$0xff]  }
  0x26   : > { %2904 = vmatmul.mubr.bf16.vlgmr.msra.gmra.mrb[0].mxu0 %v3065_v10  ;;  %2968 = vmatmul.mubr.bf16.vlgmr.msra.gmra.mrb[0].mxu1 %v3066_v11 }
  0x27   : > { %2907 = vmatprep.mubr.bf16.mxu0 %v3067_v12  ;;  %2971 = vmatprep.mubr.bf16.mxu1 %v3068_v13 }
  0x2e   : > { %2908 = vmatmul.mubr.bf16.gmra.mrb[4].mxu0 %v3069_v14  ;;  %2972 = vmatmul.mubr.bf16.gmra.mrb[4].mxu1 %v3070_v15 }
  0x2f   : > { %2911 = vmatprep.mubr.bf16.mxu0 %v3071_v16  ;;  %2975 = vmatprep.mubr.bf16.mxu1 %v3072_v17 }
  0x36   : > { %2912 = vmatmul.mubr.bf16.gmra.mrb[8].mxu0 %v3073_v18  ;;  %2976 = vmatmul.mubr.bf16.gmra.mrb[8].mxu1 %v3074_v19 }
  0x37   : > { %2915 = vmatprep.mubr.bf16.mxu0 %v3075_v20  ;;  %2979 = vmatprep.mubr.bf16.mxu1 %v3076_v21 }
  0x3e   : > { %2916 = vmatmul.mubr.bf16.gmra.mrb[12].mxu0 %v3077_v22  ;;  %2980 = vmatmul.mubr.bf16.gmra.mrb[12].mxu1 %v3078_v23 }
  0x3f   : > { %2919 = vmatprep.mubr.bf16.mxu0 %v3079_v24  ;;  %2983 = vmatprep.mubr.bf16.mxu1 %v3080_v25 }
  0x46   : > { %2920 = vmatmul.mubr.bf16.gmra.mrb[16].mxu0 %v3081_v26  ;;  %2984 = vmatmul.mubr.bf16.gmra.mrb[16].mxu1 %v3082_v27 }
  0x47   : > { %2923 = vmatprep.mubr.bf16.mxu0 %v3083_v28  ;;  %2987 = vmatprep.mubr.bf16.mxu1 %v3084_v29 }
  0x4e   : > { %2924 = vmatmul.mubr.bf16.gmra.mrb[20].mxu0 %v3085_v30  ;;  %2988 = vmatmul.mubr.bf16.gmra.mrb[20].mxu1 %v3086_v31 }
  0x4f   : > { %2927 = vmatprep.mubr.bf16.mxu0 %v3087_v32  ;;  %2991 = vmatprep.mubr.bf16.mxu1 %v3088_v33 }
  0x56   : > { %2928 = vmatmul.mubr.bf16.gmra.mrb[24].mxu0 %v3089_v34  ;;  %2992 = vmatmul.mubr.bf16.gmra.mrb[24].mxu1 %v3090_v35 }
  0x57   : > { %2931 = vmatprep.mubr.bf16.mxu0 %v3091_v36  ;;  %2995 = vmatprep.mubr.bf16.mxu1 %v3092_v37 }
  0x5e   : > { %2932 = vmatmul.mubr.bf16.gmra.mrb[28].mxu0 %v3093_v38  ;;  %2996 = vmatmul.mubr.bf16.gmra.mrb[28].mxu1 %v3094_v39 }
  0x5f   : > { %2935 = vmatprep.mubr.bf16.mxu0 %v3095_v40  ;;  %2999 = vmatprep.mubr.bf16.mxu1 %v3096_v41 }
  0x66   : > { %2936 = vmatmul.mubr.bf16.gmra.mrb[32].mxu0 %v3097_v42  ;;  %3000 = vmatmul.mubr.bf16.gmra.mrb[32].mxu1 %v3098_v43 }
  0x67   : > { %2939 = vmatprep.mubr.bf16.mxu0 %v3099_v44  ;;  %3003 = vmatprep.mubr.bf16.mxu1 %v3100_v45 }
  0x6e   : > { %2940 = vmatmul.mubr.bf16.gmra.mrb[36].mxu0 %v3101_v46  ;;  %3004 = vmatmul.mubr.bf16.gmra.mrb[36].mxu1 %v3102_v47 }
  0x6f   : > { %2943 = vmatprep.mubr.bf16.mxu0 %v3103_v48  ;;  %3007 = vmatprep.mubr.bf16.mxu1 %v3104_v49 }
  0x76   : > { %2944 = vmatmul.mubr.bf16.gmra.mrb[40].mxu0 %v3105_v50  ;;  %3008 = vmatmul.mubr.bf16.gmra.mrb[40].mxu1 %v3106_v51 }
  0x77   : > { %2947 = vmatprep.mubr.bf16.mxu0 %v3107_v52  ;;  %3011 = vmatprep.mubr.bf16.mxu1 %v3108_v53 }
  0x7e   : > { %2948 = vmatmul.mubr.bf16.gmra.mrb[44].mxu0 %v3109_v54  ;;  %3012 = vmatmul.mubr.bf16.gmra.mrb[44].mxu1 %v3110_v55 }
  0x7f   : > { %2951 = vmatprep.mubr.bf16.mxu0 %v3111_v56  ;;  %3015 = vmatprep.mubr.bf16.mxu1 %v3112_v57 }
  0x86   : > { %2952 = vmatmul.mubr.bf16.gmra.mrb[48].mxu0 %v3113_v58  ;;  %3016 = vmatmul.mubr.bf16.gmra.mrb[48].mxu1 %v3114_v59 }
  0x87   : > { %2955 = vmatprep.mubr.bf16.mxu0 %v3115_v60  ;;  %3019 = vmatprep.mubr.bf16.mxu1 %v3116_v61 }
  0x8e   : > { %2956 = vmatmul.mubr.bf16.gmra.mrb[52].mxu0 %v3117_v62  ;;  %3020 = vmatmul.mubr.bf16.gmra.mrb[52].mxu1 %v3118_v63 }
  0x8f   : > { %2959 = vmatprep.mubr.bf16.mxu0 %v3119_v0  ;;  %3023 = vmatprep.mubr.bf16.mxu1 %v3120_v1 }
  0x96   : > { %2960 = vmatmul.mubr.bf16.gmra.mrb[56].mxu0 %v3121_v2  ;;  %3024 = vmatmul.mubr.bf16.gmra.mrb[56].mxu1 %v3122_v3 }
  0x97   : > { %2963 = vmatprep.mubr.bf16.mxu0 %v3123_v4  ;;  %3027 = vmatprep.mubr.bf16.mxu1 %v3124_v5 }
  0x9e   : > { %2964 = vmatmul.mubr.bf16.gmra.mrb[60].mxu0 %v3125_v6  ;;  %3028 = vmatmul.mubr.bf16.gmra.mrb[60].mxu1 %v3126_v7 }
  0xf9   : > { %v2905_v8 = vpop.f32.mrb[0].mxu0  ;;  %v2969_v9 = vpop.f32.mrb[0].mxu1 }
  0xfa   : > { %v758_v10 = vpop.f32.mrb[1].mxu0  ;;  %v1014_v11 = vpop.f32.mrb[1].mxu1  ;;  %v1271_v14 = vmax.f32 %v2905_v8, 0.0  ;;  %v1335_v15 = vmax.f32 %v2969_v9, 0.0 }
  0xfb   : > { %v2906_v12 = vpop.f32.mrb[2].mxu0  ;;  %v2970_v13 = vpop.f32.mrb[2].mxu1  ;;  %v1269_v20 = vmax.f32 %v758_v10, 0.0  ;;  %v1333_v21 = vmax.f32 %v1014_v11, 0.0 }
  0xfc   : > { %v1272_v16 = vmax.f32 %v2906_v12, 0.0  ;;  %v1336_v17 = vmax.f32 %v2970_v13, 0.0  ;;  %v761_v18 = vpop.f32.mrb[3].mxu0  ;;  %v1017_v19 = vpop.f32.mrb[3].mxu1 }
  0xfd   : > { %v1270_v22 = vmax.f32 %v761_v18, 0.0  ;;  %v1334_v23 = vmax.f32 %v1017_v19, 0.0 }
  0xfe   : > { %v2440_v24 = vpack.c.bf16 %v1272_v16, %v1271_v14  ;;  %v2600_v25 = vpack.c.bf16 %v1336_v17, %v1335_v15 }
  0xff   : > { %v2435_v26 = vpack.c.bf16 %v1270_v22, %v1269_v20  ;;  %v2595_v27 = vpack.c.bf16 %v1334_v23, %v1333_v21 }
 0x100   : > { %2752 = vst [vmem:[%s3261_s6 + $0x8] sm:$0xff] %v2440_v24   ;;  %2784 = vst [vmem:[%s3261_s6 + $0x108] sm:$0xff] %v2600_v25  }
 0x101   : > { %2436 = vst [vmem:[%s3261_s6] sm:$0xff] %v2435_v26   ;;  %2783 = vst [vmem:[%s3261_s6 + $0x100] sm:$0xff] %v2595_v27   ;;  %v2909_v28 = vpop.f32.mrb[4].mxu0  ;;  %v2973_v29 = vpop.f32.mrb[4].mxu1 }
 0x102   : > { %v774_v30 = vpop.f32.mrb[5].mxu0  ;;  %v1030_v31 = vpop.f32.mrb[5].mxu1  ;;  %v1275_v34 = vmax.f32 %v2909_v28, 0.0  ;;  %v1339_v35 = vmax.f32 %v2973_v29, 0.0 }
 0x103   : > { %v2910_v32 = vpop.f32.mrb[6].mxu0  ;;  %v2974_v33 = vpop.f32.mrb[6].mxu1  ;;  %v1273_v40 = vmax.f32 %v774_v30, 0.0  ;;  %v1337_v41 = vmax.f32 %v1030_v31, 0.0 }
 0x104   : > { %v1276_v36 = vmax.f32 %v2910_v32, 0.0  ;;  %v1340_v37 = vmax.f32 %v2974_v33, 0.0  ;;  %v777_v38 = vpop.f32.mrb[7].mxu0  ;;  %v1033_v39 = vpop.f32.mrb[7].mxu1 }
 0x105   : > { %v1274_v42 = vmax.f32 %v777_v38, 0.0  ;;  %v1338_v43 = vmax.f32 %v1033_v39, 0.0 }
 0x106   : > { %v2450_v44 = vpack.c.bf16 %v1276_v36, %v1275_v34  ;;  %v2610_v45 = vpack.c.bf16 %v1340_v37, %v1339_v35 }
 0x107   : > { %v2445_v46 = vpack.c.bf16 %v1274_v42, %v1273_v40  ;;  %v2605_v47 = vpack.c.bf16 %v1338_v43, %v1337_v41 }
 0x108   : > { %2754 = vst [vmem:[%s3261_s6 + $0x18] sm:$0xff] %v2450_v44   ;;  %2786 = vst [vmem:[%s3261_s6 + $0x118] sm:$0xff] %v2610_v45  }
 0x109   : > { %2753 = vst [vmem:[%s3261_s6 + $0x10] sm:$0xff] %v2445_v46   ;;  %2785 = vst [vmem:[%s3261_s6 + $0x110] sm:$0xff] %v2605_v47   ;;  %v2913_v48 = vpop.f32.mrb[8].mxu0  ;;  %v2977_v49 = vpop.f32.mrb[8].mxu1 }
 0x10a   : > { %v790_v50 = vpop.f32.mrb[9].mxu0  ;;  %v1046_v51 = vpop.f32.mrb[9].mxu1  ;;  %v1279_v54 = vmax.f32 %v2913_v48, 0.0  ;;  %v1343_v55 = vmax.f32 %v2977_v49, 0.0 }
 0x10b   : > { %v2914_v52 = vpop.f32.mrb[10].mxu0  ;;  %v2978_v53 = vpop.f32.mrb[10].mxu1  ;;  %v1277_v60 = vmax.f32 %v790_v50, 0.0  ;;  %v1341_v61 = vmax.f32 %v1046_v51, 0.0 }
 0x10c   : > { %v1280_v56 = vmax.f32 %v2914_v52, 0.0  ;;  %v1344_v57 = vmax.f32 %v2978_v53, 0.0  ;;  %v793_v58 = vpop.f32.mrb[11].mxu0  ;;  %v1049_v59 = vpop.f32.mrb[11].mxu1 }
 0x10d   : > { %v1278_v62 = vmax.f32 %v793_v58, 0.0  ;;  %v1342_v63 = vmax.f32 %v1049_v59, 0.0 }
 0x10e   : > { %v2460_v0 = vpack.c.bf16 %v1280_v56, %v1279_v54  ;;  %v2620_v1 = vpack.c.bf16 %v1344_v57, %v1343_v55 }
 0x10f   : > { %v2455_v2 = vpack.c.bf16 %v1278_v62, %v1277_v60  ;;  %v2615_v3 = vpack.c.bf16 %v1342_v63, %v1341_v61 }
 0x110   : > { %2756 = vst [vmem:[%s3261_s6 + $0x28] sm:$0xff] %v2460_v0   ;;  %2788 = vst [vmem:[%s3261_s6 + $0x128] sm:$0xff] %v2620_v1  }
 0x111   : > { %2755 = vst [vmem:[%s3261_s6 + $0x20] sm:$0xff] %v2455_v2   ;;  %2787 = vst [vmem:[%s3261_s6 + $0x120] sm:$0xff] %v2615_v3   ;;  %v2917_v4 = vpop.f32.mrb[12].mxu0  ;;  %v2981_v5 = vpop.f32.mrb[12].mxu1 }
 0x112   : > { %v806_v6 = vpop.f32.mrb[13].mxu0  ;;  %v1062_v7 = vpop.f32.mrb[13].mxu1  ;;  %v1283_v10 = vmax.f32 %v2917_v4, 0.0  ;;  %v1347_v11 = vmax.f32 %v2981_v5, 0.0 }
 0x113   : > { %v2918_v8 = vpop.f32.mrb[14].mxu0  ;;  %v2982_v9 = vpop.f32.mrb[14].mxu1  ;;  %v1281_v16 = vmax.f32 %v806_v6, 0.0  ;;  %v1345_v17 = vmax.f32 %v1062_v7, 0.0 }
 0x114   : > { %v1284_v12 = vmax.f32 %v2918_v8, 0.0  ;;  %v1348_v13 = vmax.f32 %v2982_v9, 0.0  ;;  %v809_v14 = vpop.f32.mrb[15].mxu0  ;;  %v1065_v15 = vpop.f32.mrb[15].mxu1 }
 0x115   : > { %v1282_v18 = vmax.f32 %v809_v14, 0.0  ;;  %v1346_v19 = vmax.f32 %v1065_v15, 0.0 }
 0x116   : > { %v2470_v20 = vpack.c.bf16 %v1284_v12, %v1283_v10  ;;  %v2630_v21 = vpack.c.bf16 %v1348_v13, %v1347_v11 }
 0x117   : > { %v2465_v22 = vpack.c.bf16 %v1282_v18, %v1281_v16  ;;  %v2625_v23 = vpack.c.bf16 %v1346_v19, %v1345_v17 }
 0x118   : > { %2758 = vst [vmem:[%s3261_s6 + $0x38] sm:$0xff] %v2470_v20   ;;  %2790 = vst [vmem:[%s3261_s6 + $0x138] sm:$0xff] %v2630_v21  }
 0x119   : > { %2757 = vst [vmem:[%s3261_s6 + $0x30] sm:$0xff] %v2465_v22   ;;  %2789 = vst [vmem:[%s3261_s6 + $0x130] sm:$0xff] %v2625_v23   ;;  %v2921_v24 = vpop.f32.mrb[16].mxu0  ;;  %v2985_v25 = vpop.f32.mrb[16].mxu1 }
 0x11a   : > { %v822_v26 = vpop.f32.mrb[17].mxu0  ;;  %v1078_v27 = vpop.f32.mrb[17].mxu1  ;;  %v1287_v30 = vmax.f32 %v2921_v24, 0.0  ;;  %v1351_v31 = vmax.f32 %v2985_v25, 0.0 }
 0x11b   : > { %v2922_v28 = vpop.f32.mrb[18].mxu0  ;;  %v2986_v29 = vpop.f32.mrb[18].mxu1  ;;  %v1285_v36 = vmax.f32 %v822_v26, 0.0  ;;  %v1349_v37 = vmax.f32 %v1078_v27, 0.0 }
 0x11c   : > { %v1288_v32 = vmax.f32 %v2922_v28, 0.0  ;;  %v1352_v33 = vmax.f32 %v2986_v29, 0.0  ;;  %v825_v34 = vpop.f32.mrb[19].mxu0  ;;  %v1081_v35 = vpop.f32.mrb[19].mxu1 }
 0x11d   : > { %v1286_v38 = vmax.f32 %v825_v34, 0.0  ;;  %v1350_v39 = vmax.f32 %v1081_v35, 0.0 }
 0x11e   : > { %v2480_v40 = vpack.c.bf16 %v1288_v32, %v1287_v30  ;;  %v2640_v41 = vpack.c.bf16 %v1352_v33, %v1351_v31 }
 0x11f   : > { %v2475_v42 = vpack.c.bf16 %v1286_v38, %v1285_v36  ;;  %v2635_v43 = vpack.c.bf16 %v1350_v39, %v1349_v37 }
 0x120   : > { %2760 = vst [vmem:[%s3261_s6 + $0x48] sm:$0xff] %v2480_v40   ;;  %2792 = vst [vmem:[%s3261_s6 + $0x148] sm:$0xff] %v2640_v41  }
 0x121   : > { %2759 = vst [vmem:[%s3261_s6 + $0x40] sm:$0xff] %v2475_v42   ;;  %2791 = vst [vmem:[%s3261_s6 + $0x140] sm:$0xff] %v2635_v43   ;;  %v2925_v44 = vpop.f32.mrb[20].mxu0  ;;  %v2989_v45 = vpop.f32.mrb[20].mxu1 }
 0x122   : > { %v838_v46 = vpop.f32.mrb[21].mxu0  ;;  %v1094_v47 = vpop.f32.mrb[21].mxu1  ;;  %v1291_v50 = vmax.f32 %v2925_v44, 0.0  ;;  %v1355_v51 = vmax.f32 %v2989_v45, 0.0 }
 0x123   : > { %v2926_v48 = vpop.f32.mrb[22].mxu0  ;;  %v2990_v49 = vpop.f32.mrb[22].mxu1  ;;  %v1289_v56 = vmax.f32 %v838_v46, 0.0  ;;  %v1353_v57 = vmax.f32 %v1094_v47, 0.0 }
 0x124   : > { %v1292_v52 = vmax.f32 %v2926_v48, 0.0  ;;  %v1356_v53 = vmax.f32 %v2990_v49, 0.0  ;;  %v841_v54 = vpop.f32.mrb[23].mxu0  ;;  %v1097_v55 = vpop.f32.mrb[23].mxu1 }
 0x125   : > { %v1290_v58 = vmax.f32 %v841_v54, 0.0  ;;  %v1354_v59 = vmax.f32 %v1097_v55, 0.0 }
 0x126   : > { %v2490_v60 = vpack.c.bf16 %v1292_v52, %v1291_v50  ;;  %v2650_v61 = vpack.c.bf16 %v1356_v53, %v1355_v51 }
 0x127   : > { %v2485_v62 = vpack.c.bf16 %v1290_v58, %v1289_v56  ;;  %v2645_v63 = vpack.c.bf16 %v1354_v59, %v1353_v57 }
 0x128   : > { %2762 = vst [vmem:[%s3261_s6 + $0x58] sm:$0xff] %v2490_v60   ;;  %2794 = vst [vmem:[%s3261_s6 + $0x158] sm:$0xff] %v2650_v61  }
 0x129   : > { %2761 = vst [vmem:[%s3261_s6 + $0x50] sm:$0xff] %v2485_v62   ;;  %2793 = vst [vmem:[%s3261_s6 + $0x150] sm:$0xff] %v2645_v63   ;;  %v2929_v0 = vpop.f32.mrb[24].mxu0  ;;  %v2993_v1 = vpop.f32.mrb[24].mxu1 }
 0x12a   : > { %v854_v2 = vpop.f32.mrb[25].mxu0  ;;  %v1110_v3 = vpop.f32.mrb[25].mxu1  ;;  %v1295_v6 = vmax.f32 %v2929_v0, 0.0  ;;  %v1359_v7 = vmax.f32 %v2993_v1, 0.0 }
 0x12b   : > { %v2930_v4 = vpop.f32.mrb[26].mxu0  ;;  %v2994_v5 = vpop.f32.mrb[26].mxu1  ;;  %v1293_v12 = vmax.f32 %v854_v2, 0.0  ;;  %v1357_v13 = vmax.f32 %v1110_v3, 0.0 }
 0x12c   : > { %v1296_v8 = vmax.f32 %v2930_v4, 0.0  ;;  %v1360_v9 = vmax.f32 %v2994_v5, 0.0  ;;  %v857_v10 = vpop.f32.mrb[27].mxu0  ;;  %v1113_v11 = vpop.f32.mrb[27].mxu1 }
 0x12d   : > { %v1294_v14 = vmax.f32 %v857_v10, 0.0  ;;  %v1358_v15 = vmax.f32 %v1113_v11, 0.0 }
 0x12e   : > { %v2500_v16 = vpack.c.bf16 %v1296_v8, %v1295_v6  ;;  %v2660_v17 = vpack.c.bf16 %v1360_v9, %v1359_v7 }
 0x12f   : > { %v2495_v18 = vpack.c.bf16 %v1294_v14, %v1293_v12  ;;  %v2655_v19 = vpack.c.bf16 %v1358_v15, %v1357_v13 }
 0x130   : > { %2764 = vst [vmem:[%s3261_s6 + $0x68] sm:$0xff] %v2500_v16   ;;  %2796 = vst [vmem:[%s3261_s6 + $0x168] sm:$0xff] %v2660_v17  }
 0x131   : > { %2763 = vst [vmem:[%s3261_s6 + $0x60] sm:$0xff] %v2495_v18   ;;  %2795 = vst [vmem:[%s3261_s6 + $0x160] sm:$0xff] %v2655_v19   ;;  %v2933_v20 = vpop.f32.mrb[28].mxu0  ;;  %v2997_v21 = vpop.f32.mrb[28].mxu1 }
 0x132   : > { %v870_v22 = vpop.f32.mrb[29].mxu0  ;;  %v1126_v23 = vpop.f32.mrb[29].mxu1  ;;  %v1299_v26 = vmax.f32 %v2933_v20, 0.0  ;;  %v1363_v27 = vmax.f32 %v2997_v21, 0.0 }
 0x133   : > { %v2934_v24 = vpop.f32.mrb[30].mxu0  ;;  %v2998_v25 = vpop.f32.mrb[30].mxu1  ;;  %v1297_v32 = vmax.f32 %v870_v22, 0.0  ;;  %v1361_v33 = vmax.f32 %v1126_v23, 0.0 }
 0x134   : > { %v1300_v28 = vmax.f32 %v2934_v24, 0.0  ;;  %v1364_v29 = vmax.f32 %v2998_v25, 0.0  ;;  %v873_v30 = vpop.f32.mrb[31].mxu0  ;;  %v1129_v31 = vpop.f32.mrb[31].mxu1 }
 0x135   : > { %v1298_v34 = vmax.f32 %v873_v30, 0.0  ;;  %v1362_v35 = vmax.f32 %v1129_v31, 0.0 }
 0x136   : > { %v2510_v36 = vpack.c.bf16 %v1300_v28, %v1299_v26  ;;  %v2670_v37 = vpack.c.bf16 %v1364_v29, %v1363_v27 }
 0x137   : > { %v2505_v38 = vpack.c.bf16 %v1298_v34, %v1297_v32  ;;  %v2665_v39 = vpack.c.bf16 %v1362_v35, %v1361_v33 }
 0x138   : > { %2766 = vst [vmem:[%s3261_s6 + $0x78] sm:$0xff] %v2510_v36   ;;  %2798 = vst [vmem:[%s3261_s6 + $0x178] sm:$0xff] %v2670_v37  }
 0x139   : > { %2765 = vst [vmem:[%s3261_s6 + $0x70] sm:$0xff] %v2505_v38   ;;  %2797 = vst [vmem:[%s3261_s6 + $0x170] sm:$0xff] %v2665_v39   ;;  %v2937_v40 = vpop.f32.mrb[32].mxu0  ;;  %v3001_v41 = vpop.f32.mrb[32].mxu1 }
 0x13a   : > { %v886_v42 = vpop.f32.mrb[33].mxu0  ;;  %v1142_v43 = vpop.f32.mrb[33].mxu1  ;;  %v1303_v46 = vmax.f32 %v2937_v40, 0.0  ;;  %v1367_v47 = vmax.f32 %v3001_v41, 0.0 }
 0x13b   : > { %v2938_v44 = vpop.f32.mrb[34].mxu0  ;;  %v3002_v45 = vpop.f32.mrb[34].mxu1  ;;  %v1301_v52 = vmax.f32 %v886_v42, 0.0  ;;  %v1365_v53 = vmax.f32 %v1142_v43, 0.0 }
 0x13c   : > { %v1304_v48 = vmax.f32 %v2938_v44, 0.0  ;;  %v1368_v49 = vmax.f32 %v3002_v45, 0.0  ;;  %v889_v50 = vpop.f32.mrb[35].mxu0  ;;  %v1145_v51 = vpop.f32.mrb[35].mxu1 }
 0x13d   : > { %v1302_v54 = vmax.f32 %v889_v50, 0.0  ;;  %v1366_v55 = vmax.f32 %v1145_v51, 0.0 }
 0x13e   : > { %v2520_v56 = vpack.c.bf16 %v1304_v48, %v1303_v46  ;;  %v2680_v57 = vpack.c.bf16 %v1368_v49, %v1367_v47 }
 0x13f   : > { %v2515_v58 = vpack.c.bf16 %v1302_v54, %v1301_v52  ;;  %v2675_v59 = vpack.c.bf16 %v1366_v55, %v1365_v53 }
 0x140   : > { %2768 = vst [vmem:[%s3261_s6 + $0x88] sm:$0xff] %v2520_v56   ;;  %2800 = vst [vmem:[%s3261_s6 + $0x188] sm:$0xff] %v2680_v57  }
 0x141   : > { %2767 = vst [vmem:[%s3261_s6 + $0x80] sm:$0xff] %v2515_v58   ;;  %2799 = vst [vmem:[%s3261_s6 + $0x180] sm:$0xff] %v2675_v59   ;;  %v2941_v60 = vpop.f32.mrb[36].mxu0  ;;  %v3005_v61 = vpop.f32.mrb[36].mxu1 }
 0x142   : > { %v902_v62 = vpop.f32.mrb[37].mxu0  ;;  %v1158_v63 = vpop.f32.mrb[37].mxu1  ;;  %v1307_v2 = vmax.f32 %v2941_v60, 0.0  ;;  %v1371_v3 = vmax.f32 %v3005_v61, 0.0 }
 0x143   : > { %v2942_v0 = vpop.f32.mrb[38].mxu0  ;;  %v3006_v1 = vpop.f32.mrb[38].mxu1  ;;  %v1305_v8 = vmax.f32 %v902_v62, 0.0  ;;  %v1369_v9 = vmax.f32 %v1158_v63, 0.0 }
 0x144   : > { %v1308_v4 = vmax.f32 %v2942_v0, 0.0  ;;  %v1372_v5 = vmax.f32 %v3006_v1, 0.0  ;;  %v905_v6 = vpop.f32.mrb[39].mxu0  ;;  %v1161_v7 = vpop.f32.mrb[39].mxu1 }
 0x145   : > { %v1306_v10 = vmax.f32 %v905_v6, 0.0  ;;  %v1370_v11 = vmax.f32 %v1161_v7, 0.0 }
 0x146   : > { %v2530_v12 = vpack.c.bf16 %v1308_v4, %v1307_v2  ;;  %v2690_v13 = vpack.c.bf16 %v1372_v5, %v1371_v3 }
 0x147   : > { %v2525_v14 = vpack.c.bf16 %v1306_v10, %v1305_v8  ;;  %v2685_v15 = vpack.c.bf16 %v1370_v11, %v1369_v9 }
 0x148   : > { %2770 = vst [vmem:[%s3261_s6 + $0x98] sm:$0xff] %v2530_v12   ;;  %2802 = vst [vmem:[%s3261_s6 + $0x198] sm:$0xff] %v2690_v13  }
 0x149   : > { %2769 = vst [vmem:[%s3261_s6 + $0x90] sm:$0xff] %v2525_v14   ;;  %2801 = vst [vmem:[%s3261_s6 + $0x190] sm:$0xff] %v2685_v15   ;;  %v2945_v16 = vpop.f32.mrb[40].mxu0  ;;  %v3009_v17 = vpop.f32.mrb[40].mxu1 }
 0x14a   : > { %v918_v18 = vpop.f32.mrb[41].mxu0  ;;  %v1174_v19 = vpop.f32.mrb[41].mxu1  ;;  %v1311_v22 = vmax.f32 %v2945_v16, 0.0  ;;  %v1375_v23 = vmax.f32 %v3009_v17, 0.0 }
 0x14b   : > { %v2946_v20 = vpop.f32.mrb[42].mxu0  ;;  %v3010_v21 = vpop.f32.mrb[42].mxu1  ;;  %v1309_v28 = vmax.f32 %v918_v18, 0.0  ;;  %v1373_v29 = vmax.f32 %v1174_v19, 0.0 }
 0x14c   : > { %v1312_v24 = vmax.f32 %v2946_v20, 0.0  ;;  %v1376_v25 = vmax.f32 %v3010_v21, 0.0  ;;  %v921_v26 = vpop.f32.mrb[43].mxu0  ;;  %v1177_v27 = vpop.f32.mrb[43].mxu1 }
 0x14d   : > { %v1310_v30 = vmax.f32 %v921_v26, 0.0  ;;  %v1374_v31 = vmax.f32 %v1177_v27, 0.0 }
 0x14e   : > { %v2540_v32 = vpack.c.bf16 %v1312_v24, %v1311_v22  ;;  %v2700_v33 = vpack.c.bf16 %v1376_v25, %v1375_v23 }
 0x14f   : > { %v2535_v34 = vpack.c.bf16 %v1310_v30, %v1309_v28  ;;  %v2695_v35 = vpack.c.bf16 %v1374_v31, %v1373_v29 }
 0x150   : > { %2772 = vst [vmem:[%s3261_s6 + $0xa8] sm:$0xff] %v2540_v32   ;;  %2804 = vst [vmem:[%s3261_s6 + $0x1a8] sm:$0xff] %v2700_v33  }
 0x151   : > { %2771 = vst [vmem:[%s3261_s6 + $0xa0] sm:$0xff] %v2535_v34   ;;  %2803 = vst [vmem:[%s3261_s6 + $0x1a0] sm:$0xff] %v2695_v35   ;;  %v2949_v36 = vpop.f32.mrb[44].mxu0  ;;  %v3013_v37 = vpop.f32.mrb[44].mxu1 }
 0x152   : > { %v934_v38 = vpop.f32.mrb[45].mxu0  ;;  %v1190_v39 = vpop.f32.mrb[45].mxu1  ;;  %v1315_v42 = vmax.f32 %v2949_v36, 0.0  ;;  %v1379_v43 = vmax.f32 %v3013_v37, 0.0 }
 0x153   : > { %v2950_v40 = vpop.f32.mrb[46].mxu0  ;;  %v3014_v41 = vpop.f32.mrb[46].mxu1  ;;  %v1313_v48 = vmax.f32 %v934_v38, 0.0  ;;  %v1377_v49 = vmax.f32 %v1190_v39, 0.0 }
 0x154   : > { %v1316_v44 = vmax.f32 %v2950_v40, 0.0  ;;  %v1380_v45 = vmax.f32 %v3014_v41, 0.0  ;;  %v937_v46 = vpop.f32.mrb[47].mxu0  ;;  %v1193_v47 = vpop.f32.mrb[47].mxu1 }
 0x155   : > { %v1314_v50 = vmax.f32 %v937_v46, 0.0  ;;  %v1378_v51 = vmax.f32 %v1193_v47, 0.0 }
 0x156   : > { %v2550_v52 = vpack.c.bf16 %v1316_v44, %v1315_v42  ;;  %v2710_v53 = vpack.c.bf16 %v1380_v45, %v1379_v43 }
 0x157   : > { %v2545_v54 = vpack.c.bf16 %v1314_v50, %v1313_v48  ;;  %v2705_v55 = vpack.c.bf16 %v1378_v51, %v1377_v49 }
 0x158   : > { %2774 = vst [vmem:[%s3261_s6 + $0xb8] sm:$0xff] %v2550_v52   ;;  %2806 = vst [vmem:[%s3261_s6 + $0x1b8] sm:$0xff] %v2710_v53  }
 0x159   : > { %2773 = vst [vmem:[%s3261_s6 + $0xb0] sm:$0xff] %v2545_v54   ;;  %2805 = vst [vmem:[%s3261_s6 + $0x1b0] sm:$0xff] %v2705_v55   ;;  %v2953_v56 = vpop.f32.mrb[48].mxu0  ;;  %v3017_v57 = vpop.f32.mrb[48].mxu1 }
 0x15a   : > { %v950_v58 = vpop.f32.mrb[49].mxu0  ;;  %v1206_v59 = vpop.f32.mrb[49].mxu1  ;;  %v1319_v62 = vmax.f32 %v2953_v56, 0.0  ;;  %v1383_v63 = vmax.f32 %v3017_v57, 0.0 }
 0x15b   : > { %v2954_v60 = vpop.f32.mrb[50].mxu0  ;;  %v3018_v61 = vpop.f32.mrb[50].mxu1  ;;  %v1317_v4 = vmax.f32 %v950_v58, 0.0  ;;  %v1381_v5 = vmax.f32 %v1206_v59, 0.0 }
 0x15c   : > { %v1320_v0 = vmax.f32 %v2954_v60, 0.0  ;;  %v1384_v1 = vmax.f32 %v3018_v61, 0.0  ;;  %v953_v2 = vpop.f32.mrb[51].mxu0  ;;  %v1209_v3 = vpop.f32.mrb[51].mxu1 }
 0x15d   : > { %v1318_v6 = vmax.f32 %v953_v2, 0.0  ;;  %v1382_v7 = vmax.f32 %v1209_v3, 0.0 }
 0x15e   : > { %v2560_v8 = vpack.c.bf16 %v1320_v0, %v1319_v62  ;;  %v2720_v9 = vpack.c.bf16 %v1384_v1, %v1383_v63 }
 0x15f   : > { %v2555_v10 = vpack.c.bf16 %v1318_v6, %v1317_v4  ;;  %v2715_v11 = vpack.c.bf16 %v1382_v7, %v1381_v5 }
 0x160   : > { %2776 = vst [vmem:[%s3261_s6 + $0xc8] sm:$0xff] %v2560_v8   ;;  %2808 = vst [vmem:[%s3261_s6 + $0x1c8] sm:$0xff] %v2720_v9  }
 0x161   : > { %2775 = vst [vmem:[%s3261_s6 + $0xc0] sm:$0xff] %v2555_v10   ;;  %2807 = vst [vmem:[%s3261_s6 + $0x1c0] sm:$0xff] %v2715_v11   ;;  %v2957_v12 = vpop.f32.mrb[52].mxu0  ;;  %v3021_v13 = vpop.f32.mrb[52].mxu1 }
 0x162   : > { %v966_v14 = vpop.f32.mrb[53].mxu0  ;;  %v1222_v15 = vpop.f32.mrb[53].mxu1  ;;  %v1323_v18 = vmax.f32 %v2957_v12, 0.0  ;;  %v1387_v19 = vmax.f32 %v3021_v13, 0.0 }
 0x163   : > { %v2958_v16 = vpop.f32.mrb[54].mxu0  ;;  %v3022_v17 = vpop.f32.mrb[54].mxu1  ;;  %v1321_v24 = vmax.f32 %v966_v14, 0.0  ;;  %v1385_v25 = vmax.f32 %v1222_v15, 0.0 }
 0x164   : > { %v1324_v20 = vmax.f32 %v2958_v16, 0.0  ;;  %v1388_v21 = vmax.f32 %v3022_v17, 0.0  ;;  %v969_v22 = vpop.f32.mrb[55].mxu0  ;;  %v1225_v23 = vpop.f32.mrb[55].mxu1 }
 0x165   : > { %v1322_v26 = vmax.f32 %v969_v22, 0.0  ;;  %v1386_v27 = vmax.f32 %v1225_v23, 0.0 }
 0x166   : > { %v2570_v28 = vpack.c.bf16 %v1324_v20, %v1323_v18  ;;  %v2730_v29 = vpack.c.bf16 %v1388_v21, %v1387_v19 }
 0x167   : > { %v2565_v30 = vpack.c.bf16 %v1322_v26, %v1321_v24  ;;  %v2725_v31 = vpack.c.bf16 %v1386_v27, %v1385_v25 }
 0x168   : > { %2778 = vst [vmem:[%s3261_s6 + $0xd8] sm:$0xff] %v2570_v28   ;;  %2810 = vst [vmem:[%s3261_s6 + $0x1d8] sm:$0xff] %v2730_v29  }
 0x169   : > { %2777 = vst [vmem:[%s3261_s6 + $0xd0] sm:$0xff] %v2565_v30   ;;  %2809 = vst [vmem:[%s3261_s6 + $0x1d0] sm:$0xff] %v2725_v31   ;;  %v2961_v32 = vpop.f32.mrb[56].mxu0  ;;  %v3025_v33 = vpop.f32.mrb[56].mxu1 }
 0x16a   : > { %v982_v34 = vpop.f32.mrb[57].mxu0  ;;  %v1238_v35 = vpop.f32.mrb[57].mxu1  ;;  %v1327_v38 = vmax.f32 %v2961_v32, 0.0  ;;  %v1391_v39 = vmax.f32 %v3025_v33, 0.0 }
 0x16b   : > { %v2962_v36 = vpop.f32.mrb[58].mxu0  ;;  %v3026_v37 = vpop.f32.mrb[58].mxu1  ;;  %v1325_v44 = vmax.f32 %v982_v34, 0.0  ;;  %v1389_v45 = vmax.f32 %v1238_v35, 0.0 }
 0x16c   : > { %v1328_v40 = vmax.f32 %v2962_v36, 0.0  ;;  %v1392_v41 = vmax.f32 %v3026_v37, 0.0  ;;  %v985_v42 = vpop.f32.mrb[59].mxu0  ;;  %v1241_v43 = vpop.f32.mrb[59].mxu1 }
 0x16d   : > { %v1326_v46 = vmax.f32 %v985_v42, 0.0  ;;  %v1390_v47 = vmax.f32 %v1241_v43, 0.0 }
 0x16e   : > { %v2580_v48 = vpack.c.bf16 %v1328_v40, %v1327_v38  ;;  %v2740_v49 = vpack.c.bf16 %v1392_v41, %v1391_v39 }
 0x16f   : > { %v2575_v50 = vpack.c.bf16 %v1326_v46, %v1325_v44  ;;  %v2735_v51 = vpack.c.bf16 %v1390_v47, %v1389_v45 }
 0x170   : > { %2780 = vst [vmem:[%s3261_s6 + $0xe8] sm:$0xff] %v2580_v48   ;;  %2812 = vst [vmem:[%s3261_s6 + $0x1e8] sm:$0xff] %v2740_v49  }
 0x171   : > { %2779 = vst [vmem:[%s3261_s6 + $0xe0] sm:$0xff] %v2575_v50   ;;  %2811 = vst [vmem:[%s3261_s6 + $0x1e0] sm:$0xff] %v2735_v51   ;;  %v2965_v52 = vpop.f32.mrb[60].mxu0  ;;  %v3029_v53 = vpop.f32.mrb[60].mxu1 }
 0x172   : > { %v998_v54 = vpop.f32.mrb[61].mxu0  ;;  %v1254_v55 = vpop.f32.mrb[61].mxu1  ;;  %v1331_v58 = vmax.f32 %v2965_v52, 0.0  ;;  %v1395_v59 = vmax.f32 %v3029_v53, 0.0 }
 0x173   : > { %v2966_v56 = vpop.f32.mrb[62].mxu0  ;;  %v3030_v57 = vpop.f32.mrb[62].mxu1  ;;  %v1329_v0 = vmax.f32 %v998_v54, 0.0  ;;  %v1393_v1 = vmax.f32 %v1254_v55, 0.0 }
 0x174   : > { %v1332_v60 = vmax.f32 %v2966_v56, 0.0  ;;  %v1396_v61 = vmax.f32 %v3030_v57, 0.0  ;;  %v1001_v62 = vpop.f32.mrb[63].mxu0  ;;  %v1257_v63 = vpop.f32.mrb[63].mxu1 }
 0x175   : > { %v1330_v2 = vmax.f32 %v1001_v62, 0.0  ;;  %v1394_v3 = vmax.f32 %v1257_v63, 0.0 }
 0x176   : > { %v2590_v4 = vpack.c.bf16 %v1332_v60, %v1331_v58  ;;  %v2750_v5 = vpack.c.bf16 %v1396_v61, %v1395_v59 }
 0x177   : > { %v2585_v6 = vpack.c.bf16 %v1330_v2, %v1329_v0  ;;  %v2745_v7 = vpack.c.bf16 %v1394_v3, %v1393_v1 }
 0x178   : > { %2782 = vst [vmem:[%s3261_s6 + $0xf8] sm:$0xff] %v2590_v4   ;;  %2814 = vst [vmem:[%s3261_s6 + $0x1f8] sm:$0xff] %v2750_v5  }
 0x179   : > { %2781 = vst [vmem:[%s3261_s6 + $0xf0] sm:$0xff] %v2585_v6   ;;  %2813 = vst [vmem:[%s3261_s6 + $0x1f0] sm:$0xff] %v2745_v7  }
 0x17a PF: > { %s12_s9 = sadd.s32 1, %s3133_s9  }
 0x17b   : > { %p9_p4 = scmp.ge.s32.totalorder %s12_s9, 4  }
 0x17d   :  { %11 = sbr.rel (!%p9_p4) target bundleno = 1 (0x1), region = 58 }

// kernel: resnet_qnn_forward.12
= control target key start
LH: loop header
LB: loop body
LE: loop exit
PB: predicated region body
PF: predicated region fallthrough
CT: control target
= control target key end

     0   :  { %s3910_s9 = smov 0   ;;  %s4644_s0 = inlined_call_operand.vmem [shape: bf16[512,1152], index: 0, kind: input, shape index: {}]   ;;  %s4645_s1 = inlined_call_operand.vmem [shape: bf16[1152,128], index: 1, kind: input, shape index: {}]   ;;  %s4646_s2 = inlined_call_operand.vmem [shape: bf16[512,128], index: 2, kind: output, shape index: {}]  }
   0x1 LB: > { %s2676_s10 = sadd.s32 4294967295, %s3893_s9   ;;  %p2680_p0 = scmp.ge.s32.totalorder %s3893_s9, 1  ;;  %s3893_s9 = sphi %s3910_s9, %s12_s9  }
   0x2   : > { %p114_p1 = scmp.lt.s32.totalorder %s3893_s9, 3 }
   0x4   : > { %p115_p2 = pnand %p2680_p0, %p114_p1 }
   0x5   : > { %v3607_v0 = vld [vmem:[%s4645_s1 + $0x40] sm:$0xff] (!%p115_p2)   ;;  %s2681_s13 = sshll.u32 (!%p115_p2), %s2676_s10, 5  ;;  %v3609_v2 = vld [vmem:[%s4645_s1 + $0x48] sm:$0xff] (!%p115_p2)   ;;  %v3611_v4 = vld [vmem:[%s4645_s1 + $0x50] sm:$0xff] (!%p115_p2)  }
   0x6   : > { %118 = sbr.rel (%p115_p2) target bundleno = 544 (0x220), region = 28  ;;  %v3608_v1 = vld [vmem:[%s4645_s1] sm:$0xff] (!%p115_p2)   ;;  %3062 = vmatprep.subr.bf16.mxu0 (!%p115_p2), %v3607_v0  ;;  %3582 = vmatprep.subr.bf16.mxu1 (!%p115_p2), %v3607_v0  ;;  %p138_p3 = scmp.lt.s32.totalorder (!%p115_p2), %s2681_s13, 63  ;;  %v3610_v3 = vld [vmem:[%s4645_s1 + $0x8] sm:$0xff] (!%p115_p2)   ;;  %v3612_v5 = vld [vmem:[%s4645_s1 + $0x10] sm:$0xff] (!%p115_p2)  }
   0x7   : > { %3063 = vmatpush3.bf16.msra.mxu0 (!%p115_p2), %v3608_v1  ;;  %3590 = vmatpush3.bf16.msra.mxu1 (!%p115_p2), %v3608_v1  ;;  %v3613_v6 = vld [vmem:[%s4645_s1 + $0x58] sm:$0xff] (!%p115_p2)   ;;  %v3615_v8 = vld [vmem:[%s4645_s1 + $0x60] sm:$0xff] (!%p115_p2)   ;;  %v3617_v10 = vld [vmem:[%s4645_s1 + $0x68] sm:$0xff] (!%p115_p2)  }
   0x8   : > { %3064 = vmatprep.subr.bf16.mxu0 (!%p115_p2), %v3609_v2  ;;  %3583 = vmatprep.subr.bf16.mxu1 (!%p115_p2), %v3609_v2  ;;  %v3614_v7 = vld [vmem:[%s4645_s1 + $0x18] sm:$0xff] (!%p115_p2)   ;;  %v3616_v9 = vld [vmem:[%s4645_s1 + $0x20] sm:$0xff] (!%p115_p2)   ;;  %v3618_v13 = vld [vmem:[%s4645_s1 + $0x28] sm:$0xff] (!%p115_p2)  }
   0x9   : > { %v3619_v14 = vld [vmem:[%s4645_s1 + $0x70] sm:$0xff] (!%p115_p2)   ;;  %v3621_v16 = vld [vmem:[%s4645_s1 + $0x78] sm:$0xff] (!%p115_p2)   ;;  %v3629_v18 = vld [vmem:[%s4645_s1 + $0xc0] sm:$0xff] (!%p115_p2)  }
   0xa   : > { %v3620_v15 = vld [vmem:[%s4645_s1 + $0x30] sm:$0xff] (!%p115_p2)   ;;  %v3622_v17 = vld [vmem:[%s4645_s1 + $0x38] sm:$0xff] (!%p115_p2)   ;;  %v3632_v21 = vld [vmem:[%s4645_s1 + $0x140] sm:$0xff] (!%p115_p2)  }
   0xb   : > { %3065 = vmatpush3.bf16.msra.mxu0 (!%p115_p2), %v3610_v3  ;;  %3591 = vmatpush3.bf16.msra.mxu1 (!%p115_p2), %v3610_v3  ;;  %v3630_v22 = vld [vmem:[%s4645_s1 + $0x80] sm:$0xff] (!%p115_p2)   ;;  %v3631_v23 = vld [vmem:[%s4645_s1 + $0xc8] sm:$0xff] (!%p115_p2)   ;;  %v3641_v31 = vld [vmem:[%s4645_s1 + $0xd0] sm:$0xff] (!%p115_p2)  }
   0xc   : > { %3066 = vmatprep.subr.bf16.mxu0 (!%p115_p2), %v3611_v4  ;;  %3584 = vmatprep.subr.bf16.mxu1 (!%p115_p2), %v3611_v4  ;;  %v3634_v24 = vld [vmem:[%s4645_s1 + $0x100] sm:$0xff] (!%p115_p2)   ;;  %v3633_v27 = vld [vmem:[%s4645_s1 + $0x88] sm:$0xff] (!%p115_p2)   ;;  %v3642_v32 = vld [vmem:[%s4645_s1 + $0x90] sm:$0xff] (!%p115_p2)  }
   0xd   : > { %s4648_s13 = smov (!%p138_p3, %s2681_s13), 63  ;;  %v3652_v28 = vld [vmem:[%s4645_s1 + $0x148] sm:$0xff]   ;;  %v3643_v34 = vld [vmem:[%s4645_s1 + $0xd8] sm:$0xff]   ;;  %v3651_v40 = vld [vmem:[%s4645_s1 + $0xe0] sm:$0xff]  }
   0xe   : > { %s3598_s26 = smul.u32 36, %s4648_s13  ;;  %v3654_v33 = vld [vmem:[%s4645_s1 + $0x108] sm:$0xff]   ;;  %v3644_v37 = vld [vmem:[%s4645_s1 + $0x98] sm:$0xff]   ;;  %v3653_v41 = vld [vmem:[%s4645_s1 + $0xa0] sm:$0xff]  }
   0xf   : > { %3067 = vmatpush3.bf16.msra.mxu0 %v3612_v5  ;;  %3592 = vmatpush3.bf16.msra.mxu1 %v3612_v5  ;;  %v3655_v42 = vld [vmem:[%s4645_s1 + $0xe8] sm:$0xff]   ;;  %v3666_v43 = vld [vmem:[%s4645_s1 + $0x150] sm:$0xff]   ;;  %v3665_v52 = vld [vmem:[%s4645_s1 + $0xf8] sm:$0xff]  }
  0x10   : > { %3068 = vmatprep.subr.bf16.mxu0 %v3613_v6  ;;  %3585 = vmatprep.subr.bf16.mxu1 %v3613_v6  ;;  %s3951_s5 = scalar_lea.vmem %s4644_s0, %s3598_s26  ;;  %v3668_v46 = vld [vmem:[%s4645_s1 + $0x110] sm:$0xff]   ;;  %v3656_v47 = vld [vmem:[%s4645_s1 + $0xa8] sm:$0xff]   ;;  %v3683_v55 = vld [vmem:[%s4645_s1 + $0x158] sm:$0xff]  }
  0x11   : > { %v3625_v11 = vld [vmem:[%s3951_s5 + $0x4] ss:$36 sps:$4 sm:$0xff]   ;;  %v3635_v25 = vld [vmem:[%s3951_s5 + $0x4c] ss:$36 sps:$4 sm:$0xff]   ;;  %v3645_v35 = vld [vmem:[%s3951_s5 + $0x94] ss:$36 sps:$4 sm:$0xff]  }
  0x12   : > { %v3628_v12 = vld [vmem:[%s3951_s5 + $0x364] ss:$36 sps:$4 sm:$0xff]   ;;  %1655 = vmatprep.mubr.bf16.mxu0 %v3625_v11  ;;  %v3637_v26 = vld [vmem:[%s3951_s5 + $0x3ac] ss:$36 sps:$4 sm:$0xff]   ;;  %v3647_v36 = vld [vmem:[%s3951_s5 + $0x3f4] ss:$36 sps:$4 sm:$0xff]  }
  0x13   : > { %3069 = vmatpush3.bf16.msra.mxu0 %v3614_v7  ;;  %3593 = vmatpush3.bf16.msra.mxu1 %v3614_v7  ;;  %v3623_v19 = vld [vmem:[%s3951_s5] ss:$36 sps:$4 sm:$0xff]   ;;  %v3639_v29 = vld [vmem:[%s3951_s5 + $0x48] ss:$36 sps:$4 sm:$0xff]   ;;  %v3649_v38 = vld [vmem:[%s3951_s5 + $0x90] ss:$36 sps:$4 sm:$0xff]  }
  0x14   : > { %3070 = vmatprep.subr.bf16.mxu0 %v3615_v8  ;;  %3586 = vmatprep.subr.bf16.mxu1 %v3615_v8  ;;  %v3626_v20 = vld [vmem:[%s3951_s5 + $0x360] ss:$36 sps:$4 sm:$0xff]   ;;  %v3640_v30 = vld [vmem:[%s3951_s5 + $0x3a8] ss:$36 sps:$4 sm:$0xff]   ;;  %v3650_v39 = vld [vmem:[%s3951_s5 + $0x3f0] ss:$36 sps:$4 sm:$0xff]  }
  0x15   : > { %1751 = vmatprep.mubr.bf16.mxu1 %v3628_v12  ;;  %v3657_v44 = vld [vmem:[%s3951_s5 + $0xdc] ss:$36 sps:$4 sm:$0xff]   ;;  %v3663_v48 = vld [vmem:[%s4645_s1 + $0xf0] sm:$0xff]   ;;  %v3669_v53 = vld [vmem:[%s3951_s5 + $0x124] ss:$36 sps:$4 sm:$0xff]  }
  0x16   : > { %v3659_v45 = vld [vmem:[%s3951_s5 + $0x43c] ss:$36 sps:$4 sm:$0xff]   ;;  %v3664_v51 = vld [vmem:[%s4645_s1 + $0xb0] sm:$0xff]   ;;  %v3671_v58 = vld [vmem:[%s3951_s5 + $0x8] ss:$36 sps:$4 sm:$0xff]  }
  0x17   : > { %3071 = vmatpush3.bf16.msra.mxu0 %v3616_v9  ;;  %3594 = vmatpush3.bf16.msra.mxu1 %v3616_v9  ;;  %v3661_v49 = vld [vmem:[%s3951_s5 + $0xd8] ss:$36 sps:$4 sm:$0xff]   ;;  %v3673_v54 = vld [vmem:[%s3951_s5 + $0xc] ss:$36 sps:$4 sm:$0xff]   ;;  %v3674_v59 = vld [vmem:[%s3951_s5 + $0x120] ss:$36 sps:$4 sm:$0xff]  }
  0x18   : > { %3072 = vmatprep.subr.bf16.mxu0 %v3617_v10  ;;  %3587 = vmatprep.subr.bf16.mxu1 %v3617_v10  ;;  %v3662_v50 = vld [vmem:[%s3951_s5 + $0x438] ss:$36 sps:$4 sm:$0xff]   ;;  %v3675_v60 = vld [vmem:[%s4645_s1 + $0x1c0] sm:$0xff]   ;;  %v3677_v62 = vld [vmem:[%s3951_s5 + $0x16c] ss:$36 sps:$4 sm:$0xff]  }
  0x19   : > { %v3684_v56 = vld [vmem:[%s4645_s1 + $0x118] sm:$0xff]   ;;  %v3676_v61 = vld [vmem:[%s4645_s1 + $0x180] sm:$0xff]   ;;  %v3691_v1 = vld [vmem:[%s4645_s1 + $0x1c8] sm:$0xff]  }
  0x1a   : > { %v3667_v57 = vld [vmem:[%s4645_s1 + $0xb8] sm:$0xff]   ;;  %v3693_v0 = vld [vmem:[%s4645_s1 + $0x160] sm:$0xff]   ;;  %v3692_v3 = vld [vmem:[%s4645_s1 + $0x188] sm:$0xff]  }
  0x1b   : > { %3073 = vmatpush3.bf16.msra.mxu0 %v3618_v13  ;;  %3595 = vmatpush3.bf16.msra.mxu1 %v3618_v13  ;;  %v3679_v63 = vld [vmem:[%s3951_s5 + $0x54] ss:$36 sps:$4 sm:$0xff]   ;;  %v3694_v2 = vld [vmem:[%s4645_s1 + $0x120] sm:$0xff]   ;;  %v3681_v4 = vld [vmem:[%s3951_s5 + $0x168] ss:$36 sps:$4 sm:$0xff]  }
  0x1c   : > { %3074 = vmatprep.subr.bf16.mxu0 %v3619_v14  ;;  %3588 = vmatprep.subr.bf16.mxu1 %v3619_v14  ;;  %v3682_v5 = vld [vmem:[%s3951_s5 + $0x50] ss:$36 sps:$4 sm:$0xff]   ;;  %v3687_v7 = vld [vmem:[%s3951_s5 + $0x9c] ss:$36 sps:$4 sm:$0xff]   ;;  %v3707_v8 = vld [vmem:[%s4645_s1 + $0x168] sm:$0xff]  }
  0x1d   : > { %v3685_v6 = vld [vmem:[%s3951_s5 + $0x1b4] ss:$36 sps:$4 sm:$0xff]   ;;  %v3709_v10 = vld [vmem:[%s4645_s1 + $0x128] sm:$0xff]   ;;  %v3695_v14 = vld [vmem:[%s3951_s5 + $0x1fc] ss:$36 sps:$4 sm:$0xff]  }
  0x1e   : > { %v3708_v9 = vld [vmem:[%s4645_s1 + $0x1d0] sm:$0xff]   ;;  %v3690_v13 = vld [vmem:[%s3951_s5 + $0x98] ss:$36 sps:$4 sm:$0xff]  }
  0x1f   : > { %3075 = vmatpush3.bf16.msra.mxu0 %v3620_v15  ;;  %3596 = vmatpush3.bf16.msra.mxu1 %v3620_v15  ;;  %v3710_v11 = vld [vmem:[%s4645_s1 + $0x190] sm:$0xff]  }
  0x20   : > { %3076 = vmatprep.subr.bf16.mxu0 %v3621_v16  ;;  %3589 = vmatprep.subr.bf16.mxu1 %v3621_v16  ;;  %v3689_v12 = vld [vmem:[%s3951_s5 + $0x1b0] ss:$36 sps:$4 sm:$0xff]  }
  0x21   : > { %v3717_v15 = vld [vmem:[%s4645_s1 + $0x170] sm:$0xff]  }
  0x22   : > { %v3718_v16 = vld [vmem:[%s4645_s1 + $0x130] sm:$0xff]  }
  0x23   : > { %3077 = vmatpush3.bf16.msra.mxu0 %v3622_v17  ;;  %3597 = vmatpush3.bf16.msra.mxu1 %v3622_v17  ;;  %v3697_v17 = vld [vmem:[%s3951_s5 + $0xe4] ss:$36 sps:$4 sm:$0xff]  }
  0x24   : > { %3174 = vmatprep.subr.bf16.mxu1 %v3629_v18  ;;  %3286 = vmatprep.subr.bf16.mxu0 %v3632_v21  ;;  %v3725_v18 = vld [vmem:[%s4645_s1 + $0x1d8] sm:$0xff]   ;;  %v3700_v21 = vld [vmem:[%s3951_s5 + $0xe0] ss:$36 sps:$4 sm:$0xff]  }
  0x26   : > { %1656 = vmatmul.mubr.bf16.vlgmr.msra.gmra.mrb[0].mxu0 %v3623_v19  ;;  %1752 = vmatmul.mubr.bf16.vlgmr.msra.gmra.mrb[0].mxu1 %v3626_v20  ;;  %v3726_v19 = vld [vmem:[%s4645_s1 + $0x198] sm:$0xff]  }
  0x27   : > { %3175 = vmatpush3.bf16.msra.mxu1 %v3630_v22  ;;  %3287 = vmatpush3.bf16.msra.mxu0 %v3634_v24  ;;  %v3699_v20 = vld [vmem:[%s3951_s5 + $0x1f8] ss:$36 sps:$4 sm:$0xff]   ;;  %v3701_v22 = vld [vmem:[%s3951_s5 + $0x244] ss:$36 sps:$4 sm:$0xff]  }
  0x28   : > { %3176 = vmatprep.subr.bf16.mxu1 %v3631_v23  ;;  %1663 = vmatprep.mubr.bf16.mxu0 %v3635_v25  ;;  %v3703_v23 = vld [vmem:[%s3951_s5 + $0x12c] ss:$36 sps:$4 sm:$0xff]   ;;  %v3733_v24 = vld [vmem:[%s4645_s1 + $0x178] sm:$0xff]  }
  0x29   : > { %1759 = vmatprep.mubr.bf16.mxu1 %v3637_v26  ;;  %3288 = vmatprep.subr.bf16.mxu0 %v3652_v28  ;;  %v3734_v25 = vld [vmem:[%s4645_s1 + $0x138] sm:$0xff]   ;;  %v3741_v26 = vld [vmem:[%s4645_s1 + $0x1e0] sm:$0xff]  }
  0x2a   : > { %v3742_v28 = vld [vmem:[%s4645_s1 + $0x1a0] sm:$0xff]  }
  0x2b   : > { %3177 = vmatpush3.bf16.msra.mxu1 %v3633_v27  ;;  %3289 = vmatpush3.bf16.msra.mxu0 %v3654_v33  ;;  %v3705_v27 = vld [vmem:[%s3951_s5 + $0x240] ss:$36 sps:$4 sm:$0xff]   ;;  %v3756_v33 = vld [vmem:[%s4645_s1 + $0x1e8] sm:$0xff]  }
  0x2c   : > { %3178 = vmatprep.subr.bf16.mxu1 %v3641_v31  ;;  %3290 = vmatprep.subr.bf16.mxu0 %v3666_v43  ;;  %v3711_v31 = vld [vmem:[%s3951_s5 + $0x28c] ss:$36 sps:$4 sm:$0xff]   ;;  %v3727_v43 = vld [vmem:[%s3951_s5 + $0x31c] ss:$36 sps:$4 sm:$0xff]  }
  0x2e   : > { %1664 = vmatmul.mubr.bf16.gmra.mrb[4].mxu0 %v3639_v29  ;;  %1760 = vmatmul.mubr.bf16.gmra.mrb[4].mxu1 %v3640_v30  ;;  %v3743_v29 = vld [vmem:[%s4645_s1 + $0x200] sm:$0xff]   ;;  %v3706_v30 = vld [vmem:[%s3951_s5 + $0x128] ss:$36 sps:$4 sm:$0xff]  }
  0x2f   : > { %3179 = vmatpush3.bf16.msra.mxu1 %v3642_v32  ;;  %1671 = vmatprep.mubr.bf16.mxu0 %v3645_v35  ;;  %v3713_v32 = vld [vmem:[%s3951_s5 + $0x174] ss:$36 sps:$4 sm:$0xff]   ;;  %v3757_v35 = vld [vmem:[%s4645_s1 + $0x1a8] sm:$0xff]  }
  0x30   : > { %3180 = vmatprep.subr.bf16.mxu1 %v3643_v34  ;;  %1767 = vmatprep.mubr.bf16.mxu1 %v3647_v36  ;;  %v3715_v34 = vld [vmem:[%s3951_s5 + $0x288] ss:$36 sps:$4 sm:$0xff]   ;;  %v3716_v36 = vld [vmem:[%s3951_s5 + $0x170] ss:$36 sps:$4 sm:$0xff]  }
  0x31   : > { %3291 = vmatpush3.bf16.msra.mxu0 %v3668_v46  ;;  %v3732_v46 = vld [vmem:[%s3951_s5 + $0x200] ss:$36 sps:$4 sm:$0xff]  }
  0x32   : > { %3292 = vmatprep.subr.bf16.mxu0 %v3683_v55  ;;  %v3758_v55 = vld [vmem:[%s4645_s1 + $0x208] sm:$0xff]  }
  0x33   : > { %3181 = vmatpush3.bf16.msra.mxu1 %v3644_v37  ;;  %v3719_v37 = vld [vmem:[%s3951_s5 + $0x2d4] ss:$36 sps:$4 sm:$0xff]  }
  0x34   : > { %3182 = vmatprep.subr.bf16.mxu1 %v3651_v40  ;;  %v3724_v40 = vld [vmem:[%s3951_s5 + $0x1b8] ss:$36 sps:$4 sm:$0xff]  }
  0x35   : > { %3293 = vmatpush3.bf16.msra.mxu0 %v3684_v56  ;;  %v3773_v56 = vld [vmem:[%s4645_s1 + $0x210] sm:$0xff]  }
  0x36   : > { %1672 = vmatmul.mubr.bf16.gmra.mrb[8].mxu0 %v3649_v38  ;;  %1768 = vmatmul.mubr.bf16.gmra.mrb[8].mxu1 %v3650_v39  ;;  %v3721_v38 = vld [vmem:[%s3951_s5 + $0x1bc] ss:$36 sps:$4 sm:$0xff]   ;;  %v3723_v39 = vld [vmem:[%s3951_s5 + $0x2d0] ss:$36 sps:$4 sm:$0xff]  }
  0x37   : > { %3183 = vmatpush3.bf16.msra.mxu1 %v3653_v41  ;;  %1679 = vmatprep.mubr.bf16.mxu0 %v3657_v44  ;;  %v3771_v41 = vld [vmem:[%s4645_s1 + $0x1f0] sm:$0xff]   ;;  %v3729_v44 = vld [vmem:[%s3951_s5 + $0x204] ss:$36 sps:$4 sm:$0xff]  }
  0x38   : > { %3184 = vmatprep.subr.bf16.mxu1 %v3655_v42  ;;  %1775 = vmatprep.mubr.bf16.mxu1 %v3659_v45  ;;  %v3772_v42 = vld [vmem:[%s4645_s1 + $0x1b0] sm:$0xff]   ;;  %v3731_v45 = vld [vmem:[%s3951_s5 + $0x318] ss:$36 sps:$4 sm:$0xff]  }
  0x39   : > { %3294 = vmatprep.subr.bf16.mxu0 %v3693_v0  ;;  %v3755_v0 = vld [vmem:[%s3951_s5 + $0xa0] ss:$36 sps:$4 sm:$0xff]  }
  0x3a   : > { %3295 = vmatpush3.bf16.msra.mxu0 %v3694_v2  ;;  %v3761_v2 = vld [vmem:[%s3951_s5 + $0xec] ss:$36 sps:$4 sm:$0xff]  }
  0x3b   : > { %3185 = vmatpush3.bf16.msra.mxu1 %v3656_v47  ;;  %3296 = vmatprep.subr.bf16.mxu0 %v3707_v8  ;;  %v3786_v47 = vld [vmem:[%s4645_s1 + $0x1f8] sm:$0xff]  }
  0x3c   : > { %3186 = vmatprep.subr.bf16.mxu1 %v3663_v48  ;;  %v3787_v48 = vld [vmem:[%s4645_s1 + $0x1b8] sm:$0xff]  }
  0x3d   : > { %v3767_v8 = vld [vmem:[%s3951_s5 + $0x134] ss:$36 sps:$4 sm:$0xff]  }
  0x3e   : > { %1680 = vmatmul.mubr.bf16.gmra.mrb[12].mxu0 %v3661_v49  ;;  %1776 = vmatmul.mubr.bf16.gmra.mrb[12].mxu1 %v3662_v50  ;;  %v3735_v49 = vld [vmem:[%s3951_s5 + $0x24c] ss:$36 sps:$4 sm:$0xff]   ;;  %v3739_v50 = vld [vmem:[%s3951_s5 + $0x14] ss:$36 sps:$4 sm:$0xff]  }
  0x3f   : > { %3187 = vmatpush3.bf16.msra.mxu1 %v3664_v51  ;;  %1687 = vmatprep.mubr.bf16.mxu0 %v3669_v53  ;;  %v3737_v51 = vld [vmem:[%s3951_s5 + $0x10] ss:$36 sps:$4 sm:$0xff]  }
  0x40   : > { %3188 = vmatprep.subr.bf16.mxu1 %v3665_v52  ;;  %1816 = vmatprep.mubr.bf16.mxu1 %v3673_v54  ;;  %v3740_v52 = vld [vmem:[%s3951_s5 + $0x248] ss:$36 sps:$4 sm:$0xff]   ;;  %v3744_v53 = vld [vmem:[%s3951_s5 + $0x294] ss:$36 sps:$4 sm:$0xff]   ;;  %v3746_v54 = vld [vmem:[%s3951_s5 + $0x5c] ss:$36 sps:$4 sm:$0xff]  }
  0x41   : > { %3297 = vmatpush3.bf16.msra.mxu0 %v3709_v10  ;;  %v3769_v10 = vld [vmem:[%s3951_s5 + $0x368] ss:$36 sps:$4 sm:$0xff]  }
  0x42   : > { %3298 = vmatprep.subr.bf16.mxu0 %v3717_v15  ;;  %v3779_v15 = vld [vmem:[%s3951_s5 + $0x178] ss:$36 sps:$4 sm:$0xff]  }
  0x43   : > { %3189 = vmatpush3.bf16.msra.mxu1 %v3667_v57  ;;  %v3748_v57 = vld [vmem:[%s3951_s5 + $0x290] ss:$36 sps:$4 sm:$0xff]  }
  0x44   : > { %3398 = vmatprep.subr.bf16.mxu1 %v3675_v60  ;;  %v3752_v60 = vld [vmem:[%s3951_s5 + $0xa4] ss:$36 sps:$4 sm:$0xff]  }
  0x45   : > { %3299 = vmatpush3.bf16.msra.mxu0 %v3718_v16  ;;  %v3780_v16 = vld [vmem:[%s3951_s5 + $0x3fc] ss:$36 sps:$4 sm:$0xff]  }
  0x46   : > { %1688 = vmatmul.mubr.bf16.gmra.mrb[16].mxu0 %v3674_v59  ;;  %1817 = vmatmul.mubr.bf16.vlgmr.msra.gmra.mrb[16].mxu1 %v3671_v58  ;;  %v3749_v58 = vld [vmem:[%s3951_s5 + $0x58] ss:$36 sps:$4 sm:$0xff]  }
  0x47   : > { %3399 = vmatpush3.bf16.msra.mxu1 %v3676_v61  ;;  %1695 = vmatprep.mubr.bf16.mxu0 %v3677_v62  ;;  %v3750_v59 = vld [vmem:[%s3951_s5 + $0x2dc] ss:$36 sps:$4 sm:$0xff]  }
  0x48   : > { %1824 = vmatprep.mubr.bf16.mxu1 %v3679_v63  ;;  %3400 = vmatprep.subr.bf16.mxu1 %v3691_v1  ;;  %v3788_v61 = vld [vmem:[%s4645_s1 + $0x218] sm:$0xff]   ;;  %v3801_v62 = vld [vmem:[%s4645_s1 + $0x220] sm:$0xff]  }
  0x49   : > { %3300 = vmatprep.subr.bf16.mxu0 %v3733_v24  ;;  %v3754_v63 = vld [vmem:[%s3951_s5 + $0x2d8] ss:$36 sps:$4 sm:$0xff]   ;;  %v3759_v1 = vld [vmem:[%s3951_s5 + $0x324] ss:$36 sps:$4 sm:$0xff]  }
  0x4a   : > { %3301 = vmatpush3.bf16.msra.mxu0 %v3734_v25  ;;  %v3795_v24 = vld [vmem:[%s3951_s5 + $0x254] ss:$36 sps:$4 sm:$0xff]   ;;  %v3799_v25 = vld [vmem:[%s3951_s5 + $0x1c] ss:$36 sps:$4 sm:$0xff]  }
  0x4b   : > { %3401 = vmatpush3.bf16.msra.mxu1 %v3692_v3  ;;  %3534 = vmatprep.subr.bf16.mxu0 %v3743_v29  ;;  %v3814_v3 = vld [vmem:[%s4645_s1 + $0x228] sm:$0xff]  }
  0x4c   : > { %3402 = vmatprep.subr.bf16.mxu1 %v3708_v9  ;;  %v3840_v9 = vld [vmem:[%s4645_s1 + $0x238] sm:$0xff]  }
  0x4e   : > { %1696 = vmatmul.mubr.bf16.gmra.mrb[20].mxu0 %v3681_v4  ;;  %1825 = vmatmul.mubr.bf16.gmra.mrb[20].mxu1 %v3682_v5  ;;  %v3763_v4 = vld [vmem:[%s3951_s5 + $0x320] ss:$36 sps:$4 sm:$0xff]   ;;  %v3764_v5 = vld [vmem:[%s3951_s5 + $0xe8] ss:$36 sps:$4 sm:$0xff]  }
  0x4f   : > { %1703 = vmatprep.mubr.bf16.mxu0 %v3685_v6  ;;  %1832 = vmatprep.mubr.bf16.mxu1 %v3687_v7  ;;  %v3827_v6 = vld [vmem:[%s4645_s1 + $0x230] sm:$0xff]  }
  0x50   : > { %3403 = vmatpush3.bf16.msra.mxu1 %v3710_v11  ;;  %v3765_v7 = vld [vmem:[%s3951_s5 + $0x36c] ss:$36 sps:$4 sm:$0xff]  }
  0x51   : > { %3404 = vmatprep.subr.bf16.mxu1 %v3725_v18  ;;  %v3770_v11 = vld [vmem:[%s3951_s5 + $0x130] ss:$36 sps:$4 sm:$0xff]   ;;  %v3784_v18 = vld [vmem:[%s3951_s5 + $0x3f8] ss:$36 sps:$4 sm:$0xff]  }
  0x54   : > { %3405 = vmatpush3.bf16.msra.mxu1 %v3726_v19  ;;  %v3785_v19 = vld [vmem:[%s3951_s5 + $0x1c0] ss:$36 sps:$4 sm:$0xff]  }
  0x55   : > { %3406 = vmatprep.subr.bf16.mxu1 %v3741_v26  ;;  %v3797_v26 = vld [vmem:[%s3951_s5 + $0x18] ss:$36 sps:$4 sm:$0xff]  }
  0x56   : > { %1704 = vmatmul.mubr.bf16.gmra.mrb[24].mxu0 %v3689_v12  ;;  %1833 = vmatmul.mubr.bf16.gmra.mrb[24].mxu1 %v3690_v13  ;;  %v3774_v12 = vld [vmem:[%s3951_s5 + $0x3b4] ss:$36 sps:$4 sm:$0xff]   ;;  %v3776_v13 = vld [vmem:[%s3951_s5 + $0x17c] ss:$36 sps:$4 sm:$0xff]  }
  0x57   : > { %1711 = vmatprep.mubr.bf16.mxu0 %v3695_v14  ;;  %1840 = vmatprep.mubr.bf16.mxu1 %v3697_v17  ;;  %v3778_v14 = vld [vmem:[%s3951_s5 + $0x3b0] ss:$36 sps:$4 sm:$0xff]   ;;  %v3782_v17 = vld [vmem:[%s3951_s5 + $0x1c4] ss:$36 sps:$4 sm:$0xff]  }
  0x58   : > { %3407 = vmatpush3.bf16.msra.mxu1 %v3742_v28  ;;  %v3802_v28 = vld [vmem:[%s3951_s5 + $0x29c] ss:$36 sps:$4 sm:$0xff]  }
  0x59   : > { %3408 = vmatprep.subr.bf16.mxu1 %v3756_v33  ;;  %v3810_v33 = vld [vmem:[%s3951_s5 + $0xac] ss:$36 sps:$4 sm:$0xff]  }
  0x5c   : > { %3409 = vmatpush3.bf16.msra.mxu1 %v3757_v35  ;;  %v3813_v35 = vld [vmem:[%s3951_s5 + $0xa8] ss:$36 sps:$4 sm:$0xff]  }
  0x5d   : > { %3410 = vmatprep.subr.bf16.mxu1 %v3771_v41  ;;  %v3823_v41 = vld [vmem:[%s3951_s5 + $0x13c] ss:$36 sps:$4 sm:$0xff]  }
  0x5e   : > { %1712 = vmatmul.mubr.bf16.gmra.mrb[28].mxu0 %v3699_v20  ;;  %1841 = vmatmul.mubr.bf16.gmra.mrb[28].mxu1 %v3700_v21  ;;  %v3789_v20 = vld [vmem:[%s3951_s5 + $0x444] ss:$36 sps:$4 sm:$0xff]   ;;  %v3791_v21 = vld [vmem:[%s3951_s5 + $0x20c] ss:$36 sps:$4 sm:$0xff]  }
  0x5f   : > { %1719 = vmatprep.mubr.bf16.mxu0 %v3701_v22  ;;  %1848 = vmatprep.mubr.bf16.mxu1 %v3703_v23  ;;  %v3793_v22 = vld [vmem:[%s3951_s5 + $0x440] ss:$36 sps:$4 sm:$0xff]   ;;  %v3794_v23 = vld [vmem:[%s3951_s5 + $0x208] ss:$36 sps:$4 sm:$0xff]  }
  0x60   : > { %3411 = vmatpush3.bf16.msra.mxu1 %v3772_v42  ;;  %v3825_v42 = vld [vmem:[%s3951_s5 + $0x370] ss:$36 sps:$4 sm:$0xff]  }
  0x61   : > { %3412 = vmatprep.subr.bf16.mxu1 %v3786_v47  ;;  %v3833_v47 = vld [vmem:[%s3951_s5 + $0x180] ss:$36 sps:$4 sm:$0xff]  }
  0x64   : > { %3413 = vmatpush3.bf16.msra.mxu1 %v3787_v48  ;;  %v3834_v48 = vld [vmem:[%s3951_s5 + $0x404] ss:$36 sps:$4 sm:$0xff]  }
  0x66   : > { %1720 = vmatmul.mubr.bf16.gmra.mrb[32].mxu0 %v3705_v27  ;;  %1849 = vmatmul.mubr.bf16.gmra.mrb[32].mxu1 %v3706_v30  ;;  %v3800_v27 = vld [vmem:[%s3951_s5 + $0x250] ss:$36 sps:$4 sm:$0xff]   ;;  %v3806_v30 = vld [vmem:[%s3951_s5 + $0x298] ss:$36 sps:$4 sm:$0xff]  }
  0x67   : > { %1727 = vmatprep.mubr.bf16.mxu0 %v3711_v31  ;;  %1856 = vmatprep.mubr.bf16.mxu1 %v3713_v32  ;;  %v3807_v31 = vld [vmem:[%s3951_s5 + $0x60] ss:$36 sps:$4 sm:$0xff]  }
  0x68   : > { %v3808_v32 = vld [vmem:[%s3951_s5 + $0x2e4] ss:$36 sps:$4 sm:$0xff]  }
  0x6e   : > { %1728 = vmatmul.mubr.bf16.gmra.mrb[36].mxu0 %v3715_v34  ;;  %1857 = vmatmul.mubr.bf16.gmra.mrb[36].mxu1 %v3716_v36  ;;  %v3812_v34 = vld [vmem:[%s3951_s5 + $0x2e0] ss:$36 sps:$4 sm:$0xff]   ;;  %v3815_v36 = vld [vmem:[%s3951_s5 + $0x32c] ss:$36 sps:$4 sm:$0xff]  }
  0x6f   : > { %1735 = vmatprep.mubr.bf16.mxu0 %v3719_v37  ;;  %1864 = vmatprep.mubr.bf16.mxu1 %v3721_v38  ;;  %v3817_v37 = vld [vmem:[%s3951_s5 + $0xf4] ss:$36 sps:$4 sm:$0xff]   ;;  %v3819_v38 = vld [vmem:[%s3951_s5 + $0x328] ss:$36 sps:$4 sm:$0xff]  }
  0x76   : > { %1736 = vmatmul.mubr.bf16.gmra.mrb[40].mxu0 %v3723_v39  ;;  %1865 = vmatmul.mubr.bf16.gmra.mrb[40].mxu1 %v3724_v40  ;;  %v3820_v39 = vld [vmem:[%s3951_s5 + $0xf0] ss:$36 sps:$4 sm:$0xff]  }
  0x77   : > { %1743 = vmatprep.mubr.bf16.mxu0 %v3727_v43  ;;  %1872 = vmatprep.mubr.bf16.mxu1 %v3729_v44  ;;  %v3821_v40 = vld [vmem:[%s3951_s5 + $0x374] ss:$36 sps:$4 sm:$0xff]   ;;  %v3828_v44 = vld [vmem:[%s3951_s5 + $0x3bc] ss:$36 sps:$4 sm:$0xff]  }
  0x78   : > { %v3826_v43 = vld [vmem:[%s3951_s5 + $0x138] ss:$36 sps:$4 sm:$0xff]  }
  0x7e   : > { %1744 = vmatmul.mubr.bf16.gmra.mrb[44].mxu0 %v3731_v45  ;;  %1873 = vmatmul.mubr.bf16.gmra.mrb[44].mxu1 %v3732_v46  ;;  %v3830_v45 = vld [vmem:[%s3951_s5 + $0x184] ss:$36 sps:$4 sm:$0xff]   ;;  %v3832_v46 = vld [vmem:[%s3951_s5 + $0x3b8] ss:$36 sps:$4 sm:$0xff]  }
  0x7f   : > { %1880 = vmatprep.mubr.bf16.mxu1 %v3735_v49  ;;  %1977 = vmatprep.mubr.bf16.mxu0 %v3739_v50  ;;  %v3836_v49 = vld [vmem:[%s3951_s5 + $0x1cc] ss:$36 sps:$4 sm:$0xff]   ;;  %v3838_v50 = vld [vmem:[%s3951_s5 + $0x400] ss:$36 sps:$4 sm:$0xff]  }
  0x86   : > { %1881 = vmatmul.mubr.bf16.gmra.mrb[48].mxu1 %v3740_v52  ;;  %1978 = vmatmul.mubr.bf16.vlgmr.msra.gmra.mrb[48].mxu0 %v3737_v51  ;;  %v3839_v51 = vld [vmem:[%s3951_s5 + $0x1c8] ss:$36 sps:$4 sm:$0xff]  }
  0x87   : > { %3535 = vmatpush3.bf16.msra.mxu0 %v3743_v29  ;;  %1888 = vmatprep.mubr.bf16.mxu1 %v3744_v53  ;;  %v3804_v29 = vld [vmem:[%s3951_s5 + $0x64] ss:$36 sps:$4 sm:$0xff]   ;;  %v3841_v52 = vld [vmem:[%s3951_s5 + $0x44c] ss:$36 sps:$4 sm:$0xff]   ;;  %v3843_v53 = vld [vmem:[%s3951_s5 + $0x214] ss:$36 sps:$4 sm:$0xff]  }
  0x88   : > { %1985 = vmatprep.mubr.bf16.mxu0 %v3746_v54  ;;  %3536 = vmatprep.subr.bf16.mxu0 %v3758_v55 }
  0x8b   : > { %3537 = vmatpush3.bf16.msra.mxu0 %v3758_v55 }
  0x8c   : > { %3538 = vmatprep.subr.bf16.mxu0 %v3773_v56 }
  0x8e   : > { %1889 = vmatmul.mubr.bf16.gmra.mrb[52].mxu1 %v3748_v57  ;;  %1986 = vmatmul.mubr.bf16.gmra.mrb[52].mxu0 %v3749_v58  ;;  %v3845_v58 = vld [vmem:[%s3951_s5 + $0x448] ss:$36 sps:$4 sm:$0xff]  }
  0x8f   : > { %1896 = vmatprep.mubr.bf16.mxu1 %v3750_v59  ;;  %1993 = vmatprep.mubr.bf16.mxu0 %v3752_v60  ;;  %v3846_v59 = vld [vmem:[%s3951_s5 + $0x210] ss:$36 sps:$4 sm:$0xff]  }
  0x90   : > { %3539 = vmatpush3.bf16.msra.mxu0 %v3773_v56 }
  0x91   : > { %3540 = vmatprep.subr.bf16.mxu0 %v3788_v61 }
  0x94   : > { %3541 = vmatpush3.bf16.msra.mxu0 %v3788_v61 }
  0x95   : > { %3542 = vmatprep.subr.bf16.mxu0 %v3801_v62 }
  0x96   : > { %1897 = vmatmul.mubr.bf16.gmra.mrb[56].mxu1 %v3754_v63  ;;  %1994 = vmatmul.mubr.bf16.gmra.mrb[56].mxu0 %v3755_v0  ;;  %v3847_v0 = vld [vmem:[%s3951_s5 + $0x25c] ss:$36 sps:$4 sm:$0xff]  }
  0x97   : > { %1904 = vmatprep.mubr.bf16.mxu1 %v3759_v1  ;;  %2001 = vmatprep.mubr.bf16.mxu0 %v3761_v2  ;;  %v3849_v1 = vld [vmem:[%s3951_s5 + $0x20] ss:$36 sps:$4 sm:$0xff]  }
  0x98   : > { %3543 = vmatpush3.bf16.msra.mxu0 %v3801_v62 }
  0x99   : > { %3544 = vmatprep.subr.bf16.mxu0 %v3814_v3 }
  0x9c   : > { %3545 = vmatpush3.bf16.msra.mxu0 %v3814_v3 }
  0x9d   : > { %3546 = vmatprep.subr.bf16.mxu0 %v3827_v6 }
  0x9e   : > { %1905 = vmatmul.mubr.bf16.gmra.mrb[60].mxu1 %v3763_v4  ;;  %2002 = vmatmul.mubr.bf16.gmra.mrb[60].mxu0 %v3764_v5 }
  0x9f   : > { %1912 = vmatprep.mubr.bf16.mxu1 %v3765_v7  ;;  %2009 = vmatprep.mubr.bf16.mxu0 %v3767_v8 }
  0xa0   : > { %3547 = vmatpush3.bf16.msra.mxu0 %v3827_v6 }
  0xa1   : > { %3548 = vmatprep.subr.bf16.mxu0 %v3840_v9 }
  0xa4   : > { %3549 = vmatpush3.bf16.msra.mxu0 %v3840_v9 }
  0xa6   : > { %1913 = vmatmul.mubr.bf16.gmra.mrb[64].mxu1 %v3769_v10  ;;  %2010 = vmatmul.mubr.bf16.gmra.mrb[64].mxu0 %v3770_v11  ;;  %v3850_v10 = vld [vmem:[%s3951_s5 + $0x258] ss:$36 sps:$4 sm:$0xff]   ;;  %v3851_v11 = vld [vmem:[%s3951_s5 + $0x68] ss:$36 sps:$4 sm:$0xff]  }
  0xa7   : > { %1920 = vmatprep.mubr.bf16.mxu1 %v3774_v12  ;;  %2017 = vmatprep.mubr.bf16.mxu0 %v3776_v13 }
  0xae   : > { %1921 = vmatmul.mubr.bf16.gmra.mrb[68].mxu1 %v3778_v14  ;;  %2018 = vmatmul.mubr.bf16.gmra.mrb[68].mxu0 %v3779_v15 }
  0xaf   : > { %1928 = vmatprep.mubr.bf16.mxu1 %v3780_v16  ;;  %2025 = vmatprep.mubr.bf16.mxu0 %v3782_v17  ;;  %v3852_v16 = vld [vmem:[%s3951_s5 + $0x2a4] ss:$36 sps:$4 sm:$0xff]   ;;  %v3854_v17 = vld [vmem:[%s3951_s5 + $0xb0] ss:$36 sps:$4 sm:$0xff]  }
  0xb6   : > { %1929 = vmatmul.mubr.bf16.gmra.mrb[72].mxu1 %v3784_v18  ;;  %2026 = vmatmul.mubr.bf16.gmra.mrb[72].mxu0 %v3785_v19 }
  0xb7   : > { %1936 = vmatprep.mubr.bf16.mxu1 %v3789_v20  ;;  %2033 = vmatprep.mubr.bf16.mxu0 %v3791_v21 }
  0xbe   : > { %1937 = vmatmul.mubr.bf16.gmra.mrb[76].mxu1 %v3793_v22  ;;  %2034 = vmatmul.mubr.bf16.gmra.mrb[76].mxu0 %v3794_v23 }
  0xbf   : > { %2041 = vmatprep.mubr.bf16.mxu0 %v3795_v24  ;;  %2138 = vmatprep.mubr.bf16.mxu1 %v3799_v25 }
  0xc6   : > { %2042 = vmatmul.mubr.bf16.gmra.mrb[80].mxu0 %v3800_v27  ;;  %2139 = vmatmul.mubr.bf16.vlgmr.msra.gmra.mrb[80].mxu1 %v3797_v26  ;;  %v3855_v26 = vld [vmem:[%s3951_s5 + $0x2a0] ss:$36 sps:$4 sm:$0xff]   ;;  %v3856_v27 = vld [vmem:[%s3951_s5 + $0xf8] ss:$36 sps:$4 sm:$0xff]  }
  0xc7   : > { %2049 = vmatprep.mubr.bf16.mxu0 %v3802_v28  ;;  %2146 = vmatprep.mubr.bf16.mxu1 %v3804_v29 }
  0xce   : > { %2050 = vmatmul.mubr.bf16.gmra.mrb[84].mxu0 %v3806_v30  ;;  %2147 = vmatmul.mubr.bf16.gmra.mrb[84].mxu1 %v3807_v31 }
  0xcf   : > { %2057 = vmatprep.mubr.bf16.mxu0 %v3808_v32  ;;  %2154 = vmatprep.mubr.bf16.mxu1 %v3810_v33  ;;  %v3857_v32 = vld [vmem:[%s3951_s5 + $0x2ec] ss:$36 sps:$4 sm:$0xff]   ;;  %v3859_v33 = vld [vmem:[%s3951_s5 + $0x140] ss:$36 sps:$4 sm:$0xff]  }
  0xd6   : > { %2058 = vmatmul.mubr.bf16.gmra.mrb[88].mxu0 %v3812_v34  ;;  %2155 = vmatmul.mubr.bf16.gmra.mrb[88].mxu1 %v3813_v35 }
  0xd7   : > { %2065 = vmatprep.mubr.bf16.mxu0 %v3815_v36  ;;  %2162 = vmatprep.mubr.bf16.mxu1 %v3817_v37 }
  0xde   : > { %2066 = vmatmul.mubr.bf16.gmra.mrb[92].mxu0 %v3819_v38  ;;  %2163 = vmatmul.mubr.bf16.gmra.mrb[92].mxu1 %v3820_v39 }
  0xdf   : > { %2073 = vmatprep.mubr.bf16.mxu0 %v3821_v40  ;;  %2170 = vmatprep.mubr.bf16.mxu1 %v3823_v41 }
  0xe6   : > { %2074 = vmatmul.mubr.bf16.gmra.mrb[96].mxu0 %v3825_v42  ;;  %2171 = vmatmul.mubr.bf16.gmra.mrb[96].mxu1 %v3826_v43  ;;  %v3860_v42 = vld [vmem:[%s3951_s5 + $0x2e8] ss:$36 sps:$4 sm:$0xff]  }
  0xe7   : > { %2081 = vmatprep.mubr.bf16.mxu0 %v3828_v44  ;;  %2178 = vmatprep.mubr.bf16.mxu1 %v3830_v45  ;;  %v3861_v43 = vld [vmem:[%s3951_s5 + $0x188] ss:$36 sps:$4 sm:$0xff]  }
  0xee   : > { %2082 = vmatmul.mubr.bf16.gmra.mrb[100].mxu0 %v3832_v46  ;;  %2179 = vmatmul.mubr.bf16.gmra.mrb[100].mxu1 %v3833_v47 }
  0xef   : > { %2089 = vmatprep.mubr.bf16.mxu0 %v3834_v48  ;;  %2186 = vmatprep.mubr.bf16.mxu1 %v3836_v49  ;;  %v3862_v48 = vld [vmem:[%s3951_s5 + $0x334] ss:$36 sps:$4 sm:$0xff]  }
  0xf0   : > { %v3864_v49 = vld [vmem:[%s3951_s5 + $0x1d0] ss:$36 sps:$4 sm:$0xff]  }
  0xf6   : > { %2090 = vmatmul.mubr.bf16.gmra.mrb[104].mxu0 %v3838_v50  ;;  %2187 = vmatmul.mubr.bf16.gmra.mrb[104].mxu1 %v3839_v51 }
  0xf7   : > { %2097 = vmatprep.mubr.bf16.mxu0 %v3841_v52  ;;  %2194 = vmatprep.mubr.bf16.mxu1 %v3843_v53 }
  0xf9   : > { %v3150_v54 = vpop.f32.mrb[0].mxu1  ;;  %v3078_v55 = vpop.f32.mrb[0].mxu0 }
  0xfa   : > { %v3151_v56 = vpop.f32.mrb[1].mxu1  ;;  %v3079_v57 = vpop.f32.mrb[1].mxu0 }
  0xfb   : > { %v4254_v60 = vadd.f32 %v3151_v56, %v3150_v54  ;;  %v3153_v61 = vpop.f32.mrb[2].mxu1  ;;  %v4256_v62 = vadd.f32 %v3079_v57, %v3078_v55  ;;  %v3081_v63 = vpop.f32.mrb[2].mxu0 }
  0xfc   : > { %v3154_v2 = vpop.f32.mrb[3].mxu1  ;;  %v3082_v3 = vpop.f32.mrb[3].mxu0 }
  0xfd   : > { %v4260_v4 = vadd.f32 %v3154_v2, %v3153_v61  ;;  %v4262_v5 = vadd.f32 %v3082_v3, %v3081_v63  ;;  %v3867_v2 = vld [vmem:[%s3951_s5 + $0x37c] ss:$36 sps:$4 sm:$0xff]  }
  0xfe   : > { %2098 = vmatmul.mubr.bf16.gmra.mrb[108].mxu0 %v3845_v58  ;;  %2195 = vmatmul.mubr.bf16.gmra.mrb[108].mxu1 %v3846_v59  ;;  %v3865_v58 = vld [vmem:[%s3951_s5 + $0x330] ss:$36 sps:$4 sm:$0xff]   ;;  %v3866_v59 = vld [vmem:[%s3951_s5 + $0x218] ss:$36 sps:$4 sm:$0xff]   ;;  %v3869_v3 = vld [vmem:[%s3951_s5 + $0x260] ss:$36 sps:$4 sm:$0xff]  }
  0xff   : > { %2202 = vmatprep.mubr.bf16.mxu1 %v3847_v0  ;;  %3550 = vmatprep.mubr.bf16.mxu0 %v3849_v1 }
 0x101   : > { %v3156_v6 = vpop.f32.mrb[4].mxu1  ;;  %v3084_v7 = vpop.f32.mrb[4].mxu0 }
 0x102   : > { %v3157_v8 = vpop.f32.mrb[5].mxu1  ;;  %v3085_v9 = vpop.f32.mrb[5].mxu0 }
 0x103   : > { %v4266_v12 = vadd.f32 %v3157_v8, %v3156_v6  ;;  %v3159_v13 = vpop.f32.mrb[6].mxu1  ;;  %v4268_v14 = vadd.f32 %v3085_v9, %v3084_v7  ;;  %v3087_v15 = vpop.f32.mrb[6].mxu0 }
 0x104   : > { %v3160_v18 = vpop.f32.mrb[7].mxu1  ;;  %v3088_v19 = vpop.f32.mrb[7].mxu0 }
 0x105   : > { %v4272_v20 = vadd.f32 %v3160_v18, %v3159_v13  ;;  %v4274_v21 = vadd.f32 %v3088_v19, %v3087_v15  ;;  %v3870_v18 = vld [vmem:[%s3951_s5 + $0x378] ss:$36 sps:$4 sm:$0xff]   ;;  %v3871_v19 = vld [vmem:[%s3951_s5 + $0x2a8] ss:$36 sps:$4 sm:$0xff]  }
 0x106   : > { %2203 = vmatmul.mubr.bf16.gmra.mrb[112].mxu1 %v3850_v10  ;;  %3551 = vmatmul.mubr.bf16.vlgmr.msra.gmra.mrb[112].mxu0 %v3851_v11 }
 0x107   : > { %2210 = vmatprep.mubr.bf16.mxu1 %v3852_v16  ;;  %3554 = vmatprep.mubr.bf16.mxu0 %v3854_v17 }
 0x109   : > { %v3162_v22 = vpop.f32.mrb[8].mxu1  ;;  %v3090_v23 = vpop.f32.mrb[8].mxu0 }
 0x10a   : > { %v3163_v24 = vpop.f32.mrb[9].mxu1  ;;  %v3091_v25 = vpop.f32.mrb[9].mxu0 }
 0x10b   : > { %v4278_v28 = vadd.f32 %v3163_v24, %v3162_v22  ;;  %v3165_v29 = vpop.f32.mrb[10].mxu1  ;;  %v4280_v30 = vadd.f32 %v3091_v25, %v3090_v23  ;;  %v3093_v31 = vpop.f32.mrb[10].mxu0  ;;  %v3872_v25 = vld [vmem:[%s3951_s5 + $0x3c4] ss:$36 sps:$4 sm:$0xff]  }
 0x10c   : > { %v3166_v34 = vpop.f32.mrb[11].mxu1  ;;  %v3094_v35 = vpop.f32.mrb[11].mxu0 }
 0x10d   : > { %v4284_v36 = vadd.f32 %v3166_v34, %v3165_v29  ;;  %v4286_v37 = vadd.f32 %v3094_v35, %v3093_v31 }
 0x10e   : > { %2211 = vmatmul.mubr.bf16.gmra.mrb[116].mxu1 %v3855_v26  ;;  %3555 = vmatmul.mubr.bf16.gmra.mrb[116].mxu0 %v3856_v27  ;;  %v3874_v26 = vld [vmem:[%s3951_s5 + $0x2f0] ss:$36 sps:$4 sm:$0xff]  }
 0x10f   : > { %2218 = vmatprep.mubr.bf16.mxu1 %v3857_v32  ;;  %3558 = vmatprep.mubr.bf16.mxu0 %v3859_v33 }
 0x111   : > { %v3168_v38 = vpop.f32.mrb[12].mxu1  ;;  %v3096_v39 = vpop.f32.mrb[12].mxu0 }
 0x112   : > { %v3169_v40 = vpop.f32.mrb[13].mxu1  ;;  %v3097_v41 = vpop.f32.mrb[13].mxu0 }
 0x113   : > { %v4290_v44 = vadd.f32 %v3169_v40, %v3168_v38  ;;  %v3171_v45 = vpop.f32.mrb[14].mxu1  ;;  %v4292_v46 = vadd.f32 %v3097_v41, %v3096_v39  ;;  %v3099_v47 = vpop.f32.mrb[14].mxu0  ;;  %v3875_v40 = vld [vmem:[%s3951_s5 + $0x3c0] ss:$36 sps:$4 sm:$0xff]   ;;  %v3876_v41 = vld [vmem:[%s3951_s5 + $0x338] ss:$36 sps:$4 sm:$0xff]  }
 0x114   : > { %v3172_v50 = vpop.f32.mrb[15].mxu1  ;;  %v3100_v51 = vpop.f32.mrb[15].mxu0 }
 0x115   : > { %v4296_v52 = vadd.f32 %v3172_v50, %v3171_v45  ;;  %v4298_v53 = vadd.f32 %v3100_v51, %v3099_v47  ;;  %v3877_v47 = vld [vmem:[%s3951_s5 + $0x40c] ss:$36 sps:$4 sm:$0xff]  }
 0x116   : > { %2219 = vmatmul.mubr.bf16.gmra.mrb[120].mxu1 %v3860_v42  ;;  %3559 = vmatmul.mubr.bf16.gmra.mrb[120].mxu0 %v3861_v43 }
 0x117   : > { %2226 = vmatprep.mubr.bf16.mxu1 %v3862_v48  ;;  %3562 = vmatprep.mubr.bf16.mxu0 %v3864_v49  ;;  %v3879_v48 = vld [vmem:[%s3951_s5 + $0x380] ss:$36 sps:$4 sm:$0xff]  }
 0x119   : > { %v3190_v54 = vpop.f32.mrb[16].mxu1  ;;  %v3102_v55 = vpop.f32.mrb[16].mxu0 }
 0x11a   : > { %v3191_v56 = vpop.f32.mrb[17].mxu1  ;;  %v3103_v57 = vpop.f32.mrb[17].mxu0 }
 0x11b   : > { %v3192_v61 = vadd.f32 %v3191_v56, %v3190_v54  ;;  %v3193_v63 = vpop.f32.mrb[18].mxu1  ;;  %v4302_v0 = vadd.f32 %v3103_v57, %v3102_v55  ;;  %v3105_v1 = vpop.f32.mrb[18].mxu0 }
 0x11c   : > { %v3194_v6 = vpop.f32.mrb[19].mxu1  ;;  %v3106_v7 = vpop.f32.mrb[19].mxu0 }
 0x11d   : > { %v4307_v8 = vadd.f32 %v3192_v61, %v4256_v62  ;;  %v3195_v9 = vadd.f32 %v3194_v6, %v3193_v63  ;;  %v4309_v10 = vadd.f32 %v3106_v7, %v3105_v1  ;;  %v3880_v61 = vld [vmem:[%s3951_s5 + $0x408] ss:$36 sps:$4 sm:$0xff]   ;;  %v3882_v6 = vld [vmem:[%s3951_s5 + $0x454] ss:$36 sps:$4 sm:$0xff]  }
 0x11e   : > { %2227 = vmatmul.mubr.bf16.gmra.mrb[124].mxu1 %v3865_v58  ;;  %3563 = vmatmul.mubr.bf16.gmra.mrb[124].mxu0 %v3866_v59  ;;  %v3881_v63 = vld [vmem:[%s3951_s5 + $0x3c8] ss:$36 sps:$4 sm:$0xff]   ;;  %v3884_v7 = vld [vmem:[%s3951_s5 + $0x410] ss:$36 sps:$4 sm:$0xff]  }
 0x11f   : > { %v4312_v11 = vadd.f32 %v3195_v9, %v4262_v5  ;;  %2234 = vmatprep.mubr.bf16.mxu1 %v3867_v2  ;;  %3566 = vmatprep.mubr.bf16.mxu0 %v3869_v3 }
 0x121   : > { %v3196_v13 = vpop.f32.mrb[20].mxu1  ;;  %v3108_v15 = vpop.f32.mrb[20].mxu0 }
 0x122   : > { %v3197_v16 = vpop.f32.mrb[21].mxu1  ;;  %v3109_v17 = vpop.f32.mrb[21].mxu0 }
 0x123   : > { %v3198_v62 = vadd.f32 %v3197_v16, %v3196_v13  ;;  %v3199_v22 = vpop.f32.mrb[22].mxu1  ;;  %v4316_v23 = vadd.f32 %v3109_v17, %v3108_v15  ;;  %v3111_v24 = vpop.f32.mrb[22].mxu0 }
 0x124   : > { %v3200_v27 = vpop.f32.mrb[23].mxu1  ;;  %v3112_v5 = vpop.f32.mrb[23].mxu0 }
 0x125   : > { %v4321_v29 = vadd.f32 %v3198_v62, %v4268_v14  ;;  %v3201_v31 = vadd.f32 %v3200_v27, %v3199_v22  ;;  %v4323_v32 = vadd.f32 %v3112_v5, %v3111_v24  ;;  %v3885_v24 = vld [vmem:[%s3951_s5 + $0x450] ss:$36 sps:$4 sm:$0xff]  }
 0x126   : > { %2235 = vmatmul.mubr.bf16.gmra.mrb[128].mxu1 %v3870_v18  ;;  %3567 = vmatmul.mubr.bf16.gmra.mrb[128].mxu0 %v3871_v19 }
 0x127   : > { %v4326_v33 = vadd.f32 %v3201_v31, %v4274_v21  ;;  %2242 = vmatprep.mubr.bf16.mxu1 %v3872_v25  ;;  %3570 = vmatprep.mubr.bf16.mxu0 %v3874_v26  ;;  %v3886_v25 = vld [vmem:[%s3951_s5 + $0x458] ss:$36 sps:$4 sm:$0xff]   ;;  %s2684_s5 = sshll.u32 %s4648_s13, 2 }
 0x128   : > { %s4586_s10 = scalar_lea.vmem %s4646_s2, %s2684_s5 }
 0x129   : > { %v3202_v34 = vpop.f32.mrb[24].mxu1  ;;  %v3114_v35 = vpop.f32.mrb[24].mxu0 }
 0x12a   : > { %v3203_v38 = vpop.f32.mrb[25].mxu1  ;;  %v3115_v39 = vpop.f32.mrb[25].mxu0 }
 0x12b   : > { %v3204_v14 = vadd.f32 %v3203_v38, %v3202_v34  ;;  %v3205_v42 = vpop.f32.mrb[26].mxu1  ;;  %v4330_v43 = vadd.f32 %v3115_v39, %v3114_v35  ;;  %v3117_v45 = vpop.f32.mrb[26].mxu0 }
 0x12c   : > { %v3206_v49 = vpop.f32.mrb[27].mxu1  ;;  %v3118_v21 = vpop.f32.mrb[27].mxu0 }
 0x12d   : > { %v4335_v50 = vadd.f32 %v3204_v14, %v4280_v30  ;;  %v3207_v51 = vadd.f32 %v3206_v49, %v3205_v42  ;;  %v4337_v54 = vadd.f32 %v3118_v21, %v3117_v45 }
 0x12e   : > { %2243 = vmatmul.mubr.bf16.gmra.mrb[132].mxu1 %v3875_v40  ;;  %3571 = vmatmul.mubr.bf16.gmra.mrb[132].mxu0 %v3876_v41 }
 0x12f   : > { %v4340_v55 = vadd.f32 %v3207_v51, %v4286_v37  ;;  %2250 = vmatprep.mubr.bf16.mxu1 %v3877_v47  ;;  %3574 = vmatprep.mubr.bf16.mxu0 %v3879_v48 }
 0x131   : > { %v3208_v56 = vpop.f32.mrb[28].mxu1  ;;  %v3120_v57 = vpop.f32.mrb[28].mxu0 }
 0x132   : > { %v3209_v58 = vpop.f32.mrb[29].mxu1  ;;  %v3121_v59 = vpop.f32.mrb[29].mxu0 }
 0x133   : > { %v3210_v30 = vadd.f32 %v3209_v58, %v3208_v56  ;;  %v3211_v1 = vpop.f32.mrb[30].mxu1  ;;  %v4344_v2 = vadd.f32 %v3121_v59, %v3120_v57  ;;  %v3123_v3 = vpop.f32.mrb[30].mxu0 }
 0x134   : > { %v3212_v9 = vpop.f32.mrb[31].mxu1  ;;  %v3124_v37 = vpop.f32.mrb[31].mxu0 }
 0x135   : > { %v4349_v13 = vadd.f32 %v3210_v30, %v4292_v46  ;;  %v3213_v15 = vadd.f32 %v3212_v9, %v3211_v1  ;;  %v4351_v16 = vadd.f32 %v3124_v37, %v3123_v3 }
 0x136   : > { %2251 = vmatmul.mubr.bf16.gmra.mrb[136].mxu1 %v3880_v61  ;;  %3575 = vmatmul.mubr.bf16.gmra.mrb[136].mxu0 %v3881_v63 }
 0x137   : > { %v4354_v17 = vadd.f32 %v3213_v15, %v4298_v53  ;;  %2258 = vmatprep.mubr.bf16.mxu1 %v3882_v6  ;;  %3578 = vmatprep.mubr.bf16.mxu0 %v3884_v7 }
 0x139   : > { %v3214_v18 = vpop.f32.mrb[32].mxu1  ;;  %v3126_v19 = vpop.f32.mrb[32].mxu0 }
 0x13a   : > { %v3215_v62 = vpop.f32.mrb[33].mxu1  ;;  %v3127_v22 = vpop.f32.mrb[33].mxu0 }
 0x13b   : > { %v3216_v26 = vadd.f32 %v3215_v62, %v3214_v18  ;;  %v3217_v27 = vpop.f32.mrb[34].mxu1  ;;  %v3128_v46 = vadd.f32 %v3127_v22, %v3126_v19  ;;  %v3129_v5 = vpop.f32.mrb[34].mxu0 }
 0x13c   : > { %v3218_v31 = vpop.f32.mrb[35].mxu1  ;;  %v3130_v34 = vpop.f32.mrb[35].mxu0 }
 0x13d   : > { %v4359_v35 = vadd.f32 %v3216_v26, %v4302_v0  ;;  %v3219_v38 = vadd.f32 %v3218_v31, %v3217_v27  ;;  %v3131_v53 = vadd.f32 %v3130_v34, %v3129_v5 }
 0x13e   : > { %2259 = vmatmul.mubr.bf16.gmra.mrb[140].mxu1 %v3885_v24  ;;  %3579 = vmatmul.mubr.bf16.gmra.mrb[140].mxu0 %v3886_v25 }
 0x13f   : > { %v4362_v39 = vadd.f32 %v3219_v38, %v4309_v10 }
 0x141   : > { %v3220_v40 = vpop.f32.mrb[36].mxu1  ;;  %v3132_v41 = vpop.f32.mrb[36].mxu0 }
 0x142   : > { %v3221_v14 = vpop.f32.mrb[37].mxu1  ;;  %v3133_v42 = vpop.f32.mrb[37].mxu0 }
 0x143   : > { %v3222_v45 = vadd.f32 %v3221_v14, %v3220_v40  ;;  %v3223_v47 = vpop.f32.mrb[38].mxu1  ;;  %v3134_v48 = vadd.f32 %v3133_v42, %v3132_v41  ;;  %v3135_v49 = vpop.f32.mrb[38].mxu0 }
 0x144   : > { %v3224_v21 = vpop.f32.mrb[39].mxu1  ;;  %v3136_v51 = vpop.f32.mrb[39].mxu0 }
 0x145   : > { %v4365_v0 = vadd.f32 %v3222_v45, %v4316_v23  ;;  %v3225_v56 = vadd.f32 %v3224_v21, %v3223_v47  ;;  %v3137_v57 = vadd.f32 %v3136_v51, %v3135_v49 }
 0x147   : > { %v4368_v58 = vadd.f32 %v3225_v56, %v4323_v32 }
 0x149   : > { %v3226_v10 = vpop.f32.mrb[40].mxu1  ;;  %v3138_v59 = vpop.f32.mrb[40].mxu0 }
 0x14a   : > { %v3227_v61 = vpop.f32.mrb[41].mxu1  ;;  %v3139_v63 = vpop.f32.mrb[41].mxu0 }
 0x14b   : > { %v3228_v30 = vadd.f32 %v3227_v61, %v3226_v10  ;;  %v3229_v1 = vpop.f32.mrb[42].mxu1  ;;  %v4370_v3 = vadd.f32 %v3139_v63, %v3138_v59  ;;  %v3141_v6 = vpop.f32.mrb[42].mxu0 }
 0x14c   : > { %v3230_v7 = vpop.f32.mrb[43].mxu1  ;;  %v3142_v9 = vpop.f32.mrb[43].mxu0 }
 0x14d   : > { %v4373_v37 = vadd.f32 %v3228_v30, %v4330_v43  ;;  %v3231_v23 = vadd.f32 %v3230_v7, %v3229_v1  ;;  %v3143_v15 = vadd.f32 %v3142_v9, %v3141_v6 }
 0x14f   : > { %v4376_v18 = vadd.f32 %v3231_v23, %v4337_v54 }
 0x151   : > { %v3232_v32 = vpop.f32.mrb[44].mxu1  ;;  %v3144_v19 = vpop.f32.mrb[44].mxu0 }
 0x152   : > { %v3233_v62 = vpop.f32.mrb[45].mxu1  ;;  %v3145_v22 = vpop.f32.mrb[45].mxu0 }
 0x153   : > { %v3234_v24 = vadd.f32 %v3233_v62, %v3232_v32  ;;  %v3235_v25 = vpop.f32.mrb[46].mxu1  ;;  %v4378_v26 = vadd.f32 %v3145_v22, %v3144_v19  ;;  %v3147_v27 = vpop.f32.mrb[46].mxu0 }
 0x154   : > { %v3236_v5 = vpop.f32.mrb[47].mxu1  ;;  %v3148_v31 = vpop.f32.mrb[47].mxu0 }
 0x155   : > { %v4381_v34 = vadd.f32 %v3234_v24, %v4344_v2  ;;  %v3237_v43 = vadd.f32 %v3236_v5, %v3235_v25  ;;  %v4383_v38 = vadd.f32 %v3148_v31, %v3147_v27 }
 0x157   : > { %v4386_v54 = vadd.f32 %v3237_v43, %v4351_v16 }
 0x159   : > { %v3238_v40 = vpop.f32.mrb[48].mxu1  ;;  %v3302_v41 = vpop.f32.mrb[48].mxu0 }
 0x15a   : > { %v3239_v14 = vpop.f32.mrb[49].mxu1  ;;  %v3303_v42 = vpop.f32.mrb[49].mxu0 }
 0x15b   : > { %v3240_v45 = vadd.f32 %v3239_v14, %v3238_v40  ;;  %v3304_v47 = vadd.f32 %v3303_v42, %v3302_v41  ;;  %v3241_v49 = vpop.f32.mrb[50].mxu1  ;;  %v3305_v21 = vpop.f32.mrb[50].mxu0 }
 0x15c   : > { %v3242_v51 = vpop.f32.mrb[51].mxu1  ;;  %v3306_v56 = vpop.f32.mrb[51].mxu0 }
 0x15d   : > { %v4388_v10 = vadd.f32 %v3240_v45, %v3128_v46  ;;  %v4391_v2 = vadd.f32 %v3304_v47, %v4307_v8  ;;  %v3243_v59 = vadd.f32 %v3242_v51, %v3241_v49  ;;  %v3307_v61 = vadd.f32 %v3306_v56, %v3305_v21 }
 0x15f   : > { %v4393_v63 = vadd.f32 %v3243_v59, %v3131_v53  ;;  %v4396_v16 = vadd.f32 %v3307_v61, %v4312_v11 }
 0x161   : > { %v3244_v30 = vpop.f32.mrb[52].mxu1  ;;  %v3308_v1 = vpop.f32.mrb[52].mxu0 }
 0x162   : > { %v3245_v6 = vpop.f32.mrb[53].mxu1  ;;  %v3309_v7 = vpop.f32.mrb[53].mxu0 }
 0x163   : > { %v3246_v9 = vadd.f32 %v3245_v6, %v3244_v30  ;;  %v3310_v23 = vadd.f32 %v3309_v7, %v3308_v1  ;;  %v3247_v32 = vpop.f32.mrb[54].mxu1  ;;  %v3311_v19 = vpop.f32.mrb[54].mxu0 }
 0x164   : > { %v3248_v46 = vpop.f32.mrb[55].mxu1  ;;  %v3312_v62 = vpop.f32.mrb[55].mxu0 }
 0x165   : > { %v4398_v22 = vadd.f32 %v3246_v9, %v3134_v48  ;;  %v4401_v8 = vadd.f32 %v3310_v23, %v4321_v29  ;;  %v3249_v53 = vadd.f32 %v3248_v46, %v3247_v32  ;;  %v3313_v24 = vadd.f32 %v3312_v62, %v3311_v19 }
 0x167   : > { %v4403_v25 = vadd.f32 %v3249_v53, %v3137_v57  ;;  %v4406_v11 = vadd.f32 %v3313_v24, %v4326_v33 }
 0x169   : > { %v3250_v27 = vpop.f32.mrb[56].mxu1  ;;  %v3314_v5 = vpop.f32.mrb[56].mxu0 }
 0x16a   : > { %v3251_v31 = vpop.f32.mrb[57].mxu1  ;;  %v3315_v43 = vpop.f32.mrb[57].mxu0 }
 0x16b   : > { %v3252_v40 = vadd.f32 %v3251_v31, %v3250_v27  ;;  %v3316_v41 = vadd.f32 %v3315_v43, %v3314_v5  ;;  %v3253_v14 = vpop.f32.mrb[58].mxu1  ;;  %v3317_v42 = vpop.f32.mrb[58].mxu0 }
 0x16c   : > { %v3254_v48 = vpop.f32.mrb[59].mxu1  ;;  %v3318_v45 = vpop.f32.mrb[59].mxu0 }
 0x16d   : > { %v4409_v29 = vadd.f32 %v3252_v40, %v4370_v3  ;;  %v4412_v47 = vadd.f32 %v3316_v41, %v4335_v50  ;;  %v3255_v57 = vadd.f32 %v3254_v48, %v3253_v14  ;;  %v3319_v49 = vadd.f32 %v3318_v45, %v3317_v42 }
 0x16f   : > { %v4414_v33 = vadd.f32 %v3255_v57, %v3143_v15  ;;  %v4417_v21 = vadd.f32 %v3319_v49, %v4340_v55 }
 0x171   : > { %v3256_v51 = vpop.f32.mrb[60].mxu1  ;;  %v3320_v56 = vpop.f32.mrb[60].mxu0 }
 0x172   : > { %v3257_v59 = vpop.f32.mrb[61].mxu1  ;;  %v3321_v61 = vpop.f32.mrb[61].mxu0 }
 0x173   : > { %v3258_v30 = vadd.f32 %v3257_v59, %v3256_v51  ;;  %v3322_v1 = vadd.f32 %v3321_v61, %v3320_v56  ;;  %v3259_v6 = vpop.f32.mrb[62].mxu1  ;;  %v3323_v7 = vpop.f32.mrb[62].mxu0 }
 0x174   : > { %v3260_v3 = vpop.f32.mrb[63].mxu1  ;;  %v3324_v9 = vpop.f32.mrb[63].mxu0 }
 0x175   : > { %v4420_v50 = vadd.f32 %v3258_v30, %v4378_v26  ;;  %v4423_v23 = vadd.f32 %v3322_v1, %v4349_v13  ;;  %v3261_v15 = vadd.f32 %v3260_v3, %v3259_v6  ;;  %v3325_v32 = vadd.f32 %v3324_v9, %v3323_v7 }
 0x177   : > { %v4426_v55 = vadd.f32 %v3261_v15, %v4383_v38  ;;  %v4429_v19 = vadd.f32 %v3325_v32, %v4354_v17 }
 0x179   : > { %v3262_v46 = vpop.f32.mrb[64].mxu1  ;;  %v3326_v62 = vpop.f32.mrb[64].mxu0 }
 0x17a   : > { %v3263_v53 = vpop.f32.mrb[65].mxu1  ;;  %v3327_v24 = vpop.f32.mrb[65].mxu0 }
 0x17b   : > { %v3264_v27 = vadd.f32 %v3263_v53, %v3262_v46  ;;  %v3328_v5 = vadd.f32 %v3327_v24, %v3326_v62  ;;  %v3265_v31 = vpop.f32.mrb[66].mxu1  ;;  %v3329_v26 = vpop.f32.mrb[66].mxu0 }
 0x17c   : > { %v3266_v43 = vpop.f32.mrb[67].mxu1  ;;  %v3330_v40 = vpop.f32.mrb[67].mxu0 }
 0x17d   : > { %v4432_v13 = vadd.f32 %v3264_v27, %v4254_v60  ;;  %v4435_v41 = vadd.f32 %v3328_v5, %v4359_v35  ;;  %v3267_v38 = vadd.f32 %v3266_v43, %v3265_v31  ;;  %v3331_v14 = vadd.f32 %v3330_v40, %v3329_v26 }
 0x17f   : > { %v4438_v17 = vadd.f32 %v3267_v38, %v4260_v4  ;;  %v4441_v42 = vadd.f32 %v3331_v14, %v4362_v39 }
 0x181   : > { %v3268_v48 = vpop.f32.mrb[68].mxu1  ;;  %v3332_v45 = vpop.f32.mrb[68].mxu0 }
 0x182   : > { %v3269_v57 = vpop.f32.mrb[69].mxu1  ;;  %v3333_v49 = vpop.f32.mrb[69].mxu0 }
 0x183   : > { %v3270_v51 = vadd.f32 %v3269_v57, %v3268_v48  ;;  %v3334_v56 = vadd.f32 %v3333_v49, %v3332_v45  ;;  %v3271_v59 = vpop.f32.mrb[70].mxu1  ;;  %v3335_v60 = vpop.f32.mrb[70].mxu0 }
 0x184   : > { %v3272_v61 = vpop.f32.mrb[71].mxu1  ;;  %v3336_v30 = vpop.f32.mrb[71].mxu0 }
 0x185   : > { %v4444_v35 = vadd.f32 %v3270_v51, %v4266_v12  ;;  %v4447_v1 = vadd.f32 %v3334_v56, %v4365_v0  ;;  %v3273_v4 = vadd.f32 %v3272_v61, %v3271_v59  ;;  %v3337_v6 = vadd.f32 %v3336_v30, %v3335_v60 }
 0x187   : > { %v4450_v39 = vadd.f32 %v3273_v4, %v4272_v20  ;;  %v4453_v7 = vadd.f32 %v3337_v6, %v4368_v58 }
 0x189   : > { %v3274_v3 = vpop.f32.mrb[72].mxu1  ;;  %v3338_v9 = vpop.f32.mrb[72].mxu0 }
 0x18a   : > { %v3275_v15 = vpop.f32.mrb[73].mxu1  ;;  %v3339_v32 = vpop.f32.mrb[73].mxu0 }
 0x18b   : > { %v3276_v46 = vadd.f32 %v3275_v15, %v3274_v3  ;;  %v3340_v62 = vadd.f32 %v3339_v32, %v3338_v9  ;;  %v3277_v53 = vpop.f32.mrb[74].mxu1  ;;  %v3341_v12 = vpop.f32.mrb[74].mxu0 }
 0x18c   : > { %v3278_v24 = vpop.f32.mrb[75].mxu1  ;;  %v3342_v27 = vpop.f32.mrb[75].mxu0 }
 0x18d   : > { %v4456_v0 = vadd.f32 %v3276_v46, %v4278_v28  ;;  %v4459_v5 = vadd.f32 %v3340_v62, %v4373_v37  ;;  %v3279_v20 = vadd.f32 %v3278_v24, %v3277_v53  ;;  %v3343_v31 = vadd.f32 %v3342_v27, %v3341_v12 }
 0x18f   : > { %v4462_v58 = vadd.f32 %v3279_v20, %v4284_v36  ;;  %v4465_v26 = vadd.f32 %v3343_v31, %v4376_v18 }
 0x191   : > { %v3280_v43 = vpop.f32.mrb[76].mxu1  ;;  %v3344_v40 = vpop.f32.mrb[76].mxu0 }
 0x192   : > { %v3281_v38 = vpop.f32.mrb[77].mxu1  ;;  %v3345_v14 = vpop.f32.mrb[77].mxu0 }
 0x193   : > { %v3282_v48 = vadd.f32 %v3281_v38, %v3280_v43  ;;  %v3346_v45 = vadd.f32 %v3345_v14, %v3344_v40  ;;  %v3283_v57 = vpop.f32.mrb[78].mxu1  ;;  %v3347_v28 = vpop.f32.mrb[78].mxu0 }
 0x194   : > { %v3284_v49 = vpop.f32.mrb[79].mxu1  ;;  %v3348_v51 = vpop.f32.mrb[79].mxu0 }
 0x195   : > { %v4468_v37 = vadd.f32 %v3282_v48, %v4290_v44  ;;  %v4471_v56 = vadd.f32 %v3346_v45, %v4381_v34  ;;  %v3285_v36 = vadd.f32 %v3284_v49, %v3283_v57  ;;  %v3349_v59 = vadd.f32 %v3348_v51, %v3347_v28 }
 0x197   : > { %v4474_v18 = vadd.f32 %v3285_v36, %v4296_v52  ;;  %v4477_v60 = vadd.f32 %v3349_v59, %v4386_v54 }
 0x199   : > { %v3350_v61 = vpop.f32.mrb[80].mxu0  ;;  %v3414_v30 = vpop.f32.mrb[80].mxu1 }
 0x19a   : > { %v3351_v4 = vpop.f32.mrb[81].mxu0  ;;  %v3415_v6 = vpop.f32.mrb[81].mxu1 }
 0x19b   : > { %v3352_v3 = vadd.f32 %v3351_v4, %v3350_v61  ;;  %v3416_v9 = vadd.f32 %v3415_v6, %v3414_v30  ;;  %v3353_v15 = vpop.f32.mrb[82].mxu0  ;;  %v3417_v44 = vpop.f32.mrb[82].mxu1 }
 0x19c   : > { %v3354_v32 = vpop.f32.mrb[83].mxu0  ;;  %v3418_v46 = vpop.f32.mrb[83].mxu1 }
 0x19d   : > { %v4480_v34 = vadd.f32 %v3352_v3, %v4388_v10  ;;  %v3355_v62 = vadd.f32 %v3354_v32, %v3353_v15  ;;  %v3419_v53 = vadd.f32 %v3418_v46, %v3417_v44  ;;  %v4483_v52 = vadd.f32 %v3416_v9, %v4391_v2 }
 0x19f   : > { %v4486_v54 = vadd.f32 %v3355_v62, %v4393_v63  ;;  %v4489_v12 = vadd.f32 %v3419_v53, %v4396_v16 }
 0x1a1   : > { %v3356_v24 = vpop.f32.mrb[84].mxu0  ;;  %v3420_v27 = vpop.f32.mrb[84].mxu1 }
 0x1a2   : > { %v3357_v20 = vpop.f32.mrb[85].mxu0  ;;  %v3421_v31 = vpop.f32.mrb[85].mxu1 }
 0x1a3   : > { %v3358_v43 = vadd.f32 %v3357_v20, %v3356_v24  ;;  %v3422_v40 = vadd.f32 %v3421_v31, %v3420_v27  ;;  %v3359_v38 = vpop.f32.mrb[86].mxu0  ;;  %v3423_v10 = vpop.f32.mrb[86].mxu1 }
 0x1a4   : > { %v3360_v14 = vpop.f32.mrb[87].mxu0  ;;  %v3424_v48 = vpop.f32.mrb[87].mxu1 }
 0x1a5   : > { %v4492_v45 = vadd.f32 %v3358_v43, %v4398_v22  ;;  %v3361_v2 = vadd.f32 %v3360_v14, %v3359_v38  ;;  %v3425_v57 = vadd.f32 %v3424_v48, %v3423_v10  ;;  %v4495_v63 = vadd.f32 %v3422_v40, %v4401_v8 }
 0x1a7   : > { %v4498_v16 = vadd.f32 %v3361_v2, %v4403_v25  ;;  %v4501_v28 = vadd.f32 %v3425_v57, %v4406_v11 }
 0x1a9   : > { %v3362_v49 = vpop.f32.mrb[88].mxu0  ;;  %v3426_v51 = vpop.f32.mrb[88].mxu1 }
 0x1aa   : > { %v3363_v36 = vpop.f32.mrb[89].mxu0  ;;  %v3427_v59 = vpop.f32.mrb[89].mxu1 }
 0x1ab   : > { %v3364_v61 = vadd.f32 %v3363_v36, %v3362_v49  ;;  %v3428_v30 = vadd.f32 %v3427_v59, %v3426_v51  ;;  %v3365_v4 = vpop.f32.mrb[90].mxu0  ;;  %v3429_v22 = vpop.f32.mrb[90].mxu1 }
 0x1ac   : > { %v3366_v6 = vpop.f32.mrb[91].mxu0  ;;  %v3430_v3 = vpop.f32.mrb[91].mxu1 }
 0x1ad   : > { %v4504_v9 = vadd.f32 %v3364_v61, %v4409_v29  ;;  %v3367_v8 = vadd.f32 %v3366_v6, %v3365_v4  ;;  %v3431_v15 = vadd.f32 %v3430_v3, %v3429_v22  ;;  %v4507_v25 = vadd.f32 %v3428_v30, %v4412_v47 }
 0x1af   : > { %v4510_v11 = vadd.f32 %v3367_v8, %v4414_v33  ;;  %v4513_v44 = vadd.f32 %v3431_v15, %v4417_v21 }
 0x1b1   : > { %v3368_v32 = vpop.f32.mrb[92].mxu0  ;;  %v3432_v46 = vpop.f32.mrb[92].mxu1 }
 0x1b2   : > { %v3369_v62 = vpop.f32.mrb[93].mxu0  ;;  %v3433_v53 = vpop.f32.mrb[93].mxu1 }
 0x1b3   : > { %v3370_v24 = vadd.f32 %v3369_v62, %v3368_v32  ;;  %v3434_v27 = vadd.f32 %v3433_v53, %v3432_v46  ;;  %v3371_v20 = vpop.f32.mrb[94].mxu0  ;;  %v3435_v29 = vpop.f32.mrb[94].mxu1 }
 0x1b4   : > { %v3372_v31 = vpop.f32.mrb[95].mxu0  ;;  %v3436_v43 = vpop.f32.mrb[95].mxu1 }
 0x1b5   : > { %v4516_v40 = vadd.f32 %v3370_v24, %v4420_v50  ;;  %v3373_v47 = vadd.f32 %v3372_v31, %v3371_v20  ;;  %v3437_v38 = vadd.f32 %v3436_v43, %v3435_v29  ;;  %v4519_v33 = vadd.f32 %v3434_v27, %v4423_v23 }
 0x1b7   : > { %v4522_v21 = vadd.f32 %v3373_v47, %v4426_v55  ;;  %v4525_v10 = vadd.f32 %v3437_v38, %v4429_v19 }
 0x1b9   : > { %v3374_v14 = vpop.f32.mrb[96].mxu0  ;;  %v3438_v48 = vpop.f32.mrb[96].mxu1 }
 0x1ba   : > { %v3375_v2 = vpop.f32.mrb[97].mxu0  ;;  %v3439_v57 = vpop.f32.mrb[97].mxu1 }
 0x1bb   : > { %v3376_v49 = vadd.f32 %v3375_v2, %v3374_v14  ;;  %v3440_v51 = vadd.f32 %v3439_v57, %v3438_v48  ;;  %v3377_v36 = vpop.f32.mrb[98].mxu0  ;;  %v3441_v50 = vpop.f32.mrb[98].mxu1 }
 0x1bc   : > { %v3378_v59 = vpop.f32.mrb[99].mxu0  ;;  %v3442_v61 = vpop.f32.mrb[99].mxu1 }
 0x1bd   : > { %v4528_v30 = vadd.f32 %v3376_v49, %v4432_v13  ;;  %v3379_v23 = vadd.f32 %v3378_v59, %v3377_v36  ;;  %v3443_v4 = vadd.f32 %v3442_v61, %v3441_v50  ;;  %v4531_v55 = vadd.f32 %v3440_v51, %v4435_v41 }
 0x1bf   : > { %v4534_v19 = vadd.f32 %v3379_v23, %v4438_v17  ;;  %v4537_v22 = vadd.f32 %v3443_v4, %v4441_v42 }
 0x1c1   : > { %v3380_v6 = vpop.f32.mrb[100].mxu0  ;;  %v3444_v3 = vpop.f32.mrb[100].mxu1 }
 0x1c2   : > { %v3381_v8 = vpop.f32.mrb[101].mxu0  ;;  %v3445_v15 = vpop.f32.mrb[101].mxu1 }
 0x1c3   : > { %v3382_v32 = vadd.f32 %v3381_v8, %v3380_v6  ;;  %v3446_v46 = vadd.f32 %v3445_v15, %v3444_v3  ;;  %v3383_v62 = vpop.f32.mrb[102].mxu0  ;;  %v3447_v13 = vpop.f32.mrb[102].mxu1 }
 0x1c4   : > { %v3384_v53 = vpop.f32.mrb[103].mxu0  ;;  %v3448_v24 = vpop.f32.mrb[103].mxu1 }
 0x1c5   : > { %v4540_v27 = vadd.f32 %v3382_v32, %v4444_v35  ;;  %v3385_v41 = vadd.f32 %v3384_v53, %v3383_v62  ;;  %v3449_v20 = vadd.f32 %v3448_v24, %v3447_v13  ;;  %v4543_v17 = vadd.f32 %v3446_v46, %v4447_v1 }
 0x1c7   : > { %v4546_v42 = vadd.f32 %v3385_v41, %v4450_v39  ;;  %v4549_v29 = vadd.f32 %v3449_v20, %v4453_v7 }
 0x1c9   : > { %v3386_v31 = vpop.f32.mrb[104].mxu0  ;;  %v3450_v43 = vpop.f32.mrb[104].mxu1 }
 0x1ca   : > { %v3387_v47 = vpop.f32.mrb[105].mxu0  ;;  %v3451_v38 = vpop.f32.mrb[105].mxu1 }
 0x1cb   : > { %v3388_v14 = vadd.f32 %v3387_v47, %v3386_v31  ;;  %v3452_v48 = vadd.f32 %v3451_v38, %v3450_v43  ;;  %v3389_v2 = vpop.f32.mrb[106].mxu0  ;;  %v3453_v35 = vpop.f32.mrb[106].mxu1 }
 0x1cc   : > { %v3390_v57 = vpop.f32.mrb[107].mxu0  ;;  %v3454_v49 = vpop.f32.mrb[107].mxu1 }
 0x1cd   : > { %v4552_v51 = vadd.f32 %v3388_v14, %v4456_v0  ;;  %v3391_v1 = vadd.f32 %v3390_v57, %v3389_v2  ;;  %v3455_v36 = vadd.f32 %v3454_v49, %v3453_v35  ;;  %v4555_v39 = vadd.f32 %v3452_v48, %v4459_v5 }
 0x1cf   : > { %v4558_v7 = vadd.f32 %v3391_v1, %v4462_v58  ;;  %v4561_v50 = vadd.f32 %v3455_v36, %v4465_v26 }
 0x1d1   : > { %v3392_v59 = vpop.f32.mrb[108].mxu0  ;;  %v3456_v61 = vpop.f32.mrb[108].mxu1 }
 0x1d2   : > { %v3393_v23 = vpop.f32.mrb[109].mxu0  ;;  %v3457_v4 = vpop.f32.mrb[109].mxu1 }
 0x1d3   : > { %v3394_v6 = vadd.f32 %v3393_v23, %v3392_v59  ;;  %v3458_v3 = vadd.f32 %v3457_v4, %v3456_v61  ;;  %v3395_v8 = vpop.f32.mrb[110].mxu0  ;;  %v3459_v0 = vpop.f32.mrb[110].mxu1 }
 0x1d4   : > { %v3396_v15 = vpop.f32.mrb[111].mxu0  ;;  %v3460_v32 = vpop.f32.mrb[111].mxu1 }
 0x1d5   : > { %v4564_v5 = vadd.f32 %v3394_v6, %v4468_v37  ;;  %v3397_v46 = vadd.f32 %v3396_v15, %v3395_v8  ;;  %v3461_v58 = vadd.f32 %v3460_v32, %v3459_v0  ;;  %v4567_v62 = vadd.f32 %v3458_v3, %v4471_v56 }
 0x1d7   : > { %v4570_v26 = vadd.f32 %v3397_v46, %v4474_v18  ;;  %v4573_v13 = vadd.f32 %v3461_v58, %v4477_v60 }
 0x1d9   : > { %v3462_v53 = vpop.f32.mrb[112].mxu1  ;;  %v3552_v24 = vpop.f32.mrb[112].mxu0 }
 0x1da   : > { %v2310_v41 = vadd.f32 %v3552_v24, %v4495_v63  ;;  %v3463_v20 = vpop.f32.mrb[113].mxu1  ;;  %v2301_v31 = vpop.f32.mrb[113].mxu0 }
 0x1db   : > { %v3464_v43 = vadd.f32 %v3463_v20, %v3462_v53  ;;  %v2302_v37 = vadd.f32 %v2301_v31, %v4483_v52  ;;  %v3465_v47 = vpop.f32.mrb[114].mxu1  ;;  %v3553_v38 = vpop.f32.mrb[114].mxu0 }
 0x1dc   : > { %v2313_v56 = vadd.f32 %v3553_v38, %v4501_v28  ;;  %v3466_v14 = vpop.f32.mrb[115].mxu1  ;;  %v2304_v18 = vpop.f32.mrb[115].mxu0  ;;  %v2430_v35 = vmax.f32 %v2310_v41, 0.0 }
 0x1dd   : > { %v3467_v48 = vadd.f32 %v3466_v14, %v3465_v47  ;;  %v2305_v60 = vadd.f32 %v2304_v18, %v4489_v12  ;;  %v4581_v2 = vadd.f32 %v3464_v43, %v4480_v34  ;;  %v2428_v57 = vmax.f32 %v2302_v37, 0.0 }
 0x1de   : > { %v2431_v63 = vmax.f32 %v2313_v56, 0.0 }
 0x1df   : > { %v2429_v52 = vmax.f32 %v2305_v60, 0.0  ;;  %v4589_v28 = vadd.f32 %v3467_v48, %v4486_v54 }
 0x1e0   : > { %v2975_v49 = vpack.c.bf16 %v2431_v63, %v2430_v35 }
 0x1e1   : > { %v2970_v1 = vpack.c.bf16 %v2429_v52, %v2428_v57  ;;  %v3468_v12 = vpop.f32.mrb[116].mxu1  ;;  %v3556_v36 = vpop.f32.mrb[116].mxu0 }
 0x1e2   : > { %3047 = vst [vmem:[%s4586_s10 + $0x8] sm:$0xff] %v2975_v49   ;;  %v2326_v34 = vadd.f32 %v3556_v36, %v4519_v33  ;;  %v3469_v59 = vpop.f32.mrb[117].mxu1  ;;  %v2317_v61 = vpop.f32.mrb[117].mxu0 }
 0x1e3   : > { %2971 = vst [vmem:[%s4586_s10] sm:$0xff] %v2970_v1   ;;  %v3470_v23 = vadd.f32 %v3469_v59, %v3468_v12  ;;  %v2318_v4 = vadd.f32 %v2317_v61, %v4507_v25  ;;  %v3471_v6 = vpop.f32.mrb[118].mxu1  ;;  %v3557_v3 = vpop.f32.mrb[118].mxu0 }
 0x1e4   : > { %v2329_v8 = vadd.f32 %v3557_v3, %v4525_v10  ;;  %v3472_v54 = vpop.f32.mrb[119].mxu1  ;;  %v2320_v0 = vpop.f32.mrb[119].mxu0  ;;  %v2434_v33 = vmax.f32 %v2326_v34, 0.0 }
 0x1e5   : > { %v3473_v15 = vadd.f32 %v3472_v54, %v3471_v6  ;;  %v2321_v32 = vadd.f32 %v2320_v0, %v4513_v44  ;;  %v2213_v46 = vadd.f32 %v3470_v23, %v4492_v45  ;;  %v2432_v53 = vmax.f32 %v2318_v4, 0.0 }
 0x1e6   : > { %v2435_v58 = vmax.f32 %v2329_v8, 0.0 }
 0x1e7   : > { %v2433_v24 = vmax.f32 %v2321_v32, 0.0  ;;  %v2216_v41 = vadd.f32 %v3473_v15, %v4498_v16 }
 0x1e8   : > { %v2985_v25 = vpack.c.bf16 %v2435_v58, %v2434_v33 }
 0x1e9   : > { %v2980_v20 = vpack.c.bf16 %v2433_v24, %v2432_v53  ;;  %v3474_v31 = vpop.f32.mrb[120].mxu1  ;;  %v3560_v43 = vpop.f32.mrb[120].mxu0 }
 0x1ea   : > { %3049 = vst [vmem:[%s4586_s10 + $0x18] sm:$0xff] %v2985_v25   ;;  %v2342_v10 = vadd.f32 %v3560_v43, %v4543_v17  ;;  %v3475_v37 = vpop.f32.mrb[121].mxu1  ;;  %v2333_v47 = vpop.f32.mrb[121].mxu0 }
 0x1eb   : > { %3048 = vst [vmem:[%s4586_s10 + $0x10] sm:$0xff] %v2980_v20   ;;  %v3476_v38 = vadd.f32 %v3475_v37, %v3474_v31  ;;  %v2334_v44 = vadd.f32 %v2333_v47, %v4531_v55  ;;  %v3477_v45 = vpop.f32.mrb[122].mxu1  ;;  %v3561_v56 = vpop.f32.mrb[122].mxu0 }
 0x1ec   : > { %v2345_v14 = vadd.f32 %v3561_v56, %v4549_v29  ;;  %v3478_v18 = vpop.f32.mrb[123].mxu1  ;;  %v2336_v16 = vpop.f32.mrb[123].mxu0  ;;  %v2438_v17 = vmax.f32 %v2342_v10, 0.0 }
 0x1ed   : > { %v3479_v48 = vadd.f32 %v3478_v18, %v3477_v45  ;;  %v2337_v60 = vadd.f32 %v2336_v16, %v4537_v22  ;;  %v4606_v35 = vadd.f32 %v3476_v38, %v4504_v9  ;;  %v2436_v57 = vmax.f32 %v2334_v44, 0.0 }
 0x1ee   : > { %v2439_v63 = vmax.f32 %v2345_v14, 0.0 }
 0x1ef   : > { %v2437_v52 = vmax.f32 %v2337_v60, 0.0  ;;  %v4609_v55 = vadd.f32 %v3479_v48, %v4510_v11 }
 0x1f0   : > { %v2995_v49 = vpack.c.bf16 %v2439_v63, %v2438_v17 }
 0x1f1   : > { %v2990_v1 = vpack.c.bf16 %v2437_v52, %v2436_v57  ;;  %v3480_v12 = vpop.f32.mrb[124].mxu1  ;;  %v3564_v29 = vpop.f32.mrb[124].mxu0 }
 0x1f2   : > { %3051 = vst [vmem:[%s4586_s10 + $0x28] sm:$0xff] %v2995_v49   ;;  %v2358_v36 = vadd.f32 %v3564_v29, %v4567_v62  ;;  %v3481_v34 = vpop.f32.mrb[125].mxu1  ;;  %v2349_v59 = vpop.f32.mrb[125].mxu0 }
 0x1f3   : > { %3050 = vst [vmem:[%s4586_s10 + $0x20] sm:$0xff] %v2990_v1   ;;  %v3482_v22 = vadd.f32 %v3481_v34, %v3480_v12  ;;  %v2350_v9 = vadd.f32 %v2349_v59, %v4555_v39  ;;  %v3483_v61 = vpop.f32.mrb[126].mxu1  ;;  %v3565_v23 = vpop.f32.mrb[126].mxu0 }
 0x1f4   : > { %v2361_v4 = vadd.f32 %v3565_v23, %v4573_v13  ;;  %v3484_v11 = vpop.f32.mrb[127].mxu1  ;;  %v2352_v6 = vpop.f32.mrb[127].mxu0  ;;  %v2442_v62 = vmax.f32 %v2358_v36, 0.0 }
 0x1f5   : > { %v3485_v3 = vadd.f32 %v3484_v11, %v3483_v61  ;;  %v2353_v8 = vadd.f32 %v2352_v6, %v4561_v50  ;;  %v2229_v54 = vadd.f32 %v3482_v22, %v4516_v40  ;;  %v2440_v15 = vmax.f32 %v2350_v9, 0.0 }
 0x1f6   : > { %v2443_v0 = vmax.f32 %v2361_v4, 0.0 }
 0x1f7   : > { %v2441_v32 = vmax.f32 %v2353_v8, 0.0  ;;  %v2232_v33 = vadd.f32 %v3485_v3, %v4522_v21 }
 0x1f8   : > { %v3005_v39 = vpack.c.bf16 %v2443_v0, %v2442_v62 }
 0x1f9   : > { %v3000_v58 = vpack.c.bf16 %v2441_v32, %v2440_v15  ;;  %v3486_v53 = vpop.f32.mrb[128].mxu1  ;;  %v3568_v24 = vpop.f32.mrb[128].mxu0 }
 0x1fa   : > { %3053 = vst [vmem:[%s4586_s10 + $0x38] sm:$0xff] %v3005_v39   ;;  %v2374_v13 = vadd.f32 %v3568_v24, %v2213_v46  ;;  %v3487_v25 = vpop.f32.mrb[129].mxu1  ;;  %v2365_v20 = vpop.f32.mrb[129].mxu0 }
 0x1fb   : > { %3052 = vst [vmem:[%s4586_s10 + $0x30] sm:$0xff] %v3000_v58   ;;  %v3488_v31 = vadd.f32 %v3487_v25, %v3486_v53  ;;  %v2366_v50 = vadd.f32 %v2365_v20, %v4581_v2  ;;  %v3489_v43 = vpop.f32.mrb[130].mxu1  ;;  %v3569_v40 = vpop.f32.mrb[130].mxu0 }
 0x1fc   : > { %v2377_v10 = vadd.f32 %v3569_v40, %v2216_v41  ;;  %v3490_v37 = vpop.f32.mrb[131].mxu1  ;;  %v2368_v47 = vpop.f32.mrb[131].mxu0  ;;  %v2446_v45 = vmax.f32 %v2374_v13, 0.0 }
 0x1fd   : > { %v3491_v38 = vadd.f32 %v3490_v37, %v3489_v43  ;;  %v2369_v21 = vadd.f32 %v2368_v47, %v4589_v28  ;;  %v2237_v44 = vadd.f32 %v3488_v31, %v4528_v30  ;;  %v2444_v56 = vmax.f32 %v2366_v50, 0.0 }
 0x1fe   : > { %v2447_v46 = vmax.f32 %v2377_v10, 0.0 }
 0x1ff   : > { %v2445_v14 = vmax.f32 %v2369_v21, 0.0  ;;  %v2240_v18 = vadd.f32 %v3491_v38, %v4534_v19 }
 0x200   : > { %v3015_v16 = vpack.c.bf16 %v2447_v46, %v2446_v45 }
 0x201   : > { %v3010_v2 = vpack.c.bf16 %v2445_v14, %v2444_v56  ;;  %v3492_v48 = vpop.f32.mrb[132].mxu1  ;;  %v3572_v60 = vpop.f32.mrb[132].mxu0 }
 0x202   : > { %3055 = vst [vmem:[%s4586_s10 + $0x48] sm:$0xff] %v3015_v16   ;;  %v2390_v41 = vadd.f32 %v3572_v60, %v2229_v54  ;;  %v3493_v17 = vpop.f32.mrb[133].mxu1  ;;  %v2381_v63 = vpop.f32.mrb[133].mxu0 }
 0x203   : > { %3054 = vst [vmem:[%s4586_s10 + $0x40] sm:$0xff] %v3010_v2   ;;  %v3494_v57 = vadd.f32 %v3493_v17, %v3492_v48  ;;  %v2382_v28 = vadd.f32 %v2381_v63, %v4606_v35  ;;  %v3495_v52 = vpop.f32.mrb[134].mxu1  ;;  %v3573_v30 = vpop.f32.mrb[134].mxu0 }
 0x204   : > { %v2393_v49 = vadd.f32 %v3573_v30, %v2232_v33  ;;  %v3496_v1 = vpop.f32.mrb[135].mxu1  ;;  %v2384_v12 = vpop.f32.mrb[135].mxu0  ;;  %v2450_v34 = vmax.f32 %v2390_v41, 0.0 }
 0x205   : > { %v3497_v29 = vadd.f32 %v3496_v1, %v3495_v52  ;;  %v2385_v19 = vadd.f32 %v2384_v12, %v4609_v55  ;;  %v2245_v36 = vadd.f32 %v3494_v57, %v4540_v27  ;;  %v2448_v22 = vmax.f32 %v2382_v28, 0.0 }
 0x206   : > { %v2451_v59 = vmax.f32 %v2393_v49, 0.0 }
 0x207   : > { %v2449_v9 = vmax.f32 %v2385_v19, 0.0  ;;  %v2248_v61 = vadd.f32 %v3497_v29, %v4546_v42 }
 0x208   : > { %v3025_v23 = vpack.c.bf16 %v2451_v59, %v2450_v34 }
 0x209   : > { %v3020_v35 = vpack.c.bf16 %v2449_v9, %v2448_v22  ;;  %v3498_v4 = vpop.f32.mrb[136].mxu1  ;;  %v3576_v11 = vpop.f32.mrb[136].mxu0 }
 0x20a   : > { %3057 = vst [vmem:[%s4586_s10 + $0x58] sm:$0xff] %v3025_v23   ;;  %v2406_v6 = vadd.f32 %v3576_v11, %v2245_v36  ;;  %v3499_v3 = vpop.f32.mrb[137].mxu1  ;;  %v2397_v8 = vpop.f32.mrb[137].mxu0 }
 0x20b   : > { %3056 = vst [vmem:[%s4586_s10 + $0x50] sm:$0xff] %v3020_v35   ;;  %v3500_v54 = vadd.f32 %v3499_v3, %v3498_v4  ;;  %v2398_v62 = vadd.f32 %v2397_v8, %v2237_v44  ;;  %v3501_v55 = vpop.f32.mrb[138].mxu1  ;;  %v3577_v0 = vpop.f32.mrb[138].mxu0 }
 0x20c   : > { %v2409_v27 = vadd.f32 %v3577_v0, %v2248_v61  ;;  %v3502_v15 = vpop.f32.mrb[139].mxu1  ;;  %v2400_v32 = vpop.f32.mrb[139].mxu0  ;;  %v2454_v58 = vmax.f32 %v2406_v6, 0.0 }
 0x20d   : > { %v3503_v33 = vadd.f32 %v3502_v15, %v3501_v55  ;;  %v2401_v42 = vadd.f32 %v2400_v32, %v2240_v18  ;;  %v2253_v39 = vadd.f32 %v3500_v54, %v4552_v51  ;;  %v2452_v24 = vmax.f32 %v2398_v62, 0.0 }
 0x20e   : > { %v2455_v53 = vmax.f32 %v2409_v27, 0.0 }
 0x20f   : > { %v2453_v13 = vmax.f32 %v2401_v42, 0.0  ;;  %v2256_v25 = vadd.f32 %v3503_v33, %v4558_v7 }
 0x210   : > { %v3035_v20 = vpack.c.bf16 %v2455_v53, %v2454_v58 }
 0x211   : > { %v3030_v31 = vpack.c.bf16 %v2453_v13, %v2452_v24  ;;  %v3504_v50 = vpop.f32.mrb[140].mxu1  ;;  %v3580_v43 = vpop.f32.mrb[140].mxu0 }
 0x212   : > { %3059 = vst [vmem:[%s4586_s10 + $0x68] sm:$0xff] %v3035_v20   ;;  %v3505_v40 = vpop.f32.mrb[141].mxu1  ;;  %v2413_v10 = vpop.f32.mrb[141].mxu0 }
 0x213   : > { %3058 = vst [vmem:[%s4586_s10 + $0x60] sm:$0xff] %v3030_v31   ;;  %v3506_v37 = vadd.f32 %v3505_v40, %v3504_v50  ;;  %v2414_v47 = vadd.f32 %v2413_v10, %v2253_v39  ;;  %v3507_v38 = vpop.f32.mrb[142].mxu1  ;;  %v3581_v21 = vpop.f32.mrb[142].mxu0 }
 0x214   : > { %v3508_v51 = vpop.f32.mrb[143].mxu1  ;;  %v2416_v44 = vpop.f32.mrb[143].mxu0 }
 0x215   : > { %v2261_v45 = vadd.f32 %v3506_v37, %v4564_v5  ;;  %v3509_v46 = vadd.f32 %v3508_v51, %v3507_v38  ;;  %v2417_v7 = vadd.f32 %v2416_v44, %v2256_v25  ;;  %v2456_v14 = vmax.f32 %v2414_v47, 0.0 }
 0x217   : > { %v2422_v56 = vadd.f32 %v3580_v43, %v2261_v45  ;;  %v2264_v18 = vadd.f32 %v3509_v46, %v4570_v26  ;;  %v2457_v16 = vmax.f32 %v2417_v7, 0.0 }
 0x219   : > { %v2425_v2 = vadd.f32 %v3581_v21, %v2264_v18  ;;  %v3040_v48 = vpack.c.bf16 %v2457_v16, %v2456_v14  ;;  %v2458_v60 = vmax.f32 %v2422_v56, 0.0 }
 0x21b   : > { %v2459_v41 = vmax.f32 %v2425_v2, 0.0  ;;  %3060 = vst [vmem:[%s4586_s10 + $0x70] sm:$0xff] %v3040_v48  }
 0x21d   : > { %v3045_v17 = vpack.c.bf16 %v2459_v41, %v2458_v60 }
 0x21f   : > { %3061 = vst [vmem:[%s4586_s10 + $0x78] sm:$0xff] %v3045_v17  }
 0x220 PF: > { %s12_s9 = sadd.s32 1, %s3893_s9  }
 0x221   : > { %p9_p4 = scmp.ge.s32.totalorder %s12_s9, 4  }
 0x223   :  { %11 = sbr.rel (!%p9_p4) target bundleno = 1 (0x1), region = 58 }

// kernel: resnet_qnn_forward.16
= control target key start
LH: loop header
LB: loop body
LE: loop exit
PB: predicated region body
PF: predicated region fallthrough
CT: control target
= control target key end

     0   :  { %s583_s1 = inlined_call_operand.vmem [shape: bf16[128,128], index: 1, kind: input, shape index: {}]   ;;  %s584_s0 = inlined_call_operand.vmem [shape: bf16[128,128], index: 0, kind: input, shape index: {}]   ;;  %s585_s2 = inlined_call_operand.vmem [shape: bf16[128,128], index: 2, kind: output, shape index: {}]  }
   0x1   :  { %v480_v0 = vld [vmem:[%s583_s1] sm:$0xff]   ;;  %v481_v1 = vld [vmem:[%s583_s1 + $0x8] sm:$0xff]   ;;  %v482_v2 = vld [vmem:[%s583_s1 + $0x10] sm:$0xff]  }
   0x2   :  { %432 = vmatprep.subr.bf16.mxu0 %v480_v0  ;;  %464 = vmatprep.subr.bf16.mxu1 %v480_v0  ;;  %v483_v3 = vld [vmem:[%s583_s1 + $0x18] sm:$0xff]   ;;  %v488_v4 = vld [vmem:[%s584_s0] sm:$0xff]   ;;  %v485_v7 = vld [vmem:[%s583_s1 + $0x28] sm:$0xff]  }
   0x3   :  { %433 = vmatpush3.bf16.msra.mxu0 %v480_v0  ;;  %472 = vmatpush3.bf16.msra.mxu1 %v480_v0  ;;  %v489_v5 = vld [vmem:[%s584_s0 + $0x20] sm:$0xff]   ;;  %v486_v8 = vld [vmem:[%s583_s1 + $0x30] sm:$0xff]   ;;  %v487_v9 = vld [vmem:[%s583_s1 + $0x38] sm:$0xff]  }
   0x4   :  { %434 = vmatprep.subr.bf16.mxu0 %v481_v1  ;;  %465 = vmatprep.subr.bf16.mxu1 %v481_v1  ;;  %v484_v6 = vld [vmem:[%s583_s1 + $0x20] sm:$0xff]   ;;  %v490_v10 = vld [vmem:[%s584_s0 + $0x8] sm:$0xff]   ;;  %v492_v12 = vld [vmem:[%s584_s0 + $0x10] sm:$0xff]  }
   0x5   :  { %448 = vmatprep.mubr.bf16.mxu0 %v488_v4  ;;  %456 = vmatprep.mubr.bf16.mxu1 %v489_v5  ;;  %v491_v11 = vld [vmem:[%s584_s0 + $0x28] sm:$0xff]   ;;  %v493_v13 = vld [vmem:[%s584_s0 + $0x30] sm:$0xff]   ;;  %v494_v14 = vld [vmem:[%s584_s0 + $0x18] sm:$0xff]  }
   0x6   :  { %v495_v15 = vld [vmem:[%s584_s0 + $0x38] sm:$0xff]  }
   0x7   :  { %435 = vmatpush3.bf16.msra.mxu0 %v481_v1  ;;  %473 = vmatpush3.bf16.msra.mxu1 %v481_v1 }
   0x8   :  { %436 = vmatprep.subr.bf16.mxu0 %v482_v2  ;;  %466 = vmatprep.subr.bf16.mxu1 %v482_v2 }
   0xb   :  { %437 = vmatpush3.bf16.msra.mxu0 %v482_v2  ;;  %474 = vmatpush3.bf16.msra.mxu1 %v482_v2 }
   0xc   :  { %438 = vmatprep.subr.bf16.mxu0 %v483_v3  ;;  %467 = vmatprep.subr.bf16.mxu1 %v483_v3 }
   0xf   :  { %439 = vmatpush3.bf16.msra.mxu0 %v483_v3  ;;  %475 = vmatpush3.bf16.msra.mxu1 %v483_v3 }
  0x10   :  { %440 = vmatprep.subr.bf16.mxu0 %v484_v6  ;;  %468 = vmatprep.subr.bf16.mxu1 %v484_v6 }
  0x13   :  { %441 = vmatpush3.bf16.msra.mxu0 %v484_v6  ;;  %476 = vmatpush3.bf16.msra.mxu1 %v484_v6 }
  0x14   :  { %442 = vmatprep.subr.bf16.mxu0 %v485_v7  ;;  %469 = vmatprep.subr.bf16.mxu1 %v485_v7 }
  0x17   :  { %443 = vmatpush3.bf16.msra.mxu0 %v485_v7  ;;  %477 = vmatpush3.bf16.msra.mxu1 %v485_v7 }
  0x18   :  { %444 = vmatprep.subr.bf16.mxu0 %v486_v8  ;;  %470 = vmatprep.subr.bf16.mxu1 %v486_v8 }
  0x1b   :  { %445 = vmatpush3.bf16.msra.mxu0 %v486_v8  ;;  %478 = vmatpush3.bf16.msra.mxu1 %v486_v8 }
  0x1c   :  { %446 = vmatprep.subr.bf16.mxu0 %v487_v9  ;;  %471 = vmatprep.subr.bf16.mxu1 %v487_v9 }
  0x1f   :  { %447 = vmatpush3.bf16.msra.mxu0 %v487_v9  ;;  %479 = vmatpush3.bf16.msra.mxu1 %v487_v9 }
  0x22   :  { %449 = vmatmul.mubr.bf16.vlgmr.msra.gmra.mrb[0].mxu0 %v490_v10  ;;  %457 = vmatmul.mubr.bf16.vlgmr.msra.gmra.mrb[0].mxu1 %v491_v11 }
  0x23   :  { %452 = vmatprep.mubr.bf16.mxu0 %v492_v12  ;;  %460 = vmatprep.mubr.bf16.mxu1 %v493_v13 }
  0x2a   :  { %453 = vmatmul.mubr.bf16.gmra.mrb[4].mxu0 %v494_v14  ;;  %461 = vmatmul.mubr.bf16.gmra.mrb[4].mxu1 %v495_v15 }
  0xf5   :  { %v450_v16 = vpop.f32.mrb[0].mxu0  ;;  %v458_v17 = vpop.f32.mrb[0].mxu1 }
  0xf6   :  { %v174_v18 = vpop.f32.mrb[1].mxu0  ;;  %v206_v19 = vpop.f32.mrb[1].mxu1 }
  0xf7   :  { %v451_v20 = vpop.f32.mrb[2].mxu0  ;;  %v459_v21 = vpop.f32.mrb[2].mxu1 }
  0xf8   :  { %v377_v22 = vpack.c.bf16 %v451_v20, %v450_v16  ;;  %v397_v23 = vpack.c.bf16 %v459_v21, %v458_v17  ;;  %v177_v24 = vpop.f32.mrb[3].mxu0  ;;  %v209_v25 = vpop.f32.mrb[3].mxu1 }
  0xf9   :  { %v372_v26 = vpack.c.bf16 %v177_v24, %v174_v18  ;;  %v392_v27 = vpack.c.bf16 %v209_v25, %v206_v19 }
  0xfa   :  { %409 = vst [vmem:[%s585_s2 + $0x8] sm:$0xff] %v377_v22   ;;  %413 = vst [vmem:[%s585_s2 + $0x28] sm:$0xff] %v397_v23  }
  0xfb   :  { %373 = vst [vmem:[%s585_s2] sm:$0xff] %v372_v26   ;;  %412 = vst [vmem:[%s585_s2 + $0x20] sm:$0xff] %v392_v27  }
  0xfd   :  { %v454_v28 = vpop.f32.mrb[4].mxu0  ;;  %v462_v29 = vpop.f32.mrb[4].mxu1 }
  0xfe   :  { %v190_v30 = vpop.f32.mrb[5].mxu0  ;;  %v222_v31 = vpop.f32.mrb[5].mxu1 }
  0xff   :  { %v455_v32 = vpop.f32.mrb[6].mxu0  ;;  %v463_v33 = vpop.f32.mrb[6].mxu1 }
 0x100   :  { %v387_v34 = vpack.c.bf16 %v455_v32, %v454_v28  ;;  %v407_v35 = vpack.c.bf16 %v463_v33, %v462_v29  ;;  %v193_v36 = vpop.f32.mrb[7].mxu0  ;;  %v225_v37 = vpop.f32.mrb[7].mxu1 }
 0x101   :  { %v382_v38 = vpack.c.bf16 %v193_v36, %v190_v30  ;;  %v402_v39 = vpack.c.bf16 %v225_v37, %v222_v31 }
 0x102   :  { %411 = vst [vmem:[%s585_s2 + $0x18] sm:$0xff] %v387_v34   ;;  %415 = vst [vmem:[%s585_s2 + $0x38] sm:$0xff] %v407_v35  }
 0x103   :  { %410 = vst [vmem:[%s585_s2 + $0x10] sm:$0xff] %v382_v38   ;;  %414 = vst [vmem:[%s585_s2 + $0x30] sm:$0xff] %v402_v39  }

// kernel: resnet_qnn_forward.14
= control target key start
LH: loop header
LB: loop body
LE: loop exit
PB: predicated region body
PF: predicated region fallthrough
CT: control target
= control target key end

     0   :  { %s4121_s12 = smov 0   ;;  %s4895_s0 = inlined_call_operand.vmem [shape: bf16[512,1152], index: 0, kind: input, shape index: {}]   ;;  %s4896_s1 = inlined_call_operand.vmem [shape: bf16[1152,128], index: 1, kind: input, shape index: {}]   ;;  %s4897_s2 = inlined_call_operand.vmem [shape: bf16[512,128], index: 2, kind: input, shape index: {}]   ;;  %s4898_s3 = inlined_call_operand.vmem [shape: bf16[512,128], index: 3, kind: output, shape index: {}]  }
   0x1 LB: > { %s2801_s13 = sadd.s32 4294967295, %s4099_s12   ;;  %p2805_p0 = scmp.ge.s32.totalorder %s4099_s12, 1  ;;  %s4099_s12 = sphi %s4121_s12, %s13_s12  }
   0x2   : > { %p150_p1 = scmp.lt.s32.totalorder %s4099_s12, 3 }
   0x4   : > { %p151_p2 = pnand %p2805_p0, %p150_p1 }
   0x5   : > { %v3813_v0 = vld [vmem:[%s4896_s1 + $0x40] sm:$0xff] (!%p151_p2)   ;;  %s2806_s16 = sshll.u32 (!%p151_p2), %s2801_s13, 5  ;;  %v3815_v2 = vld [vmem:[%s4896_s1 + $0x48] sm:$0xff] (!%p151_p2)   ;;  %v3817_v4 = vld [vmem:[%s4896_s1 + $0x50] sm:$0xff] (!%p151_p2)  }
   0x6   : > { %154 = sbr.rel (%p151_p2) target bundleno = 544 (0x220), region = 32  ;;  %v3814_v1 = vld [vmem:[%s4896_s1] sm:$0xff] (!%p151_p2)   ;;  %3268 = vmatprep.subr.bf16.mxu0 (!%p151_p2), %v3813_v0  ;;  %3788 = vmatprep.subr.bf16.mxu1 (!%p151_p2), %v3813_v0  ;;  %p181_p3 = scmp.lt.s32.totalorder (!%p151_p2), %s2806_s16, 63  ;;  %v3816_v3 = vld [vmem:[%s4896_s1 + $0x8] sm:$0xff] (!%p151_p2)   ;;  %v3818_v5 = vld [vmem:[%s4896_s1 + $0x10] sm:$0xff] (!%p151_p2)  }
   0x7   : > { %3269 = vmatpush3.bf16.msra.mxu0 (!%p151_p2), %v3814_v1  ;;  %3796 = vmatpush3.bf16.msra.mxu1 (!%p151_p2), %v3814_v1  ;;  %v3819_v6 = vld [vmem:[%s4896_s1 + $0x58] sm:$0xff] (!%p151_p2)   ;;  %v3821_v8 = vld [vmem:[%s4896_s1 + $0x60] sm:$0xff] (!%p151_p2)   ;;  %v3823_v10 = vld [vmem:[%s4896_s1 + $0x68] sm:$0xff] (!%p151_p2)  }
   0x8   : > { %3270 = vmatprep.subr.bf16.mxu0 (!%p151_p2), %v3815_v2  ;;  %3789 = vmatprep.subr.bf16.mxu1 (!%p151_p2), %v3815_v2  ;;  %v3820_v7 = vld [vmem:[%s4896_s1 + $0x18] sm:$0xff] (!%p151_p2)   ;;  %v3822_v9 = vld [vmem:[%s4896_s1 + $0x20] sm:$0xff] (!%p151_p2)   ;;  %v3824_v13 = vld [vmem:[%s4896_s1 + $0x28] sm:$0xff] (!%p151_p2)  }
   0x9   : > { %v3825_v14 = vld [vmem:[%s4896_s1 + $0x70] sm:$0xff] (!%p151_p2)   ;;  %v3827_v16 = vld [vmem:[%s4896_s1 + $0x78] sm:$0xff] (!%p151_p2)   ;;  %v3835_v18 = vld [vmem:[%s4896_s1 + $0xc0] sm:$0xff] (!%p151_p2)  }
   0xa   : > { %v3826_v15 = vld [vmem:[%s4896_s1 + $0x30] sm:$0xff] (!%p151_p2)   ;;  %v3828_v17 = vld [vmem:[%s4896_s1 + $0x38] sm:$0xff] (!%p151_p2)   ;;  %v3838_v21 = vld [vmem:[%s4896_s1 + $0x140] sm:$0xff] (!%p151_p2)  }
   0xb   : > { %3271 = vmatpush3.bf16.msra.mxu0 (!%p151_p2), %v3816_v3  ;;  %3797 = vmatpush3.bf16.msra.mxu1 (!%p151_p2), %v3816_v3  ;;  %v3836_v22 = vld [vmem:[%s4896_s1 + $0x80] sm:$0xff] (!%p151_p2)   ;;  %v3837_v23 = vld [vmem:[%s4896_s1 + $0xc8] sm:$0xff] (!%p151_p2)   ;;  %v3847_v31 = vld [vmem:[%s4896_s1 + $0xd0] sm:$0xff] (!%p151_p2)  }
   0xc   : > { %3272 = vmatprep.subr.bf16.mxu0 (!%p151_p2), %v3817_v4  ;;  %3790 = vmatprep.subr.bf16.mxu1 (!%p151_p2), %v3817_v4  ;;  %v3840_v24 = vld [vmem:[%s4896_s1 + $0x100] sm:$0xff] (!%p151_p2)   ;;  %v3839_v27 = vld [vmem:[%s4896_s1 + $0x88] sm:$0xff] (!%p151_p2)   ;;  %v3848_v32 = vld [vmem:[%s4896_s1 + $0x90] sm:$0xff] (!%p151_p2)  }
   0xd   : > { %s4900_s16 = smov (!%p181_p3, %s2806_s16), 63  ;;  %v3858_v28 = vld [vmem:[%s4896_s1 + $0x148] sm:$0xff]   ;;  %v3849_v34 = vld [vmem:[%s4896_s1 + $0xd8] sm:$0xff]   ;;  %v3857_v40 = vld [vmem:[%s4896_s1 + $0xe0] sm:$0xff]  }
   0xe   : > { %s3804_s29 = smul.u32 36, %s4900_s16  ;;  %v3860_v33 = vld [vmem:[%s4896_s1 + $0x108] sm:$0xff]   ;;  %v3850_v37 = vld [vmem:[%s4896_s1 + $0x98] sm:$0xff]   ;;  %v3859_v41 = vld [vmem:[%s4896_s1 + $0xa0] sm:$0xff]   ;;  %s2809_s18 = sshll.u32 %s4900_s16, 2 }
   0xf   : > { %3273 = vmatpush3.bf16.msra.mxu0 %v3818_v5  ;;  %3798 = vmatpush3.bf16.msra.mxu1 %v3818_v5  ;;  %v3861_v42 = vld [vmem:[%s4896_s1 + $0xe8] sm:$0xff]   ;;  %v3872_v43 = vld [vmem:[%s4896_s1 + $0x150] sm:$0xff]   ;;  %v3871_v52 = vld [vmem:[%s4896_s1 + $0xf8] sm:$0xff]   ;;  %s4507_s21 = scalar_lea.vmem %s4897_s2, %s2809_s18  ;;  %s4837_s23 = scalar_lea.vmem %s4898_s3, %s2809_s18 }
  0x10   : > { %3274 = vmatprep.subr.bf16.mxu0 %v3819_v6  ;;  %3791 = vmatprep.subr.bf16.mxu1 %v3819_v6  ;;  %s4162_s9 = scalar_lea.vmem %s4895_s0, %s3804_s29  ;;  %v3874_v46 = vld [vmem:[%s4896_s1 + $0x110] sm:$0xff]   ;;  %v3862_v47 = vld [vmem:[%s4896_s1 + $0xa8] sm:$0xff]   ;;  %v3889_v55 = vld [vmem:[%s4896_s1 + $0x158] sm:$0xff]  }
  0x11   : > { %v3831_v11 = vld [vmem:[%s4162_s9 + $0x4] ss:$36 sps:$4 sm:$0xff]   ;;  %v3841_v25 = vld [vmem:[%s4162_s9 + $0x4c] ss:$36 sps:$4 sm:$0xff]   ;;  %v3851_v35 = vld [vmem:[%s4162_s9 + $0x94] ss:$36 sps:$4 sm:$0xff]  }
  0x12   : > { %v3834_v12 = vld [vmem:[%s4162_s9 + $0x364] ss:$36 sps:$4 sm:$0xff]   ;;  %1768 = vmatprep.mubr.bf16.mxu0 %v3831_v11  ;;  %v3843_v26 = vld [vmem:[%s4162_s9 + $0x3ac] ss:$36 sps:$4 sm:$0xff]   ;;  %v3853_v36 = vld [vmem:[%s4162_s9 + $0x3f4] ss:$36 sps:$4 sm:$0xff]  }
  0x13   : > { %3275 = vmatpush3.bf16.msra.mxu0 %v3820_v7  ;;  %3799 = vmatpush3.bf16.msra.mxu1 %v3820_v7  ;;  %v3829_v19 = vld [vmem:[%s4162_s9] ss:$36 sps:$4 sm:$0xff]   ;;  %v3845_v29 = vld [vmem:[%s4162_s9 + $0x48] ss:$36 sps:$4 sm:$0xff]   ;;  %v3855_v38 = vld [vmem:[%s4162_s9 + $0x90] ss:$36 sps:$4 sm:$0xff]  }
  0x14   : > { %3276 = vmatprep.subr.bf16.mxu0 %v3821_v8  ;;  %3792 = vmatprep.subr.bf16.mxu1 %v3821_v8  ;;  %v3832_v20 = vld [vmem:[%s4162_s9 + $0x360] ss:$36 sps:$4 sm:$0xff]   ;;  %v3846_v30 = vld [vmem:[%s4162_s9 + $0x3a8] ss:$36 sps:$4 sm:$0xff]   ;;  %v3856_v39 = vld [vmem:[%s4162_s9 + $0x3f0] ss:$36 sps:$4 sm:$0xff]  }
  0x15   : > { %1864 = vmatprep.mubr.bf16.mxu1 %v3834_v12  ;;  %v3863_v44 = vld [vmem:[%s4162_s9 + $0xdc] ss:$36 sps:$4 sm:$0xff]   ;;  %v3869_v48 = vld [vmem:[%s4896_s1 + $0xf0] sm:$0xff]   ;;  %v3875_v53 = vld [vmem:[%s4162_s9 + $0x124] ss:$36 sps:$4 sm:$0xff]  }
  0x16   : > { %v3865_v45 = vld [vmem:[%s4162_s9 + $0x43c] ss:$36 sps:$4 sm:$0xff]   ;;  %v3870_v51 = vld [vmem:[%s4896_s1 + $0xb0] sm:$0xff]   ;;  %v3877_v58 = vld [vmem:[%s4162_s9 + $0x8] ss:$36 sps:$4 sm:$0xff]  }
  0x17   : > { %3277 = vmatpush3.bf16.msra.mxu0 %v3822_v9  ;;  %3800 = vmatpush3.bf16.msra.mxu1 %v3822_v9  ;;  %v3867_v49 = vld [vmem:[%s4162_s9 + $0xd8] ss:$36 sps:$4 sm:$0xff]   ;;  %v3879_v54 = vld [vmem:[%s4162_s9 + $0xc] ss:$36 sps:$4 sm:$0xff]   ;;  %v3880_v59 = vld [vmem:[%s4162_s9 + $0x120] ss:$36 sps:$4 sm:$0xff]  }
  0x18   : > { %3278 = vmatprep.subr.bf16.mxu0 %v3823_v10  ;;  %3793 = vmatprep.subr.bf16.mxu1 %v3823_v10  ;;  %v3868_v50 = vld [vmem:[%s4162_s9 + $0x438] ss:$36 sps:$4 sm:$0xff]   ;;  %v3881_v60 = vld [vmem:[%s4896_s1 + $0x1c0] sm:$0xff]   ;;  %v3883_v62 = vld [vmem:[%s4162_s9 + $0x16c] ss:$36 sps:$4 sm:$0xff]  }
  0x19   : > { %v3890_v56 = vld [vmem:[%s4896_s1 + $0x118] sm:$0xff]   ;;  %v3882_v61 = vld [vmem:[%s4896_s1 + $0x180] sm:$0xff]   ;;  %v3897_v1 = vld [vmem:[%s4896_s1 + $0x1c8] sm:$0xff]  }
  0x1a   : > { %v3873_v57 = vld [vmem:[%s4896_s1 + $0xb8] sm:$0xff]   ;;  %v3899_v0 = vld [vmem:[%s4896_s1 + $0x160] sm:$0xff]   ;;  %v3898_v3 = vld [vmem:[%s4896_s1 + $0x188] sm:$0xff]  }
  0x1b   : > { %3279 = vmatpush3.bf16.msra.mxu0 %v3824_v13  ;;  %3801 = vmatpush3.bf16.msra.mxu1 %v3824_v13  ;;  %v3885_v63 = vld [vmem:[%s4162_s9 + $0x54] ss:$36 sps:$4 sm:$0xff]   ;;  %v3900_v2 = vld [vmem:[%s4896_s1 + $0x120] sm:$0xff]   ;;  %v3887_v4 = vld [vmem:[%s4162_s9 + $0x168] ss:$36 sps:$4 sm:$0xff]  }
  0x1c   : > { %3280 = vmatprep.subr.bf16.mxu0 %v3825_v14  ;;  %3794 = vmatprep.subr.bf16.mxu1 %v3825_v14  ;;  %v3888_v5 = vld [vmem:[%s4162_s9 + $0x50] ss:$36 sps:$4 sm:$0xff]   ;;  %v3893_v7 = vld [vmem:[%s4162_s9 + $0x9c] ss:$36 sps:$4 sm:$0xff]   ;;  %v3913_v8 = vld [vmem:[%s4896_s1 + $0x168] sm:$0xff]  }
  0x1d   : > { %v3891_v6 = vld [vmem:[%s4162_s9 + $0x1b4] ss:$36 sps:$4 sm:$0xff]   ;;  %v3915_v10 = vld [vmem:[%s4896_s1 + $0x128] sm:$0xff]   ;;  %v3901_v14 = vld [vmem:[%s4162_s9 + $0x1fc] ss:$36 sps:$4 sm:$0xff]  }
  0x1e   : > { %v3914_v9 = vld [vmem:[%s4896_s1 + $0x1d0] sm:$0xff]   ;;  %v3896_v13 = vld [vmem:[%s4162_s9 + $0x98] ss:$36 sps:$4 sm:$0xff]  }
  0x1f   : > { %3281 = vmatpush3.bf16.msra.mxu0 %v3826_v15  ;;  %3802 = vmatpush3.bf16.msra.mxu1 %v3826_v15  ;;  %v3916_v11 = vld [vmem:[%s4896_s1 + $0x190] sm:$0xff]  }
  0x20   : > { %3282 = vmatprep.subr.bf16.mxu0 %v3827_v16  ;;  %3795 = vmatprep.subr.bf16.mxu1 %v3827_v16  ;;  %v3895_v12 = vld [vmem:[%s4162_s9 + $0x1b0] ss:$36 sps:$4 sm:$0xff]  }
  0x21   : > { %v3923_v15 = vld [vmem:[%s4896_s1 + $0x170] sm:$0xff]  }
  0x22   : > { %v3924_v16 = vld [vmem:[%s4896_s1 + $0x130] sm:$0xff]  }
  0x23   : > { %3283 = vmatpush3.bf16.msra.mxu0 %v3828_v17  ;;  %3803 = vmatpush3.bf16.msra.mxu1 %v3828_v17  ;;  %v3903_v17 = vld [vmem:[%s4162_s9 + $0xe4] ss:$36 sps:$4 sm:$0xff]  }
  0x24   : > { %3380 = vmatprep.subr.bf16.mxu1 %v3835_v18  ;;  %3492 = vmatprep.subr.bf16.mxu0 %v3838_v21  ;;  %v3931_v18 = vld [vmem:[%s4896_s1 + $0x1d8] sm:$0xff]   ;;  %v3906_v21 = vld [vmem:[%s4162_s9 + $0xe0] ss:$36 sps:$4 sm:$0xff]  }
  0x26   : > { %1769 = vmatmul.mubr.bf16.vlgmr.msra.gmra.mrb[0].mxu0 %v3829_v19  ;;  %1865 = vmatmul.mubr.bf16.vlgmr.msra.gmra.mrb[0].mxu1 %v3832_v20  ;;  %v3932_v19 = vld [vmem:[%s4896_s1 + $0x198] sm:$0xff]  }
  0x27   : > { %3381 = vmatpush3.bf16.msra.mxu1 %v3836_v22  ;;  %3493 = vmatpush3.bf16.msra.mxu0 %v3840_v24  ;;  %v3905_v20 = vld [vmem:[%s4162_s9 + $0x1f8] ss:$36 sps:$4 sm:$0xff]   ;;  %v3907_v22 = vld [vmem:[%s4162_s9 + $0x244] ss:$36 sps:$4 sm:$0xff]  }
  0x28   : > { %3382 = vmatprep.subr.bf16.mxu1 %v3837_v23  ;;  %1776 = vmatprep.mubr.bf16.mxu0 %v3841_v25  ;;  %v3909_v23 = vld [vmem:[%s4162_s9 + $0x12c] ss:$36 sps:$4 sm:$0xff]   ;;  %v3939_v24 = vld [vmem:[%s4896_s1 + $0x178] sm:$0xff]  }
  0x29   : > { %1872 = vmatprep.mubr.bf16.mxu1 %v3843_v26  ;;  %3494 = vmatprep.subr.bf16.mxu0 %v3858_v28  ;;  %v3940_v25 = vld [vmem:[%s4896_s1 + $0x138] sm:$0xff]   ;;  %v3947_v26 = vld [vmem:[%s4896_s1 + $0x1e0] sm:$0xff]  }
  0x2a   : > { %v3948_v28 = vld [vmem:[%s4896_s1 + $0x1a0] sm:$0xff]  }
  0x2b   : > { %3383 = vmatpush3.bf16.msra.mxu1 %v3839_v27  ;;  %3495 = vmatpush3.bf16.msra.mxu0 %v3860_v33  ;;  %v3911_v27 = vld [vmem:[%s4162_s9 + $0x240] ss:$36 sps:$4 sm:$0xff]   ;;  %v3962_v33 = vld [vmem:[%s4896_s1 + $0x1e8] sm:$0xff]  }
  0x2c   : > { %3384 = vmatprep.subr.bf16.mxu1 %v3847_v31  ;;  %3496 = vmatprep.subr.bf16.mxu0 %v3872_v43  ;;  %v3917_v31 = vld [vmem:[%s4162_s9 + $0x28c] ss:$36 sps:$4 sm:$0xff]   ;;  %v3933_v43 = vld [vmem:[%s4162_s9 + $0x31c] ss:$36 sps:$4 sm:$0xff]  }
  0x2e   : > { %1777 = vmatmul.mubr.bf16.gmra.mrb[4].mxu0 %v3845_v29  ;;  %1873 = vmatmul.mubr.bf16.gmra.mrb[4].mxu1 %v3846_v30  ;;  %v3949_v29 = vld [vmem:[%s4896_s1 + $0x200] sm:$0xff]   ;;  %v3912_v30 = vld [vmem:[%s4162_s9 + $0x128] ss:$36 sps:$4 sm:$0xff]  }
  0x2f   : > { %3385 = vmatpush3.bf16.msra.mxu1 %v3848_v32  ;;  %1784 = vmatprep.mubr.bf16.mxu0 %v3851_v35  ;;  %v3919_v32 = vld [vmem:[%s4162_s9 + $0x174] ss:$36 sps:$4 sm:$0xff]   ;;  %v3963_v35 = vld [vmem:[%s4896_s1 + $0x1a8] sm:$0xff]  }
  0x30   : > { %3386 = vmatprep.subr.bf16.mxu1 %v3849_v34  ;;  %1880 = vmatprep.mubr.bf16.mxu1 %v3853_v36  ;;  %v3921_v34 = vld [vmem:[%s4162_s9 + $0x288] ss:$36 sps:$4 sm:$0xff]   ;;  %v3922_v36 = vld [vmem:[%s4162_s9 + $0x170] ss:$36 sps:$4 sm:$0xff]  }
  0x31   : > { %3497 = vmatpush3.bf16.msra.mxu0 %v3874_v46  ;;  %v3938_v46 = vld [vmem:[%s4162_s9 + $0x200] ss:$36 sps:$4 sm:$0xff]  }
  0x32   : > { %3498 = vmatprep.subr.bf16.mxu0 %v3889_v55  ;;  %v3964_v55 = vld [vmem:[%s4896_s1 + $0x208] sm:$0xff]  }
  0x33   : > { %3387 = vmatpush3.bf16.msra.mxu1 %v3850_v37  ;;  %v3925_v37 = vld [vmem:[%s4162_s9 + $0x2d4] ss:$36 sps:$4 sm:$0xff]  }
  0x34   : > { %3388 = vmatprep.subr.bf16.mxu1 %v3857_v40  ;;  %v3930_v40 = vld [vmem:[%s4162_s9 + $0x1b8] ss:$36 sps:$4 sm:$0xff]  }
  0x35   : > { %3499 = vmatpush3.bf16.msra.mxu0 %v3890_v56  ;;  %v3979_v56 = vld [vmem:[%s4896_s1 + $0x210] sm:$0xff]  }
  0x36   : > { %1785 = vmatmul.mubr.bf16.gmra.mrb[8].mxu0 %v3855_v38  ;;  %1881 = vmatmul.mubr.bf16.gmra.mrb[8].mxu1 %v3856_v39  ;;  %v3927_v38 = vld [vmem:[%s4162_s9 + $0x1bc] ss:$36 sps:$4 sm:$0xff]   ;;  %v3929_v39 = vld [vmem:[%s4162_s9 + $0x2d0] ss:$36 sps:$4 sm:$0xff]  }
  0x37   : > { %3389 = vmatpush3.bf16.msra.mxu1 %v3859_v41  ;;  %1792 = vmatprep.mubr.bf16.mxu0 %v3863_v44  ;;  %v3977_v41 = vld [vmem:[%s4896_s1 + $0x1f0] sm:$0xff]   ;;  %v3935_v44 = vld [vmem:[%s4162_s9 + $0x204] ss:$36 sps:$4 sm:$0xff]  }
  0x38   : > { %3390 = vmatprep.subr.bf16.mxu1 %v3861_v42  ;;  %1888 = vmatprep.mubr.bf16.mxu1 %v3865_v45  ;;  %v3978_v42 = vld [vmem:[%s4896_s1 + $0x1b0] sm:$0xff]   ;;  %v3937_v45 = vld [vmem:[%s4162_s9 + $0x318] ss:$36 sps:$4 sm:$0xff]  }
  0x39   : > { %3500 = vmatprep.subr.bf16.mxu0 %v3899_v0  ;;  %v3961_v0 = vld [vmem:[%s4162_s9 + $0xa0] ss:$36 sps:$4 sm:$0xff]  }
  0x3a   : > { %3501 = vmatpush3.bf16.msra.mxu0 %v3900_v2  ;;  %v3967_v2 = vld [vmem:[%s4162_s9 + $0xec] ss:$36 sps:$4 sm:$0xff]  }
  0x3b   : > { %3391 = vmatpush3.bf16.msra.mxu1 %v3862_v47  ;;  %3502 = vmatprep.subr.bf16.mxu0 %v3913_v8  ;;  %v3992_v47 = vld [vmem:[%s4896_s1 + $0x1f8] sm:$0xff]  }
  0x3c   : > { %3392 = vmatprep.subr.bf16.mxu1 %v3869_v48  ;;  %v3993_v48 = vld [vmem:[%s4896_s1 + $0x1b8] sm:$0xff]  }
  0x3d   : > { %v3973_v8 = vld [vmem:[%s4162_s9 + $0x134] ss:$36 sps:$4 sm:$0xff]  }
  0x3e   : > { %1793 = vmatmul.mubr.bf16.gmra.mrb[12].mxu0 %v3867_v49  ;;  %1889 = vmatmul.mubr.bf16.gmra.mrb[12].mxu1 %v3868_v50  ;;  %v3941_v49 = vld [vmem:[%s4162_s9 + $0x24c] ss:$36 sps:$4 sm:$0xff]   ;;  %v3945_v50 = vld [vmem:[%s4162_s9 + $0x14] ss:$36 sps:$4 sm:$0xff]  }
  0x3f   : > { %3393 = vmatpush3.bf16.msra.mxu1 %v3870_v51  ;;  %1800 = vmatprep.mubr.bf16.mxu0 %v3875_v53  ;;  %v3943_v51 = vld [vmem:[%s4162_s9 + $0x10] ss:$36 sps:$4 sm:$0xff]  }
  0x40   : > { %3394 = vmatprep.subr.bf16.mxu1 %v3871_v52  ;;  %1929 = vmatprep.mubr.bf16.mxu1 %v3879_v54  ;;  %v3946_v52 = vld [vmem:[%s4162_s9 + $0x248] ss:$36 sps:$4 sm:$0xff]   ;;  %v3950_v53 = vld [vmem:[%s4162_s9 + $0x294] ss:$36 sps:$4 sm:$0xff]   ;;  %v3952_v54 = vld [vmem:[%s4162_s9 + $0x5c] ss:$36 sps:$4 sm:$0xff]  }
  0x41   : > { %3503 = vmatpush3.bf16.msra.mxu0 %v3915_v10  ;;  %v3975_v10 = vld [vmem:[%s4162_s9 + $0x368] ss:$36 sps:$4 sm:$0xff]  }
  0x42   : > { %3504 = vmatprep.subr.bf16.mxu0 %v3923_v15  ;;  %v3985_v15 = vld [vmem:[%s4162_s9 + $0x178] ss:$36 sps:$4 sm:$0xff]  }
  0x43   : > { %3395 = vmatpush3.bf16.msra.mxu1 %v3873_v57  ;;  %v3954_v57 = vld [vmem:[%s4162_s9 + $0x290] ss:$36 sps:$4 sm:$0xff]  }
  0x44   : > { %3604 = vmatprep.subr.bf16.mxu1 %v3881_v60  ;;  %v3958_v60 = vld [vmem:[%s4162_s9 + $0xa4] ss:$36 sps:$4 sm:$0xff]  }
  0x45   : > { %3505 = vmatpush3.bf16.msra.mxu0 %v3924_v16  ;;  %v3986_v16 = vld [vmem:[%s4162_s9 + $0x3fc] ss:$36 sps:$4 sm:$0xff]  }
  0x46   : > { %1801 = vmatmul.mubr.bf16.gmra.mrb[16].mxu0 %v3880_v59  ;;  %1930 = vmatmul.mubr.bf16.vlgmr.msra.gmra.mrb[16].mxu1 %v3877_v58  ;;  %v3955_v58 = vld [vmem:[%s4162_s9 + $0x58] ss:$36 sps:$4 sm:$0xff]  }
  0x47   : > { %3605 = vmatpush3.bf16.msra.mxu1 %v3882_v61  ;;  %1808 = vmatprep.mubr.bf16.mxu0 %v3883_v62  ;;  %v3956_v59 = vld [vmem:[%s4162_s9 + $0x2dc] ss:$36 sps:$4 sm:$0xff]  }
  0x48   : > { %1937 = vmatprep.mubr.bf16.mxu1 %v3885_v63  ;;  %3606 = vmatprep.subr.bf16.mxu1 %v3897_v1  ;;  %v3994_v61 = vld [vmem:[%s4896_s1 + $0x218] sm:$0xff]   ;;  %v4007_v62 = vld [vmem:[%s4896_s1 + $0x220] sm:$0xff]  }
  0x49   : > { %3506 = vmatprep.subr.bf16.mxu0 %v3939_v24  ;;  %v3960_v63 = vld [vmem:[%s4162_s9 + $0x2d8] ss:$36 sps:$4 sm:$0xff]   ;;  %v3965_v1 = vld [vmem:[%s4162_s9 + $0x324] ss:$36 sps:$4 sm:$0xff]  }
  0x4a   : > { %3507 = vmatpush3.bf16.msra.mxu0 %v3940_v25  ;;  %v4001_v24 = vld [vmem:[%s4162_s9 + $0x254] ss:$36 sps:$4 sm:$0xff]   ;;  %v4005_v25 = vld [vmem:[%s4162_s9 + $0x1c] ss:$36 sps:$4 sm:$0xff]  }
  0x4b   : > { %3607 = vmatpush3.bf16.msra.mxu1 %v3898_v3  ;;  %3740 = vmatprep.subr.bf16.mxu0 %v3949_v29  ;;  %v4020_v3 = vld [vmem:[%s4896_s1 + $0x228] sm:$0xff]  }
  0x4c   : > { %3608 = vmatprep.subr.bf16.mxu1 %v3914_v9  ;;  %v4046_v9 = vld [vmem:[%s4896_s1 + $0x238] sm:$0xff]  }
  0x4e   : > { %1809 = vmatmul.mubr.bf16.gmra.mrb[20].mxu0 %v3887_v4  ;;  %1938 = vmatmul.mubr.bf16.gmra.mrb[20].mxu1 %v3888_v5  ;;  %v3969_v4 = vld [vmem:[%s4162_s9 + $0x320] ss:$36 sps:$4 sm:$0xff]   ;;  %v4033_v5 = vld [vmem:[%s4896_s1 + $0x230] sm:$0xff]  }
  0x4f   : > { %1816 = vmatprep.mubr.bf16.mxu0 %v3891_v6  ;;  %1945 = vmatprep.mubr.bf16.mxu1 %v3893_v7  ;;  %v3970_v6 = vld [vmem:[%s4162_s9 + $0xe8] ss:$36 sps:$4 sm:$0xff]  }
  0x50   : > { %3609 = vmatpush3.bf16.msra.mxu1 %v3916_v11  ;;  %v3971_v7 = vld [vmem:[%s4162_s9 + $0x36c] ss:$36 sps:$4 sm:$0xff]  }
  0x51   : > { %3610 = vmatprep.subr.bf16.mxu1 %v3931_v18  ;;  %v3976_v11 = vld [vmem:[%s4162_s9 + $0x130] ss:$36 sps:$4 sm:$0xff]   ;;  %v3990_v18 = vld [vmem:[%s4162_s9 + $0x3f8] ss:$36 sps:$4 sm:$0xff]  }
  0x54   : > { %3611 = vmatpush3.bf16.msra.mxu1 %v3932_v19  ;;  %v3991_v19 = vld [vmem:[%s4162_s9 + $0x1c0] ss:$36 sps:$4 sm:$0xff]  }
  0x55   : > { %3612 = vmatprep.subr.bf16.mxu1 %v3947_v26  ;;  %v4003_v26 = vld [vmem:[%s4162_s9 + $0x18] ss:$36 sps:$4 sm:$0xff]  }
  0x56   : > { %1817 = vmatmul.mubr.bf16.gmra.mrb[24].mxu0 %v3895_v12  ;;  %1946 = vmatmul.mubr.bf16.gmra.mrb[24].mxu1 %v3896_v13  ;;  %v3980_v12 = vld [vmem:[%s4162_s9 + $0x3b4] ss:$36 sps:$4 sm:$0xff]   ;;  %v3982_v13 = vld [vmem:[%s4162_s9 + $0x17c] ss:$36 sps:$4 sm:$0xff]  }
  0x57   : > { %1824 = vmatprep.mubr.bf16.mxu0 %v3901_v14  ;;  %1953 = vmatprep.mubr.bf16.mxu1 %v3903_v17  ;;  %v3984_v14 = vld [vmem:[%s4162_s9 + $0x3b0] ss:$36 sps:$4 sm:$0xff]   ;;  %v3988_v17 = vld [vmem:[%s4162_s9 + $0x1c4] ss:$36 sps:$4 sm:$0xff]  }
  0x58   : > { %3613 = vmatpush3.bf16.msra.mxu1 %v3948_v28  ;;  %v4008_v28 = vld [vmem:[%s4162_s9 + $0x29c] ss:$36 sps:$4 sm:$0xff]  }
  0x59   : > { %3614 = vmatprep.subr.bf16.mxu1 %v3962_v33  ;;  %v4016_v33 = vld [vmem:[%s4162_s9 + $0xac] ss:$36 sps:$4 sm:$0xff]  }
  0x5c   : > { %3615 = vmatpush3.bf16.msra.mxu1 %v3963_v35  ;;  %v4019_v35 = vld [vmem:[%s4162_s9 + $0xa8] ss:$36 sps:$4 sm:$0xff]  }
  0x5d   : > { %3616 = vmatprep.subr.bf16.mxu1 %v3977_v41  ;;  %v4029_v41 = vld [vmem:[%s4162_s9 + $0x13c] ss:$36 sps:$4 sm:$0xff]  }
  0x5e   : > { %1825 = vmatmul.mubr.bf16.gmra.mrb[28].mxu0 %v3905_v20  ;;  %1954 = vmatmul.mubr.bf16.gmra.mrb[28].mxu1 %v3906_v21  ;;  %v3995_v20 = vld [vmem:[%s4162_s9 + $0x444] ss:$36 sps:$4 sm:$0xff]   ;;  %v3997_v21 = vld [vmem:[%s4162_s9 + $0x20c] ss:$36 sps:$4 sm:$0xff]  }
  0x5f   : > { %1832 = vmatprep.mubr.bf16.mxu0 %v3907_v22  ;;  %1961 = vmatprep.mubr.bf16.mxu1 %v3909_v23  ;;  %v3999_v22 = vld [vmem:[%s4162_s9 + $0x440] ss:$36 sps:$4 sm:$0xff]   ;;  %v4000_v23 = vld [vmem:[%s4162_s9 + $0x208] ss:$36 sps:$4 sm:$0xff]  }
  0x60   : > { %3617 = vmatpush3.bf16.msra.mxu1 %v3978_v42  ;;  %v4031_v42 = vld [vmem:[%s4162_s9 + $0x370] ss:$36 sps:$4 sm:$0xff]  }
  0x61   : > { %3618 = vmatprep.subr.bf16.mxu1 %v3992_v47  ;;  %v4039_v47 = vld [vmem:[%s4162_s9 + $0x180] ss:$36 sps:$4 sm:$0xff]  }
  0x64   : > { %3619 = vmatpush3.bf16.msra.mxu1 %v3993_v48  ;;  %v4040_v48 = vld [vmem:[%s4162_s9 + $0x404] ss:$36 sps:$4 sm:$0xff]  }
  0x66   : > { %1833 = vmatmul.mubr.bf16.gmra.mrb[32].mxu0 %v3911_v27  ;;  %1962 = vmatmul.mubr.bf16.gmra.mrb[32].mxu1 %v3912_v30  ;;  %v4006_v27 = vld [vmem:[%s4162_s9 + $0x250] ss:$36 sps:$4 sm:$0xff]   ;;  %v4012_v30 = vld [vmem:[%s4162_s9 + $0x298] ss:$36 sps:$4 sm:$0xff]  }
  0x67   : > { %1840 = vmatprep.mubr.bf16.mxu0 %v3917_v31  ;;  %1969 = vmatprep.mubr.bf16.mxu1 %v3919_v32  ;;  %v4013_v31 = vld [vmem:[%s4162_s9 + $0x60] ss:$36 sps:$4 sm:$0xff]  }
  0x68   : > { %v4014_v32 = vld [vmem:[%s4162_s9 + $0x2e4] ss:$36 sps:$4 sm:$0xff]  }
  0x6e   : > { %1841 = vmatmul.mubr.bf16.gmra.mrb[36].mxu0 %v3921_v34  ;;  %1970 = vmatmul.mubr.bf16.gmra.mrb[36].mxu1 %v3922_v36  ;;  %v4018_v34 = vld [vmem:[%s4162_s9 + $0x2e0] ss:$36 sps:$4 sm:$0xff]   ;;  %v4021_v36 = vld [vmem:[%s4162_s9 + $0x32c] ss:$36 sps:$4 sm:$0xff]  }
  0x6f   : > { %1848 = vmatprep.mubr.bf16.mxu0 %v3925_v37  ;;  %1977 = vmatprep.mubr.bf16.mxu1 %v3927_v38  ;;  %v4023_v37 = vld [vmem:[%s4162_s9 + $0xf4] ss:$36 sps:$4 sm:$0xff]   ;;  %v4025_v38 = vld [vmem:[%s4162_s9 + $0x328] ss:$36 sps:$4 sm:$0xff]  }
  0x76   : > { %1849 = vmatmul.mubr.bf16.gmra.mrb[40].mxu0 %v3929_v39  ;;  %1978 = vmatmul.mubr.bf16.gmra.mrb[40].mxu1 %v3930_v40  ;;  %v4026_v39 = vld [vmem:[%s4162_s9 + $0xf0] ss:$36 sps:$4 sm:$0xff]  }
  0x77   : > { %1856 = vmatprep.mubr.bf16.mxu0 %v3933_v43  ;;  %1985 = vmatprep.mubr.bf16.mxu1 %v3935_v44  ;;  %v4027_v40 = vld [vmem:[%s4162_s9 + $0x374] ss:$36 sps:$4 sm:$0xff]   ;;  %v4034_v44 = vld [vmem:[%s4162_s9 + $0x3bc] ss:$36 sps:$4 sm:$0xff]  }
  0x78   : > { %v4032_v43 = vld [vmem:[%s4162_s9 + $0x138] ss:$36 sps:$4 sm:$0xff]  }
  0x7e   : > { %1857 = vmatmul.mubr.bf16.gmra.mrb[44].mxu0 %v3937_v45  ;;  %1986 = vmatmul.mubr.bf16.gmra.mrb[44].mxu1 %v3938_v46  ;;  %v4036_v45 = vld [vmem:[%s4162_s9 + $0x184] ss:$36 sps:$4 sm:$0xff]   ;;  %v4038_v46 = vld [vmem:[%s4162_s9 + $0x3b8] ss:$36 sps:$4 sm:$0xff]  }
  0x7f   : > { %1993 = vmatprep.mubr.bf16.mxu1 %v3941_v49  ;;  %2090 = vmatprep.mubr.bf16.mxu0 %v3945_v50  ;;  %v4042_v49 = vld [vmem:[%s4162_s9 + $0x1cc] ss:$36 sps:$4 sm:$0xff]   ;;  %v4044_v50 = vld [vmem:[%s4162_s9 + $0x400] ss:$36 sps:$4 sm:$0xff]  }
  0x86   : > { %1994 = vmatmul.mubr.bf16.gmra.mrb[48].mxu1 %v3946_v52  ;;  %2091 = vmatmul.mubr.bf16.vlgmr.msra.gmra.mrb[48].mxu0 %v3943_v51  ;;  %v4045_v51 = vld [vmem:[%s4162_s9 + $0x1c8] ss:$36 sps:$4 sm:$0xff]  }
  0x87   : > { %3741 = vmatpush3.bf16.msra.mxu0 %v3949_v29  ;;  %2001 = vmatprep.mubr.bf16.mxu1 %v3950_v53  ;;  %v4010_v29 = vld [vmem:[%s4162_s9 + $0x64] ss:$36 sps:$4 sm:$0xff]   ;;  %v4047_v52 = vld [vmem:[%s4162_s9 + $0x44c] ss:$36 sps:$4 sm:$0xff]   ;;  %v4049_v53 = vld [vmem:[%s4162_s9 + $0x214] ss:$36 sps:$4 sm:$0xff]  }
  0x88   : > { %2098 = vmatprep.mubr.bf16.mxu0 %v3952_v54  ;;  %3742 = vmatprep.subr.bf16.mxu0 %v3964_v55 }
  0x8b   : > { %3743 = vmatpush3.bf16.msra.mxu0 %v3964_v55 }
  0x8c   : > { %3744 = vmatprep.subr.bf16.mxu0 %v3979_v56 }
  0x8e   : > { %2002 = vmatmul.mubr.bf16.gmra.mrb[52].mxu1 %v3954_v57  ;;  %2099 = vmatmul.mubr.bf16.gmra.mrb[52].mxu0 %v3955_v58  ;;  %v4051_v58 = vld [vmem:[%s4162_s9 + $0x448] ss:$36 sps:$4 sm:$0xff]  }
  0x8f   : > { %2009 = vmatprep.mubr.bf16.mxu1 %v3956_v59  ;;  %2106 = vmatprep.mubr.bf16.mxu0 %v3958_v60  ;;  %v4052_v59 = vld [vmem:[%s4162_s9 + $0x210] ss:$36 sps:$4 sm:$0xff]  }
  0x90   : > { %3745 = vmatpush3.bf16.msra.mxu0 %v3979_v56 }
  0x91   : > { %3746 = vmatprep.subr.bf16.mxu0 %v3994_v61 }
  0x94   : > { %3747 = vmatpush3.bf16.msra.mxu0 %v3994_v61 }
  0x95   : > { %3748 = vmatprep.subr.bf16.mxu0 %v4007_v62 }
  0x96   : > { %2010 = vmatmul.mubr.bf16.gmra.mrb[56].mxu1 %v3960_v63  ;;  %2107 = vmatmul.mubr.bf16.gmra.mrb[56].mxu0 %v3961_v0  ;;  %v4053_v0 = vld [vmem:[%s4162_s9 + $0x25c] ss:$36 sps:$4 sm:$0xff]  }
  0x97   : > { %2017 = vmatprep.mubr.bf16.mxu1 %v3965_v1  ;;  %2114 = vmatprep.mubr.bf16.mxu0 %v3967_v2  ;;  %v4055_v1 = vld [vmem:[%s4162_s9 + $0x20] ss:$36 sps:$4 sm:$0xff]  }
  0x98   : > { %3749 = vmatpush3.bf16.msra.mxu0 %v4007_v62 }
  0x99   : > { %3750 = vmatprep.subr.bf16.mxu0 %v4020_v3 }
  0x9c   : > { %3751 = vmatpush3.bf16.msra.mxu0 %v4020_v3 }
  0x9d   : > { %3752 = vmatprep.subr.bf16.mxu0 %v4033_v5 }
  0x9e   : > { %2018 = vmatmul.mubr.bf16.gmra.mrb[60].mxu1 %v3969_v4  ;;  %2115 = vmatmul.mubr.bf16.gmra.mrb[60].mxu0 %v3970_v6 }
  0x9f   : > { %2025 = vmatprep.mubr.bf16.mxu1 %v3971_v7  ;;  %2122 = vmatprep.mubr.bf16.mxu0 %v3973_v8 }
  0xa0   : > { %3753 = vmatpush3.bf16.msra.mxu0 %v4033_v5 }
  0xa1   : > { %3754 = vmatprep.subr.bf16.mxu0 %v4046_v9 }
  0xa4   : > { %3755 = vmatpush3.bf16.msra.mxu0 %v4046_v9 }
  0xa6   : > { %2026 = vmatmul.mubr.bf16.gmra.mrb[64].mxu1 %v3975_v10  ;;  %2123 = vmatmul.mubr.bf16.gmra.mrb[64].mxu0 %v3976_v11  ;;  %v4056_v10 = vld [vmem:[%s4162_s9 + $0x258] ss:$36 sps:$4 sm:$0xff]   ;;  %v4057_v11 = vld [vmem:[%s4162_s9 + $0x68] ss:$36 sps:$4 sm:$0xff]  }
  0xa7   : > { %2033 = vmatprep.mubr.bf16.mxu1 %v3980_v12  ;;  %2130 = vmatprep.mubr.bf16.mxu0 %v3982_v13 }
  0xae   : > { %2034 = vmatmul.mubr.bf16.gmra.mrb[68].mxu1 %v3984_v14  ;;  %2131 = vmatmul.mubr.bf16.gmra.mrb[68].mxu0 %v3985_v15 }
  0xaf   : > { %2041 = vmatprep.mubr.bf16.mxu1 %v3986_v16  ;;  %2138 = vmatprep.mubr.bf16.mxu0 %v3988_v17  ;;  %v4058_v16 = vld [vmem:[%s4162_s9 + $0x2a4] ss:$36 sps:$4 sm:$0xff]   ;;  %v4060_v17 = vld [vmem:[%s4162_s9 + $0xb0] ss:$36 sps:$4 sm:$0xff]  }
  0xb6   : > { %2042 = vmatmul.mubr.bf16.gmra.mrb[72].mxu1 %v3990_v18  ;;  %2139 = vmatmul.mubr.bf16.gmra.mrb[72].mxu0 %v3991_v19 }
  0xb7   : > { %2049 = vmatprep.mubr.bf16.mxu1 %v3995_v20  ;;  %2146 = vmatprep.mubr.bf16.mxu0 %v3997_v21 }
  0xbe   : > { %2050 = vmatmul.mubr.bf16.gmra.mrb[76].mxu1 %v3999_v22  ;;  %2147 = vmatmul.mubr.bf16.gmra.mrb[76].mxu0 %v4000_v23 }
  0xbf   : > { %2154 = vmatprep.mubr.bf16.mxu0 %v4001_v24  ;;  %2251 = vmatprep.mubr.bf16.mxu1 %v4005_v25 }
  0xc6   : > { %2155 = vmatmul.mubr.bf16.gmra.mrb[80].mxu0 %v4006_v27  ;;  %2252 = vmatmul.mubr.bf16.vlgmr.msra.gmra.mrb[80].mxu1 %v4003_v26  ;;  %v4061_v26 = vld [vmem:[%s4162_s9 + $0x2a0] ss:$36 sps:$4 sm:$0xff]   ;;  %v4062_v27 = vld [vmem:[%s4162_s9 + $0xf8] ss:$36 sps:$4 sm:$0xff]  }
  0xc7   : > { %2162 = vmatprep.mubr.bf16.mxu0 %v4008_v28  ;;  %2259 = vmatprep.mubr.bf16.mxu1 %v4010_v29 }
  0xce   : > { %2163 = vmatmul.mubr.bf16.gmra.mrb[84].mxu0 %v4012_v30  ;;  %2260 = vmatmul.mubr.bf16.gmra.mrb[84].mxu1 %v4013_v31 }
  0xcf   : > { %2170 = vmatprep.mubr.bf16.mxu0 %v4014_v32  ;;  %2267 = vmatprep.mubr.bf16.mxu1 %v4016_v33  ;;  %v4063_v32 = vld [vmem:[%s4162_s9 + $0x2ec] ss:$36 sps:$4 sm:$0xff]   ;;  %v4065_v33 = vld [vmem:[%s4162_s9 + $0x140] ss:$36 sps:$4 sm:$0xff]  }
  0xd6   : > { %2171 = vmatmul.mubr.bf16.gmra.mrb[88].mxu0 %v4018_v34  ;;  %2268 = vmatmul.mubr.bf16.gmra.mrb[88].mxu1 %v4019_v35 }
  0xd7   : > { %2178 = vmatprep.mubr.bf16.mxu0 %v4021_v36  ;;  %2275 = vmatprep.mubr.bf16.mxu1 %v4023_v37 }
  0xde   : > { %2179 = vmatmul.mubr.bf16.gmra.mrb[92].mxu0 %v4025_v38  ;;  %2276 = vmatmul.mubr.bf16.gmra.mrb[92].mxu1 %v4026_v39 }
  0xdf   : > { %2186 = vmatprep.mubr.bf16.mxu0 %v4027_v40  ;;  %2283 = vmatprep.mubr.bf16.mxu1 %v4029_v41 }
  0xe6   : > { %2187 = vmatmul.mubr.bf16.gmra.mrb[96].mxu0 %v4031_v42  ;;  %2284 = vmatmul.mubr.bf16.gmra.mrb[96].mxu1 %v4032_v43  ;;  %v4066_v42 = vld [vmem:[%s4162_s9 + $0x2e8] ss:$36 sps:$4 sm:$0xff]  }
  0xe7   : > { %2194 = vmatprep.mubr.bf16.mxu0 %v4034_v44  ;;  %2291 = vmatprep.mubr.bf16.mxu1 %v4036_v45  ;;  %v4067_v43 = vld [vmem:[%s4162_s9 + $0x188] ss:$36 sps:$4 sm:$0xff]  }
  0xee   : > { %2195 = vmatmul.mubr.bf16.gmra.mrb[100].mxu0 %v4038_v46  ;;  %2292 = vmatmul.mubr.bf16.gmra.mrb[100].mxu1 %v4039_v47 }
  0xef   : > { %2202 = vmatprep.mubr.bf16.mxu0 %v4040_v48  ;;  %2299 = vmatprep.mubr.bf16.mxu1 %v4042_v49  ;;  %v4068_v48 = vld [vmem:[%s4162_s9 + $0x334] ss:$36 sps:$4 sm:$0xff]  }
  0xf0   : > { %v4070_v49 = vld [vmem:[%s4162_s9 + $0x1d0] ss:$36 sps:$4 sm:$0xff]  }
  0xf6   : > { %2203 = vmatmul.mubr.bf16.gmra.mrb[104].mxu0 %v4044_v50  ;;  %2300 = vmatmul.mubr.bf16.gmra.mrb[104].mxu1 %v4045_v51  ;;  %v3095_v50 = vld [vmem:[%s4507_s21] sm:$0xff]  }
  0xf7   : > { %2210 = vmatprep.mubr.bf16.mxu0 %v4047_v52  ;;  %2307 = vmatprep.mubr.bf16.mxu1 %v4049_v53 }
  0xf9   : > { %v3356_v54 = vpop.f32.mrb[0].mxu1  ;;  %v3284_v55 = vpop.f32.mrb[0].mxu0 }
  0xfa   : > { %v3357_v56 = vpop.f32.mrb[1].mxu1  ;;  %v3285_v57 = vpop.f32.mrb[1].mxu0 }
  0xfb   : > { %v4465_v60 = vadd.f32 %v3357_v56, %v3356_v54  ;;  %v3359_v61 = vpop.f32.mrb[2].mxu1  ;;  %v4467_v62 = vadd.f32 %v3285_v57, %v3284_v55  ;;  %v3287_v63 = vpop.f32.mrb[2].mxu0  ;;  %v3096_v55 = vunpack.c.l.bf16 %v3095_v50  ;;  %v3097_v56 = vunpack.c.h.bf16 %v3095_v50 }
  0xfc   : > { %v3360_v2 = vpop.f32.mrb[3].mxu1  ;;  %v3288_v3 = vpop.f32.mrb[3].mxu0 }
  0xfd   : > { %v4471_v4 = vadd.f32 %v3360_v2, %v3359_v61  ;;  %v4473_v5 = vadd.f32 %v3288_v3, %v3287_v63  ;;  %v4071_v63 = vld [vmem:[%s4162_s9 + $0x330] ss:$36 sps:$4 sm:$0xff]  }
  0xfe   : > { %2211 = vmatmul.mubr.bf16.gmra.mrb[108].mxu0 %v4051_v58  ;;  %2308 = vmatmul.mubr.bf16.gmra.mrb[108].mxu1 %v4052_v59 }
  0xff   : > { %2315 = vmatprep.mubr.bf16.mxu1 %v4053_v0  ;;  %3756 = vmatprep.mubr.bf16.mxu0 %v4055_v1  ;;  %v4072_v0 = vld [vmem:[%s4162_s9 + $0x218] ss:$36 sps:$4 sm:$0xff]   ;;  %v1771_v1 = vadd.f32 %v4467_v62, %v3096_v55  ;;  %v4081_v55 = vld [vmem:[%s4162_s9 + $0x3c0] ss:$36 sps:$4 sm:$0xff]  }
 0x101   : > { %v3362_v6 = vpop.f32.mrb[4].mxu1  ;;  %v3290_v7 = vpop.f32.mrb[4].mxu0 }
 0x102   : > { %v3363_v8 = vpop.f32.mrb[5].mxu1  ;;  %v3291_v9 = vpop.f32.mrb[5].mxu0 }
 0x103   : > { %v4477_v12 = vadd.f32 %v3363_v8, %v3362_v6  ;;  %v3365_v13 = vpop.f32.mrb[6].mxu1  ;;  %v4479_v14 = vadd.f32 %v3291_v9, %v3290_v7  ;;  %v3293_v15 = vpop.f32.mrb[6].mxu0  ;;  %v4073_v8 = vld [vmem:[%s4162_s9 + $0x37c] ss:$36 sps:$4 sm:$0xff]  }
 0x104   : > { %v3366_v18 = vpop.f32.mrb[7].mxu1  ;;  %v3294_v19 = vpop.f32.mrb[7].mxu0  ;;  %v4075_v9 = vld [vmem:[%s4162_s9 + $0x260] ss:$36 sps:$4 sm:$0xff]  }
 0x105   : > { %v4483_v20 = vadd.f32 %v3366_v18, %v3365_v13  ;;  %v4485_v21 = vadd.f32 %v3294_v19, %v3293_v15  ;;  %v1774_v15 = vadd.f32 %v4473_v5, %v3097_v56  ;;  %v4082_v56 = vld [vmem:[%s4162_s9 + $0x338] ss:$36 sps:$4 sm:$0xff]  }
 0x106   : > { %2316 = vmatmul.mubr.bf16.gmra.mrb[112].mxu1 %v4056_v10  ;;  %3757 = vmatmul.mubr.bf16.vlgmr.msra.gmra.mrb[112].mxu0 %v4057_v11  ;;  %v3238_v10 = vld [vmem:[%s4507_s21 + $0x8] sm:$0xff]  }
 0x107   : > { %2323 = vmatprep.mubr.bf16.mxu1 %v4058_v16  ;;  %3760 = vmatprep.mubr.bf16.mxu0 %v4060_v17  ;;  %v3100_v62 = vunpack.c.l.bf16 %v3238_v10 }
 0x109   : > { %v3368_v22 = vpop.f32.mrb[8].mxu1  ;;  %v3296_v23 = vpop.f32.mrb[8].mxu0 }
 0x10a   : > { %v3369_v24 = vpop.f32.mrb[9].mxu1  ;;  %v3297_v25 = vpop.f32.mrb[9].mxu0 }
 0x10b   : > { %v4489_v28 = vadd.f32 %v3369_v24, %v3368_v22  ;;  %v3371_v29 = vpop.f32.mrb[10].mxu1  ;;  %v4491_v30 = vadd.f32 %v3297_v25, %v3296_v23  ;;  %v3299_v31 = vpop.f32.mrb[10].mxu0  ;;  %v3101_v22 = vunpack.c.h.bf16 %v3238_v10 }
 0x10c   : > { %v3372_v34 = vpop.f32.mrb[11].mxu1  ;;  %v3300_v35 = vpop.f32.mrb[11].mxu0 }
 0x10d   : > { %v4495_v36 = vadd.f32 %v3372_v34, %v3371_v29  ;;  %v4497_v37 = vadd.f32 %v3300_v35, %v3299_v31  ;;  %v1779_v29 = vadd.f32 %v4479_v14, %v3100_v62  ;;  %v4078_v35 = vld [vmem:[%s4162_s9 + $0x3c4] ss:$36 sps:$4 sm:$0xff]  }
 0x10e   : > { %2324 = vmatmul.mubr.bf16.gmra.mrb[116].mxu1 %v4061_v26  ;;  %3761 = vmatmul.mubr.bf16.gmra.mrb[116].mxu0 %v4062_v27  ;;  %v4076_v26 = vld [vmem:[%s4162_s9 + $0x378] ss:$36 sps:$4 sm:$0xff]   ;;  %v4077_v27 = vld [vmem:[%s4162_s9 + $0x2a8] ss:$36 sps:$4 sm:$0xff]  }
 0x10f   : > { %2331 = vmatprep.mubr.bf16.mxu1 %v4063_v32  ;;  %3764 = vmatprep.mubr.bf16.mxu0 %v4065_v33 }
 0x111   : > { %v3374_v38 = vpop.f32.mrb[12].mxu1  ;;  %v3302_v39 = vpop.f32.mrb[12].mxu0 }
 0x112   : > { %v3375_v40 = vpop.f32.mrb[13].mxu1  ;;  %v3303_v41 = vpop.f32.mrb[13].mxu0 }
 0x113   : > { %v4509_v44 = vadd.f32 %v3375_v40, %v3374_v38  ;;  %v3377_v45 = vpop.f32.mrb[14].mxu1  ;;  %v4511_v46 = vadd.f32 %v3303_v41, %v3302_v39  ;;  %v3305_v47 = vpop.f32.mrb[14].mxu0  ;;  %v4080_v38 = vld [vmem:[%s4162_s9 + $0x2f0] ss:$36 sps:$4 sm:$0xff]  }
 0x114   : > { %v3378_v51 = vpop.f32.mrb[15].mxu1  ;;  %v3306_v52 = vpop.f32.mrb[15].mxu0  ;;  %v3239_v39 = vld [vmem:[%s4507_s21 + $0x10] sm:$0xff]  }
 0x115   : > { %v4516_v53 = vadd.f32 %v3378_v51, %v3377_v45  ;;  %v4518_v54 = vadd.f32 %v3306_v52, %v3305_v47  ;;  %v3104_v14 = vunpack.c.l.bf16 %v3239_v39 }
 0x116   : > { %2332 = vmatmul.mubr.bf16.gmra.mrb[120].mxu1 %v4066_v42  ;;  %3765 = vmatmul.mubr.bf16.gmra.mrb[120].mxu0 %v4067_v43  ;;  %v1782_v42 = vadd.f32 %v4485_v21, %v3101_v22 }
 0x117   : > { %2339 = vmatprep.mubr.bf16.mxu1 %v4068_v48  ;;  %3768 = vmatprep.mubr.bf16.mxu0 %v4070_v49  ;;  %v3105_v49 = vunpack.c.h.bf16 %v3239_v39 }
 0x119   : > { %v3396_v57 = vpop.f32.mrb[16].mxu1  ;;  %v3308_v58 = vpop.f32.mrb[16].mxu0 }
 0x11a   : > { %v3397_v59 = vpop.f32.mrb[17].mxu1  ;;  %v3309_v61 = vpop.f32.mrb[17].mxu0 }
 0x11b   : > { %v3398_v2 = vadd.f32 %v3397_v59, %v3396_v57  ;;  %v3399_v3 = vpop.f32.mrb[18].mxu1  ;;  %v4523_v6 = vadd.f32 %v3309_v61, %v3308_v58  ;;  %v3311_v7 = vpop.f32.mrb[18].mxu0  ;;  %v1787_v57 = vadd.f32 %v4491_v30, %v3104_v14 }
 0x11c   : > { %v3400_v11 = vpop.f32.mrb[19].mxu1  ;;  %v3312_v13 = vpop.f32.mrb[19].mxu0 }
 0x11d   : > { %v4529_v16 = vadd.f32 %v3398_v2, %v1771_v1  ;;  %v3401_v17 = vadd.f32 %v3400_v11, %v3399_v3  ;;  %v4531_v18 = vadd.f32 %v3312_v13, %v3311_v7  ;;  %v4085_v1 = vld [vmem:[%s4162_s9 + $0x380] ss:$36 sps:$4 sm:$0xff]   ;;  %v3240_v2 = vld [vmem:[%s4507_s21 + $0x18] sm:$0xff]  }
 0x11e   : > { %2340 = vmatmul.mubr.bf16.gmra.mrb[124].mxu1 %v4071_v63  ;;  %3769 = vmatmul.mubr.bf16.gmra.mrb[124].mxu0 %v4072_v0  ;;  %v4083_v0 = vld [vmem:[%s4162_s9 + $0x40c] ss:$36 sps:$4 sm:$0xff]   ;;  %v3108_v30 = vunpack.c.l.bf16 %v3240_v2 }
 0x11f   : > { %v4533_v19 = vadd.f32 %v3401_v17, %v1774_v15  ;;  %2347 = vmatprep.mubr.bf16.mxu1 %v4073_v8  ;;  %3772 = vmatprep.mubr.bf16.mxu0 %v4075_v9  ;;  %v1790_v8 = vadd.f32 %v4497_v37, %v3105_v49  ;;  %v3109_v15 = vunpack.c.h.bf16 %v3240_v2 }
 0x121   : > { %v3402_v23 = vpop.f32.mrb[20].mxu1  ;;  %v3314_v24 = vpop.f32.mrb[20].mxu0  ;;  %v1798_v39 = vadd.f32 %v4518_v54, %v3109_v15  ;;  %v4091_v54 = vld [vmem:[%s4162_s9 + $0x450] ss:$36 sps:$4 sm:$0xff]  }
 0x122   : > { %v3403_v5 = vpop.f32.mrb[21].mxu1  ;;  %v3315_v25 = vpop.f32.mrb[21].mxu0 }
 0x123   : > { %v3404_v31 = vadd.f32 %v3403_v5, %v3402_v23  ;;  %v3405_v32 = vpop.f32.mrb[22].mxu1  ;;  %v4538_v33 = vadd.f32 %v3315_v25, %v3314_v24  ;;  %v3317_v34 = vpop.f32.mrb[22].mxu0  ;;  %v4086_v23 = vld [vmem:[%s4162_s9 + $0x408] ss:$36 sps:$4 sm:$0xff]   ;;  %v1795_v5 = vadd.f32 %v4511_v46, %v3108_v30 }
 0x124   : > { %v3406_v40 = vpop.f32.mrb[23].mxu1  ;;  %v3318_v41 = vpop.f32.mrb[23].mxu0  ;;  %v4087_v24 = vld [vmem:[%s4162_s9 + $0x3c8] ss:$36 sps:$4 sm:$0xff]  }
 0x125   : > { %v4544_v43 = vadd.f32 %v3404_v31, %v1779_v29  ;;  %v3407_v45 = vadd.f32 %v3406_v40, %v3405_v32  ;;  %v4546_v47 = vadd.f32 %v3318_v41, %v3317_v34  ;;  %v4088_v31 = vld [vmem:[%s4162_s9 + $0x454] ss:$36 sps:$4 sm:$0xff]   ;;  %v3241_v34 = vld [vmem:[%s4507_s21 + $0x20] sm:$0xff]  }
 0x126   : > { %2348 = vmatmul.mubr.bf16.gmra.mrb[128].mxu1 %v4076_v26  ;;  %3773 = vmatmul.mubr.bf16.gmra.mrb[128].mxu0 %v4077_v27  ;;  %v4090_v32 = vld [vmem:[%s4162_s9 + $0x410] ss:$36 sps:$4 sm:$0xff]   ;;  %v3112_v46 = vunpack.c.l.bf16 %v3241_v34  ;;  %v3113_v14 = vunpack.c.h.bf16 %v3241_v34 }
 0x127   : > { %v4548_v48 = vadd.f32 %v3407_v45, %v1782_v42  ;;  %2355 = vmatprep.mubr.bf16.mxu1 %v4078_v35  ;;  %3776 = vmatprep.mubr.bf16.mxu0 %v4080_v38 }
 0x128   : > { %v1806_v2 = vadd.f32 %v4531_v18, %v3113_v14 }
 0x129   : > { %v3408_v50 = vpop.f32.mrb[24].mxu1  ;;  %v3320_v51 = vpop.f32.mrb[24].mxu0 }
 0x12a   : > { %v3409_v21 = vpop.f32.mrb[25].mxu1  ;;  %v3321_v52 = vpop.f32.mrb[25].mxu0 }
 0x12b   : > { %v3410_v58 = vadd.f32 %v3409_v21, %v3408_v50  ;;  %v3411_v59 = vpop.f32.mrb[26].mxu1  ;;  %v4553_v61 = vadd.f32 %v3321_v52, %v3320_v51  ;;  %v3323_v63 = vpop.f32.mrb[26].mxu0  ;;  %v4092_v52 = vld [vmem:[%s4162_s9 + $0x458] ss:$36 sps:$4 sm:$0xff]  }
 0x12c   : > { %v3412_v3 = vpop.f32.mrb[27].mxu1  ;;  %v3324_v7 = vpop.f32.mrb[27].mxu0 }
 0x12d   : > { %v4559_v9 = vadd.f32 %v3410_v58, %v1787_v57  ;;  %v3413_v10 = vadd.f32 %v3412_v3, %v3411_v59  ;;  %v4561_v11 = vadd.f32 %v3324_v7, %v3323_v63  ;;  %v3242_v63 = vld [vmem:[%s4507_s21 + $0x28] sm:$0xff]  }
 0x12e   : > { %2356 = vmatmul.mubr.bf16.gmra.mrb[132].mxu1 %v4081_v55  ;;  %3777 = vmatmul.mubr.bf16.gmra.mrb[132].mxu0 %v4082_v56  ;;  %v1803_v55 = vadd.f32 %v4523_v6, %v3112_v46  ;;  %v3117_v30 = vunpack.c.h.bf16 %v3242_v63 }
 0x12f   : > { %v4563_v13 = vadd.f32 %v3413_v10, %v1790_v8  ;;  %2363 = vmatprep.mubr.bf16.mxu1 %v4083_v0  ;;  %3780 = vmatprep.mubr.bf16.mxu0 %v4085_v1  ;;  %v3116_v10 = vunpack.c.l.bf16 %v3242_v63 }
 0x131   : > { %v3414_v17 = vpop.f32.mrb[28].mxu1  ;;  %v3326_v62 = vpop.f32.mrb[28].mxu0 }
 0x132   : > { %v3415_v37 = vpop.f32.mrb[29].mxu1  ;;  %v3327_v22 = vpop.f32.mrb[29].mxu0 }
 0x133   : > { %v3416_v25 = vadd.f32 %v3415_v37, %v3414_v17  ;;  %v3417_v26 = vpop.f32.mrb[30].mxu1  ;;  %v4568_v27 = vadd.f32 %v3327_v22, %v3326_v62  ;;  %v3329_v29 = vpop.f32.mrb[30].mxu0  ;;  %v1811_v22 = vadd.f32 %v4538_v33, %v3116_v10 }
 0x134   : > { %v3418_v35 = vpop.f32.mrb[31].mxu1  ;;  %v3330_v38 = vpop.f32.mrb[31].mxu0 }
 0x135   : > { %v4574_v40 = vadd.f32 %v3416_v25, %v1795_v5  ;;  %v3419_v41 = vadd.f32 %v3418_v35, %v3417_v26  ;;  %v4576_v42 = vadd.f32 %v3330_v38, %v3329_v29  ;;  %v3243_v25 = vld [vmem:[%s4507_s21 + $0x30] sm:$0xff]  }
 0x136   : > { %2364 = vmatmul.mubr.bf16.gmra.mrb[136].mxu1 %v4086_v23  ;;  %3781 = vmatmul.mubr.bf16.gmra.mrb[136].mxu0 %v4087_v24  ;;  %v3120_v38 = vunpack.c.l.bf16 %v3243_v25  ;;  %v3121_v33 = vunpack.c.h.bf16 %v3243_v25 }
 0x137   : > { %v4578_v45 = vadd.f32 %v3419_v41, %v1798_v39  ;;  %2371 = vmatprep.mubr.bf16.mxu1 %v4088_v31  ;;  %3784 = vmatprep.mubr.bf16.mxu0 %v4090_v32  ;;  %v1814_v31 = vadd.f32 %v4546_v47, %v3117_v30 }
 0x139   : > { %v3420_v49 = vpop.f32.mrb[32].mxu1  ;;  %v3332_v50 = vpop.f32.mrb[32].mxu0 }
 0x13a   : > { %v3421_v51 = vpop.f32.mrb[33].mxu1  ;;  %v3333_v21 = vpop.f32.mrb[33].mxu0 }
 0x13b   : > { %v3422_v56 = vadd.f32 %v3421_v51, %v3420_v49  ;;  %v3423_v57 = vpop.f32.mrb[34].mxu1  ;;  %v4583_v58 = vadd.f32 %v3333_v21, %v3332_v50  ;;  %v3335_v59 = vpop.f32.mrb[34].mxu0  ;;  %v1819_v50 = vadd.f32 %v4553_v61, %v3120_v38 }
 0x13c   : > { %v3424_v0 = vpop.f32.mrb[35].mxu1  ;;  %v3336_v1 = vpop.f32.mrb[35].mxu0 }
 0x13d   : > { %v4587_v3 = vadd.f32 %v3422_v56, %v1803_v55  ;;  %v3425_v7 = vadd.f32 %v3424_v0, %v3423_v57  ;;  %v4589_v8 = vadd.f32 %v3336_v1, %v3335_v59  ;;  %v1822_v57 = vadd.f32 %v4561_v11, %v3121_v33 }
 0x13e   : > { %2372 = vmatmul.mubr.bf16.gmra.mrb[140].mxu1 %v4091_v54  ;;  %3785 = vmatmul.mubr.bf16.gmra.mrb[140].mxu0 %v4092_v52  ;;  %v3244_v52 = vld [vmem:[%s4507_s21 + $0x38] sm:$0xff]  }
 0x13f   : > { %v4591_v6 = vadd.f32 %v3425_v7, %v1806_v2  ;;  %v3124_v1 = vunpack.c.l.bf16 %v3244_v52  ;;  %v3125_v61 = vunpack.c.h.bf16 %v3244_v52  ;;  %v3246_v52 = vld [vmem:[%s4507_s21 + $0x48] sm:$0xff]  }
 0x141   : > { %v3426_v15 = vpop.f32.mrb[36].mxu1  ;;  %v3338_v17 = vpop.f32.mrb[36].mxu0  ;;  %v1830_v25 = vadd.f32 %v4576_v42, %v3125_v61 }
 0x142   : > { %v3427_v62 = vpop.f32.mrb[37].mxu1  ;;  %v3339_v37 = vpop.f32.mrb[37].mxu0 }
 0x143   : > { %v3428_v23 = vadd.f32 %v3427_v62, %v3426_v15  ;;  %v3429_v18 = vpop.f32.mrb[38].mxu1  ;;  %v4594_v24 = vadd.f32 %v3339_v37, %v3338_v17  ;;  %v3341_v5 = vpop.f32.mrb[38].mxu0  ;;  %v1827_v17 = vadd.f32 %v4568_v27, %v3124_v1 }
 0x144   : > { %v3430_v26 = vpop.f32.mrb[39].mxu1  ;;  %v3342_v29 = vpop.f32.mrb[39].mxu0 }
 0x145   : > { %v4598_v32 = vadd.f32 %v3428_v23, %v1811_v22  ;;  %v3431_v34 = vadd.f32 %v3430_v26, %v3429_v18  ;;  %v4600_v35 = vadd.f32 %v3342_v29, %v3341_v5  ;;  %v3245_v23 = vld [vmem:[%s4507_s21 + $0x40] sm:$0xff]  }
 0x146   : > { %v3129_v27 = vunpack.c.h.bf16 %v3245_v23 }
 0x147   : > { %v4602_v39 = vadd.f32 %v3431_v34, %v1814_v31  ;;  %v3128_v34 = vunpack.c.l.bf16 %v3245_v23 }
 0x149   : > { %v3432_v41 = vpop.f32.mrb[40].mxu1  ;;  %v3344_v46 = vpop.f32.mrb[40].mxu0 }
 0x14a   : > { %v3433_v14 = vpop.f32.mrb[41].mxu1  ;;  %v3345_v49 = vpop.f32.mrb[41].mxu0 }
 0x14b   : > { %v3434_v51 = vadd.f32 %v3433_v14, %v3432_v41  ;;  %v3435_v21 = vpop.f32.mrb[42].mxu1  ;;  %v4605_v54 = vadd.f32 %v3345_v49, %v3344_v46  ;;  %v3347_v47 = vpop.f32.mrb[42].mxu0  ;;  %v1835_v49 = vadd.f32 %v4583_v58, %v3128_v34 }
 0x14c   : > { %v3436_v55 = vpop.f32.mrb[43].mxu1  ;;  %v3348_v56 = vpop.f32.mrb[43].mxu0 }
 0x14d   : > { %v4609_v59 = vadd.f32 %v3434_v51, %v1819_v50  ;;  %v3437_v63 = vadd.f32 %v3436_v55, %v3435_v21  ;;  %v4611_v0 = vadd.f32 %v3348_v56, %v3347_v47  ;;  %v1838_v47 = vadd.f32 %v4589_v8, %v3129_v27 }
 0x14f   : > { %v4613_v2 = vadd.f32 %v3437_v63, %v1822_v57 }
 0x151   : > { %v3438_v7 = vpop.f32.mrb[44].mxu1  ;;  %v3350_v10 = vpop.f32.mrb[44].mxu0 }
 0x152   : > { %v3439_v30 = vpop.f32.mrb[45].mxu1  ;;  %v3351_v15 = vpop.f32.mrb[45].mxu0 }
 0x153   : > { %v3440_v62 = vadd.f32 %v3439_v30, %v3438_v7  ;;  %v3441_v37 = vpop.f32.mrb[46].mxu1  ;;  %v4616_v22 = vadd.f32 %v3351_v15, %v3350_v10  ;;  %v3353_v11 = vpop.f32.mrb[46].mxu0  ;;  %v3132_v7 = vunpack.c.l.bf16 %v3246_v52  ;;  %v3133_v30 = vunpack.c.h.bf16 %v3246_v52 }
 0x154   : > { %v3442_v18 = vpop.f32.mrb[47].mxu1  ;;  %v3354_v5 = vpop.f32.mrb[47].mxu0 }
 0x155   : > { %v4620_v26 = vadd.f32 %v3440_v62, %v1827_v17  ;;  %v3443_v29 = vadd.f32 %v3442_v18, %v3441_v37  ;;  %v4622_v31 = vadd.f32 %v3354_v5, %v3353_v11  ;;  %v1843_v37 = vadd.f32 %v4594_v24, %v3132_v7 }
 0x156   : > { %v1846_v5 = vadd.f32 %v4600_v35, %v3133_v30 }
 0x157   : > { %v4624_v38 = vadd.f32 %v3443_v29, %v1830_v25  ;;  %v3247_v25 = vld [vmem:[%s4507_s21 + $0x50] sm:$0xff]  }
 0x159   : > { %v3444_v33 = vpop.f32.mrb[48].mxu1  ;;  %v3508_v41 = vpop.f32.mrb[48].mxu0 }
 0x15a   : > { %v3445_v46 = vpop.f32.mrb[49].mxu1  ;;  %v3509_v14 = vpop.f32.mrb[49].mxu0 }
 0x15b   : > { %v3446_v50 = vadd.f32 %v3445_v46, %v3444_v33  ;;  %v3510_v51 = vadd.f32 %v3509_v14, %v3508_v41  ;;  %v3447_v21 = vpop.f32.mrb[50].mxu1  ;;  %v3511_v42 = vpop.f32.mrb[50].mxu0  ;;  %v3136_v46 = vunpack.c.l.bf16 %v3247_v25 }
 0x15c   : > { %v3448_v55 = vpop.f32.mrb[51].mxu1  ;;  %v3512_v56 = vpop.f32.mrb[51].mxu0 }
 0x15d   : > { %v4629_v57 = vadd.f32 %v3446_v50, %v1835_v49  ;;  %v4632_v63 = vadd.f32 %v3510_v51, %v4529_v16  ;;  %v3449_v1 = vadd.f32 %v3448_v55, %v3447_v21  ;;  %v3513_v61 = vadd.f32 %v3512_v56, %v3511_v42 }
 0x15e   : > { %v3137_v49 = vunpack.c.h.bf16 %v3247_v25  ;;  %v1851_v42 = vadd.f32 %v4605_v54, %v3136_v46 }
 0x15f   : > { %v4634_v10 = vadd.f32 %v3449_v1, %v1838_v47  ;;  %v4637_v58 = vadd.f32 %v3513_v61, %v4533_v19  ;;  %v3248_v1 = vld [vmem:[%s4507_s21 + $0x58] sm:$0xff]  }
 0x160   : > { %v1854_v56 = vadd.f32 %v4611_v0, %v3137_v49 }
 0x161   : > { %v3450_v15 = vpop.f32.mrb[52].mxu1  ;;  %v3514_v8 = vpop.f32.mrb[52].mxu0 }
 0x162   : > { %v3451_v17 = vpop.f32.mrb[53].mxu1  ;;  %v3515_v62 = vpop.f32.mrb[53].mxu0 }
 0x163   : > { %v3452_v11 = vadd.f32 %v3451_v17, %v3450_v15  ;;  %v3516_v23 = vadd.f32 %v3515_v62, %v3514_v8  ;;  %v3453_v16 = vpop.f32.mrb[54].mxu1  ;;  %v3517_v18 = vpop.f32.mrb[54].mxu0  ;;  %v3140_v17 = vunpack.c.l.bf16 %v3248_v1 }
 0x164   : > { %v3454_v29 = vpop.f32.mrb[55].mxu1  ;;  %v3518_v34 = vpop.f32.mrb[55].mxu0 }
 0x165   : > { %v4642_v27 = vadd.f32 %v3452_v11, %v1843_v37  ;;  %v4645_v19 = vadd.f32 %v3516_v23, %v4544_v43  ;;  %v3455_v33 = vadd.f32 %v3454_v29, %v3453_v16  ;;  %v3519_v41 = vadd.f32 %v3518_v34, %v3517_v18  ;;  %v3249_v34 = vld [vmem:[%s4507_s21 + $0x60] sm:$0xff]  }
 0x166   : > { %v3141_v37 = vunpack.c.h.bf16 %v3248_v1  ;;  %v1859_v18 = vadd.f32 %v4616_v22, %v3140_v17 }
 0x167   : > { %v4647_v14 = vadd.f32 %v3455_v33, %v1846_v5  ;;  %v4650_v24 = vadd.f32 %v3519_v41, %v4548_v48 }
 0x168   : > { %v1862_v33 = vadd.f32 %v4622_v31, %v3141_v37 }
 0x169   : > { %v3456_v50 = vpop.f32.mrb[56].mxu1  ;;  %v3520_v35 = vpop.f32.mrb[56].mxu0 }
 0x16a   : > { %v3457_v51 = vpop.f32.mrb[57].mxu1  ;;  %v3521_v21 = vpop.f32.mrb[57].mxu0 }
 0x16b   : > { %v3458_v47 = vadd.f32 %v3457_v51, %v3456_v50  ;;  %v3522_v52 = vadd.f32 %v3521_v21, %v3520_v35  ;;  %v3459_v43 = vpop.f32.mrb[58].mxu1  ;;  %v3523_v55 = vpop.f32.mrb[58].mxu0  ;;  %v3144_v51 = vunpack.c.l.bf16 %v3249_v34 }
 0x16c   : > { %v3460_v61 = vpop.f32.mrb[59].mxu1  ;;  %v3524_v7 = vpop.f32.mrb[59].mxu0 }
 0x16d   : > { %v4655_v30 = vadd.f32 %v3458_v47, %v1851_v42  ;;  %v4658_v48 = vadd.f32 %v3522_v52, %v4559_v9  ;;  %v3461_v15 = vadd.f32 %v3460_v61, %v3459_v43  ;;  %v3525_v8 = vadd.f32 %v3524_v7, %v3523_v55 }
 0x16e   : > { %v3145_v42 = vunpack.c.h.bf16 %v3249_v34  ;;  %v1867_v55 = vadd.f32 %v4465_v60, %v3144_v51 }
 0x16f   : > { %v4660_v62 = vadd.f32 %v3461_v15, %v1854_v56  ;;  %v4663_v54 = vadd.f32 %v3525_v8, %v4563_v13  ;;  %v3250_v15 = vld [vmem:[%s4507_s21 + $0x68] sm:$0xff]  }
 0x170   : > { %v1870_v7 = vadd.f32 %v4471_v4, %v3145_v42 }
 0x171   : > { %v3462_v11 = vpop.f32.mrb[60].mxu1  ;;  %v3526_v0 = vpop.f32.mrb[60].mxu0 }
 0x172   : > { %v3463_v23 = vpop.f32.mrb[61].mxu1  ;;  %v3527_v16 = vpop.f32.mrb[61].mxu0 }
 0x173   : > { %v3464_v5 = vadd.f32 %v3463_v23, %v3462_v11  ;;  %v3528_v25 = vadd.f32 %v3527_v16, %v3526_v0  ;;  %v3465_v9 = vpop.f32.mrb[62].mxu1  ;;  %v3529_v29 = vpop.f32.mrb[62].mxu0  ;;  %v3148_v23 = vunpack.c.l.bf16 %v3250_v15 }
 0x174   : > { %v3466_v41 = vpop.f32.mrb[63].mxu1  ;;  %v3530_v46 = vpop.f32.mrb[63].mxu0 }
 0x175   : > { %v4668_v49 = vadd.f32 %v3464_v5, %v1859_v18  ;;  %v4671_v13 = vadd.f32 %v3528_v25, %v4574_v40  ;;  %v3467_v50 = vadd.f32 %v3466_v41, %v3465_v9  ;;  %v3531_v35 = vadd.f32 %v3530_v46, %v3529_v29 }
 0x176   : > { %v3149_v18 = vunpack.c.h.bf16 %v3250_v15  ;;  %v1875_v29 = vadd.f32 %v4477_v12, %v3148_v23 }
 0x177   : > { %v4673_v21 = vadd.f32 %v3467_v50, %v1862_v33  ;;  %v4676_v22 = vadd.f32 %v3531_v35, %v4578_v45  ;;  %v3251_v50 = vld [vmem:[%s4507_s21 + $0x70] sm:$0xff]  }
 0x178   : > { %v1878_v46 = vadd.f32 %v4483_v20, %v3149_v18 }
 0x179   : > { %v3468_v47 = vpop.f32.mrb[64].mxu1  ;;  %v3532_v52 = vpop.f32.mrb[64].mxu0 }
 0x17a   : > { %v3469_v31 = vpop.f32.mrb[65].mxu1  ;;  %v3533_v43 = vpop.f32.mrb[65].mxu0 }
 0x17b   : > { %v3470_v56 = vadd.f32 %v3469_v31, %v3468_v47  ;;  %v3534_v1 = vadd.f32 %v3533_v43, %v3532_v52  ;;  %v3471_v40 = vpop.f32.mrb[66].mxu1  ;;  %v3535_v61 = vpop.f32.mrb[66].mxu0  ;;  %v3152_v31 = vunpack.c.l.bf16 %v3251_v50 }
 0x17c   : > { %v3472_v8 = vpop.f32.mrb[67].mxu1  ;;  %v3536_v17 = vpop.f32.mrb[67].mxu0 }
 0x17d   : > { %v4681_v37 = vadd.f32 %v3470_v56, %v1867_v55  ;;  %v4684_v45 = vadd.f32 %v3534_v1, %v4587_v3  ;;  %v3473_v11 = vadd.f32 %v3472_v8, %v3471_v40  ;;  %v3537_v0 = vadd.f32 %v3536_v17, %v3535_v61 }
 0x17e   : > { %v3153_v55 = vunpack.c.h.bf16 %v3251_v50  ;;  %v1883_v61 = vadd.f32 %v4489_v28, %v3152_v31 }
 0x17f   : > { %v4686_v16 = vadd.f32 %v3473_v11, %v1870_v7  ;;  %v4689_v60 = vadd.f32 %v3537_v0, %v4591_v6  ;;  %v3252_v11 = vld [vmem:[%s4507_s21 + $0x78] sm:$0xff]  }
 0x180   : > { %v1886_v17 = vadd.f32 %v4495_v36, %v3153_v55 }
 0x181   : > { %v3474_v5 = vpop.f32.mrb[68].mxu1  ;;  %v3538_v4 = vpop.f32.mrb[68].mxu0 }
 0x182   : > { %v3475_v25 = vpop.f32.mrb[69].mxu1  ;;  %v3539_v9 = vpop.f32.mrb[69].mxu0 }
 0x183   : > { %v3476_v34 = vadd.f32 %v3475_v25, %v3474_v5  ;;  %v3540_v33 = vadd.f32 %v3539_v9, %v3538_v4  ;;  %v3477_v3 = vpop.f32.mrb[70].mxu1  ;;  %v3541_v41 = vpop.f32.mrb[70].mxu0  ;;  %v3156_v25 = vunpack.c.l.bf16 %v3252_v11 }
 0x184   : > { %v3478_v35 = vpop.f32.mrb[71].mxu1  ;;  %v3542_v51 = vpop.f32.mrb[71].mxu0 }
 0x185   : > { %v4694_v42 = vadd.f32 %v3476_v34, %v1875_v29  ;;  %v4697_v6 = vadd.f32 %v3540_v33, %v4598_v32  ;;  %v3479_v47 = vadd.f32 %v3478_v35, %v3477_v3  ;;  %v3543_v52 = vadd.f32 %v3542_v51, %v3541_v41 }
 0x186   : > { %v3157_v29 = vunpack.c.h.bf16 %v3252_v11  ;;  %v1891_v41 = vadd.f32 %v4509_v44, %v3156_v25 }
 0x187   : > { %v4699_v43 = vadd.f32 %v3479_v47, %v1878_v46  ;;  %v4702_v12 = vadd.f32 %v3543_v52, %v4602_v39 }
 0x188   : > { %v1894_v51 = vadd.f32 %v4516_v53, %v3157_v29 }
 0x189   : > { %v3480_v56 = vpop.f32.mrb[72].mxu1  ;;  %v3544_v20 = vpop.f32.mrb[72].mxu0 }
 0x18a   : > { %v3481_v1 = vpop.f32.mrb[73].mxu1  ;;  %v3545_v40 = vpop.f32.mrb[73].mxu0 }
 0x18b   : > { %v3482_v7 = vadd.f32 %v3481_v1, %v3480_v56  ;;  %v3546_v15 = vadd.f32 %v3545_v40, %v3544_v20  ;;  %v3483_v32 = vpop.f32.mrb[74].mxu1  ;;  %v3547_v8 = vpop.f32.mrb[74].mxu0 }
 0x18c   : > { %v3484_v0 = vpop.f32.mrb[75].mxu1  ;;  %v3548_v23 = vpop.f32.mrb[75].mxu0 }
 0x18d   : > { %v4707_v18 = vadd.f32 %v3482_v7, %v1883_v61  ;;  %v4710_v39 = vadd.f32 %v3546_v15, %v4609_v59  ;;  %v3485_v5 = vadd.f32 %v3484_v0, %v3483_v32  ;;  %v3549_v4 = vadd.f32 %v3548_v23, %v3547_v8 }
 0x18f   : > { %v4712_v9 = vadd.f32 %v3485_v5, %v1886_v17  ;;  %v4715_v28 = vadd.f32 %v3549_v4, %v4613_v2 }
 0x191   : > { %v3486_v34 = vpop.f32.mrb[76].mxu1  ;;  %v3550_v33 = vpop.f32.mrb[76].mxu0 }
 0x192   : > { %v3487_v36 = vpop.f32.mrb[77].mxu1  ;;  %v3551_v3 = vpop.f32.mrb[77].mxu0 }
 0x193   : > { %v3488_v46 = vadd.f32 %v3487_v36, %v3486_v34  ;;  %v3552_v50 = vadd.f32 %v3551_v3, %v3550_v33  ;;  %v3489_v35 = vpop.f32.mrb[78].mxu1  ;;  %v3553_v59 = vpop.f32.mrb[78].mxu0 }
 0x194   : > { %v3490_v47 = vpop.f32.mrb[79].mxu1  ;;  %v3554_v52 = vpop.f32.mrb[79].mxu0 }
 0x195   : > { %v4719_v31 = vadd.f32 %v3488_v46, %v1891_v41  ;;  %v4722_v2 = vadd.f32 %v3552_v50, %v4620_v26  ;;  %v3491_v55 = vadd.f32 %v3490_v47, %v3489_v35  ;;  %v3555_v56 = vadd.f32 %v3554_v52, %v3553_v59 }
 0x197   : > { %v4724_v20 = vadd.f32 %v3491_v55, %v1894_v51  ;;  %v4727_v1 = vadd.f32 %v3555_v56, %v4624_v38 }
 0x199   : > { %v3556_v44 = vpop.f32.mrb[80].mxu0  ;;  %v3620_v40 = vpop.f32.mrb[80].mxu1 }
 0x19a   : > { %v3557_v61 = vpop.f32.mrb[81].mxu0  ;;  %v3621_v7 = vpop.f32.mrb[81].mxu1 }
 0x19b   : > { %v3558_v15 = vadd.f32 %v3557_v61, %v3556_v44  ;;  %v3622_v53 = vadd.f32 %v3621_v7, %v3620_v40  ;;  %v3559_v32 = vpop.f32.mrb[82].mxu0  ;;  %v3623_v8 = vpop.f32.mrb[82].mxu1 }
 0x19c   : > { %v3560_v17 = vpop.f32.mrb[83].mxu0  ;;  %v3624_v11 = vpop.f32.mrb[83].mxu1 }
 0x19d   : > { %v4730_v26 = vadd.f32 %v3558_v15, %v4629_v57  ;;  %v3561_v0 = vadd.f32 %v3560_v17, %v3559_v32  ;;  %v3625_v23 = vadd.f32 %v3624_v11, %v3623_v8  ;;  %v4733_v5 = vadd.f32 %v3622_v53, %v4632_v63 }
 0x19f   : > { %v4736_v38 = vadd.f32 %v3561_v0, %v4634_v10  ;;  %v4739_v4 = vadd.f32 %v3625_v23, %v4637_v58 }
 0x1a1   : > { %v3562_v25 = vpop.f32.mrb[84].mxu0  ;;  %v3626_v29 = vpop.f32.mrb[84].mxu1 }
 0x1a2   : > { %v3563_v34 = vpop.f32.mrb[85].mxu0  ;;  %v3627_v33 = vpop.f32.mrb[85].mxu1 }
 0x1a3   : > { %v3564_v36 = vadd.f32 %v3563_v34, %v3562_v25  ;;  %v3628_v3 = vadd.f32 %v3627_v33, %v3626_v29  ;;  %v3565_v41 = vpop.f32.mrb[86].mxu0  ;;  %v3629_v57 = vpop.f32.mrb[86].mxu1 }
 0x1a4   : > { %v3566_v46 = vpop.f32.mrb[87].mxu0  ;;  %v3630_v50 = vpop.f32.mrb[87].mxu1 }
 0x1a5   : > { %v4742_v35 = vadd.f32 %v3564_v36, %v4642_v27  ;;  %v3567_v63 = vadd.f32 %v3566_v46, %v3565_v41  ;;  %v3631_v59 = vadd.f32 %v3630_v50, %v3629_v57  ;;  %v4745_v10 = vadd.f32 %v3628_v3, %v4645_v19 }
 0x1a7   : > { %v4748_v58 = vadd.f32 %v3567_v63, %v4647_v14  ;;  %v4751_v51 = vadd.f32 %v3631_v59, %v4650_v24 }
 0x1a9   : > { %v3568_v47 = vpop.f32.mrb[88].mxu0  ;;  %v3632_v52 = vpop.f32.mrb[88].mxu1 }
 0x1aa   : > { %v3569_v55 = vpop.f32.mrb[89].mxu0  ;;  %v3633_v56 = vpop.f32.mrb[89].mxu1 }
 0x1ab   : > { %v3570_v44 = vadd.f32 %v3569_v55, %v3568_v47  ;;  %v3634_v40 = vadd.f32 %v3633_v56, %v3632_v52  ;;  %v3571_v61 = vpop.f32.mrb[90].mxu0  ;;  %v3635_v27 = vpop.f32.mrb[90].mxu1 }
 0x1ac   : > { %v3572_v7 = vpop.f32.mrb[91].mxu0  ;;  %v3636_v15 = vpop.f32.mrb[91].mxu1 }
 0x1ad   : > { %v4754_v53 = vadd.f32 %v3570_v44, %v4655_v30  ;;  %v3573_v19 = vadd.f32 %v3572_v7, %v3571_v61  ;;  %v3637_v32 = vadd.f32 %v3636_v15, %v3635_v27  ;;  %v4757_v14 = vadd.f32 %v3634_v40, %v4658_v48 }
 0x1af   : > { %v4760_v24 = vadd.f32 %v3573_v19, %v4660_v62  ;;  %v4763_v8 = vadd.f32 %v3637_v32, %v4663_v54 }
 0x1b1   : > { %v3574_v17 = vpop.f32.mrb[92].mxu0  ;;  %v3638_v11 = vpop.f32.mrb[92].mxu1 }
 0x1b2   : > { %v3575_v0 = vpop.f32.mrb[93].mxu0  ;;  %v3639_v23 = vpop.f32.mrb[93].mxu1 }
 0x1b3   : > { %v3576_v25 = vadd.f32 %v3575_v0, %v3574_v17  ;;  %v3640_v29 = vadd.f32 %v3639_v23, %v3638_v11  ;;  %v3577_v34 = vpop.f32.mrb[94].mxu0  ;;  %v3641_v30 = vpop.f32.mrb[94].mxu1 }
 0x1b4   : > { %v3578_v33 = vpop.f32.mrb[95].mxu0  ;;  %v3642_v36 = vpop.f32.mrb[95].mxu1 }
 0x1b5   : > { %v4766_v3 = vadd.f32 %v3576_v25, %v4668_v49  ;;  %v3579_v48 = vadd.f32 %v3578_v33, %v3577_v34  ;;  %v3643_v41 = vadd.f32 %v3642_v36, %v3641_v30  ;;  %v4769_v62 = vadd.f32 %v3640_v29, %v4671_v13 }
 0x1b7   : > { %v4772_v54 = vadd.f32 %v3579_v48, %v4673_v21  ;;  %v4775_v57 = vadd.f32 %v3643_v41, %v4676_v22 }
 0x1b9   : > { %v3580_v46 = vpop.f32.mrb[96].mxu0  ;;  %v3644_v50 = vpop.f32.mrb[96].mxu1 }
 0x1ba   : > { %v3581_v63 = vpop.f32.mrb[97].mxu0  ;;  %v3645_v59 = vpop.f32.mrb[97].mxu1 }
 0x1bb   : > { %v3582_v47 = vadd.f32 %v3581_v63, %v3580_v46  ;;  %v3646_v52 = vadd.f32 %v3645_v59, %v3644_v50  ;;  %v3583_v55 = vpop.f32.mrb[98].mxu0  ;;  %v3647_v49 = vpop.f32.mrb[98].mxu1 }
 0x1bc   : > { %v3584_v56 = vpop.f32.mrb[99].mxu0  ;;  %v3648_v44 = vpop.f32.mrb[99].mxu1 }
 0x1bd   : > { %v4778_v40 = vadd.f32 %v3582_v47, %v4681_v37  ;;  %v3585_v13 = vadd.f32 %v3584_v56, %v3583_v55  ;;  %v3649_v61 = vadd.f32 %v3648_v44, %v3647_v49  ;;  %v4781_v21 = vadd.f32 %v3646_v52, %v4684_v45 }
 0x1bf   : > { %v4784_v22 = vadd.f32 %v3585_v13, %v4686_v16  ;;  %v4787_v27 = vadd.f32 %v3649_v61, %v4689_v60 }
 0x1c1   : > { %v3586_v7 = vpop.f32.mrb[100].mxu0  ;;  %v3650_v15 = vpop.f32.mrb[100].mxu1 }
 0x1c2   : > { %v3587_v19 = vpop.f32.mrb[101].mxu0  ;;  %v3651_v32 = vpop.f32.mrb[101].mxu1 }
 0x1c3   : > { %v3588_v17 = vadd.f32 %v3587_v19, %v3586_v7  ;;  %v3652_v11 = vadd.f32 %v3651_v32, %v3650_v15  ;;  %v3589_v0 = vpop.f32.mrb[102].mxu0  ;;  %v3653_v37 = vpop.f32.mrb[102].mxu1 }
 0x1c4   : > { %v3590_v23 = vpop.f32.mrb[103].mxu0  ;;  %v3654_v25 = vpop.f32.mrb[103].mxu1 }
 0x1c5   : > { %v4790_v29 = vadd.f32 %v3588_v17, %v4694_v42  ;;  %v3591_v45 = vadd.f32 %v3590_v23, %v3589_v0  ;;  %v3655_v34 = vadd.f32 %v3654_v25, %v3653_v37  ;;  %v4793_v16 = vadd.f32 %v3652_v11, %v4697_v6 }
 0x1c7   : > { %v4796_v60 = vadd.f32 %v3591_v45, %v4699_v43  ;;  %v4799_v30 = vadd.f32 %v3655_v34, %v4702_v12 }
 0x1c9   : > { %v3592_v33 = vpop.f32.mrb[104].mxu0  ;;  %v3656_v36 = vpop.f32.mrb[104].mxu1 }
 0x1ca   : > { %v3593_v48 = vpop.f32.mrb[105].mxu0  ;;  %v3657_v41 = vpop.f32.mrb[105].mxu1 }
 0x1cb   : > { %v3594_v46 = vadd.f32 %v3593_v48, %v3592_v33  ;;  %v3658_v50 = vadd.f32 %v3657_v41, %v3656_v36  ;;  %v3595_v63 = vpop.f32.mrb[106].mxu0  ;;  %v3659_v42 = vpop.f32.mrb[106].mxu1 }
 0x1cc   : > { %v3596_v59 = vpop.f32.mrb[107].mxu0  ;;  %v3660_v47 = vpop.f32.mrb[107].mxu1 }
 0x1cd   : > { %v4802_v52 = vadd.f32 %v3594_v46, %v4707_v18  ;;  %v3597_v6 = vadd.f32 %v3596_v59, %v3595_v63  ;;  %v3661_v55 = vadd.f32 %v3660_v47, %v3659_v42  ;;  %v4805_v43 = vadd.f32 %v3658_v50, %v4710_v39 }
 0x1cf   : > { %v4808_v12 = vadd.f32 %v3597_v6, %v4712_v9  ;;  %v4811_v49 = vadd.f32 %v3661_v55, %v4715_v28 }
 0x1d1   : > { %v3598_v56 = vpop.f32.mrb[108].mxu0  ;;  %v3662_v44 = vpop.f32.mrb[108].mxu1 }
 0x1d2   : > { %v3599_v13 = vpop.f32.mrb[109].mxu0  ;;  %v3663_v61 = vpop.f32.mrb[109].mxu1 }
 0x1d3   : > { %v3600_v7 = vadd.f32 %v3599_v13, %v3598_v56  ;;  %v3664_v15 = vadd.f32 %v3663_v61, %v3662_v44  ;;  %v3601_v19 = vpop.f32.mrb[110].mxu0  ;;  %v3665_v18 = vpop.f32.mrb[110].mxu1 }
 0x1d4   : > { %v3602_v32 = vpop.f32.mrb[111].mxu0  ;;  %v3666_v17 = vpop.f32.mrb[111].mxu1 }
 0x1d5   : > { %v4814_v11 = vadd.f32 %v3600_v7, %v4719_v31  ;;  %v3603_v39 = vadd.f32 %v3602_v32, %v3601_v19  ;;  %v3667_v0 = vadd.f32 %v3666_v17, %v3665_v18  ;;  %v4817_v9 = vadd.f32 %v3664_v15, %v4722_v2 }
 0x1d7   : > { %v4820_v28 = vadd.f32 %v3603_v39, %v4724_v20  ;;  %v4823_v37 = vadd.f32 %v3667_v0, %v4727_v1 }
 0x1d9   : > { %v3668_v23 = vpop.f32.mrb[112].mxu1  ;;  %v3758_v25 = vpop.f32.mrb[112].mxu0 }
 0x1da   : > { %v2423_v45 = vadd.f32 %v3758_v25, %v4745_v10  ;;  %v3669_v34 = vpop.f32.mrb[113].mxu1  ;;  %v2414_v33 = vpop.f32.mrb[113].mxu0 }
 0x1db   : > { %v3670_v31 = vadd.f32 %v3669_v34, %v3668_v23  ;;  %v2415_v36 = vadd.f32 %v2414_v33, %v4733_v5  ;;  %v3671_v48 = vpop.f32.mrb[114].mxu1  ;;  %v3759_v41 = vpop.f32.mrb[114].mxu0 }
 0x1dc   : > { %v2426_v2 = vadd.f32 %v3759_v41, %v4751_v51  ;;  %v3672_v46 = vpop.f32.mrb[115].mxu1  ;;  %v2417_v20 = vpop.f32.mrb[115].mxu0  ;;  %v2543_v42 = vmax.f32 %v2423_v45, 0.0 }
 0x1dd   : > { %v3673_v50 = vadd.f32 %v3672_v46, %v3671_v48  ;;  %v2418_v1 = vadd.f32 %v2417_v20, %v4739_v4  ;;  %v4830_v63 = vadd.f32 %v3670_v31, %v4730_v26  ;;  %v2541_v59 = vmax.f32 %v2415_v36, 0.0 }
 0x1de   : > { %v2544_v10 = vmax.f32 %v2426_v2, 0.0 }
 0x1df   : > { %v2542_v5 = vmax.f32 %v2418_v1, 0.0  ;;  %v4840_v51 = vadd.f32 %v3673_v50, %v4736_v38 }
 0x1e0   : > { %v3166_v47 = vpack.c.bf16 %v2544_v10, %v2543_v42 }
 0x1e1   : > { %v3161_v4 = vpack.c.bf16 %v2542_v5, %v2541_v59  ;;  %v3674_v6 = vpop.f32.mrb[116].mxu1  ;;  %v3762_v26 = vpop.f32.mrb[116].mxu0 }
 0x1e2   : > { %3253 = vst [vmem:[%s4837_s23 + $0x8] sm:$0xff] %v3166_v47   ;;  %v2439_v55 = vadd.f32 %v3762_v26, %v4769_v62  ;;  %v3675_v56 = vpop.f32.mrb[117].mxu1  ;;  %v2430_v44 = vpop.f32.mrb[117].mxu0 }
 0x1e3   : > { %3162 = vst [vmem:[%s4837_s23] sm:$0xff] %v3161_v4   ;;  %v3676_v13 = vadd.f32 %v3675_v56, %v3674_v6  ;;  %v2431_v61 = vadd.f32 %v2430_v44, %v4757_v14  ;;  %v3677_v7 = vpop.f32.mrb[118].mxu1  ;;  %v3763_v15 = vpop.f32.mrb[118].mxu0 }
 0x1e4   : > { %v2442_v19 = vadd.f32 %v3763_v15, %v4775_v57  ;;  %v3678_v38 = vpop.f32.mrb[119].mxu1  ;;  %v2433_v18 = vpop.f32.mrb[119].mxu0  ;;  %v2547_v62 = vmax.f32 %v2439_v55, 0.0 }
 0x1e5   : > { %v3679_v32 = vadd.f32 %v3678_v38, %v3677_v7  ;;  %v2434_v17 = vadd.f32 %v2433_v18, %v4763_v8  ;;  %v2326_v39 = vadd.f32 %v3676_v13, %v4742_v35  ;;  %v2545_v23 = vmax.f32 %v2431_v61, 0.0 }
 0x1e6   : > { %v2548_v0 = vmax.f32 %v2442_v19, 0.0 }
 0x1e7   : > { %v2546_v25 = vmax.f32 %v2434_v17, 0.0  ;;  %v2329_v45 = vadd.f32 %v3679_v32, %v4748_v58 }
 0x1e8   : > { %v3176_v14 = vpack.c.bf16 %v2548_v0, %v2547_v62 }
 0x1e9   : > { %v3171_v34 = vpack.c.bf16 %v2546_v25, %v2545_v23  ;;  %v3680_v33 = vpop.f32.mrb[120].mxu1  ;;  %v3766_v31 = vpop.f32.mrb[120].mxu0 }
 0x1ea   : > { %3255 = vst [vmem:[%s4837_s23 + $0x18] sm:$0xff] %v3176_v14   ;;  %v2455_v57 = vadd.f32 %v3766_v31, %v4793_v16  ;;  %v3681_v36 = vpop.f32.mrb[121].mxu1  ;;  %v2446_v48 = vpop.f32.mrb[121].mxu0 }
 0x1eb   : > { %3254 = vst [vmem:[%s4837_s23 + $0x10] sm:$0xff] %v3171_v34   ;;  %v3682_v41 = vadd.f32 %v3681_v36, %v3680_v33  ;;  %v2447_v8 = vadd.f32 %v2446_v48, %v4781_v21  ;;  %v3683_v35 = vpop.f32.mrb[122].mxu1  ;;  %v3767_v2 = vpop.f32.mrb[122].mxu0 }
 0x1ec   : > { %v2458_v46 = vadd.f32 %v3767_v2, %v4799_v30  ;;  %v3684_v20 = vpop.f32.mrb[123].mxu1  ;;  %v2449_v58 = vpop.f32.mrb[123].mxu0  ;;  %v2551_v16 = vmax.f32 %v2455_v57, 0.0 }
 0x1ed   : > { %v3685_v50 = vadd.f32 %v3684_v20, %v3683_v35  ;;  %v2450_v1 = vadd.f32 %v2449_v58, %v4787_v27  ;;  %v4857_v42 = vadd.f32 %v3682_v41, %v4754_v53  ;;  %v2549_v59 = vmax.f32 %v2447_v8, 0.0 }
 0x1ee   : > { %v2552_v10 = vmax.f32 %v2458_v46, 0.0 }
 0x1ef   : > { %v2550_v5 = vmax.f32 %v2450_v1, 0.0  ;;  %v4860_v21 = vadd.f32 %v3685_v50, %v4760_v24 }
 0x1f0   : > { %v3186_v47 = vpack.c.bf16 %v2552_v10, %v2551_v16 }
 0x1f1   : > { %v3181_v4 = vpack.c.bf16 %v2550_v5, %v2549_v59  ;;  %v3686_v6 = vpop.f32.mrb[124].mxu1  ;;  %v3770_v30 = vpop.f32.mrb[124].mxu0 }
 0x1f2   : > { %3257 = vst [vmem:[%s4837_s23 + $0x28] sm:$0xff] %v3186_v47   ;;  %v2471_v26 = vadd.f32 %v3770_v30, %v4817_v9  ;;  %v3687_v55 = vpop.f32.mrb[125].mxu1  ;;  %v2462_v56 = vpop.f32.mrb[125].mxu0 }
 0x1f3   : > { %3256 = vst [vmem:[%s4837_s23 + $0x20] sm:$0xff] %v3181_v4   ;;  %v3688_v27 = vadd.f32 %v3687_v55, %v3686_v6  ;;  %v2463_v53 = vadd.f32 %v2462_v56, %v4805_v43  ;;  %v3689_v44 = vpop.f32.mrb[126].mxu1  ;;  %v3771_v13 = vpop.f32.mrb[126].mxu0 }
 0x1f4   : > { %v2474_v61 = vadd.f32 %v3771_v13, %v4823_v37  ;;  %v3690_v24 = vpop.f32.mrb[127].mxu1  ;;  %v2465_v7 = vpop.f32.mrb[127].mxu0  ;;  %v2555_v9 = vmax.f32 %v2471_v26, 0.0 }
 0x1f5   : > { %v3691_v15 = vadd.f32 %v3690_v24, %v3689_v44  ;;  %v2466_v19 = vadd.f32 %v2465_v7, %v4811_v49  ;;  %v2342_v38 = vadd.f32 %v3688_v27, %v4766_v3  ;;  %v2553_v32 = vmax.f32 %v2463_v53, 0.0 }
 0x1f6   : > { %v2556_v18 = vmax.f32 %v2474_v61, 0.0 }
 0x1f7   : > { %v2554_v17 = vmax.f32 %v2466_v19, 0.0  ;;  %v2345_v62 = vadd.f32 %v3691_v15, %v4772_v54 }
 0x1f8   : > { %v3196_v43 = vpack.c.bf16 %v2556_v18, %v2555_v9 }
 0x1f9   : > { %v3191_v0 = vpack.c.bf16 %v2554_v17, %v2553_v32  ;;  %v3692_v23 = vpop.f32.mrb[128].mxu1  ;;  %v3774_v25 = vpop.f32.mrb[128].mxu0 }
 0x1fa   : > { %3259 = vst [vmem:[%s4837_s23 + $0x38] sm:$0xff] %v3196_v43   ;;  %v2487_v37 = vadd.f32 %v3774_v25, %v2326_v39  ;;  %v3693_v14 = vpop.f32.mrb[129].mxu1  ;;  %v2478_v34 = vpop.f32.mrb[129].mxu0 }
 0x1fb   : > { %3258 = vst [vmem:[%s4837_s23 + $0x30] sm:$0xff] %v3191_v0   ;;  %v3694_v33 = vadd.f32 %v3693_v14, %v3692_v23  ;;  %v2479_v49 = vadd.f32 %v2478_v34, %v4830_v63  ;;  %v3695_v31 = vpop.f32.mrb[130].mxu1  ;;  %v3775_v3 = vpop.f32.mrb[130].mxu0 }
 0x1fc   : > { %v2490_v57 = vadd.f32 %v3775_v3, %v2329_v45  ;;  %v3696_v36 = vpop.f32.mrb[131].mxu1  ;;  %v2481_v48 = vpop.f32.mrb[131].mxu0  ;;  %v2559_v35 = vmax.f32 %v2487_v37, 0.0 }
 0x1fd   : > { %v3697_v41 = vadd.f32 %v3696_v36, %v3695_v31  ;;  %v2482_v54 = vadd.f32 %v2481_v48, %v4840_v51  ;;  %v2350_v8 = vadd.f32 %v3694_v33, %v4778_v40  ;;  %v2557_v2 = vmax.f32 %v2479_v49, 0.0 }
 0x1fe   : > { %v2560_v39 = vmax.f32 %v2490_v57, 0.0 }
 0x1ff   : > { %v2558_v46 = vmax.f32 %v2482_v54, 0.0  ;;  %v2353_v20 = vadd.f32 %v3697_v41, %v4784_v22 }
 0x200   : > { %v3206_v58 = vpack.c.bf16 %v2560_v39, %v2559_v35 }
 0x201   : > { %v3201_v63 = vpack.c.bf16 %v2558_v46, %v2557_v2  ;;  %v3698_v50 = vpop.f32.mrb[132].mxu1  ;;  %v3778_v1 = vpop.f32.mrb[132].mxu0 }
 0x202   : > { %3261 = vst [vmem:[%s4837_s23 + $0x48] sm:$0xff] %v3206_v58   ;;  %v2503_v45 = vadd.f32 %v3778_v1, %v2342_v38  ;;  %v3699_v16 = vpop.f32.mrb[133].mxu1  ;;  %v2494_v10 = vpop.f32.mrb[133].mxu0 }
 0x203   : > { %3260 = vst [vmem:[%s4837_s23 + $0x40] sm:$0xff] %v3201_v63   ;;  %v3700_v59 = vadd.f32 %v3699_v16, %v3698_v50  ;;  %v2495_v51 = vadd.f32 %v2494_v10, %v4857_v42  ;;  %v3701_v5 = vpop.f32.mrb[134].mxu1  ;;  %v3779_v40 = vpop.f32.mrb[134].mxu0 }
 0x204   : > { %v2506_v47 = vadd.f32 %v3779_v40, %v2345_v62  ;;  %v3702_v4 = vpop.f32.mrb[135].mxu1  ;;  %v2497_v6 = vpop.f32.mrb[135].mxu0  ;;  %v2563_v55 = vmax.f32 %v2503_v45, 0.0 }
 0x205   : > { %v3703_v30 = vadd.f32 %v3702_v4, %v3701_v5  ;;  %v2498_v22 = vadd.f32 %v2497_v6, %v4860_v21  ;;  %v2358_v26 = vadd.f32 %v3700_v59, %v4790_v29  ;;  %v2561_v27 = vmax.f32 %v2495_v51, 0.0 }
 0x206   : > { %v2564_v56 = vmax.f32 %v2506_v47, 0.0 }
 0x207   : > { %v2562_v53 = vmax.f32 %v2498_v22, 0.0  ;;  %v2361_v44 = vadd.f32 %v3703_v30, %v4796_v60 }
 0x208   : > { %v3216_v13 = vpack.c.bf16 %v2564_v56, %v2563_v55 }
 0x209   : > { %v3211_v42 = vpack.c.bf16 %v2562_v53, %v2561_v27  ;;  %v3704_v61 = vpop.f32.mrb[136].mxu1  ;;  %v3782_v24 = vpop.f32.mrb[136].mxu0 }
 0x20a   : > { %3263 = vst [vmem:[%s4837_s23 + $0x58] sm:$0xff] %v3216_v13   ;;  %v2519_v7 = vadd.f32 %v3782_v24, %v2358_v26  ;;  %v3705_v15 = vpop.f32.mrb[137].mxu1  ;;  %v2510_v19 = vpop.f32.mrb[137].mxu0 }
 0x20b   : > { %3262 = vst [vmem:[%s4837_s23 + $0x50] sm:$0xff] %v3211_v42   ;;  %v3706_v38 = vadd.f32 %v3705_v15, %v3704_v61  ;;  %v2511_v9 = vadd.f32 %v2510_v19, %v2350_v8  ;;  %v3707_v21 = vpop.f32.mrb[138].mxu1  ;;  %v3783_v18 = vpop.f32.mrb[138].mxu0 }
 0x20c   : > { %v2522_v29 = vadd.f32 %v3783_v18, %v2361_v44  ;;  %v3708_v32 = vpop.f32.mrb[139].mxu1  ;;  %v2513_v17 = vpop.f32.mrb[139].mxu0  ;;  %v2567_v0 = vmax.f32 %v2519_v7, 0.0 }
 0x20d   : > { %v3709_v62 = vadd.f32 %v3708_v32, %v3707_v21  ;;  %v2514_v60 = vadd.f32 %v2513_v17, %v2353_v20  ;;  %v2366_v43 = vadd.f32 %v3706_v38, %v4802_v52  ;;  %v2565_v25 = vmax.f32 %v2511_v9, 0.0 }
 0x20e   : > { %v2568_v23 = vmax.f32 %v2522_v29, 0.0 }
 0x20f   : > { %v2566_v37 = vmax.f32 %v2514_v60, 0.0  ;;  %v2369_v14 = vadd.f32 %v3709_v62, %v4808_v12 }
 0x210   : > { %v3226_v34 = vpack.c.bf16 %v2568_v23, %v2567_v0 }
 0x211   : > { %v3221_v33 = vpack.c.bf16 %v2566_v37, %v2565_v25  ;;  %v3710_v49 = vpop.f32.mrb[140].mxu1  ;;  %v3786_v31 = vpop.f32.mrb[140].mxu0 }
 0x212   : > { %3265 = vst [vmem:[%s4837_s23 + $0x68] sm:$0xff] %v3226_v34   ;;  %v3711_v3 = vpop.f32.mrb[141].mxu1  ;;  %v2526_v57 = vpop.f32.mrb[141].mxu0 }
 0x213   : > { %3264 = vst [vmem:[%s4837_s23 + $0x60] sm:$0xff] %v3221_v33   ;;  %v3712_v36 = vadd.f32 %v3711_v3, %v3710_v49  ;;  %v2527_v48 = vadd.f32 %v2526_v57, %v2366_v43  ;;  %v3713_v41 = vpop.f32.mrb[142].mxu1  ;;  %v3787_v54 = vpop.f32.mrb[142].mxu0 }
 0x214   : > { %v3714_v52 = vpop.f32.mrb[143].mxu1  ;;  %v2529_v8 = vpop.f32.mrb[143].mxu0 }
 0x215   : > { %v2374_v35 = vadd.f32 %v3712_v36, %v4814_v11  ;;  %v3715_v39 = vadd.f32 %v3714_v52, %v3713_v41  ;;  %v2530_v12 = vadd.f32 %v2529_v8, %v2369_v14  ;;  %v2569_v46 = vmax.f32 %v2527_v48, 0.0 }
 0x217   : > { %v2535_v2 = vadd.f32 %v3786_v31, %v2374_v35  ;;  %v2377_v20 = vadd.f32 %v3715_v39, %v4820_v28  ;;  %v2570_v58 = vmax.f32 %v2530_v12, 0.0 }
 0x219   : > { %v2538_v63 = vadd.f32 %v3787_v54, %v2377_v20  ;;  %v3231_v50 = vpack.c.bf16 %v2570_v58, %v2569_v46  ;;  %v2571_v1 = vmax.f32 %v2535_v2, 0.0 }
 0x21b   : > { %v2572_v45 = vmax.f32 %v2538_v63, 0.0  ;;  %3266 = vst [vmem:[%s4837_s23 + $0x70] sm:$0xff] %v3231_v50  }
 0x21d   : > { %v3236_v16 = vpack.c.bf16 %v2572_v45, %v2571_v1 }
 0x21f   : > { %3267 = vst [vmem:[%s4837_s23 + $0x78] sm:$0xff] %v3236_v16  }
 0x220 PF: > { %s13_s12 = sadd.s32 1, %s4099_s12  }
 0x221   : > { %p10_p4 = scmp.ge.s32.totalorder %s13_s12, 4  }
 0x223   :  { %12 = sbr.rel (!%p10_p4) target bundleno = 1 (0x1), region = 65 }

// kernel: resnet_qnn_forward.15
= control target key start
LH: loop header
LB: loop body
LE: loop exit
PB: predicated region body
PF: predicated region fallthrough
CT: control target
= control target key end

     0   :  { %s2889_s1 = inlined_call_operand.vmem [shape: bf16[1152,128], index: 1, kind: input, shape index: {}]   ;;  %s2890_s0 = inlined_call_operand.vmem [shape: bf16[128,1152], index: 0, kind: input, shape index: {}]   ;;  %s2891_s2 = inlined_call_operand.vmem [shape: bf16[128,128], index: 2, kind: output, shape index: {}]  }
   0x1   :  { %v2164_v0 = vld [vmem:[%s2889_s1 + $0x40] sm:$0xff]   ;;  %v2168_v4 = vld [vmem:[%s2889_s1 + $0x48] sm:$0xff]   ;;  %v2172_v8 = vld [vmem:[%s2889_s1 + $0x50] sm:$0xff]  }
   0x2   :  { %v2165_v1 = vld [vmem:[%s2889_s1 + $0xc0] sm:$0xff]   ;;  %1844 = vmatprep.subr.bf16.mxu0 %v2164_v0  ;;  %v2169_v5 = vld [vmem:[%s2889_s1 + $0xc8] sm:$0xff]   ;;  %v2173_v9 = vld [vmem:[%s2889_s1 + $0xd0] sm:$0xff]  }
   0x3   :  { %v2166_v2 = vld [vmem:[%s2889_s1] sm:$0xff]   ;;  %1908 = vmatprep.subr.bf16.mxu1 %v2165_v1  ;;  %v2170_v6 = vld [vmem:[%s2889_s1 + $0x8] sm:$0xff]   ;;  %v2174_v10 = vld [vmem:[%s2889_s1 + $0x10] sm:$0xff]  }
   0x4   :  { %v2167_v3 = vld [vmem:[%s2889_s1 + $0x80] sm:$0xff]   ;;  %1845 = vmatpush3.bf16.msra.mxu0 %v2166_v2  ;;  %v2171_v7 = vld [vmem:[%s2889_s1 + $0x88] sm:$0xff]   ;;  %v2175_v11 = vld [vmem:[%s2889_s1 + $0x90] sm:$0xff]  }
   0x5   :  { %1909 = vmatpush3.bf16.msra.mxu1 %v2167_v3  ;;  %1846 = vmatprep.subr.bf16.mxu0 %v2168_v4  ;;  %v2176_v12 = vld [vmem:[%s2889_s1 + $0x58] sm:$0xff]   ;;  %v2180_v16 = vld [vmem:[%s2889_s1 + $0x60] sm:$0xff]   ;;  %v2184_v20 = vld [vmem:[%s2889_s1 + $0x68] sm:$0xff]  }
   0x6   :  { %1910 = vmatprep.subr.bf16.mxu1 %v2169_v5  ;;  %v2177_v13 = vld [vmem:[%s2889_s1 + $0xd8] sm:$0xff]   ;;  %v2181_v17 = vld [vmem:[%s2889_s1 + $0xe0] sm:$0xff]   ;;  %v2185_v21 = vld [vmem:[%s2889_s1 + $0xe8] sm:$0xff]  }
   0x7   :  { %v2178_v14 = vld [vmem:[%s2889_s1 + $0x18] sm:$0xff]   ;;  %v2182_v18 = vld [vmem:[%s2889_s1 + $0x20] sm:$0xff]   ;;  %v2186_v22 = vld [vmem:[%s2889_s1 + $0x28] sm:$0xff]  }
   0x8   :  { %1847 = vmatpush3.bf16.msra.mxu0 %v2170_v6  ;;  %v2179_v15 = vld [vmem:[%s2889_s1 + $0x98] sm:$0xff]   ;;  %v2183_v19 = vld [vmem:[%s2889_s1 + $0xa0] sm:$0xff]   ;;  %v2187_v23 = vld [vmem:[%s2889_s1 + $0xa8] sm:$0xff]  }
   0x9   :  { %1911 = vmatpush3.bf16.msra.mxu1 %v2171_v7  ;;  %1848 = vmatprep.subr.bf16.mxu0 %v2172_v8  ;;  %v2188_v24 = vld [vmem:[%s2889_s1 + $0x70] sm:$0xff]   ;;  %v2192_v28 = vld [vmem:[%s2889_s1 + $0x78] sm:$0xff]   ;;  %v2196_v32 = vld [vmem:[%s2890_s0] ss:$36 sps:$4 sm:$0xff]  }
   0xa   :  { %1912 = vmatprep.subr.bf16.mxu1 %v2173_v9  ;;  %v2189_v25 = vld [vmem:[%s2889_s1 + $0xf0] sm:$0xff]   ;;  %v2193_v29 = vld [vmem:[%s2889_s1 + $0xf8] sm:$0xff]   ;;  %v2198_v33 = vld [vmem:[%s2890_s0 + $0x4] ss:$36 sps:$4 sm:$0xff]  }
   0xb   :  { %v2190_v26 = vld [vmem:[%s2889_s1 + $0x30] sm:$0xff]   ;;  %v2194_v30 = vld [vmem:[%s2889_s1 + $0x38] sm:$0xff]   ;;  %v2199_v34 = vld [vmem:[%s2890_s0 + $0x8] ss:$36 sps:$4 sm:$0xff]   ;;  %1068 = vmatprep.mubr.bf16.mxu0 %v2198_v33 }
   0xc   :  { %1849 = vmatpush3.bf16.msra.mxu0 %v2174_v10  ;;  %v2191_v27 = vld [vmem:[%s2889_s1 + $0xb0] sm:$0xff]   ;;  %v2195_v31 = vld [vmem:[%s2889_s1 + $0xb8] sm:$0xff]   ;;  %v2202_v36 = vld [vmem:[%s2889_s1 + $0x140] sm:$0xff]  }
   0xd   :  { %1913 = vmatpush3.bf16.msra.mxu1 %v2175_v11  ;;  %1850 = vmatprep.subr.bf16.mxu0 %v2176_v12  ;;  %v2201_v35 = vld [vmem:[%s2890_s0 + $0xc] ss:$36 sps:$4 sm:$0xff]   ;;  %v2203_v37 = vld [vmem:[%s2889_s1 + $0x1c0] sm:$0xff]   ;;  %v2208_v41 = vld [vmem:[%s2890_s0 + $0x54] ss:$36 sps:$4 sm:$0xff]  }
   0xe   :  { %1914 = vmatprep.subr.bf16.mxu1 %v2177_v13  ;;  %1165 = vmatprep.mubr.bf16.mxu1 %v2201_v35  ;;  %v2204_v38 = vld [vmem:[%s2889_s1 + $0x100] sm:$0xff]   ;;  %v2206_v40 = vld [vmem:[%s2890_s0 + $0x4c] ss:$36 sps:$4 sm:$0xff]   ;;  %v2216_v48 = vld [vmem:[%s2890_s0 + $0x94] ss:$36 sps:$4 sm:$0xff]  }
   0xf   :  { %v2205_v39 = vld [vmem:[%s2889_s1 + $0x180] sm:$0xff]   ;;  %v2210_v42 = vld [vmem:[%s2890_s0 + $0x48] ss:$36 sps:$4 sm:$0xff]   ;;  %v2211_v43 = vld [vmem:[%s2890_s0 + $0x50] ss:$36 sps:$4 sm:$0xff]  }
  0x10   :  { %1851 = vmatpush3.bf16.msra.mxu0 %v2178_v14  ;;  %v2212_v44 = vld [vmem:[%s2889_s1 + $0x148] sm:$0xff]   ;;  %v2218_v49 = vld [vmem:[%s2890_s0 + $0x9c] ss:$36 sps:$4 sm:$0xff]   ;;  %v2220_v50 = vld [vmem:[%s2890_s0 + $0x90] ss:$36 sps:$4 sm:$0xff]  }
  0x11   :  { %1915 = vmatpush3.bf16.msra.mxu1 %v2179_v15  ;;  %1852 = vmatprep.subr.bf16.mxu0 %v2180_v16  ;;  %v2213_v45 = vld [vmem:[%s2889_s1 + $0x1c8] sm:$0xff]   ;;  %v2221_v51 = vld [vmem:[%s2890_s0 + $0x98] ss:$36 sps:$4 sm:$0xff]   ;;  %v2222_v52 = vld [vmem:[%s2889_s1 + $0x150] sm:$0xff]  }
  0x12   :  { %1916 = vmatprep.subr.bf16.mxu1 %v2181_v17  ;;  %v2214_v46 = vld [vmem:[%s2889_s1 + $0x108] sm:$0xff]   ;;  %v2223_v53 = vld [vmem:[%s2889_s1 + $0x1d0] sm:$0xff]   ;;  %v2226_v56 = vld [vmem:[%s2890_s0 + $0xdc] ss:$36 sps:$4 sm:$0xff]  }
  0x13   :  { %v2215_v47 = vld [vmem:[%s2889_s1 + $0x188] sm:$0xff]   ;;  %v2224_v54 = vld [vmem:[%s2889_s1 + $0x110] sm:$0xff]   ;;  %v2230_v58 = vld [vmem:[%s2890_s0 + $0xd8] ss:$36 sps:$4 sm:$0xff]  }
  0x14   :  { %1853 = vmatpush3.bf16.msra.mxu0 %v2182_v18  ;;  %v2225_v55 = vld [vmem:[%s2889_s1 + $0x190] sm:$0xff]   ;;  %v2228_v57 = vld [vmem:[%s2890_s0 + $0xe4] ss:$36 sps:$4 sm:$0xff]   ;;  %v2232_v60 = vld [vmem:[%s2889_s1 + $0x158] sm:$0xff]  }
  0x15   :  { %1917 = vmatpush3.bf16.msra.mxu1 %v2183_v19  ;;  %1854 = vmatprep.subr.bf16.mxu0 %v2184_v20  ;;  %v2231_v59 = vld [vmem:[%s2890_s0 + $0xe0] ss:$36 sps:$4 sm:$0xff]   ;;  %v2233_v61 = vld [vmem:[%s2889_s1 + $0x1d8] sm:$0xff]   ;;  %v2238_v1 = vld [vmem:[%s2890_s0 + $0x12c] ss:$36 sps:$4 sm:$0xff]  }
  0x16   :  { %1918 = vmatprep.subr.bf16.mxu1 %v2185_v21  ;;  %v2234_v62 = vld [vmem:[%s2889_s1 + $0x118] sm:$0xff]   ;;  %v2236_v0 = vld [vmem:[%s2890_s0 + $0x124] ss:$36 sps:$4 sm:$0xff]   ;;  %v2246_v8 = vld [vmem:[%s2890_s0 + $0x16c] ss:$36 sps:$4 sm:$0xff]  }
  0x17   :  { %v2235_v63 = vld [vmem:[%s2889_s1 + $0x198] sm:$0xff]   ;;  %v2240_v2 = vld [vmem:[%s2890_s0 + $0x120] ss:$36 sps:$4 sm:$0xff]   ;;  %v2241_v4 = vld [vmem:[%s2890_s0 + $0x128] ss:$36 sps:$4 sm:$0xff]  }
  0x18   :  { %1855 = vmatpush3.bf16.msra.mxu0 %v2186_v22  ;;  %v2242_v3 = vld [vmem:[%s2889_s1 + $0x160] sm:$0xff]   ;;  %v2248_v9 = vld [vmem:[%s2890_s0 + $0x174] ss:$36 sps:$4 sm:$0xff]   ;;  %v2252_v10 = vld [vmem:[%s2889_s1 + $0x168] sm:$0xff]  }
  0x19   :  { %1919 = vmatpush3.bf16.msra.mxu1 %v2187_v23  ;;  %1856 = vmatprep.subr.bf16.mxu0 %v2188_v24  ;;  %v2243_v5 = vld [vmem:[%s2889_s1 + $0x1e0] sm:$0xff]   ;;  %v2253_v11 = vld [vmem:[%s2889_s1 + $0x1e8] sm:$0xff]   ;;  %v2251_v15 = vld [vmem:[%s2890_s0 + $0x170] ss:$36 sps:$4 sm:$0xff]  }
  0x1a   :  { %1920 = vmatprep.subr.bf16.mxu1 %v2189_v25  ;;  %v2244_v6 = vld [vmem:[%s2889_s1 + $0x120] sm:$0xff]   ;;  %v2250_v12 = vld [vmem:[%s2890_s0 + $0x168] ss:$36 sps:$4 sm:$0xff]   ;;  %v2256_v16 = vld [vmem:[%s2890_s0 + $0x1b4] ss:$36 sps:$4 sm:$0xff]  }
  0x1b   :  { %v2245_v7 = vld [vmem:[%s2889_s1 + $0x1a0] sm:$0xff]   ;;  %v2254_v13 = vld [vmem:[%s2889_s1 + $0x128] sm:$0xff]   ;;  %v2262_v18 = vld [vmem:[%s2889_s1 + $0x170] sm:$0xff]  }
  0x1c   :  { %1857 = vmatpush3.bf16.msra.mxu0 %v2190_v26  ;;  %v2255_v14 = vld [vmem:[%s2889_s1 + $0x1a8] sm:$0xff]   ;;  %v2258_v17 = vld [vmem:[%s2890_s0 + $0x1bc] ss:$36 sps:$4 sm:$0xff]   ;;  %v2263_v19 = vld [vmem:[%s2889_s1 + $0x1f0] sm:$0xff]  }
  0x1d   :  { %1921 = vmatpush3.bf16.msra.mxu1 %v2191_v27  ;;  %1858 = vmatprep.subr.bf16.mxu0 %v2192_v28  ;;  %v2264_v20 = vld [vmem:[%s2889_s1 + $0x130] sm:$0xff]   ;;  %v2261_v23 = vld [vmem:[%s2890_s0 + $0x1b8] ss:$36 sps:$4 sm:$0xff]   ;;  %v2268_v25 = vld [vmem:[%s2890_s0 + $0x204] ss:$36 sps:$4 sm:$0xff]  }
  0x1e   :  { %1922 = vmatprep.subr.bf16.mxu1 %v2193_v29  ;;  %v2265_v21 = vld [vmem:[%s2889_s1 + $0x1b0] sm:$0xff]   ;;  %v2266_v24 = vld [vmem:[%s2890_s0 + $0x1fc] ss:$36 sps:$4 sm:$0xff]  }
  0x1f   :  { %v2260_v22 = vld [vmem:[%s2890_s0 + $0x1b0] ss:$36 sps:$4 sm:$0xff]   ;;  %v2272_v26 = vld [vmem:[%s2889_s1 + $0x178] sm:$0xff]  }
  0x20   :  { %1859 = vmatpush3.bf16.msra.mxu0 %v2194_v30  ;;  %v2273_v27 = vld [vmem:[%s2889_s1 + $0x1f8] sm:$0xff]   ;;  %v2276_v35 = vld [vmem:[%s2890_s0 + $0x10] ss:$36 sps:$4 sm:$0xff]  }
  0x21   :  { %1923 = vmatpush3.bf16.msra.mxu1 %v2195_v31  ;;  %1972 = vmatprep.subr.bf16.mxu0 %v2202_v36  ;;  %v2274_v28 = vld [vmem:[%s2889_s1 + $0x138] sm:$0xff]   ;;  %v2271_v31 = vld [vmem:[%s2890_s0 + $0x200] ss:$36 sps:$4 sm:$0xff]  }
  0x22   :  { %2036 = vmatprep.subr.bf16.mxu1 %v2203_v37  ;;  %v2275_v29 = vld [vmem:[%s2889_s1 + $0x1b8] sm:$0xff]  }
  0x23   :  { %1069 = vmatmul.mubr.bf16.vlgmr.msra.gmra.mrb[0].mxu0 %v2196_v32  ;;  %v2270_v30 = vld [vmem:[%s2890_s0 + $0x1f8] ss:$36 sps:$4 sm:$0xff]   ;;  %v2282_v32 = vld [vmem:[%s2889_s1 + $0x200] sm:$0xff]  }
  0x24   :  { %1166 = vmatmul.mubr.bf16.vlgmr.msra.gmra.mrb[0].mxu1 %v2199_v34  ;;  %1973 = vmatpush3.bf16.msra.mxu0 %v2204_v38  ;;  %v2278_v33 = vld [vmem:[%s2890_s0 + $0x14] ss:$36 sps:$4 sm:$0xff]   ;;  %v2281_v34 = vld [vmem:[%s2890_s0 + $0x1c] ss:$36 sps:$4 sm:$0xff]   ;;  %v2285_v38 = vld [vmem:[%s2890_s0 + $0x64] ss:$36 sps:$4 sm:$0xff]  }
  0x25   :  { %2037 = vmatpush3.bf16.msra.mxu1 %v2205_v39  ;;  %1076 = vmatprep.mubr.bf16.mxu0 %v2206_v40  ;;  %v2279_v36 = vld [vmem:[%s2890_s0 + $0x18] ss:$36 sps:$4 sm:$0xff]   ;;  %v2289_v39 = vld [vmem:[%s2889_s1 + $0x208] sm:$0xff]   ;;  %v2296_v40 = vld [vmem:[%s2889_s1 + $0x210] sm:$0xff]  }
  0x26   :  { %1173 = vmatprep.mubr.bf16.mxu1 %v2208_v41  ;;  %1974 = vmatprep.subr.bf16.mxu0 %v2212_v44  ;;  %v2283_v37 = vld [vmem:[%s2890_s0 + $0x5c] ss:$36 sps:$4 sm:$0xff]   ;;  %v2292_v44 = vld [vmem:[%s2890_s0 + $0xac] ss:$36 sps:$4 sm:$0xff]  }
  0x27   :  { %2038 = vmatprep.subr.bf16.mxu1 %v2213_v45  ;;  %v2287_v41 = vld [vmem:[%s2890_s0 + $0x58] ss:$36 sps:$4 sm:$0xff]  }
  0x28   :  { %1975 = vmatpush3.bf16.msra.mxu0 %v2214_v46  ;;  %v2303_v45 = vld [vmem:[%s2889_s1 + $0x218] sm:$0xff]   ;;  %v2310_v46 = vld [vmem:[%s2889_s1 + $0x220] sm:$0xff]  }
  0x29   :  { %2039 = vmatpush3.bf16.msra.mxu1 %v2215_v47  ;;  %1976 = vmatprep.subr.bf16.mxu0 %v2222_v52  ;;  %v2294_v47 = vld [vmem:[%s2890_s0 + $0xa0] ss:$36 sps:$4 sm:$0xff]   ;;  %v2301_v52 = vld [vmem:[%s2890_s0 + $0xe8] ss:$36 sps:$4 sm:$0xff]  }
  0x2a   :  { %2040 = vmatprep.subr.bf16.mxu1 %v2223_v53  ;;  %v2324_v53 = vld [vmem:[%s2889_s1 + $0x230] sm:$0xff]  }
  0x2b   :  { %1077 = vmatmul.mubr.bf16.gmra.mrb[4].mxu0 %v2210_v42  ;;  %v2288_v42 = vld [vmem:[%s2890_s0 + $0x60] ss:$36 sps:$4 sm:$0xff]  }
  0x2c   :  { %1174 = vmatmul.mubr.bf16.gmra.mrb[4].mxu1 %v2211_v43  ;;  %1084 = vmatprep.mubr.bf16.mxu0 %v2216_v48  ;;  %v2290_v43 = vld [vmem:[%s2890_s0 + $0xa4] ss:$36 sps:$4 sm:$0xff]  }
  0x2d   :  { %1181 = vmatprep.mubr.bf16.mxu1 %v2218_v49  ;;  %1977 = vmatpush3.bf16.msra.mxu0 %v2224_v54  ;;  %v2295_v48 = vld [vmem:[%s2890_s0 + $0xa8] ss:$36 sps:$4 sm:$0xff]   ;;  %v2302_v54 = vld [vmem:[%s2890_s0 + $0xf0] ss:$36 sps:$4 sm:$0xff]  }
  0x2e   :  { %2041 = vmatpush3.bf16.msra.mxu1 %v2225_v55  ;;  %1978 = vmatprep.subr.bf16.mxu0 %v2232_v60  ;;  %v2297_v49 = vld [vmem:[%s2890_s0 + $0xec] ss:$36 sps:$4 sm:$0xff]   ;;  %v2304_v55 = vld [vmem:[%s2890_s0 + $0x134] ss:$36 sps:$4 sm:$0xff]   ;;  %v2311_v60 = vld [vmem:[%s2890_s0 + $0x17c] ss:$36 sps:$4 sm:$0xff]  }
  0x2f   :  { %2042 = vmatprep.subr.bf16.mxu1 %v2233_v61  ;;  %v2313_v61 = vld [vmem:[%s2890_s0 + $0x184] ss:$36 sps:$4 sm:$0xff]  }
  0x31   :  { %1979 = vmatpush3.bf16.msra.mxu0 %v2234_v62  ;;  %v2315_v62 = vld [vmem:[%s2890_s0 + $0x178] ss:$36 sps:$4 sm:$0xff]  }
  0x32   :  { %2043 = vmatpush3.bf16.msra.mxu1 %v2235_v63  ;;  %1980 = vmatprep.subr.bf16.mxu0 %v2242_v3  ;;  %v2316_v63 = vld [vmem:[%s2890_s0 + $0x180] ss:$36 sps:$4 sm:$0xff]   ;;  %v2323_v3 = vld [vmem:[%s2890_s0 + $0x1c8] ss:$36 sps:$4 sm:$0xff]  }
  0x33   :  { %1085 = vmatmul.mubr.bf16.gmra.mrb[8].mxu0 %v2220_v50  ;;  %2044 = vmatprep.subr.bf16.mxu1 %v2243_v5  ;;  %v2299_v50 = vld [vmem:[%s2890_s0 + $0xf4] ss:$36 sps:$4 sm:$0xff]  }
  0x34   :  { %1182 = vmatmul.mubr.bf16.gmra.mrb[8].mxu1 %v2221_v51  ;;  %1092 = vmatprep.mubr.bf16.mxu0 %v2226_v56  ;;  %v2317_v51 = vld [vmem:[%s2889_s1 + $0x228] sm:$0xff]   ;;  %v2306_v56 = vld [vmem:[%s2890_s0 + $0x13c] ss:$36 sps:$4 sm:$0xff]   ;;  %v2327_v5 = vld [vmem:[%s2890_s0 + $0x214] ss:$36 sps:$4 sm:$0xff]  }
  0x35   :  { %1189 = vmatprep.mubr.bf16.mxu1 %v2228_v57  ;;  %1981 = vmatpush3.bf16.msra.mxu0 %v2244_v6  ;;  %v2331_v57 = vld [vmem:[%s2889_s1 + $0x238] sm:$0xff]   ;;  %v2329_v6 = vld [vmem:[%s2890_s0 + $0x208] ss:$36 sps:$4 sm:$0xff]  }
  0x36   :  { %2045 = vmatpush3.bf16.msra.mxu1 %v2245_v7  ;;  %1982 = vmatprep.subr.bf16.mxu0 %v2252_v10  ;;  %v2330_v7 = vld [vmem:[%s2890_s0 + $0x210] ss:$36 sps:$4 sm:$0xff]   ;;  %v2334_v10 = vld [vmem:[%s2890_s0 + $0x68] ss:$36 sps:$4 sm:$0xff]  }
  0x37   :  { %2046 = vmatprep.subr.bf16.mxu1 %v2253_v11  ;;  %v2335_v11 = vld [vmem:[%s2890_s0 + $0x188] ss:$36 sps:$4 sm:$0xff]  }
  0x39   :  { %1983 = vmatpush3.bf16.msra.mxu0 %v2254_v13  ;;  %v2337_v13 = vld [vmem:[%s2890_s0 + $0x1d0] ss:$36 sps:$4 sm:$0xff]  }
  0x3a   :  { %2047 = vmatpush3.bf16.msra.mxu1 %v2255_v14  ;;  %1984 = vmatprep.subr.bf16.mxu0 %v2262_v18  ;;  %v2338_v14 = vld [vmem:[%s2890_s0 + $0xf8] ss:$36 sps:$4 sm:$0xff]  }
  0x3b   :  { %1093 = vmatmul.mubr.bf16.gmra.mrb[12].mxu0 %v2230_v58  ;;  %2048 = vmatprep.subr.bf16.mxu1 %v2263_v19  ;;  %v2308_v58 = vld [vmem:[%s2890_s0 + $0x130] ss:$36 sps:$4 sm:$0xff]  }
  0x3c   :  { %1190 = vmatmul.mubr.bf16.gmra.mrb[12].mxu1 %v2231_v59  ;;  %1100 = vmatprep.mubr.bf16.mxu0 %v2236_v0  ;;  %v2309_v59 = vld [vmem:[%s2890_s0 + $0x138] ss:$36 sps:$4 sm:$0xff]   ;;  %v2318_v0 = vld [vmem:[%s2890_s0 + $0x1c4] ss:$36 sps:$4 sm:$0xff]  }
  0x3d   :  { %1197 = vmatprep.mubr.bf16.mxu1 %v2238_v1  ;;  %1985 = vmatpush3.bf16.msra.mxu0 %v2264_v20  ;;  %v2320_v1 = vld [vmem:[%s2890_s0 + $0x1cc] ss:$36 sps:$4 sm:$0xff]  }
  0x3e   :  { %2049 = vmatpush3.bf16.msra.mxu1 %v2265_v21  ;;  %1986 = vmatprep.subr.bf16.mxu0 %v2272_v26 }
  0x3f   :  { %2050 = vmatprep.subr.bf16.mxu1 %v2273_v27 }
  0x41   :  { %1987 = vmatpush3.bf16.msra.mxu0 %v2274_v28 }
  0x42   :  { %2051 = vmatpush3.bf16.msra.mxu1 %v2275_v29  ;;  %2116 = vmatprep.subr.bf16.mxu0 %v2282_v32 }
  0x43   :  { %1101 = vmatmul.mubr.bf16.gmra.mrb[16].mxu0 %v2240_v2  ;;  %2148 = vmatprep.subr.bf16.mxu1 %v2282_v32  ;;  %v2322_v2 = vld [vmem:[%s2890_s0 + $0x1c0] ss:$36 sps:$4 sm:$0xff]  }
  0x44   :  { %1198 = vmatmul.mubr.bf16.gmra.mrb[16].mxu1 %v2241_v4  ;;  %1108 = vmatprep.mubr.bf16.mxu0 %v2246_v8  ;;  %v2325_v4 = vld [vmem:[%s2890_s0 + $0x20c] ss:$36 sps:$4 sm:$0xff]   ;;  %v2332_v8 = vld [vmem:[%s2890_s0 + $0x20] ss:$36 sps:$4 sm:$0xff]  }
  0x45   :  { %1205 = vmatprep.mubr.bf16.mxu1 %v2248_v9  ;;  %v2333_v9 = vld [vmem:[%s2890_s0 + $0x140] ss:$36 sps:$4 sm:$0xff]  }
  0x4b   :  { %1109 = vmatmul.mubr.bf16.gmra.mrb[20].mxu0 %v2250_v12  ;;  %v2336_v12 = vld [vmem:[%s2890_s0 + $0xb0] ss:$36 sps:$4 sm:$0xff]  }
  0x4c   :  { %1206 = vmatmul.mubr.bf16.gmra.mrb[20].mxu1 %v2251_v15  ;;  %1116 = vmatprep.mubr.bf16.mxu0 %v2256_v16  ;;  %v2339_v15 = vld [vmem:[%s2890_s0 + $0x218] ss:$36 sps:$4 sm:$0xff]  }
  0x4d   :  { %1213 = vmatprep.mubr.bf16.mxu1 %v2258_v17 }
  0x53   :  { %1117 = vmatmul.mubr.bf16.gmra.mrb[24].mxu0 %v2260_v22 }
  0x54   :  { %1214 = vmatmul.mubr.bf16.gmra.mrb[24].mxu1 %v2261_v23  ;;  %1124 = vmatprep.mubr.bf16.mxu0 %v2266_v24 }
  0x55   :  { %1221 = vmatprep.mubr.bf16.mxu1 %v2268_v25 }
  0x5b   :  { %1125 = vmatmul.mubr.bf16.gmra.mrb[28].mxu0 %v2270_v30 }
  0x5c   :  { %1222 = vmatmul.mubr.bf16.gmra.mrb[28].mxu1 %v2271_v31  ;;  %1262 = vmatprep.mubr.bf16.mxu0 %v2278_v33 }
  0x5d   :  { %1359 = vmatprep.mubr.bf16.mxu1 %v2281_v34 }
  0x63   :  { %1263 = vmatmul.mubr.bf16.vlgmr.msra.gmra.mrb[32].mxu0 %v2276_v35 }
  0x64   :  { %1360 = vmatmul.mubr.bf16.vlgmr.msra.gmra.mrb[32].mxu1 %v2279_v36  ;;  %2117 = vmatpush3.bf16.msra.mxu0 %v2282_v32 }
  0x65   :  { %2156 = vmatpush3.bf16.msra.mxu1 %v2282_v32  ;;  %1270 = vmatprep.mubr.bf16.mxu0 %v2283_v37 }
  0x66   :  { %1367 = vmatprep.mubr.bf16.mxu1 %v2285_v38  ;;  %2118 = vmatprep.subr.bf16.mxu0 %v2289_v39 }
  0x67   :  { %2149 = vmatprep.subr.bf16.mxu1 %v2289_v39 }
  0x68   :  { %2119 = vmatpush3.bf16.msra.mxu0 %v2289_v39 }
  0x69   :  { %2157 = vmatpush3.bf16.msra.mxu1 %v2289_v39  ;;  %2120 = vmatprep.subr.bf16.mxu0 %v2296_v40 }
  0x6a   :  { %2150 = vmatprep.subr.bf16.mxu1 %v2296_v40 }
  0x6b   :  { %1271 = vmatmul.mubr.bf16.gmra.mrb[36].mxu0 %v2287_v41 }
  0x6c   :  { %1368 = vmatmul.mubr.bf16.gmra.mrb[36].mxu1 %v2288_v42  ;;  %1278 = vmatprep.mubr.bf16.mxu0 %v2290_v43 }
  0x6d   :  { %1375 = vmatprep.mubr.bf16.mxu1 %v2292_v44  ;;  %2121 = vmatpush3.bf16.msra.mxu0 %v2296_v40 }
  0x6e   :  { %2158 = vmatpush3.bf16.msra.mxu1 %v2296_v40  ;;  %2122 = vmatprep.subr.bf16.mxu0 %v2303_v45 }
  0x6f   :  { %2151 = vmatprep.subr.bf16.mxu1 %v2303_v45 }
  0x71   :  { %2123 = vmatpush3.bf16.msra.mxu0 %v2303_v45 }
  0x72   :  { %2159 = vmatpush3.bf16.msra.mxu1 %v2303_v45  ;;  %2124 = vmatprep.subr.bf16.mxu0 %v2310_v46 }
  0x73   :  { %1279 = vmatmul.mubr.bf16.gmra.mrb[40].mxu0 %v2294_v47  ;;  %2152 = vmatprep.subr.bf16.mxu1 %v2310_v46 }
  0x74   :  { %1376 = vmatmul.mubr.bf16.gmra.mrb[40].mxu1 %v2295_v48  ;;  %1286 = vmatprep.mubr.bf16.mxu0 %v2297_v49 }
  0x75   :  { %1383 = vmatprep.mubr.bf16.mxu1 %v2299_v50  ;;  %2125 = vmatpush3.bf16.msra.mxu0 %v2310_v46 }
  0x76   :  { %2160 = vmatpush3.bf16.msra.mxu1 %v2310_v46  ;;  %2126 = vmatprep.subr.bf16.mxu0 %v2317_v51 }
  0x77   :  { %2153 = vmatprep.subr.bf16.mxu1 %v2317_v51 }
  0x79   :  { %2127 = vmatpush3.bf16.msra.mxu0 %v2317_v51 }
  0x7a   :  { %2161 = vmatpush3.bf16.msra.mxu1 %v2317_v51  ;;  %2128 = vmatprep.subr.bf16.mxu0 %v2324_v53 }
  0x7b   :  { %1287 = vmatmul.mubr.bf16.gmra.mrb[44].mxu0 %v2301_v52  ;;  %2154 = vmatprep.subr.bf16.mxu1 %v2324_v53 }
  0x7c   :  { %1384 = vmatmul.mubr.bf16.gmra.mrb[44].mxu1 %v2302_v54  ;;  %1294 = vmatprep.mubr.bf16.mxu0 %v2304_v55 }
  0x7d   :  { %1391 = vmatprep.mubr.bf16.mxu1 %v2306_v56  ;;  %2129 = vmatpush3.bf16.msra.mxu0 %v2324_v53 }
  0x7e   :  { %2162 = vmatpush3.bf16.msra.mxu1 %v2324_v53  ;;  %2130 = vmatprep.subr.bf16.mxu0 %v2331_v57 }
  0x7f   :  { %2155 = vmatprep.subr.bf16.mxu1 %v2331_v57 }
  0x81   :  { %2131 = vmatpush3.bf16.msra.mxu0 %v2331_v57 }
  0x82   :  { %2163 = vmatpush3.bf16.msra.mxu1 %v2331_v57 }
  0x83   :  { %1295 = vmatmul.mubr.bf16.gmra.mrb[48].mxu0 %v2308_v58 }
  0x84   :  { %1392 = vmatmul.mubr.bf16.gmra.mrb[48].mxu1 %v2309_v59  ;;  %1302 = vmatprep.mubr.bf16.mxu0 %v2311_v60 }
  0x85   :  { %1399 = vmatprep.mubr.bf16.mxu1 %v2313_v61 }
  0x8b   :  { %1303 = vmatmul.mubr.bf16.gmra.mrb[52].mxu0 %v2315_v62 }
  0x8c   :  { %1400 = vmatmul.mubr.bf16.gmra.mrb[52].mxu1 %v2316_v63  ;;  %1310 = vmatprep.mubr.bf16.mxu0 %v2318_v0 }
  0x8d   :  { %1407 = vmatprep.mubr.bf16.mxu1 %v2320_v1 }
  0x93   :  { %1311 = vmatmul.mubr.bf16.gmra.mrb[56].mxu0 %v2322_v2 }
  0x94   :  { %1408 = vmatmul.mubr.bf16.gmra.mrb[56].mxu1 %v2323_v3  ;;  %1318 = vmatprep.mubr.bf16.mxu0 %v2325_v4 }
  0x95   :  { %1415 = vmatprep.mubr.bf16.mxu1 %v2327_v5 }
  0x9b   :  { %1319 = vmatmul.mubr.bf16.gmra.mrb[60].mxu0 %v2329_v6 }
  0x9c   :  { %1416 = vmatmul.mubr.bf16.gmra.mrb[60].mxu1 %v2330_v7  ;;  %2132 = vmatprep.mubr.bf16.mxu0 %v2332_v8 }
  0x9d   :  { %2140 = vmatprep.mubr.bf16.mxu1 %v2333_v9 }
  0xa3   :  { %2133 = vmatmul.mubr.bf16.vlgmr.msra.gmra.mrb[64].mxu0 %v2334_v10 }
  0xa4   :  { %2141 = vmatmul.mubr.bf16.vlgmr.msra.gmra.mrb[64].mxu1 %v2335_v11  ;;  %2136 = vmatprep.mubr.bf16.mxu0 %v2336_v12 }
  0xa5   :  { %2144 = vmatprep.mubr.bf16.mxu1 %v2337_v13 }
  0xab   :  { %2137 = vmatmul.mubr.bf16.gmra.mrb[68].mxu0 %v2338_v14 }
  0xac   :  { %2145 = vmatmul.mubr.bf16.gmra.mrb[68].mxu1 %v2339_v15 }
  0xf6   :  { %v1860_v16 = vpop.f32.mrb[0].mxu0 }
  0xf7   :  { %v1924_v17 = vpop.f32.mrb[0].mxu1  ;;  %v1861_v18 = vpop.f32.mrb[1].mxu0 }
  0xf8   :  { %v1862_v19 = vadd.f32 %v1861_v18, %v1860_v16  ;;  %v1925_v20 = vpop.f32.mrb[1].mxu1  ;;  %v1863_v21 = vpop.f32.mrb[2].mxu0 }
  0xf9   :  { %v1926_v22 = vadd.f32 %v1925_v20, %v1924_v17  ;;  %v1927_v23 = vpop.f32.mrb[2].mxu1  ;;  %v1864_v24 = vpop.f32.mrb[3].mxu0 }
  0xfa   :  { %v1865_v25 = vadd.f32 %v1864_v24, %v1863_v21  ;;  %v1928_v26 = vpop.f32.mrb[3].mxu1 }
  0xfb   :  { %v2787_v27 = vadd.f32 %v1926_v22, %v1862_v19  ;;  %v1929_v28 = vadd.f32 %v1928_v26, %v1927_v23 }
  0xfd   :  { %v2789_v29 = vadd.f32 %v1929_v28, %v1865_v25 }
  0xfe   :  { %v1866_v30 = vpop.f32.mrb[4].mxu0 }
  0xff   :  { %v1930_v31 = vpop.f32.mrb[4].mxu1  ;;  %v1867_v32 = vpop.f32.mrb[5].mxu0 }
 0x100   :  { %v1868_v33 = vadd.f32 %v1867_v32, %v1866_v30  ;;  %v1931_v34 = vpop.f32.mrb[5].mxu1  ;;  %v1869_v35 = vpop.f32.mrb[6].mxu0 }
 0x101   :  { %v1932_v36 = vadd.f32 %v1931_v34, %v1930_v31  ;;  %v1933_v37 = vpop.f32.mrb[6].mxu1  ;;  %v1870_v38 = vpop.f32.mrb[7].mxu0 }
 0x102   :  { %v1871_v39 = vadd.f32 %v1870_v38, %v1869_v35  ;;  %v1934_v40 = vpop.f32.mrb[7].mxu1 }
 0x103   :  { %v2791_v41 = vadd.f32 %v1932_v36, %v1868_v33  ;;  %v1935_v42 = vadd.f32 %v1934_v40, %v1933_v37 }
 0x105   :  { %v2793_v43 = vadd.f32 %v1935_v42, %v1871_v39 }
 0x106   :  { %v1872_v44 = vpop.f32.mrb[8].mxu0 }
 0x107   :  { %v1936_v45 = vpop.f32.mrb[8].mxu1  ;;  %v1873_v46 = vpop.f32.mrb[9].mxu0 }
 0x108   :  { %v1874_v47 = vadd.f32 %v1873_v46, %v1872_v44  ;;  %v1937_v48 = vpop.f32.mrb[9].mxu1  ;;  %v1875_v49 = vpop.f32.mrb[10].mxu0 }
 0x109   :  { %v1938_v50 = vadd.f32 %v1937_v48, %v1936_v45  ;;  %v1939_v51 = vpop.f32.mrb[10].mxu1  ;;  %v1876_v52 = vpop.f32.mrb[11].mxu0 }
 0x10a   :  { %v1877_v53 = vadd.f32 %v1876_v52, %v1875_v49  ;;  %v1940_v54 = vpop.f32.mrb[11].mxu1 }
 0x10b   :  { %v2795_v55 = vadd.f32 %v1938_v50, %v1874_v47  ;;  %v1941_v56 = vadd.f32 %v1940_v54, %v1939_v51 }
 0x10d   :  { %v2797_v57 = vadd.f32 %v1941_v56, %v1877_v53 }
 0x10e   :  { %v1878_v58 = vpop.f32.mrb[12].mxu0 }
 0x10f   :  { %v1942_v59 = vpop.f32.mrb[12].mxu1  ;;  %v1879_v60 = vpop.f32.mrb[13].mxu0 }
 0x110   :  { %v1880_v61 = vadd.f32 %v1879_v60, %v1878_v58  ;;  %v1943_v62 = vpop.f32.mrb[13].mxu1  ;;  %v1881_v63 = vpop.f32.mrb[14].mxu0 }
 0x111   :  { %v1944_v0 = vadd.f32 %v1943_v62, %v1942_v59  ;;  %v1945_v1 = vpop.f32.mrb[14].mxu1  ;;  %v1882_v2 = vpop.f32.mrb[15].mxu0 }
 0x112   :  { %v1883_v3 = vadd.f32 %v1882_v2, %v1881_v63  ;;  %v1946_v4 = vpop.f32.mrb[15].mxu1 }
 0x113   :  { %v2799_v5 = vadd.f32 %v1944_v0, %v1880_v61  ;;  %v1947_v6 = vadd.f32 %v1946_v4, %v1945_v1 }
 0x115   :  { %v2801_v7 = vadd.f32 %v1947_v6, %v1883_v3 }
 0x116   :  { %v1884_v8 = vpop.f32.mrb[16].mxu0 }
 0x117   :  { %v1948_v9 = vpop.f32.mrb[16].mxu1  ;;  %v1885_v10 = vpop.f32.mrb[17].mxu0 }
 0x118   :  { %v1886_v11 = vadd.f32 %v1885_v10, %v1884_v8  ;;  %v1949_v12 = vpop.f32.mrb[17].mxu1  ;;  %v1887_v13 = vpop.f32.mrb[18].mxu0 }
 0x119   :  { %v1950_v14 = vadd.f32 %v1949_v12, %v1948_v9  ;;  %v1951_v15 = vpop.f32.mrb[18].mxu1  ;;  %v1888_v16 = vpop.f32.mrb[19].mxu0 }
 0x11a   :  { %v1889_v17 = vadd.f32 %v1888_v16, %v1887_v13  ;;  %v1952_v18 = vpop.f32.mrb[19].mxu1 }
 0x11b   :  { %v2803_v19 = vadd.f32 %v1950_v14, %v1886_v11  ;;  %v1953_v20 = vadd.f32 %v1952_v18, %v1951_v15 }
 0x11d   :  { %v2805_v21 = vadd.f32 %v1953_v20, %v1889_v17 }
 0x11e   :  { %v1890_v22 = vpop.f32.mrb[20].mxu0 }
 0x11f   :  { %v1954_v23 = vpop.f32.mrb[20].mxu1  ;;  %v1891_v24 = vpop.f32.mrb[21].mxu0 }
 0x120   :  { %v1892_v25 = vadd.f32 %v1891_v24, %v1890_v22  ;;  %v1955_v26 = vpop.f32.mrb[21].mxu1  ;;  %v1893_v28 = vpop.f32.mrb[22].mxu0 }
 0x121   :  { %v1956_v30 = vadd.f32 %v1955_v26, %v1954_v23  ;;  %v1957_v31 = vpop.f32.mrb[22].mxu1  ;;  %v1894_v32 = vpop.f32.mrb[23].mxu0 }
 0x122   :  { %v1895_v33 = vadd.f32 %v1894_v32, %v1893_v28  ;;  %v1958_v34 = vpop.f32.mrb[23].mxu1 }
 0x123   :  { %v2807_v35 = vadd.f32 %v1956_v30, %v1892_v25  ;;  %v1959_v36 = vadd.f32 %v1958_v34, %v1957_v31 }
 0x125   :  { %v2809_v37 = vadd.f32 %v1959_v36, %v1895_v33 }
 0x126   :  { %v1896_v38 = vpop.f32.mrb[24].mxu0 }
 0x127   :  { %v1960_v39 = vpop.f32.mrb[24].mxu1  ;;  %v1897_v40 = vpop.f32.mrb[25].mxu0 }
 0x128   :  { %v1898_v42 = vadd.f32 %v1897_v40, %v1896_v38  ;;  %v1961_v44 = vpop.f32.mrb[25].mxu1  ;;  %v1899_v45 = vpop.f32.mrb[26].mxu0 }
 0x129   :  { %v1962_v46 = vadd.f32 %v1961_v44, %v1960_v39  ;;  %v1963_v47 = vpop.f32.mrb[26].mxu1  ;;  %v1900_v48 = vpop.f32.mrb[27].mxu0 }
 0x12a   :  { %v1901_v49 = vadd.f32 %v1900_v48, %v1899_v45  ;;  %v1964_v50 = vpop.f32.mrb[27].mxu1 }
 0x12b   :  { %v2811_v51 = vadd.f32 %v1962_v46, %v1898_v42  ;;  %v1965_v52 = vadd.f32 %v1964_v50, %v1963_v47 }
 0x12d   :  { %v2813_v53 = vadd.f32 %v1965_v52, %v1901_v49 }
 0x12e   :  { %v1902_v54 = vpop.f32.mrb[28].mxu0 }
 0x12f   :  { %v1966_v56 = vpop.f32.mrb[28].mxu1  ;;  %v1903_v58 = vpop.f32.mrb[29].mxu0 }
 0x130   :  { %v1904_v59 = vadd.f32 %v1903_v58, %v1902_v54  ;;  %v1967_v60 = vpop.f32.mrb[29].mxu1  ;;  %v1905_v61 = vpop.f32.mrb[30].mxu0 }
 0x131   :  { %v1968_v62 = vadd.f32 %v1967_v60, %v1966_v56  ;;  %v1969_v63 = vpop.f32.mrb[30].mxu1  ;;  %v1906_v0 = vpop.f32.mrb[31].mxu0 }
 0x132   :  { %v1907_v1 = vadd.f32 %v1906_v0, %v1905_v61  ;;  %v1970_v2 = vpop.f32.mrb[31].mxu1 }
 0x133   :  { %v2815_v3 = vadd.f32 %v1968_v62, %v1904_v59  ;;  %v1971_v4 = vadd.f32 %v1970_v2, %v1969_v63 }
 0x135   :  { %v2817_v6 = vadd.f32 %v1971_v4, %v1907_v1 }
 0x136   :  { %v1988_v8 = vpop.f32.mrb[32].mxu0 }
 0x137   :  { %v2052_v9 = vpop.f32.mrb[32].mxu1  ;;  %v1989_v10 = vpop.f32.mrb[33].mxu0 }
 0x138   :  { %v1990_v11 = vadd.f32 %v1989_v10, %v1988_v8  ;;  %v2053_v12 = vpop.f32.mrb[33].mxu1  ;;  %v1991_v13 = vpop.f32.mrb[34].mxu0 }
 0x139   :  { %v2054_v14 = vadd.f32 %v2053_v12, %v2052_v9  ;;  %v2055_v15 = vpop.f32.mrb[34].mxu1  ;;  %v1992_v16 = vpop.f32.mrb[35].mxu0 }
 0x13a   :  { %v1265_v17 = vadd.f32 %v1990_v11, %v2787_v27  ;;  %v1993_v18 = vadd.f32 %v1992_v16, %v1991_v13  ;;  %v2056_v20 = vpop.f32.mrb[35].mxu1 }
 0x13b   :  { %v2057_v22 = vadd.f32 %v2056_v20, %v2055_v15 }
 0x13c   :  { %v1268_v23 = vadd.f32 %v1993_v18, %v2789_v29  ;;  %v2821_v24 = vadd.f32 %v2054_v14, %v1265_v17 }
 0x13e   :  { %v1994_v25 = vpop.f32.mrb[36].mxu0  ;;  %v2823_v26 = vadd.f32 %v2057_v22, %v1268_v23 }
 0x13f   :  { %v2058_v28 = vpop.f32.mrb[36].mxu1  ;;  %v1995_v30 = vpop.f32.mrb[37].mxu0 }
 0x140   :  { %v1996_v31 = vadd.f32 %v1995_v30, %v1994_v25  ;;  %v2059_v32 = vpop.f32.mrb[37].mxu1  ;;  %v1997_v33 = vpop.f32.mrb[38].mxu0 }
 0x141   :  { %v2060_v34 = vadd.f32 %v2059_v32, %v2058_v28  ;;  %v2061_v36 = vpop.f32.mrb[38].mxu1  ;;  %v1998_v38 = vpop.f32.mrb[39].mxu0 }
 0x142   :  { %v1273_v27 = vadd.f32 %v1996_v31, %v2791_v41  ;;  %v1999_v39 = vadd.f32 %v1998_v38, %v1997_v33  ;;  %v2062_v40 = vpop.f32.mrb[39].mxu1 }
 0x143   :  { %v2063_v42 = vadd.f32 %v2062_v40, %v2061_v36 }
 0x144   :  { %v1276_v29 = vadd.f32 %v1999_v39, %v2793_v43  ;;  %v2827_v44 = vadd.f32 %v2060_v34, %v1273_v27 }
 0x146   :  { %v2000_v45 = vpop.f32.mrb[40].mxu0  ;;  %v2829_v46 = vadd.f32 %v2063_v42, %v1276_v29 }
 0x147   :  { %v2064_v47 = vpop.f32.mrb[40].mxu1  ;;  %v2001_v48 = vpop.f32.mrb[41].mxu0 }
 0x148   :  { %v2002_v49 = vadd.f32 %v2001_v48, %v2000_v45  ;;  %v2065_v50 = vpop.f32.mrb[41].mxu1  ;;  %v2003_v52 = vpop.f32.mrb[42].mxu0 }
 0x149   :  { %v2066_v54 = vadd.f32 %v2065_v50, %v2064_v47  ;;  %v2067_v56 = vpop.f32.mrb[42].mxu1  ;;  %v2004_v58 = vpop.f32.mrb[43].mxu0 }
 0x14a   :  { %v1281_v41 = vadd.f32 %v2002_v49, %v2795_v55  ;;  %v2005_v59 = vadd.f32 %v2004_v58, %v2003_v52  ;;  %v2068_v60 = vpop.f32.mrb[43].mxu1 }
 0x14b   :  { %v2069_v61 = vadd.f32 %v2068_v60, %v2067_v56 }
 0x14c   :  { %v1284_v43 = vadd.f32 %v2005_v59, %v2797_v57  ;;  %v2833_v62 = vadd.f32 %v2066_v54, %v1281_v41 }
 0x14e   :  { %v2006_v63 = vpop.f32.mrb[44].mxu0  ;;  %v2835_v0 = vadd.f32 %v2069_v61, %v1284_v43 }
 0x14f   :  { %v2070_v1 = vpop.f32.mrb[44].mxu1  ;;  %v2007_v2 = vpop.f32.mrb[45].mxu0 }
 0x150   :  { %v2008_v4 = vadd.f32 %v2007_v2, %v2006_v63  ;;  %v2071_v8 = vpop.f32.mrb[45].mxu1  ;;  %v2009_v9 = vpop.f32.mrb[46].mxu0 }
 0x151   :  { %v2072_v10 = vadd.f32 %v2071_v8, %v2070_v1  ;;  %v2073_v11 = vpop.f32.mrb[46].mxu1  ;;  %v2010_v12 = vpop.f32.mrb[47].mxu0 }
 0x152   :  { %v1289_v55 = vadd.f32 %v2008_v4, %v2799_v5  ;;  %v2011_v13 = vadd.f32 %v2010_v12, %v2009_v9  ;;  %v2074_v14 = vpop.f32.mrb[47].mxu1 }
 0x153   :  { %v2075_v15 = vadd.f32 %v2074_v14, %v2073_v11 }
 0x154   :  { %v1292_v57 = vadd.f32 %v2011_v13, %v2801_v7  ;;  %v2839_v16 = vadd.f32 %v2072_v10, %v1289_v55 }
 0x156   :  { %v2012_v17 = vpop.f32.mrb[48].mxu0  ;;  %v2841_v18 = vadd.f32 %v2075_v15, %v1292_v57 }
 0x157   :  { %v2076_v20 = vpop.f32.mrb[48].mxu1  ;;  %v2013_v22 = vpop.f32.mrb[49].mxu0 }
 0x158   :  { %v2014_v23 = vadd.f32 %v2013_v22, %v2012_v17  ;;  %v2077_v25 = vpop.f32.mrb[49].mxu1  ;;  %v2015_v28 = vpop.f32.mrb[50].mxu0 }
 0x159   :  { %v2078_v30 = vadd.f32 %v2077_v25, %v2076_v20  ;;  %v2079_v31 = vpop.f32.mrb[50].mxu1  ;;  %v2016_v32 = vpop.f32.mrb[51].mxu0 }
 0x15a   :  { %v1297_v5 = vadd.f32 %v2014_v23, %v2803_v19  ;;  %v2017_v33 = vadd.f32 %v2016_v32, %v2015_v28  ;;  %v2080_v34 = vpop.f32.mrb[51].mxu1 }
 0x15b   :  { %v2081_v36 = vadd.f32 %v2080_v34, %v2079_v31 }
 0x15c   :  { %v1300_v7 = vadd.f32 %v2017_v33, %v2805_v21  ;;  %v1394_v38 = vadd.f32 %v2078_v30, %v1297_v5 }
 0x15e   :  { %v2018_v27 = vpop.f32.mrb[52].mxu0  ;;  %v2845_v39 = vadd.f32 %v2081_v36, %v1300_v7 }
 0x15f   :  { %v2082_v40 = vpop.f32.mrb[52].mxu1  ;;  %v2019_v42 = vpop.f32.mrb[53].mxu0 }
 0x160   :  { %v2020_v29 = vadd.f32 %v2019_v42, %v2018_v27  ;;  %v2083_v45 = vpop.f32.mrb[53].mxu1  ;;  %v2021_v47 = vpop.f32.mrb[54].mxu0 }
 0x161   :  { %v2084_v48 = vadd.f32 %v2083_v45, %v2082_v40  ;;  %v2085_v49 = vpop.f32.mrb[54].mxu1  ;;  %v2022_v50 = vpop.f32.mrb[55].mxu0 }
 0x162   :  { %v1305_v52 = vadd.f32 %v2020_v29, %v2807_v35  ;;  %v2023_v19 = vadd.f32 %v2022_v50, %v2021_v47  ;;  %v2086_v54 = vpop.f32.mrb[55].mxu1 }
 0x163   :  { %v2087_v56 = vadd.f32 %v2086_v54, %v2085_v49 }
 0x164   :  { %v1308_v58 = vadd.f32 %v2023_v19, %v2809_v37  ;;  %v1402_v21 = vadd.f32 %v2084_v48, %v1305_v52 }
 0x166   :  { %v2024_v41 = vpop.f32.mrb[56].mxu0  ;;  %v1405_v59 = vadd.f32 %v2087_v56, %v1308_v58 }
 0x167   :  { %v2088_v60 = vpop.f32.mrb[56].mxu1  ;;  %v2025_v61 = vpop.f32.mrb[57].mxu0 }
 0x168   :  { %v2026_v43 = vadd.f32 %v2025_v61, %v2024_v41  ;;  %v2089_v63 = vpop.f32.mrb[57].mxu1  ;;  %v2027_v1 = vpop.f32.mrb[58].mxu0 }
 0x169   :  { %v2090_v2 = vadd.f32 %v2089_v63, %v2088_v60  ;;  %v2091_v4 = vpop.f32.mrb[58].mxu1  ;;  %v2028_v8 = vpop.f32.mrb[59].mxu0 }
 0x16a   :  { %v1313_v9 = vadd.f32 %v2026_v43, %v2811_v51  ;;  %v2029_v10 = vadd.f32 %v2028_v8, %v2027_v1  ;;  %v2092_v35 = vpop.f32.mrb[59].mxu1 }
 0x16b   :  { %v2093_v11 = vadd.f32 %v2092_v35, %v2091_v4 }
 0x16c   :  { %v1316_v12 = vadd.f32 %v2029_v10, %v2813_v53  ;;  %v1410_v55 = vadd.f32 %v2090_v2, %v1313_v9 }
 0x16e   :  { %v2030_v37 = vpop.f32.mrb[60].mxu0  ;;  %v2851_v13 = vadd.f32 %v2093_v11, %v1316_v12 }
 0x16f   :  { %v2094_v14 = vpop.f32.mrb[60].mxu1  ;;  %v2031_v15 = vpop.f32.mrb[61].mxu0 }
 0x170   :  { %v2032_v57 = vadd.f32 %v2031_v15, %v2030_v37  ;;  %v2095_v17 = vpop.f32.mrb[61].mxu1  ;;  %v2033_v20 = vpop.f32.mrb[62].mxu0 }
 0x171   :  { %v2096_v22 = vadd.f32 %v2095_v17, %v2094_v14  ;;  %v2097_v23 = vpop.f32.mrb[62].mxu1  ;;  %v2034_v25 = vpop.f32.mrb[63].mxu0 }
 0x172   :  { %v1321_v28 = vadd.f32 %v2032_v57, %v2815_v3  ;;  %v2035_v51 = vadd.f32 %v2034_v25, %v2033_v20  ;;  %v2098_v30 = vpop.f32.mrb[63].mxu1 }
 0x173   :  { %v2099_v31 = vadd.f32 %v2098_v30, %v2097_v23 }
 0x174   :  { %v1324_v32 = vadd.f32 %v2035_v51, %v2817_v6  ;;  %v1418_v53 = vadd.f32 %v2096_v22, %v1321_v28 }
 0x176   :  { %v2134_v5 = vpop.f32.mrb[64].mxu0  ;;  %v1421_v33 = vadd.f32 %v2099_v31, %v1324_v32 }
 0x177   :  { %v1467_v34 = vadd.f32 %v2134_v5, %v2827_v44  ;;  %v2142_v36 = vpop.f32.mrb[64].mxu1  ;;  %v1458_v7 = vpop.f32.mrb[65].mxu0 }
 0x178   :  { %v1499_v27 = vadd.f32 %v2142_v36, %v1402_v21  ;;  %v1459_v40 = vadd.f32 %v1458_v7, %v2821_v24  ;;  %v1490_v42 = vpop.f32.mrb[65].mxu1  ;;  %v2135_v29 = vpop.f32.mrb[66].mxu0 }
 0x179   :  { %v1491_v45 = vadd.f32 %v1490_v42, %v1394_v38  ;;  %v1470_v3 = vadd.f32 %v2135_v29, %v2829_v46  ;;  %v2143_v47 = vpop.f32.mrb[66].mxu1  ;;  %v1461_v48 = vpop.f32.mrb[67].mxu0  ;;  %v1523_v52 = vmax.f32 %v1467_v34, 0.0 }
 0x17a   :  { %v1502_v49 = vadd.f32 %v2143_v47, %v1405_v59  ;;  %v1462_v6 = vadd.f32 %v1461_v48, %v2823_v26  ;;  %v1493_v50 = vpop.f32.mrb[67].mxu1  ;;  %v1531_v54 = vmax.f32 %v1499_v27, 0.0  ;;  %v1521_v56 = vmax.f32 %v1459_v40, 0.0 }
 0x17b   :  { %v1524_v19 = vmax.f32 %v1470_v3, 0.0  ;;  %v1494_v44 = vadd.f32 %v1493_v50, %v2845_v39  ;;  %v1529_v24 = vmax.f32 %v1491_v45, 0.0 }
 0x17c   :  { %v1532_v58 = vmax.f32 %v1502_v49, 0.0  ;;  %v1522_v21 = vmax.f32 %v1462_v6, 0.0 }
 0x17d   :  { %v1805_v41 = vpack.c.bf16 %v1524_v19, %v1523_v52  ;;  %v1530_v60 = vmax.f32 %v1494_v44, 0.0 }
 0x17e   :  { %v1825_v38 = vpack.c.bf16 %v1532_v58, %v1531_v54  ;;  %v1800_v61 = vpack.c.bf16 %v1522_v21, %v1521_v56  ;;  %v2138_v46 = vpop.f32.mrb[68].mxu0 }
 0x17f   :  { %1837 = vst [vmem:[%s2891_s2 + $0x8] sm:$0xff] %v1805_v41   ;;  %v1820_v26 = vpack.c.bf16 %v1530_v60, %v1529_v24  ;;  %v1483_v59 = vadd.f32 %v2138_v46, %v2839_v16  ;;  %v2146_v43 = vpop.f32.mrb[68].mxu1  ;;  %v1474_v63 = vpop.f32.mrb[69].mxu0 }
 0x180   :  { %1841 = vst [vmem:[%s2891_s2 + $0x28] sm:$0xff] %v1825_v38   ;;  %1801 = vst [vmem:[%s2891_s2] sm:$0xff] %v1800_v61   ;;  %v1515_v39 = vadd.f32 %v2146_v43, %v1418_v53  ;;  %v1475_v1 = vadd.f32 %v1474_v63, %v2833_v62  ;;  %v1506_v2 = vpop.f32.mrb[69].mxu1  ;;  %v2139_v4 = vpop.f32.mrb[70].mxu0 }
 0x181   :  { %1840 = vst [vmem:[%s2891_s2 + $0x20] sm:$0xff] %v1820_v26   ;;  %v1507_v16 = vadd.f32 %v1506_v2, %v1410_v55  ;;  %v1486_v8 = vadd.f32 %v2139_v4, %v2841_v18  ;;  %v2147_v9 = vpop.f32.mrb[70].mxu1  ;;  %v1477_v10 = vpop.f32.mrb[71].mxu0  ;;  %v1527_v37 = vmax.f32 %v1483_v59, 0.0 }
 0x182   :  { %v1518_v35 = vadd.f32 %v2147_v9, %v1421_v33  ;;  %v1478_v11 = vadd.f32 %v1477_v10, %v2835_v0  ;;  %v1509_v12 = vpop.f32.mrb[71].mxu1  ;;  %v1535_v62 = vmax.f32 %v1515_v39, 0.0  ;;  %v1525_v57 = vmax.f32 %v1475_v1, 0.0 }
 0x183   :  { %v1528_v14 = vmax.f32 %v1486_v8, 0.0  ;;  %v1510_v15 = vadd.f32 %v1509_v12, %v2851_v13  ;;  %v1533_v22 = vmax.f32 %v1507_v16, 0.0 }
 0x184   :  { %v1536_v17 = vmax.f32 %v1518_v35, 0.0  ;;  %v1526_v20 = vmax.f32 %v1478_v11, 0.0 }
 0x185   :  { %v1815_v23 = vpack.c.bf16 %v1528_v14, %v1527_v37  ;;  %v1534_v25 = vmax.f32 %v1510_v15, 0.0 }
 0x186   :  { %v1835_v55 = vpack.c.bf16 %v1536_v17, %v1535_v62  ;;  %v1810_v28 = vpack.c.bf16 %v1526_v20, %v1525_v57 }
 0x187   :  { %1839 = vst [vmem:[%s2891_s2 + $0x18] sm:$0xff] %v1815_v23   ;;  %v1830_v18 = vpack.c.bf16 %v1534_v25, %v1533_v22 }
 0x188   :  { %1843 = vst [vmem:[%s2891_s2 + $0x38] sm:$0xff] %v1835_v55   ;;  %1838 = vst [vmem:[%s2891_s2 + $0x10] sm:$0xff] %v1810_v28  }
 0x189   :  { %1842 = vst [vmem:[%s2891_s2 + $0x30] sm:$0xff] %v1830_v18  }

// kernel: resnet_qnn_forward.19
= control target key start
LH: loop header
LB: loop body
LE: loop exit
PB: predicated region body
PF: predicated region fallthrough
CT: control target
= control target key end

     0   :  { %s285_s1 = inlined_call_operand.vmem [shape: bf16[128,128], index: 1, kind: input, shape index: {}]   ;;  %s286_s0 = inlined_call_operand.vmem [shape: bf16[32,128], index: 0, kind: input, shape index: {}]   ;;  %s287_s2 = inlined_call_operand.vmem [shape: bf16[32,128], index: 2, kind: output, shape index: {}]  }
   0x1   :  { %v224_v0 = vld [vmem:[%s285_s1] sm:$0xff]   ;;  %v225_v1 = vld [vmem:[%s285_s1 + $0x8] sm:$0xff]   ;;  %v226_v2 = vld [vmem:[%s285_s1 + $0x10] sm:$0xff]  }
   0x2   :  { %204 = vmatprep.subr.bf16.mxu0 %v224_v0  ;;  %v227_v3 = vld [vmem:[%s285_s1 + $0x18] sm:$0xff]   ;;  %v232_v4 = vld [vmem:[%s286_s0] sm:$0xff]   ;;  %v229_v6 = vld [vmem:[%s285_s1 + $0x28] sm:$0xff]  }
   0x3   :  { %205 = vmatpush3.bf16.msra.mxu0 %v224_v0  ;;  %220 = vmatprep.mubr.bf16.mxu0 %v232_v4  ;;  %v228_v5 = vld [vmem:[%s285_s1 + $0x20] sm:$0xff]   ;;  %v230_v7 = vld [vmem:[%s285_s1 + $0x30] sm:$0xff]   ;;  %v231_v8 = vld [vmem:[%s285_s1 + $0x38] sm:$0xff]  }
   0x4   :  { %206 = vmatprep.subr.bf16.mxu0 %v225_v1  ;;  %v233_v9 = vld [vmem:[%s286_s0 + $0x8] sm:$0xff]  }
   0x7   :  { %207 = vmatpush3.bf16.msra.mxu0 %v225_v1 }
   0x8   :  { %208 = vmatprep.subr.bf16.mxu0 %v226_v2 }
   0xb   :  { %209 = vmatpush3.bf16.msra.mxu0 %v226_v2 }
   0xc   :  { %210 = vmatprep.subr.bf16.mxu0 %v227_v3 }
   0xf   :  { %211 = vmatpush3.bf16.msra.mxu0 %v227_v3 }
  0x10   :  { %212 = vmatprep.subr.bf16.mxu0 %v228_v5 }
  0x13   :  { %213 = vmatpush3.bf16.msra.mxu0 %v228_v5 }
  0x14   :  { %214 = vmatprep.subr.bf16.mxu0 %v229_v6 }
  0x17   :  { %215 = vmatpush3.bf16.msra.mxu0 %v229_v6 }
  0x18   :  { %216 = vmatprep.subr.bf16.mxu0 %v230_v7 }
  0x1b   :  { %217 = vmatpush3.bf16.msra.mxu0 %v230_v7 }
  0x1c   :  { %218 = vmatprep.subr.bf16.mxu0 %v231_v8 }
  0x1f   :  { %219 = vmatpush3.bf16.msra.mxu0 %v231_v8 }
  0x22   :  { %221 = vmatmul.mubr.bf16.vlgmr.msra.gmra.mrb[0].mxu0 %v233_v9 }
  0xf5   :  { %v222_v10 = vpop.f32.mrb[0].mxu0 }
  0xf6   :  { %v126_v11 = vpop.f32.mrb[1].mxu0 }
  0xf7   :  { %v223_v12 = vpop.f32.mrb[2].mxu0 }
  0xf8   :  { %v191_v13 = vpack.c.bf16 %v223_v12, %v222_v10  ;;  %v129_v14 = vpop.f32.mrb[3].mxu0 }
  0xf9   :  { %v186_v15 = vpack.c.bf16 %v129_v14, %v126_v11 }
  0xfa   :  { %193 = vst [vmem:[%s287_s2 + $0x8] sm:$0xff] %v191_v13  }
  0xfb   :  { %187 = vst [vmem:[%s287_s2] sm:$0xff] %v186_v15  }

// kernel: resnet_qnn_forward.17
= control target key start
LH: loop header
LB: loop body
LE: loop exit
PB: predicated region body
PF: predicated region fallthrough
CT: control target
= control target key end

     0   :  { %s2992_s1 = inlined_call_operand.vmem [shape: bf16[1152,128], index: 1, kind: input, shape index: {}]   ;;  %s2993_s0 = inlined_call_operand.vmem [shape: bf16[128,1152], index: 0, kind: input, shape index: {}]   ;;  %s2994_s2 = inlined_call_operand.vmem [shape: bf16[128,128], index: 2, kind: input, shape index: {}]   ;;  %s2995_s3 = inlined_call_operand.vmem [shape: bf16[128,128], index: 3, kind: output, shape index: {}]  }
   0x1   :  { %v2238_v0 = vld [vmem:[%s2992_s1 + $0x40] sm:$0xff]   ;;  %v2242_v4 = vld [vmem:[%s2992_s1 + $0x48] sm:$0xff]   ;;  %v2246_v8 = vld [vmem:[%s2992_s1 + $0x50] sm:$0xff]  }
   0x2   :  { %v2239_v1 = vld [vmem:[%s2992_s1 + $0xc0] sm:$0xff]   ;;  %1918 = vmatprep.subr.bf16.mxu0 %v2238_v0  ;;  %v2243_v5 = vld [vmem:[%s2992_s1 + $0xc8] sm:$0xff]   ;;  %v2247_v9 = vld [vmem:[%s2992_s1 + $0xd0] sm:$0xff]  }
   0x3   :  { %v2240_v2 = vld [vmem:[%s2992_s1] sm:$0xff]   ;;  %1982 = vmatprep.subr.bf16.mxu1 %v2239_v1  ;;  %v2244_v6 = vld [vmem:[%s2992_s1 + $0x8] sm:$0xff]   ;;  %v2248_v10 = vld [vmem:[%s2992_s1 + $0x10] sm:$0xff]  }
   0x4   :  { %v2241_v3 = vld [vmem:[%s2992_s1 + $0x80] sm:$0xff]   ;;  %1919 = vmatpush3.bf16.msra.mxu0 %v2240_v2  ;;  %v2245_v7 = vld [vmem:[%s2992_s1 + $0x88] sm:$0xff]   ;;  %v2249_v11 = vld [vmem:[%s2992_s1 + $0x90] sm:$0xff]  }
   0x5   :  { %1983 = vmatpush3.bf16.msra.mxu1 %v2241_v3  ;;  %1920 = vmatprep.subr.bf16.mxu0 %v2242_v4  ;;  %v2250_v12 = vld [vmem:[%s2992_s1 + $0x58] sm:$0xff]   ;;  %v2254_v16 = vld [vmem:[%s2992_s1 + $0x60] sm:$0xff]   ;;  %v2258_v20 = vld [vmem:[%s2992_s1 + $0x68] sm:$0xff]  }
   0x6   :  { %1984 = vmatprep.subr.bf16.mxu1 %v2243_v5  ;;  %v2251_v13 = vld [vmem:[%s2992_s1 + $0xd8] sm:$0xff]   ;;  %v2255_v17 = vld [vmem:[%s2992_s1 + $0xe0] sm:$0xff]   ;;  %v2259_v21 = vld [vmem:[%s2992_s1 + $0xe8] sm:$0xff]  }
   0x7   :  { %v2252_v14 = vld [vmem:[%s2992_s1 + $0x18] sm:$0xff]   ;;  %v2256_v18 = vld [vmem:[%s2992_s1 + $0x20] sm:$0xff]   ;;  %v2260_v22 = vld [vmem:[%s2992_s1 + $0x28] sm:$0xff]  }
   0x8   :  { %1921 = vmatpush3.bf16.msra.mxu0 %v2244_v6  ;;  %v2253_v15 = vld [vmem:[%s2992_s1 + $0x98] sm:$0xff]   ;;  %v2257_v19 = vld [vmem:[%s2992_s1 + $0xa0] sm:$0xff]   ;;  %v2261_v23 = vld [vmem:[%s2992_s1 + $0xa8] sm:$0xff]  }
   0x9   :  { %1985 = vmatpush3.bf16.msra.mxu1 %v2245_v7  ;;  %1922 = vmatprep.subr.bf16.mxu0 %v2246_v8  ;;  %v2262_v24 = vld [vmem:[%s2992_s1 + $0x70] sm:$0xff]   ;;  %v2266_v28 = vld [vmem:[%s2992_s1 + $0x78] sm:$0xff]   ;;  %v2270_v32 = vld [vmem:[%s2993_s0] ss:$36 sps:$4 sm:$0xff]  }
   0xa   :  { %1986 = vmatprep.subr.bf16.mxu1 %v2247_v9  ;;  %v2263_v25 = vld [vmem:[%s2992_s1 + $0xf0] sm:$0xff]   ;;  %v2267_v29 = vld [vmem:[%s2992_s1 + $0xf8] sm:$0xff]   ;;  %v2272_v33 = vld [vmem:[%s2993_s0 + $0x4] ss:$36 sps:$4 sm:$0xff]  }
   0xb   :  { %v2264_v26 = vld [vmem:[%s2992_s1 + $0x30] sm:$0xff]   ;;  %v2268_v30 = vld [vmem:[%s2992_s1 + $0x38] sm:$0xff]   ;;  %v2273_v34 = vld [vmem:[%s2993_s0 + $0x8] ss:$36 sps:$4 sm:$0xff]   ;;  %1103 = vmatprep.mubr.bf16.mxu0 %v2272_v33 }
   0xc   :  { %1923 = vmatpush3.bf16.msra.mxu0 %v2248_v10  ;;  %v2265_v27 = vld [vmem:[%s2992_s1 + $0xb0] sm:$0xff]   ;;  %v2269_v31 = vld [vmem:[%s2992_s1 + $0xb8] sm:$0xff]   ;;  %v2276_v36 = vld [vmem:[%s2992_s1 + $0x140] sm:$0xff]  }
   0xd   :  { %1987 = vmatpush3.bf16.msra.mxu1 %v2249_v11  ;;  %1924 = vmatprep.subr.bf16.mxu0 %v2250_v12  ;;  %v2275_v35 = vld [vmem:[%s2993_s0 + $0xc] ss:$36 sps:$4 sm:$0xff]   ;;  %v2277_v37 = vld [vmem:[%s2992_s1 + $0x1c0] sm:$0xff]   ;;  %v2282_v41 = vld [vmem:[%s2993_s0 + $0x54] ss:$36 sps:$4 sm:$0xff]  }
   0xe   :  { %1988 = vmatprep.subr.bf16.mxu1 %v2251_v13  ;;  %1200 = vmatprep.mubr.bf16.mxu1 %v2275_v35  ;;  %v2278_v38 = vld [vmem:[%s2992_s1 + $0x100] sm:$0xff]   ;;  %v2280_v40 = vld [vmem:[%s2993_s0 + $0x4c] ss:$36 sps:$4 sm:$0xff]   ;;  %v2290_v48 = vld [vmem:[%s2993_s0 + $0x94] ss:$36 sps:$4 sm:$0xff]  }
   0xf   :  { %v2279_v39 = vld [vmem:[%s2992_s1 + $0x180] sm:$0xff]   ;;  %v2284_v42 = vld [vmem:[%s2993_s0 + $0x48] ss:$36 sps:$4 sm:$0xff]   ;;  %v2285_v43 = vld [vmem:[%s2993_s0 + $0x50] ss:$36 sps:$4 sm:$0xff]  }
  0x10   :  { %1925 = vmatpush3.bf16.msra.mxu0 %v2252_v14  ;;  %v2286_v44 = vld [vmem:[%s2992_s1 + $0x148] sm:$0xff]   ;;  %v2292_v49 = vld [vmem:[%s2993_s0 + $0x9c] ss:$36 sps:$4 sm:$0xff]   ;;  %v2294_v50 = vld [vmem:[%s2993_s0 + $0x90] ss:$36 sps:$4 sm:$0xff]  }
  0x11   :  { %1989 = vmatpush3.bf16.msra.mxu1 %v2253_v15  ;;  %1926 = vmatprep.subr.bf16.mxu0 %v2254_v16  ;;  %v2287_v45 = vld [vmem:[%s2992_s1 + $0x1c8] sm:$0xff]   ;;  %v2295_v51 = vld [vmem:[%s2993_s0 + $0x98] ss:$36 sps:$4 sm:$0xff]   ;;  %v2296_v52 = vld [vmem:[%s2992_s1 + $0x150] sm:$0xff]  }
  0x12   :  { %1990 = vmatprep.subr.bf16.mxu1 %v2255_v17  ;;  %v2288_v46 = vld [vmem:[%s2992_s1 + $0x108] sm:$0xff]   ;;  %v2297_v53 = vld [vmem:[%s2992_s1 + $0x1d0] sm:$0xff]   ;;  %v2300_v56 = vld [vmem:[%s2993_s0 + $0xdc] ss:$36 sps:$4 sm:$0xff]  }
  0x13   :  { %v2289_v47 = vld [vmem:[%s2992_s1 + $0x188] sm:$0xff]   ;;  %v2298_v54 = vld [vmem:[%s2992_s1 + $0x110] sm:$0xff]   ;;  %v2304_v58 = vld [vmem:[%s2993_s0 + $0xd8] ss:$36 sps:$4 sm:$0xff]  }
  0x14   :  { %1927 = vmatpush3.bf16.msra.mxu0 %v2256_v18  ;;  %v2299_v55 = vld [vmem:[%s2992_s1 + $0x190] sm:$0xff]   ;;  %v2302_v57 = vld [vmem:[%s2993_s0 + $0xe4] ss:$36 sps:$4 sm:$0xff]   ;;  %v2306_v60 = vld [vmem:[%s2992_s1 + $0x158] sm:$0xff]  }
  0x15   :  { %1991 = vmatpush3.bf16.msra.mxu1 %v2257_v19  ;;  %1928 = vmatprep.subr.bf16.mxu0 %v2258_v20  ;;  %v2305_v59 = vld [vmem:[%s2993_s0 + $0xe0] ss:$36 sps:$4 sm:$0xff]   ;;  %v2307_v61 = vld [vmem:[%s2992_s1 + $0x1d8] sm:$0xff]   ;;  %v2312_v1 = vld [vmem:[%s2993_s0 + $0x12c] ss:$36 sps:$4 sm:$0xff]  }
  0x16   :  { %1992 = vmatprep.subr.bf16.mxu1 %v2259_v21  ;;  %v2308_v62 = vld [vmem:[%s2992_s1 + $0x118] sm:$0xff]   ;;  %v2310_v0 = vld [vmem:[%s2993_s0 + $0x124] ss:$36 sps:$4 sm:$0xff]   ;;  %v2320_v8 = vld [vmem:[%s2993_s0 + $0x16c] ss:$36 sps:$4 sm:$0xff]  }
  0x17   :  { %v2309_v63 = vld [vmem:[%s2992_s1 + $0x198] sm:$0xff]   ;;  %v2314_v2 = vld [vmem:[%s2993_s0 + $0x120] ss:$36 sps:$4 sm:$0xff]   ;;  %v2315_v4 = vld [vmem:[%s2993_s0 + $0x128] ss:$36 sps:$4 sm:$0xff]  }
  0x18   :  { %1929 = vmatpush3.bf16.msra.mxu0 %v2260_v22  ;;  %v2316_v3 = vld [vmem:[%s2992_s1 + $0x160] sm:$0xff]   ;;  %v2322_v9 = vld [vmem:[%s2993_s0 + $0x174] ss:$36 sps:$4 sm:$0xff]   ;;  %v2326_v10 = vld [vmem:[%s2992_s1 + $0x168] sm:$0xff]  }
  0x19   :  { %1993 = vmatpush3.bf16.msra.mxu1 %v2261_v23  ;;  %1930 = vmatprep.subr.bf16.mxu0 %v2262_v24  ;;  %v2317_v5 = vld [vmem:[%s2992_s1 + $0x1e0] sm:$0xff]   ;;  %v2327_v11 = vld [vmem:[%s2992_s1 + $0x1e8] sm:$0xff]   ;;  %v2325_v15 = vld [vmem:[%s2993_s0 + $0x170] ss:$36 sps:$4 sm:$0xff]  }
  0x1a   :  { %1994 = vmatprep.subr.bf16.mxu1 %v2263_v25  ;;  %v2318_v6 = vld [vmem:[%s2992_s1 + $0x120] sm:$0xff]   ;;  %v2324_v12 = vld [vmem:[%s2993_s0 + $0x168] ss:$36 sps:$4 sm:$0xff]   ;;  %v2330_v16 = vld [vmem:[%s2993_s0 + $0x1b4] ss:$36 sps:$4 sm:$0xff]  }
  0x1b   :  { %v2319_v7 = vld [vmem:[%s2992_s1 + $0x1a0] sm:$0xff]   ;;  %v2328_v13 = vld [vmem:[%s2992_s1 + $0x128] sm:$0xff]   ;;  %v2336_v18 = vld [vmem:[%s2992_s1 + $0x170] sm:$0xff]  }
  0x1c   :  { %1931 = vmatpush3.bf16.msra.mxu0 %v2264_v26  ;;  %v2329_v14 = vld [vmem:[%s2992_s1 + $0x1a8] sm:$0xff]   ;;  %v2332_v17 = vld [vmem:[%s2993_s0 + $0x1bc] ss:$36 sps:$4 sm:$0xff]   ;;  %v2337_v19 = vld [vmem:[%s2992_s1 + $0x1f0] sm:$0xff]  }
  0x1d   :  { %1995 = vmatpush3.bf16.msra.mxu1 %v2265_v27  ;;  %1932 = vmatprep.subr.bf16.mxu0 %v2266_v28  ;;  %v2338_v20 = vld [vmem:[%s2992_s1 + $0x130] sm:$0xff]   ;;  %v2335_v23 = vld [vmem:[%s2993_s0 + $0x1b8] ss:$36 sps:$4 sm:$0xff]   ;;  %v2342_v25 = vld [vmem:[%s2993_s0 + $0x204] ss:$36 sps:$4 sm:$0xff]  }
  0x1e   :  { %1996 = vmatprep.subr.bf16.mxu1 %v2267_v29  ;;  %v2339_v21 = vld [vmem:[%s2992_s1 + $0x1b0] sm:$0xff]   ;;  %v2340_v24 = vld [vmem:[%s2993_s0 + $0x1fc] ss:$36 sps:$4 sm:$0xff]  }
  0x1f   :  { %v2334_v22 = vld [vmem:[%s2993_s0 + $0x1b0] ss:$36 sps:$4 sm:$0xff]   ;;  %v2346_v26 = vld [vmem:[%s2992_s1 + $0x178] sm:$0xff]  }
  0x20   :  { %1933 = vmatpush3.bf16.msra.mxu0 %v2268_v30  ;;  %v2347_v27 = vld [vmem:[%s2992_s1 + $0x1f8] sm:$0xff]   ;;  %v2350_v35 = vld [vmem:[%s2993_s0 + $0x10] ss:$36 sps:$4 sm:$0xff]  }
  0x21   :  { %1997 = vmatpush3.bf16.msra.mxu1 %v2269_v31  ;;  %2046 = vmatprep.subr.bf16.mxu0 %v2276_v36  ;;  %v2348_v28 = vld [vmem:[%s2992_s1 + $0x138] sm:$0xff]   ;;  %v2345_v31 = vld [vmem:[%s2993_s0 + $0x200] ss:$36 sps:$4 sm:$0xff]  }
  0x22   :  { %2110 = vmatprep.subr.bf16.mxu1 %v2277_v37  ;;  %v2349_v29 = vld [vmem:[%s2992_s1 + $0x1b8] sm:$0xff]  }
  0x23   :  { %1104 = vmatmul.mubr.bf16.vlgmr.msra.gmra.mrb[0].mxu0 %v2270_v32  ;;  %v2344_v30 = vld [vmem:[%s2993_s0 + $0x1f8] ss:$36 sps:$4 sm:$0xff]   ;;  %v2356_v32 = vld [vmem:[%s2992_s1 + $0x200] sm:$0xff]  }
  0x24   :  { %1201 = vmatmul.mubr.bf16.vlgmr.msra.gmra.mrb[0].mxu1 %v2273_v34  ;;  %2047 = vmatpush3.bf16.msra.mxu0 %v2278_v38  ;;  %v2352_v33 = vld [vmem:[%s2993_s0 + $0x14] ss:$36 sps:$4 sm:$0xff]   ;;  %v2355_v34 = vld [vmem:[%s2993_s0 + $0x1c] ss:$36 sps:$4 sm:$0xff]   ;;  %v2359_v38 = vld [vmem:[%s2993_s0 + $0x64] ss:$36 sps:$4 sm:$0xff]  }
  0x25   :  { %2111 = vmatpush3.bf16.msra.mxu1 %v2279_v39  ;;  %1111 = vmatprep.mubr.bf16.mxu0 %v2280_v40  ;;  %v2353_v36 = vld [vmem:[%s2993_s0 + $0x18] ss:$36 sps:$4 sm:$0xff]   ;;  %v2363_v39 = vld [vmem:[%s2992_s1 + $0x208] sm:$0xff]   ;;  %v2370_v40 = vld [vmem:[%s2992_s1 + $0x210] sm:$0xff]  }
  0x26   :  { %1208 = vmatprep.mubr.bf16.mxu1 %v2282_v41  ;;  %2048 = vmatprep.subr.bf16.mxu0 %v2286_v44  ;;  %v2357_v37 = vld [vmem:[%s2993_s0 + $0x5c] ss:$36 sps:$4 sm:$0xff]   ;;  %v2366_v44 = vld [vmem:[%s2993_s0 + $0xac] ss:$36 sps:$4 sm:$0xff]  }
  0x27   :  { %2112 = vmatprep.subr.bf16.mxu1 %v2287_v45  ;;  %v2361_v41 = vld [vmem:[%s2993_s0 + $0x58] ss:$36 sps:$4 sm:$0xff]  }
  0x28   :  { %2049 = vmatpush3.bf16.msra.mxu0 %v2288_v46  ;;  %v2377_v45 = vld [vmem:[%s2992_s1 + $0x218] sm:$0xff]   ;;  %v2384_v46 = vld [vmem:[%s2992_s1 + $0x220] sm:$0xff]  }
  0x29   :  { %2113 = vmatpush3.bf16.msra.mxu1 %v2289_v47  ;;  %2050 = vmatprep.subr.bf16.mxu0 %v2296_v52  ;;  %v2368_v47 = vld [vmem:[%s2993_s0 + $0xa0] ss:$36 sps:$4 sm:$0xff]   ;;  %v2375_v52 = vld [vmem:[%s2993_s0 + $0xe8] ss:$36 sps:$4 sm:$0xff]  }
  0x2a   :  { %2114 = vmatprep.subr.bf16.mxu1 %v2297_v53  ;;  %v2398_v53 = vld [vmem:[%s2992_s1 + $0x230] sm:$0xff]  }
  0x2b   :  { %1112 = vmatmul.mubr.bf16.gmra.mrb[4].mxu0 %v2284_v42  ;;  %v2362_v42 = vld [vmem:[%s2993_s0 + $0x60] ss:$36 sps:$4 sm:$0xff]  }
  0x2c   :  { %1209 = vmatmul.mubr.bf16.gmra.mrb[4].mxu1 %v2285_v43  ;;  %1119 = vmatprep.mubr.bf16.mxu0 %v2290_v48  ;;  %v2364_v43 = vld [vmem:[%s2993_s0 + $0xa4] ss:$36 sps:$4 sm:$0xff]  }
  0x2d   :  { %1216 = vmatprep.mubr.bf16.mxu1 %v2292_v49  ;;  %2051 = vmatpush3.bf16.msra.mxu0 %v2298_v54  ;;  %v2369_v48 = vld [vmem:[%s2993_s0 + $0xa8] ss:$36 sps:$4 sm:$0xff]   ;;  %v2376_v54 = vld [vmem:[%s2993_s0 + $0xf0] ss:$36 sps:$4 sm:$0xff]  }
  0x2e   :  { %2115 = vmatpush3.bf16.msra.mxu1 %v2299_v55  ;;  %2052 = vmatprep.subr.bf16.mxu0 %v2306_v60  ;;  %v2371_v49 = vld [vmem:[%s2993_s0 + $0xec] ss:$36 sps:$4 sm:$0xff]   ;;  %v2378_v55 = vld [vmem:[%s2993_s0 + $0x134] ss:$36 sps:$4 sm:$0xff]   ;;  %v2385_v60 = vld [vmem:[%s2993_s0 + $0x17c] ss:$36 sps:$4 sm:$0xff]  }
  0x2f   :  { %2116 = vmatprep.subr.bf16.mxu1 %v2307_v61  ;;  %v2387_v61 = vld [vmem:[%s2993_s0 + $0x184] ss:$36 sps:$4 sm:$0xff]  }
  0x31   :  { %2053 = vmatpush3.bf16.msra.mxu0 %v2308_v62  ;;  %v2389_v62 = vld [vmem:[%s2993_s0 + $0x178] ss:$36 sps:$4 sm:$0xff]  }
  0x32   :  { %2117 = vmatpush3.bf16.msra.mxu1 %v2309_v63  ;;  %2054 = vmatprep.subr.bf16.mxu0 %v2316_v3  ;;  %v2390_v63 = vld [vmem:[%s2993_s0 + $0x180] ss:$36 sps:$4 sm:$0xff]   ;;  %v2397_v3 = vld [vmem:[%s2993_s0 + $0x1c8] ss:$36 sps:$4 sm:$0xff]  }
  0x33   :  { %1120 = vmatmul.mubr.bf16.gmra.mrb[8].mxu0 %v2294_v50  ;;  %2118 = vmatprep.subr.bf16.mxu1 %v2317_v5  ;;  %v2373_v50 = vld [vmem:[%s2993_s0 + $0xf4] ss:$36 sps:$4 sm:$0xff]  }
  0x34   :  { %1217 = vmatmul.mubr.bf16.gmra.mrb[8].mxu1 %v2295_v51  ;;  %1127 = vmatprep.mubr.bf16.mxu0 %v2300_v56  ;;  %v2391_v51 = vld [vmem:[%s2992_s1 + $0x228] sm:$0xff]   ;;  %v2380_v56 = vld [vmem:[%s2993_s0 + $0x13c] ss:$36 sps:$4 sm:$0xff]   ;;  %v2401_v5 = vld [vmem:[%s2993_s0 + $0x214] ss:$36 sps:$4 sm:$0xff]  }
  0x35   :  { %1224 = vmatprep.mubr.bf16.mxu1 %v2302_v57  ;;  %2055 = vmatpush3.bf16.msra.mxu0 %v2318_v6  ;;  %v2405_v57 = vld [vmem:[%s2992_s1 + $0x238] sm:$0xff]   ;;  %v2403_v6 = vld [vmem:[%s2993_s0 + $0x208] ss:$36 sps:$4 sm:$0xff]  }
  0x36   :  { %2119 = vmatpush3.bf16.msra.mxu1 %v2319_v7  ;;  %2056 = vmatprep.subr.bf16.mxu0 %v2326_v10  ;;  %v2404_v7 = vld [vmem:[%s2993_s0 + $0x210] ss:$36 sps:$4 sm:$0xff]   ;;  %v2408_v10 = vld [vmem:[%s2993_s0 + $0x68] ss:$36 sps:$4 sm:$0xff]  }
  0x37   :  { %2120 = vmatprep.subr.bf16.mxu1 %v2327_v11  ;;  %v2409_v11 = vld [vmem:[%s2993_s0 + $0x188] ss:$36 sps:$4 sm:$0xff]  }
  0x39   :  { %2057 = vmatpush3.bf16.msra.mxu0 %v2328_v13  ;;  %v2411_v13 = vld [vmem:[%s2993_s0 + $0x1d0] ss:$36 sps:$4 sm:$0xff]  }
  0x3a   :  { %2121 = vmatpush3.bf16.msra.mxu1 %v2329_v14  ;;  %2058 = vmatprep.subr.bf16.mxu0 %v2336_v18  ;;  %v2412_v14 = vld [vmem:[%s2993_s0 + $0xf8] ss:$36 sps:$4 sm:$0xff]  }
  0x3b   :  { %1128 = vmatmul.mubr.bf16.gmra.mrb[12].mxu0 %v2304_v58  ;;  %2122 = vmatprep.subr.bf16.mxu1 %v2337_v19  ;;  %v2382_v58 = vld [vmem:[%s2993_s0 + $0x130] ss:$36 sps:$4 sm:$0xff]  }
  0x3c   :  { %1225 = vmatmul.mubr.bf16.gmra.mrb[12].mxu1 %v2305_v59  ;;  %1135 = vmatprep.mubr.bf16.mxu0 %v2310_v0  ;;  %v2383_v59 = vld [vmem:[%s2993_s0 + $0x138] ss:$36 sps:$4 sm:$0xff]   ;;  %v2392_v0 = vld [vmem:[%s2993_s0 + $0x1c4] ss:$36 sps:$4 sm:$0xff]  }
  0x3d   :  { %1232 = vmatprep.mubr.bf16.mxu1 %v2312_v1  ;;  %2059 = vmatpush3.bf16.msra.mxu0 %v2338_v20  ;;  %v2394_v1 = vld [vmem:[%s2993_s0 + $0x1cc] ss:$36 sps:$4 sm:$0xff]  }
  0x3e   :  { %2123 = vmatpush3.bf16.msra.mxu1 %v2339_v21  ;;  %2060 = vmatprep.subr.bf16.mxu0 %v2346_v26 }
  0x3f   :  { %2124 = vmatprep.subr.bf16.mxu1 %v2347_v27 }
  0x41   :  { %2061 = vmatpush3.bf16.msra.mxu0 %v2348_v28 }
  0x42   :  { %2125 = vmatpush3.bf16.msra.mxu1 %v2349_v29  ;;  %2190 = vmatprep.subr.bf16.mxu0 %v2356_v32 }
  0x43   :  { %1136 = vmatmul.mubr.bf16.gmra.mrb[16].mxu0 %v2314_v2  ;;  %2222 = vmatprep.subr.bf16.mxu1 %v2356_v32  ;;  %v2396_v2 = vld [vmem:[%s2993_s0 + $0x1c0] ss:$36 sps:$4 sm:$0xff]  }
  0x44   :  { %1233 = vmatmul.mubr.bf16.gmra.mrb[16].mxu1 %v2315_v4  ;;  %1143 = vmatprep.mubr.bf16.mxu0 %v2320_v8  ;;  %v2399_v4 = vld [vmem:[%s2993_s0 + $0x20c] ss:$36 sps:$4 sm:$0xff]   ;;  %v2406_v8 = vld [vmem:[%s2993_s0 + $0x20] ss:$36 sps:$4 sm:$0xff]  }
  0x45   :  { %1240 = vmatprep.mubr.bf16.mxu1 %v2322_v9  ;;  %v2407_v9 = vld [vmem:[%s2993_s0 + $0x140] ss:$36 sps:$4 sm:$0xff]  }
  0x4b   :  { %1144 = vmatmul.mubr.bf16.gmra.mrb[20].mxu0 %v2324_v12  ;;  %v2410_v12 = vld [vmem:[%s2993_s0 + $0xb0] ss:$36 sps:$4 sm:$0xff]  }
  0x4c   :  { %1241 = vmatmul.mubr.bf16.gmra.mrb[20].mxu1 %v2325_v15  ;;  %1151 = vmatprep.mubr.bf16.mxu0 %v2330_v16  ;;  %v2413_v15 = vld [vmem:[%s2993_s0 + $0x218] ss:$36 sps:$4 sm:$0xff]   ;;  %v1833_v16 = vld [vmem:[%s2994_s2] sm:$0xff]  }
  0x4d   :  { %1248 = vmatprep.mubr.bf16.mxu1 %v2332_v17  ;;  %v1834_v18 = vunpack.c.l.bf16 %v1833_v16 }
  0x53   :  { %1152 = vmatmul.mubr.bf16.gmra.mrb[24].mxu0 %v2334_v22 }
  0x54   :  { %1249 = vmatmul.mubr.bf16.gmra.mrb[24].mxu1 %v2335_v23  ;;  %1159 = vmatprep.mubr.bf16.mxu0 %v2340_v24  ;;  %v1835_v24 = vunpack.c.h.bf16 %v1833_v16 }
  0x55   :  { %1256 = vmatprep.mubr.bf16.mxu1 %v2342_v25 }
  0x5b   :  { %1160 = vmatmul.mubr.bf16.gmra.mrb[28].mxu0 %v2344_v30 }
  0x5c   :  { %1257 = vmatmul.mubr.bf16.gmra.mrb[28].mxu1 %v2345_v31  ;;  %1297 = vmatprep.mubr.bf16.mxu0 %v2352_v33 }
  0x5d   :  { %1394 = vmatprep.mubr.bf16.mxu1 %v2355_v34 }
  0x63   :  { %1298 = vmatmul.mubr.bf16.vlgmr.msra.gmra.mrb[32].mxu0 %v2350_v35 }
  0x64   :  { %1395 = vmatmul.mubr.bf16.vlgmr.msra.gmra.mrb[32].mxu1 %v2353_v36  ;;  %2191 = vmatpush3.bf16.msra.mxu0 %v2356_v32 }
  0x65   :  { %2230 = vmatpush3.bf16.msra.mxu1 %v2356_v32  ;;  %1305 = vmatprep.mubr.bf16.mxu0 %v2357_v37  ;;  %v1904_v32 = vld [vmem:[%s2994_s2 + $0x8] sm:$0xff]  }
  0x66   :  { %1402 = vmatprep.mubr.bf16.mxu1 %v2359_v38  ;;  %2192 = vmatprep.subr.bf16.mxu0 %v2363_v39  ;;  %v1838_v37 = vunpack.c.l.bf16 %v1904_v32 }
  0x67   :  { %2223 = vmatprep.subr.bf16.mxu1 %v2363_v39 }
  0x68   :  { %2193 = vmatpush3.bf16.msra.mxu0 %v2363_v39 }
  0x69   :  { %2231 = vmatpush3.bf16.msra.mxu1 %v2363_v39  ;;  %2194 = vmatprep.subr.bf16.mxu0 %v2370_v40 }
  0x6a   :  { %2224 = vmatprep.subr.bf16.mxu1 %v2370_v40 }
  0x6b   :  { %1306 = vmatmul.mubr.bf16.gmra.mrb[36].mxu0 %v2361_v41 }
  0x6c   :  { %1403 = vmatmul.mubr.bf16.gmra.mrb[36].mxu1 %v2362_v42  ;;  %1313 = vmatprep.mubr.bf16.mxu0 %v2364_v43  ;;  %v1839_v43 = vunpack.c.h.bf16 %v1904_v32 }
  0x6d   :  { %1410 = vmatprep.mubr.bf16.mxu1 %v2366_v44  ;;  %2195 = vmatpush3.bf16.msra.mxu0 %v2370_v40 }
  0x6e   :  { %2232 = vmatpush3.bf16.msra.mxu1 %v2370_v40  ;;  %2196 = vmatprep.subr.bf16.mxu0 %v2377_v45 }
  0x6f   :  { %2225 = vmatprep.subr.bf16.mxu1 %v2377_v45 }
  0x71   :  { %2197 = vmatpush3.bf16.msra.mxu0 %v2377_v45 }
  0x72   :  { %2233 = vmatpush3.bf16.msra.mxu1 %v2377_v45  ;;  %2198 = vmatprep.subr.bf16.mxu0 %v2384_v46 }
  0x73   :  { %1314 = vmatmul.mubr.bf16.gmra.mrb[40].mxu0 %v2368_v47  ;;  %2226 = vmatprep.subr.bf16.mxu1 %v2384_v46 }
  0x74   :  { %1411 = vmatmul.mubr.bf16.gmra.mrb[40].mxu1 %v2369_v48  ;;  %1321 = vmatprep.mubr.bf16.mxu0 %v2371_v49 }
  0x75   :  { %1418 = vmatprep.mubr.bf16.mxu1 %v2373_v50  ;;  %2199 = vmatpush3.bf16.msra.mxu0 %v2384_v46 }
  0x76   :  { %2234 = vmatpush3.bf16.msra.mxu1 %v2384_v46  ;;  %2200 = vmatprep.subr.bf16.mxu0 %v2391_v51 }
  0x77   :  { %2227 = vmatprep.subr.bf16.mxu1 %v2391_v51 }
  0x79   :  { %2201 = vmatpush3.bf16.msra.mxu0 %v2391_v51 }
  0x7a   :  { %2235 = vmatpush3.bf16.msra.mxu1 %v2391_v51  ;;  %2202 = vmatprep.subr.bf16.mxu0 %v2398_v53  ;;  %v1905_v51 = vld [vmem:[%s2994_s2 + $0x10] sm:$0xff]  }
  0x7b   :  { %1322 = vmatmul.mubr.bf16.gmra.mrb[44].mxu0 %v2375_v52  ;;  %2228 = vmatprep.subr.bf16.mxu1 %v2398_v53 }
  0x7c   :  { %1419 = vmatmul.mubr.bf16.gmra.mrb[44].mxu1 %v2376_v54  ;;  %1329 = vmatprep.mubr.bf16.mxu0 %v2378_v55 }
  0x7d   :  { %1426 = vmatprep.mubr.bf16.mxu1 %v2380_v56  ;;  %2203 = vmatpush3.bf16.msra.mxu0 %v2398_v53  ;;  %v1842_v56 = vunpack.c.l.bf16 %v1905_v51 }
  0x7e   :  { %2236 = vmatpush3.bf16.msra.mxu1 %v2398_v53  ;;  %2204 = vmatprep.subr.bf16.mxu0 %v2405_v57 }
  0x7f   :  { %2229 = vmatprep.subr.bf16.mxu1 %v2405_v57 }
  0x81   :  { %2205 = vmatpush3.bf16.msra.mxu0 %v2405_v57 }
  0x82   :  { %2237 = vmatpush3.bf16.msra.mxu1 %v2405_v57 }
  0x83   :  { %1330 = vmatmul.mubr.bf16.gmra.mrb[48].mxu0 %v2382_v58 }
  0x84   :  { %1427 = vmatmul.mubr.bf16.gmra.mrb[48].mxu1 %v2383_v59  ;;  %1337 = vmatprep.mubr.bf16.mxu0 %v2385_v60 }
  0x85   :  { %1434 = vmatprep.mubr.bf16.mxu1 %v2387_v61 }
  0x8b   :  { %1338 = vmatmul.mubr.bf16.gmra.mrb[52].mxu0 %v2389_v62  ;;  %v1843_v62 = vunpack.c.h.bf16 %v1905_v51 }
  0x8c   :  { %1435 = vmatmul.mubr.bf16.gmra.mrb[52].mxu1 %v2390_v63  ;;  %1345 = vmatprep.mubr.bf16.mxu0 %v2392_v0 }
  0x8d   :  { %1442 = vmatprep.mubr.bf16.mxu1 %v2394_v1 }
  0x93   :  { %1346 = vmatmul.mubr.bf16.gmra.mrb[56].mxu0 %v2396_v2 }
  0x94   :  { %1443 = vmatmul.mubr.bf16.gmra.mrb[56].mxu1 %v2397_v3  ;;  %1353 = vmatprep.mubr.bf16.mxu0 %v2399_v4 }
  0x95   :  { %1450 = vmatprep.mubr.bf16.mxu1 %v2401_v5 }
  0x9b   :  { %1354 = vmatmul.mubr.bf16.gmra.mrb[60].mxu0 %v2403_v6  ;;  %v1906_v6 = vld [vmem:[%s2994_s2 + $0x18] sm:$0xff]  }
  0x9c   :  { %1451 = vmatmul.mubr.bf16.gmra.mrb[60].mxu1 %v2404_v7  ;;  %2206 = vmatprep.mubr.bf16.mxu0 %v2406_v8 }
  0x9d   :  { %2214 = vmatprep.mubr.bf16.mxu1 %v2407_v9 }
  0xa3   :  { %2207 = vmatmul.mubr.bf16.vlgmr.msra.gmra.mrb[64].mxu0 %v2408_v10 }
  0xa4   :  { %2215 = vmatmul.mubr.bf16.vlgmr.msra.gmra.mrb[64].mxu1 %v2409_v11  ;;  %2210 = vmatprep.mubr.bf16.mxu0 %v2410_v12  ;;  %v1846_v11 = vunpack.c.l.bf16 %v1906_v6 }
  0xa5   :  { %2218 = vmatprep.mubr.bf16.mxu1 %v2411_v13 }
  0xab   :  { %2211 = vmatmul.mubr.bf16.gmra.mrb[68].mxu0 %v2412_v14 }
  0xac   :  { %2219 = vmatmul.mubr.bf16.gmra.mrb[68].mxu1 %v2413_v15 }
  0xf6   :  { %v1934_v17 = vpop.f32.mrb[0].mxu0 }
  0xf7   :  { %v1998_v19 = vpop.f32.mrb[0].mxu1  ;;  %v1935_v20 = vpop.f32.mrb[1].mxu0 }
  0xf8   :  { %v1936_v21 = vadd.f32 %v1935_v20, %v1934_v17  ;;  %v1999_v22 = vpop.f32.mrb[1].mxu1  ;;  %v1937_v23 = vpop.f32.mrb[2].mxu0  ;;  %v1847_v17 = vunpack.c.h.bf16 %v1906_v6 }
  0xf9   :  { %v2000_v25 = vadd.f32 %v1999_v22, %v1998_v19  ;;  %v2001_v26 = vpop.f32.mrb[2].mxu1  ;;  %v1938_v27 = vpop.f32.mrb[3].mxu0 }
  0xfa   :  { %v1106_v28 = vadd.f32 %v1936_v21, %v1834_v18  ;;  %v1939_v29 = vadd.f32 %v1938_v27, %v1937_v23  ;;  %v2002_v30 = vpop.f32.mrb[3].mxu1 }
  0xfb   :  { %v2003_v31 = vadd.f32 %v2002_v30, %v2001_v26 }
  0xfc   :  { %v2872_v33 = vadd.f32 %v2000_v25, %v1106_v28  ;;  %v1109_v34 = vadd.f32 %v1939_v29, %v1835_v24  ;;  %v1907_v25 = vld [vmem:[%s2994_s2 + $0x20] sm:$0xff]  }
  0xfd   :  { %v1850_v30 = vunpack.c.l.bf16 %v1907_v25 }
  0xfe   :  { %v2874_v35 = vadd.f32 %v2003_v31, %v1109_v34  ;;  %v1940_v36 = vpop.f32.mrb[4].mxu0 }
  0xff   :  { %v2004_v38 = vpop.f32.mrb[4].mxu1  ;;  %v1941_v39 = vpop.f32.mrb[5].mxu0 }
 0x100   :  { %v1942_v40 = vadd.f32 %v1941_v39, %v1940_v36  ;;  %v2005_v41 = vpop.f32.mrb[5].mxu1  ;;  %v1943_v42 = vpop.f32.mrb[6].mxu0 }
 0x101   :  { %v2006_v44 = vadd.f32 %v2005_v41, %v2004_v38  ;;  %v2007_v45 = vpop.f32.mrb[6].mxu1  ;;  %v1944_v46 = vpop.f32.mrb[7].mxu0  ;;  %v1851_v38 = vunpack.c.h.bf16 %v1907_v25 }
 0x102   :  { %v1114_v47 = vadd.f32 %v1942_v40, %v1838_v37  ;;  %v1945_v48 = vadd.f32 %v1944_v46, %v1943_v42  ;;  %v2008_v49 = vpop.f32.mrb[7].mxu1  ;;  %v1908_v46 = vld [vmem:[%s2994_s2 + $0x28] sm:$0xff]  }
 0x103   :  { %v2009_v50 = vadd.f32 %v2008_v49, %v2007_v45  ;;  %v1854_v51 = vunpack.c.l.bf16 %v1908_v46 }
 0x104   :  { %v2879_v52 = vadd.f32 %v2006_v44, %v1114_v47  ;;  %v1117_v53 = vadd.f32 %v1945_v48, %v1839_v43 }
 0x106   :  { %v2881_v54 = vadd.f32 %v2009_v50, %v1117_v53  ;;  %v1946_v55 = vpop.f32.mrb[8].mxu0 }
 0x107   :  { %v2010_v57 = vpop.f32.mrb[8].mxu1  ;;  %v1947_v58 = vpop.f32.mrb[9].mxu0 }
 0x108   :  { %v1948_v59 = vadd.f32 %v1947_v58, %v1946_v55  ;;  %v2011_v60 = vpop.f32.mrb[9].mxu1  ;;  %v1949_v61 = vpop.f32.mrb[10].mxu0 }
 0x109   :  { %v2012_v63 = vadd.f32 %v2011_v60, %v2010_v57  ;;  %v2013_v0 = vpop.f32.mrb[10].mxu1  ;;  %v1950_v1 = vpop.f32.mrb[11].mxu0 }
 0x10a   :  { %v1122_v2 = vadd.f32 %v1948_v59, %v1842_v56  ;;  %v1951_v3 = vadd.f32 %v1950_v1, %v1949_v61  ;;  %v2014_v4 = vpop.f32.mrb[11].mxu1  ;;  %v1855_v59 = vunpack.c.h.bf16 %v1908_v46 }
 0x10b   :  { %v2015_v5 = vadd.f32 %v2014_v4, %v2013_v0 }
 0x10c   :  { %v2886_v7 = vadd.f32 %v2012_v63, %v1122_v2  ;;  %v1125_v8 = vadd.f32 %v1951_v3, %v1843_v62  ;;  %v1909_v3 = vld [vmem:[%s2994_s2 + $0x30] sm:$0xff]  }
 0x10e   :  { %v2888_v9 = vadd.f32 %v2015_v5, %v1125_v8  ;;  %v1952_v10 = vpop.f32.mrb[12].mxu0 }
 0x10f   :  { %v2016_v12 = vpop.f32.mrb[12].mxu1  ;;  %v1953_v13 = vpop.f32.mrb[13].mxu0 }
 0x110   :  { %v1954_v14 = vadd.f32 %v1953_v13, %v1952_v10  ;;  %v2017_v15 = vpop.f32.mrb[13].mxu1  ;;  %v1955_v16 = vpop.f32.mrb[14].mxu0  ;;  %v1858_v10 = vunpack.c.l.bf16 %v1909_v3 }
 0x111   :  { %v2018_v18 = vadd.f32 %v2017_v15, %v2016_v12  ;;  %v2019_v19 = vpop.f32.mrb[14].mxu1  ;;  %v1956_v20 = vpop.f32.mrb[15].mxu0 }
 0x112   :  { %v1130_v21 = vadd.f32 %v1954_v14, %v1846_v11  ;;  %v1957_v22 = vadd.f32 %v1956_v20, %v1955_v16  ;;  %v2020_v23 = vpop.f32.mrb[15].mxu1  ;;  %v1859_v16 = vunpack.c.h.bf16 %v1909_v3 }
 0x113   :  { %v2021_v24 = vadd.f32 %v2020_v23, %v2019_v19 }
 0x114   :  { %v2893_v26 = vadd.f32 %v2018_v18, %v1130_v21  ;;  %v1133_v27 = vadd.f32 %v1957_v22, %v1847_v17 }
 0x116   :  { %v2895_v28 = vadd.f32 %v2021_v24, %v1133_v27  ;;  %v1958_v29 = vpop.f32.mrb[16].mxu0  ;;  %v1910_v24 = vld [vmem:[%s2994_s2 + $0x38] sm:$0xff]  }
 0x117   :  { %v2022_v31 = vpop.f32.mrb[16].mxu1  ;;  %v1959_v32 = vpop.f32.mrb[17].mxu0 }
 0x118   :  { %v1960_v34 = vadd.f32 %v1959_v32, %v1958_v29  ;;  %v2023_v36 = vpop.f32.mrb[17].mxu1  ;;  %v1961_v37 = vpop.f32.mrb[18].mxu0 }
 0x119   :  { %v2024_v39 = vadd.f32 %v2023_v36, %v2022_v31  ;;  %v2025_v40 = vpop.f32.mrb[18].mxu1  ;;  %v1962_v41 = vpop.f32.mrb[19].mxu0  ;;  %v1862_v31 = vunpack.c.l.bf16 %v1910_v24 }
 0x11a   :  { %v1138_v42 = vadd.f32 %v1960_v34, %v1850_v30  ;;  %v1963_v43 = vadd.f32 %v1962_v41, %v1961_v37  ;;  %v2026_v44 = vpop.f32.mrb[19].mxu1 }
 0x11b   :  { %v2027_v45 = vadd.f32 %v2026_v44, %v2025_v40 }
 0x11c   :  { %v2900_v47 = vadd.f32 %v2024_v39, %v1138_v42  ;;  %v1141_v48 = vadd.f32 %v1963_v43, %v1851_v38  ;;  %v1863_v39 = vunpack.c.h.bf16 %v1910_v24 }
 0x11e   :  { %v2902_v49 = vadd.f32 %v2027_v45, %v1141_v48  ;;  %v1964_v50 = vpop.f32.mrb[20].mxu0 }
 0x11f   :  { %v2028_v53 = vpop.f32.mrb[20].mxu1  ;;  %v1965_v55 = vpop.f32.mrb[21].mxu0 }
 0x120   :  { %v1966_v56 = vadd.f32 %v1965_v55, %v1964_v50  ;;  %v2029_v57 = vpop.f32.mrb[21].mxu1  ;;  %v1967_v58 = vpop.f32.mrb[22].mxu0 }
 0x121   :  { %v2030_v60 = vadd.f32 %v2029_v57, %v2028_v53  ;;  %v2031_v61 = vpop.f32.mrb[22].mxu1  ;;  %v1968_v62 = vpop.f32.mrb[23].mxu0 }
 0x122   :  { %v1146_v63 = vadd.f32 %v1966_v56, %v1854_v51  ;;  %v1969_v0 = vadd.f32 %v1968_v62, %v1967_v58  ;;  %v2032_v1 = vpop.f32.mrb[23].mxu1 }
 0x123   :  { %v2033_v2 = vadd.f32 %v2032_v1, %v2031_v61 }
 0x124   :  { %v2907_v4 = vadd.f32 %v2030_v60, %v1146_v63  ;;  %v1149_v5 = vadd.f32 %v1969_v0, %v1855_v59 }
 0x126   :  { %v2909_v6 = vadd.f32 %v2033_v2, %v1149_v5  ;;  %v1970_v8 = vpop.f32.mrb[24].mxu0 }
 0x127   :  { %v2034_v11 = vpop.f32.mrb[24].mxu1  ;;  %v1971_v12 = vpop.f32.mrb[25].mxu0 }
 0x128   :  { %v1972_v13 = vadd.f32 %v1971_v12, %v1970_v8  ;;  %v2035_v14 = vpop.f32.mrb[25].mxu1  ;;  %v1973_v15 = vpop.f32.mrb[26].mxu0 }
 0x129   :  { %v2036_v17 = vadd.f32 %v2035_v14, %v2034_v11  ;;  %v2037_v18 = vpop.f32.mrb[26].mxu1  ;;  %v1974_v19 = vpop.f32.mrb[27].mxu0 }
 0x12a   :  { %v1154_v20 = vadd.f32 %v1972_v13, %v1858_v10  ;;  %v1975_v21 = vadd.f32 %v1974_v19, %v1973_v15  ;;  %v2038_v22 = vpop.f32.mrb[27].mxu1 }
 0x12b   :  { %v2039_v23 = vadd.f32 %v2038_v22, %v2037_v18 }
 0x12c   :  { %v2914_v25 = vadd.f32 %v2036_v17, %v1154_v20  ;;  %v1157_v27 = vadd.f32 %v1975_v21, %v1859_v16 }
 0x12e   :  { %v2916_v29 = vadd.f32 %v2039_v23, %v1157_v27  ;;  %v1976_v30 = vpop.f32.mrb[28].mxu0 }
 0x12f   :  { %v2040_v32 = vpop.f32.mrb[28].mxu1  ;;  %v1977_v34 = vpop.f32.mrb[29].mxu0 }
 0x130   :  { %v1978_v36 = vadd.f32 %v1977_v34, %v1976_v30  ;;  %v2041_v37 = vpop.f32.mrb[29].mxu1  ;;  %v1979_v38 = vpop.f32.mrb[30].mxu0 }
 0x131   :  { %v2042_v40 = vadd.f32 %v2041_v37, %v2040_v32  ;;  %v2043_v41 = vpop.f32.mrb[30].mxu1  ;;  %v1980_v42 = vpop.f32.mrb[31].mxu0 }
 0x132   :  { %v1162_v43 = vadd.f32 %v1978_v36, %v1862_v31  ;;  %v1981_v44 = vadd.f32 %v1980_v42, %v1979_v38  ;;  %v2044_v45 = vpop.f32.mrb[31].mxu1 }
 0x133   :  { %v2045_v46 = vadd.f32 %v2044_v45, %v2043_v41 }
 0x134   :  { %v2918_v48 = vadd.f32 %v2042_v40, %v1162_v43  ;;  %v1165_v50 = vadd.f32 %v1981_v44, %v1863_v39 }
 0x136   :  { %v2920_v51 = vadd.f32 %v2045_v46, %v1165_v50  ;;  %v2062_v53 = vpop.f32.mrb[32].mxu0 }
 0x137   :  { %v2126_v55 = vpop.f32.mrb[32].mxu1  ;;  %v2063_v56 = vpop.f32.mrb[33].mxu0 }
 0x138   :  { %v2064_v57 = vadd.f32 %v2063_v56, %v2062_v53  ;;  %v2127_v58 = vpop.f32.mrb[33].mxu1  ;;  %v2065_v59 = vpop.f32.mrb[34].mxu0 }
 0x139   :  { %v2128_v60 = vadd.f32 %v2127_v58, %v2126_v55  ;;  %v2129_v61 = vpop.f32.mrb[34].mxu1  ;;  %v2066_v62 = vpop.f32.mrb[35].mxu0 }
 0x13a   :  { %v1300_v63 = vadd.f32 %v2064_v57, %v2872_v33  ;;  %v2067_v0 = vadd.f32 %v2066_v62, %v2065_v59  ;;  %v2130_v1 = vpop.f32.mrb[35].mxu1 }
 0x13b   :  { %v2131_v2 = vadd.f32 %v2130_v1, %v2129_v61 }
 0x13c   :  { %v1303_v3 = vadd.f32 %v2067_v0, %v2874_v35  ;;  %v2924_v5 = vadd.f32 %v2128_v60, %v1300_v63 }
 0x13e   :  { %v2068_v8 = vpop.f32.mrb[36].mxu0  ;;  %v2926_v10 = vadd.f32 %v2131_v2, %v1303_v3 }
 0x13f   :  { %v2132_v11 = vpop.f32.mrb[36].mxu1  ;;  %v2069_v12 = vpop.f32.mrb[37].mxu0 }
 0x140   :  { %v2070_v13 = vadd.f32 %v2069_v12, %v2068_v8  ;;  %v2133_v14 = vpop.f32.mrb[37].mxu1  ;;  %v2071_v15 = vpop.f32.mrb[38].mxu0 }
 0x141   :  { %v2134_v16 = vadd.f32 %v2133_v14, %v2132_v11  ;;  %v2135_v17 = vpop.f32.mrb[38].mxu1  ;;  %v2072_v18 = vpop.f32.mrb[39].mxu0 }
 0x142   :  { %v1308_v33 = vadd.f32 %v2070_v13, %v2879_v52  ;;  %v2073_v19 = vadd.f32 %v2072_v18, %v2071_v15  ;;  %v2136_v20 = vpop.f32.mrb[39].mxu1 }
 0x143   :  { %v2137_v21 = vadd.f32 %v2136_v20, %v2135_v17 }
 0x144   :  { %v1311_v35 = vadd.f32 %v2073_v19, %v2881_v54  ;;  %v2930_v22 = vadd.f32 %v2134_v16, %v1308_v33 }
 0x146   :  { %v2074_v23 = vpop.f32.mrb[40].mxu0  ;;  %v2932_v24 = vadd.f32 %v2137_v21, %v1311_v35 }
 0x147   :  { %v2138_v27 = vpop.f32.mrb[40].mxu1  ;;  %v2075_v30 = vpop.f32.mrb[41].mxu0 }
 0x148   :  { %v2076_v31 = vadd.f32 %v2075_v30, %v2074_v23  ;;  %v2139_v32 = vpop.f32.mrb[41].mxu1  ;;  %v2077_v34 = vpop.f32.mrb[42].mxu0 }
 0x149   :  { %v2140_v36 = vadd.f32 %v2139_v32, %v2138_v27  ;;  %v2141_v37 = vpop.f32.mrb[42].mxu1  ;;  %v2078_v38 = vpop.f32.mrb[43].mxu0 }
 0x14a   :  { %v1316_v52 = vadd.f32 %v2076_v31, %v2886_v7  ;;  %v2079_v39 = vadd.f32 %v2078_v38, %v2077_v34  ;;  %v2142_v40 = vpop.f32.mrb[43].mxu1 }
 0x14b   :  { %v2143_v41 = vadd.f32 %v2142_v40, %v2141_v37 }
 0x14c   :  { %v1319_v54 = vadd.f32 %v2079_v39, %v2888_v9  ;;  %v2936_v42 = vadd.f32 %v2140_v36, %v1316_v52 }
 0x14e   :  { %v2080_v43 = vpop.f32.mrb[44].mxu0  ;;  %v2938_v44 = vadd.f32 %v2143_v41, %v1319_v54 }
 0x14f   :  { %v2144_v45 = vpop.f32.mrb[44].mxu1  ;;  %v2081_v46 = vpop.f32.mrb[45].mxu0 }
 0x150   :  { %v2082_v50 = vadd.f32 %v2081_v46, %v2080_v43  ;;  %v2145_v53 = vpop.f32.mrb[45].mxu1  ;;  %v2083_v55 = vpop.f32.mrb[46].mxu0 }
 0x151   :  { %v2146_v56 = vadd.f32 %v2145_v53, %v2144_v45  ;;  %v2147_v57 = vpop.f32.mrb[46].mxu1  ;;  %v2084_v58 = vpop.f32.mrb[47].mxu0 }
 0x152   :  { %v1324_v7 = vadd.f32 %v2082_v50, %v2893_v26  ;;  %v2085_v59 = vadd.f32 %v2084_v58, %v2083_v55  ;;  %v2148_v60 = vpop.f32.mrb[47].mxu1 }
 0x153   :  { %v2149_v61 = vadd.f32 %v2148_v60, %v2147_v57 }
 0x154   :  { %v1327_v9 = vadd.f32 %v2085_v59, %v2895_v28  ;;  %v2942_v62 = vadd.f32 %v2146_v56, %v1324_v7 }
 0x156   :  { %v2086_v63 = vpop.f32.mrb[48].mxu0  ;;  %v2944_v0 = vadd.f32 %v2149_v61, %v1327_v9 }
 0x157   :  { %v2150_v1 = vpop.f32.mrb[48].mxu1  ;;  %v2087_v2 = vpop.f32.mrb[49].mxu0 }
 0x158   :  { %v2088_v3 = vadd.f32 %v2087_v2, %v2086_v63  ;;  %v2151_v8 = vpop.f32.mrb[49].mxu1  ;;  %v2089_v11 = vpop.f32.mrb[50].mxu0 }
 0x159   :  { %v2152_v12 = vadd.f32 %v2151_v8, %v2150_v1  ;;  %v2153_v13 = vpop.f32.mrb[50].mxu1  ;;  %v2090_v14 = vpop.f32.mrb[51].mxu0 }
 0x15a   :  { %v1332_v26 = vadd.f32 %v2088_v3, %v2900_v47  ;;  %v2091_v15 = vadd.f32 %v2090_v14, %v2089_v11  ;;  %v2154_v16 = vpop.f32.mrb[51].mxu1 }
 0x15b   :  { %v2155_v17 = vadd.f32 %v2154_v16, %v2153_v13 }
 0x15c   :  { %v1335_v28 = vadd.f32 %v2091_v15, %v2902_v49  ;;  %v1429_v18 = vadd.f32 %v2152_v12, %v1332_v26 }
 0x15e   :  { %v2092_v33 = vpop.f32.mrb[52].mxu0  ;;  %v2948_v19 = vadd.f32 %v2155_v17, %v1335_v28 }
 0x15f   :  { %v2156_v20 = vpop.f32.mrb[52].mxu1  ;;  %v2093_v21 = vpop.f32.mrb[53].mxu0 }
 0x160   :  { %v2094_v35 = vadd.f32 %v2093_v21, %v2092_v33  ;;  %v2157_v23 = vpop.f32.mrb[53].mxu1  ;;  %v2095_v27 = vpop.f32.mrb[54].mxu0 }
 0x161   :  { %v2158_v30 = vadd.f32 %v2157_v23, %v2156_v20  ;;  %v2159_v31 = vpop.f32.mrb[54].mxu1  ;;  %v2096_v32 = vpop.f32.mrb[55].mxu0 }
 0x162   :  { %v1340_v34 = vadd.f32 %v2094_v35, %v2907_v4  ;;  %v2097_v47 = vadd.f32 %v2096_v32, %v2095_v27  ;;  %v2160_v36 = vpop.f32.mrb[55].mxu1 }
 0x163   :  { %v2161_v37 = vadd.f32 %v2160_v36, %v2159_v31 }
 0x164   :  { %v1343_v38 = vadd.f32 %v2097_v47, %v2909_v6  ;;  %v1437_v49 = vadd.f32 %v2158_v30, %v1340_v34 }
 0x166   :  { %v2098_v52 = vpop.f32.mrb[56].mxu0  ;;  %v1440_v39 = vadd.f32 %v2161_v37, %v1343_v38 }
 0x167   :  { %v2162_v40 = vpop.f32.mrb[56].mxu1  ;;  %v2099_v41 = vpop.f32.mrb[57].mxu0 }
 0x168   :  { %v2100_v54 = vadd.f32 %v2099_v41, %v2098_v52  ;;  %v2163_v43 = vpop.f32.mrb[57].mxu1  ;;  %v2101_v45 = vpop.f32.mrb[58].mxu0 }
 0x169   :  { %v2164_v46 = vadd.f32 %v2163_v43, %v2162_v40  ;;  %v2165_v50 = vpop.f32.mrb[58].mxu1  ;;  %v2102_v53 = vpop.f32.mrb[59].mxu0 }
 0x16a   :  { %v1348_v55 = vadd.f32 %v2100_v54, %v2914_v25  ;;  %v2103_v56 = vadd.f32 %v2102_v53, %v2101_v45  ;;  %v2166_v4 = vpop.f32.mrb[59].mxu1 }
 0x16b   :  { %v2167_v57 = vadd.f32 %v2166_v4, %v2165_v50 }
 0x16c   :  { %v1351_v58 = vadd.f32 %v2103_v56, %v2916_v29  ;;  %v1445_v7 = vadd.f32 %v2164_v46, %v1348_v55 }
 0x16e   :  { %v2104_v6 = vpop.f32.mrb[60].mxu0  ;;  %v2954_v59 = vadd.f32 %v2167_v57, %v1351_v58 }
 0x16f   :  { %v2168_v60 = vpop.f32.mrb[60].mxu1  ;;  %v2105_v61 = vpop.f32.mrb[61].mxu0 }
 0x170   :  { %v2106_v9 = vadd.f32 %v2105_v61, %v2104_v6  ;;  %v2169_v63 = vpop.f32.mrb[61].mxu1  ;;  %v2107_v1 = vpop.f32.mrb[62].mxu0 }
 0x171   :  { %v2170_v2 = vadd.f32 %v2169_v63, %v2168_v60  ;;  %v2171_v3 = vpop.f32.mrb[62].mxu1  ;;  %v2108_v8 = vpop.f32.mrb[63].mxu0 }
 0x172   :  { %v1356_v11 = vadd.f32 %v2106_v9, %v2918_v48  ;;  %v2109_v25 = vadd.f32 %v2108_v8, %v2107_v1  ;;  %v2172_v12 = vpop.f32.mrb[63].mxu1 }
 0x173   :  { %v2173_v13 = vadd.f32 %v2172_v12, %v2171_v3 }
 0x174   :  { %v1359_v14 = vadd.f32 %v2109_v25, %v2920_v51  ;;  %v1453_v29 = vadd.f32 %v2170_v2, %v1356_v11 }
 0x176   :  { %v2208_v26 = vpop.f32.mrb[64].mxu0  ;;  %v1456_v15 = vadd.f32 %v2173_v13, %v1359_v14 }
 0x177   :  { %v1502_v16 = vadd.f32 %v2208_v26, %v2930_v22  ;;  %v2216_v17 = vpop.f32.mrb[64].mxu1  ;;  %v1493_v28 = vpop.f32.mrb[65].mxu0 }
 0x178   :  { %v1534_v33 = vadd.f32 %v2216_v17, %v1437_v49  ;;  %v1494_v20 = vadd.f32 %v1493_v28, %v2924_v5  ;;  %v1525_v21 = vpop.f32.mrb[65].mxu1  ;;  %v2209_v35 = vpop.f32.mrb[66].mxu0 }
 0x179   :  { %v1526_v23 = vadd.f32 %v1525_v21, %v1429_v18  ;;  %v1505_v48 = vadd.f32 %v2209_v35, %v2932_v24  ;;  %v2217_v27 = vpop.f32.mrb[66].mxu1  ;;  %v1496_v30 = vpop.f32.mrb[67].mxu0  ;;  %v1558_v34 = vmax.f32 %v1502_v16, 0.0 }
 0x17a   :  { %v1537_v31 = vadd.f32 %v2217_v27, %v1440_v39  ;;  %v1497_v51 = vadd.f32 %v1496_v30, %v2926_v10  ;;  %v1528_v32 = vpop.f32.mrb[67].mxu1  ;;  %v1566_v36 = vmax.f32 %v1534_v33, 0.0  ;;  %v1556_v37 = vmax.f32 %v1494_v20, 0.0 }
 0x17b   :  { %v1559_v47 = vmax.f32 %v1505_v48, 0.0  ;;  %v1529_v22 = vadd.f32 %v1528_v32, %v2948_v19  ;;  %v1564_v5 = vmax.f32 %v1526_v23, 0.0 }
 0x17c   :  { %v1567_v38 = vmax.f32 %v1537_v31, 0.0  ;;  %v1557_v49 = vmax.f32 %v1497_v51, 0.0 }
 0x17d   :  { %v1872_v52 = vpack.c.bf16 %v1559_v47, %v1558_v34  ;;  %v1565_v40 = vmax.f32 %v1529_v22, 0.0 }
 0x17e   :  { %v1892_v18 = vpack.c.bf16 %v1567_v38, %v1566_v36  ;;  %v1867_v41 = vpack.c.bf16 %v1557_v49, %v1556_v37  ;;  %v2212_v24 = vpop.f32.mrb[68].mxu0 }
 0x17f   :  { %1911 = vst [vmem:[%s2995_s3 + $0x8] sm:$0xff] %v1872_v52   ;;  %v1887_v10 = vpack.c.bf16 %v1565_v40, %v1564_v5  ;;  %v1518_v39 = vadd.f32 %v2212_v24, %v2942_v62  ;;  %v2220_v54 = vpop.f32.mrb[68].mxu1  ;;  %v1509_v43 = vpop.f32.mrb[69].mxu0 }
 0x180   :  { %1915 = vst [vmem:[%s2995_s3 + $0x28] sm:$0xff] %v1892_v18   ;;  %1868 = vst [vmem:[%s2995_s3] sm:$0xff] %v1867_v41   ;;  %v1550_v19 = vadd.f32 %v2220_v54, %v1453_v29  ;;  %v1510_v45 = vadd.f32 %v1509_v43, %v2936_v42  ;;  %v1541_v46 = vpop.f32.mrb[69].mxu1  ;;  %v2213_v50 = vpop.f32.mrb[70].mxu0 }
 0x181   :  { %1914 = vst [vmem:[%s2995_s3 + $0x20] sm:$0xff] %v1887_v10   ;;  %v1542_v62 = vadd.f32 %v1541_v46, %v1445_v7  ;;  %v1521_v53 = vadd.f32 %v2213_v50, %v2944_v0  ;;  %v2221_v55 = vpop.f32.mrb[70].mxu1  ;;  %v1512_v56 = vpop.f32.mrb[71].mxu0  ;;  %v1562_v6 = vmax.f32 %v1518_v39, 0.0 }
 0x182   :  { %v1553_v4 = vadd.f32 %v2221_v55, %v1456_v15  ;;  %v1513_v57 = vadd.f32 %v1512_v56, %v2938_v44  ;;  %v1544_v58 = vpop.f32.mrb[71].mxu1  ;;  %v1570_v42 = vmax.f32 %v1550_v19, 0.0  ;;  %v1560_v9 = vmax.f32 %v1510_v45, 0.0 }
 0x183   :  { %v1563_v60 = vmax.f32 %v1521_v53, 0.0  ;;  %v1545_v61 = vadd.f32 %v1544_v58, %v2954_v59  ;;  %v1568_v2 = vmax.f32 %v1542_v62, 0.0 }
 0x184   :  { %v1571_v63 = vmax.f32 %v1553_v4, 0.0  ;;  %v1561_v1 = vmax.f32 %v1513_v57, 0.0 }
 0x185   :  { %v1882_v3 = vpack.c.bf16 %v1563_v60, %v1562_v6  ;;  %v1569_v8 = vmax.f32 %v1545_v61, 0.0 }
 0x186   :  { %v1902_v7 = vpack.c.bf16 %v1571_v63, %v1570_v42  ;;  %v1877_v11 = vpack.c.bf16 %v1561_v1, %v1560_v9 }
 0x187   :  { %1913 = vst [vmem:[%s2995_s3 + $0x18] sm:$0xff] %v1882_v3   ;;  %v1897_v0 = vpack.c.bf16 %v1569_v8, %v1568_v2 }
 0x188   :  { %1917 = vst [vmem:[%s2995_s3 + $0x38] sm:$0xff] %v1902_v7   ;;  %1912 = vst [vmem:[%s2995_s3 + $0x10] sm:$0xff] %v1877_v11  }
 0x189   :  { %1916 = vst [vmem:[%s2995_s3 + $0x30] sm:$0xff] %v1897_v0  }

// kernel: resnet_qnn_forward.18
= control target key start
LH: loop header
LB: loop body
LE: loop exit
PB: predicated region body
PF: predicated region fallthrough
CT: control target
= control target key end

     0   :  { %s1613_s1 = inlined_call_operand.vmem [shape: bf16[1152,128], index: 1, kind: input, shape index: {}]   ;;  %s1614_s0 = inlined_call_operand.vmem [shape: bf16[32,1152], index: 0, kind: input, shape index: {}]   ;;  %s1615_s2 = inlined_call_operand.vmem [shape: bf16[32,128], index: 2, kind: output, shape index: {}]  }
   0x1   :  { %v1224_v0 = vld [vmem:[%s1613_s1 + $0x40] sm:$0xff]   ;;  %v1228_v4 = vld [vmem:[%s1613_s1 + $0x48] sm:$0xff]   ;;  %v1232_v8 = vld [vmem:[%s1613_s1 + $0x50] sm:$0xff]  }
   0x2   :  { %v1225_v1 = vld [vmem:[%s1613_s1 + $0xc0] sm:$0xff]   ;;  %1082 = vmatprep.subr.bf16.mxu0 %v1224_v0  ;;  %v1229_v5 = vld [vmem:[%s1613_s1 + $0xc8] sm:$0xff]   ;;  %v1233_v9 = vld [vmem:[%s1613_s1 + $0xd0] sm:$0xff]  }
   0x3   :  { %v1226_v2 = vld [vmem:[%s1613_s1] sm:$0xff]   ;;  %1110 = vmatprep.subr.bf16.mxu1 %v1225_v1  ;;  %v1230_v6 = vld [vmem:[%s1613_s1 + $0x8] sm:$0xff]   ;;  %v1234_v10 = vld [vmem:[%s1613_s1 + $0x10] sm:$0xff]  }
   0x4   :  { %v1227_v3 = vld [vmem:[%s1613_s1 + $0x80] sm:$0xff]   ;;  %1083 = vmatpush3.bf16.msra.mxu0 %v1226_v2  ;;  %v1231_v7 = vld [vmem:[%s1613_s1 + $0x88] sm:$0xff]   ;;  %v1235_v11 = vld [vmem:[%s1613_s1 + $0x90] sm:$0xff]  }
   0x5   :  { %1111 = vmatpush3.bf16.msra.mxu1 %v1227_v3  ;;  %1084 = vmatprep.subr.bf16.mxu0 %v1228_v4  ;;  %v1236_v12 = vld [vmem:[%s1613_s1 + $0x58] sm:$0xff]   ;;  %v1240_v16 = vld [vmem:[%s1613_s1 + $0x60] sm:$0xff]   ;;  %v1244_v20 = vld [vmem:[%s1613_s1 + $0x68] sm:$0xff]  }
   0x6   :  { %1112 = vmatprep.subr.bf16.mxu1 %v1229_v5  ;;  %v1237_v13 = vld [vmem:[%s1613_s1 + $0xd8] sm:$0xff]   ;;  %v1241_v17 = vld [vmem:[%s1613_s1 + $0xe0] sm:$0xff]   ;;  %v1245_v21 = vld [vmem:[%s1613_s1 + $0xe8] sm:$0xff]  }
   0x7   :  { %v1238_v14 = vld [vmem:[%s1613_s1 + $0x18] sm:$0xff]   ;;  %v1242_v18 = vld [vmem:[%s1613_s1 + $0x20] sm:$0xff]   ;;  %v1246_v22 = vld [vmem:[%s1613_s1 + $0x28] sm:$0xff]  }
   0x8   :  { %1085 = vmatpush3.bf16.msra.mxu0 %v1230_v6  ;;  %v1239_v15 = vld [vmem:[%s1613_s1 + $0x98] sm:$0xff]   ;;  %v1243_v19 = vld [vmem:[%s1613_s1 + $0xa0] sm:$0xff]   ;;  %v1247_v23 = vld [vmem:[%s1613_s1 + $0xa8] sm:$0xff]  }
   0x9   :  { %1113 = vmatpush3.bf16.msra.mxu1 %v1231_v7  ;;  %1086 = vmatprep.subr.bf16.mxu0 %v1232_v8  ;;  %v1248_v24 = vld [vmem:[%s1613_s1 + $0x70] sm:$0xff]   ;;  %v1252_v28 = vld [vmem:[%s1613_s1 + $0x78] sm:$0xff]   ;;  %v1256_v32 = vld [vmem:[%s1614_s0] ss:$36 sps:$4 sm:$0xff]  }
   0xa   :  { %1114 = vmatprep.subr.bf16.mxu1 %v1233_v9  ;;  %v1249_v25 = vld [vmem:[%s1613_s1 + $0xf0] sm:$0xff]   ;;  %v1253_v29 = vld [vmem:[%s1613_s1 + $0xf8] sm:$0xff]   ;;  %v1258_v33 = vld [vmem:[%s1614_s0 + $0x4] ss:$36 sps:$4 sm:$0xff]  }
   0xb   :  { %v1250_v26 = vld [vmem:[%s1613_s1 + $0x30] sm:$0xff]   ;;  %v1254_v30 = vld [vmem:[%s1613_s1 + $0x38] sm:$0xff]   ;;  %v1259_v34 = vld [vmem:[%s1614_s0 + $0x8] ss:$36 sps:$4 sm:$0xff]   ;;  %732 = vmatprep.mubr.bf16.mxu0 %v1258_v33 }
   0xc   :  { %1087 = vmatpush3.bf16.msra.mxu0 %v1234_v10  ;;  %v1251_v27 = vld [vmem:[%s1613_s1 + $0xb0] sm:$0xff]   ;;  %v1255_v31 = vld [vmem:[%s1613_s1 + $0xb8] sm:$0xff]   ;;  %v1262_v36 = vld [vmem:[%s1613_s1 + $0x140] sm:$0xff]  }
   0xd   :  { %1115 = vmatpush3.bf16.msra.mxu1 %v1235_v11  ;;  %1088 = vmatprep.subr.bf16.mxu0 %v1236_v12  ;;  %v1261_v35 = vld [vmem:[%s1614_s0 + $0xc] ss:$36 sps:$4 sm:$0xff]   ;;  %v1263_v37 = vld [vmem:[%s1613_s1 + $0x100] sm:$0xff]   ;;  %v1274_v48 = vld [vmem:[%s1613_s1 + $0x158] sm:$0xff]  }
   0xe   :  { %1116 = vmatprep.subr.bf16.mxu1 %v1237_v13  ;;  %781 = vmatprep.mubr.bf16.mxu1 %v1261_v35  ;;  %v1264_v38 = vld [vmem:[%s1613_s1 + $0x1c0] sm:$0xff]   ;;  %v1266_v40 = vld [vmem:[%s1613_s1 + $0x148] sm:$0xff]   ;;  %v1270_v44 = vld [vmem:[%s1613_s1 + $0x150] sm:$0xff]  }
   0xf   :  { %v1265_v39 = vld [vmem:[%s1613_s1 + $0x180] sm:$0xff]   ;;  %v1267_v41 = vld [vmem:[%s1613_s1 + $0x108] sm:$0xff]   ;;  %v1271_v45 = vld [vmem:[%s1613_s1 + $0x110] sm:$0xff]  }
  0x10   :  { %1089 = vmatpush3.bf16.msra.mxu0 %v1238_v14  ;;  %v1268_v42 = vld [vmem:[%s1613_s1 + $0x1c8] sm:$0xff]   ;;  %v1272_v46 = vld [vmem:[%s1613_s1 + $0x1d0] sm:$0xff]   ;;  %v1275_v49 = vld [vmem:[%s1613_s1 + $0x118] sm:$0xff]  }
  0x11   :  { %1117 = vmatpush3.bf16.msra.mxu1 %v1239_v15  ;;  %1090 = vmatprep.subr.bf16.mxu0 %v1240_v16  ;;  %v1269_v43 = vld [vmem:[%s1613_s1 + $0x188] sm:$0xff]   ;;  %v1273_v47 = vld [vmem:[%s1613_s1 + $0x190] sm:$0xff]   ;;  %v1276_v50 = vld [vmem:[%s1613_s1 + $0x1d8] sm:$0xff]  }
  0x12   :  { %1118 = vmatprep.subr.bf16.mxu1 %v1241_v17  ;;  %v1277_v51 = vld [vmem:[%s1613_s1 + $0x198] sm:$0xff]   ;;  %v1278_v52 = vld [vmem:[%s1613_s1 + $0x160] sm:$0xff]   ;;  %v1282_v56 = vld [vmem:[%s1613_s1 + $0x168] sm:$0xff]  }
  0x13   :  { %v1279_v53 = vld [vmem:[%s1613_s1 + $0x120] sm:$0xff]   ;;  %v1283_v57 = vld [vmem:[%s1614_s0 + $0x4c] ss:$36 sps:$4 sm:$0xff]   ;;  %v1285_v58 = vld [vmem:[%s1614_s0 + $0x54] ss:$36 sps:$4 sm:$0xff]  }
  0x14   :  { %1091 = vmatpush3.bf16.msra.mxu0 %v1242_v18  ;;  %v1280_v54 = vld [vmem:[%s1613_s1 + $0x1e0] sm:$0xff]   ;;  %v1287_v59 = vld [vmem:[%s1613_s1 + $0x128] sm:$0xff]   ;;  %v1289_v61 = vld [vmem:[%s1614_s0 + $0x50] ss:$36 sps:$4 sm:$0xff]  }
  0x15   :  { %1119 = vmatpush3.bf16.msra.mxu1 %v1243_v19  ;;  %1092 = vmatprep.subr.bf16.mxu0 %v1244_v20  ;;  %v1281_v55 = vld [vmem:[%s1613_s1 + $0x1a0] sm:$0xff]   ;;  %v1288_v60 = vld [vmem:[%s1614_s0 + $0x48] ss:$36 sps:$4 sm:$0xff]   ;;  %v1292_v0 = vld [vmem:[%s1613_s1 + $0x170] sm:$0xff]  }
  0x16   :  { %1120 = vmatprep.subr.bf16.mxu1 %v1245_v21  ;;  %v1290_v62 = vld [vmem:[%s1613_s1 + $0x1e8] sm:$0xff]   ;;  %v1293_v1 = vld [vmem:[%s1613_s1 + $0x130] sm:$0xff]   ;;  %v1296_v4 = vld [vmem:[%s1613_s1 + $0x178] sm:$0xff]  }
  0x17   :  { %v1291_v63 = vld [vmem:[%s1613_s1 + $0x1a8] sm:$0xff]   ;;  %v1294_v2 = vld [vmem:[%s1613_s1 + $0x1f0] sm:$0xff]   ;;  %v1297_v5 = vld [vmem:[%s1613_s1 + $0x138] sm:$0xff]  }
  0x18   :  { %1093 = vmatpush3.bf16.msra.mxu0 %v1246_v22  ;;  %v1295_v3 = vld [vmem:[%s1613_s1 + $0x1b0] sm:$0xff]   ;;  %v1298_v6 = vld [vmem:[%s1613_s1 + $0x1f8] sm:$0xff]   ;;  %v1303_v10 = vld [vmem:[%s1613_s1 + $0x200] sm:$0xff]  }
  0x19   :  { %1121 = vmatpush3.bf16.msra.mxu1 %v1247_v23  ;;  %1094 = vmatprep.subr.bf16.mxu0 %v1248_v24  ;;  %v1299_v7 = vld [vmem:[%s1614_s0 + $0x10] ss:$36 sps:$4 sm:$0xff]   ;;  %v1302_v9 = vld [vmem:[%s1613_s1 + $0x1b8] sm:$0xff]   ;;  %v1307_v13 = vld [vmem:[%s1613_s1 + $0x208] sm:$0xff]  }
  0x1a   :  { %1122 = vmatprep.subr.bf16.mxu1 %v1249_v25  ;;  %v1301_v8 = vld [vmem:[%s1614_s0 + $0x14] ss:$36 sps:$4 sm:$0xff]   ;;  %v1306_v12 = vld [vmem:[%s1614_s0 + $0x1c] ss:$36 sps:$4 sm:$0xff]   ;;  %v1312_v17 = vld [vmem:[%s1614_s0 + $0x64] ss:$36 sps:$4 sm:$0xff]  }
  0x1b   :  { %v1304_v11 = vld [vmem:[%s1614_s0 + $0x18] ss:$36 sps:$4 sm:$0xff]   ;;  %v1311_v16 = vld [vmem:[%s1613_s1 + $0x210] sm:$0xff]   ;;  %v1314_v18 = vld [vmem:[%s1614_s0 + $0x60] ss:$36 sps:$4 sm:$0xff]  }
  0x1c   :  { %1095 = vmatpush3.bf16.msra.mxu0 %v1250_v26  ;;  %v1308_v14 = vld [vmem:[%s1614_s0 + $0x5c] ss:$36 sps:$4 sm:$0xff]   ;;  %v1317_v22 = vld [vmem:[%s1613_s1 + $0x228] sm:$0xff]   ;;  %v1318_v23 = vld [vmem:[%s1613_s1 + $0x230] sm:$0xff]  }
  0x1d   :  { %1123 = vmatpush3.bf16.msra.mxu1 %v1251_v27  ;;  %1096 = vmatprep.subr.bf16.mxu0 %v1252_v28  ;;  %v1310_v15 = vld [vmem:[%s1614_s0 + $0x58] ss:$36 sps:$4 sm:$0xff]   ;;  %v1316_v20 = vld [vmem:[%s1613_s1 + $0x220] sm:$0xff]   ;;  %v1321_v25 = vld [vmem:[%s1614_s0 + $0x68] ss:$36 sps:$4 sm:$0xff]  }
  0x1e   :  { %1124 = vmatprep.subr.bf16.mxu1 %v1253_v29  ;;  %v1315_v19 = vld [vmem:[%s1613_s1 + $0x218] sm:$0xff]   ;;  %v1320_v21 = vld [vmem:[%s1614_s0 + $0x20] ss:$36 sps:$4 sm:$0xff]  }
  0x1f   :  { %v1319_v24 = vld [vmem:[%s1613_s1 + $0x238] sm:$0xff]  }
  0x20   :  { %1097 = vmatpush3.bf16.msra.mxu0 %v1254_v30 }
  0x21   :  { %1125 = vmatpush3.bf16.msra.mxu1 %v1255_v31  ;;  %1138 = vmatprep.subr.bf16.mxu0 %v1262_v36 }
  0x22   :  { %1166 = vmatprep.subr.bf16.mxu1 %v1264_v38 }
  0x23   :  { %733 = vmatmul.mubr.bf16.vlgmr.msra.gmra.mrb[0].mxu0 %v1256_v32 }
  0x24   :  { %782 = vmatmul.mubr.bf16.vlgmr.msra.gmra.mrb[0].mxu1 %v1259_v34  ;;  %1139 = vmatpush3.bf16.msra.mxu0 %v1263_v37 }
  0x25   :  { %1167 = vmatpush3.bf16.msra.mxu1 %v1265_v39  ;;  %1140 = vmatprep.subr.bf16.mxu0 %v1266_v40 }
  0x26   :  { %1168 = vmatprep.subr.bf16.mxu1 %v1268_v42  ;;  %740 = vmatprep.mubr.bf16.mxu0 %v1283_v57 }
  0x27   :  { %789 = vmatprep.mubr.bf16.mxu1 %v1285_v58 }
  0x28   :  { %1141 = vmatpush3.bf16.msra.mxu0 %v1267_v41 }
  0x29   :  { %1169 = vmatpush3.bf16.msra.mxu1 %v1269_v43  ;;  %1142 = vmatprep.subr.bf16.mxu0 %v1270_v44 }
  0x2a   :  { %1170 = vmatprep.subr.bf16.mxu1 %v1272_v46 }
  0x2b   :  { %741 = vmatmul.mubr.bf16.gmra.mrb[4].mxu0 %v1288_v60 }
  0x2c   :  { %1143 = vmatpush3.bf16.msra.mxu0 %v1271_v45  ;;  %790 = vmatmul.mubr.bf16.gmra.mrb[4].mxu1 %v1289_v61 }
  0x2d   :  { %1171 = vmatpush3.bf16.msra.mxu1 %v1273_v47  ;;  %1144 = vmatprep.subr.bf16.mxu0 %v1274_v48 }
  0x2e   :  { %1172 = vmatprep.subr.bf16.mxu1 %v1276_v50  ;;  %830 = vmatprep.mubr.bf16.mxu0 %v1301_v8 }
  0x2f   :  { %879 = vmatprep.mubr.bf16.mxu1 %v1306_v12 }
  0x30   :  { %1145 = vmatpush3.bf16.msra.mxu0 %v1275_v49 }
  0x31   :  { %1173 = vmatpush3.bf16.msra.mxu1 %v1277_v51  ;;  %1146 = vmatprep.subr.bf16.mxu0 %v1278_v52 }
  0x32   :  { %1174 = vmatprep.subr.bf16.mxu1 %v1280_v54 }
  0x34   :  { %1147 = vmatpush3.bf16.msra.mxu0 %v1279_v53 }
  0x35   :  { %1175 = vmatpush3.bf16.msra.mxu1 %v1281_v55  ;;  %1148 = vmatprep.subr.bf16.mxu0 %v1282_v56 }
  0x36   :  { %1176 = vmatprep.subr.bf16.mxu1 %v1290_v62 }
  0x38   :  { %1149 = vmatpush3.bf16.msra.mxu0 %v1287_v59 }
  0x39   :  { %1177 = vmatpush3.bf16.msra.mxu1 %v1291_v63  ;;  %1150 = vmatprep.subr.bf16.mxu0 %v1292_v0 }
  0x3a   :  { %1178 = vmatprep.subr.bf16.mxu1 %v1294_v2 }
  0x3c   :  { %1151 = vmatpush3.bf16.msra.mxu0 %v1293_v1 }
  0x3d   :  { %1179 = vmatpush3.bf16.msra.mxu1 %v1295_v3  ;;  %1152 = vmatprep.subr.bf16.mxu0 %v1296_v4 }
  0x3e   :  { %1180 = vmatprep.subr.bf16.mxu1 %v1298_v6 }
  0x40   :  { %1153 = vmatpush3.bf16.msra.mxu0 %v1297_v5 }
  0x41   :  { %1181 = vmatpush3.bf16.msra.mxu1 %v1302_v9  ;;  %1204 = vmatprep.subr.bf16.mxu0 %v1303_v10 }
  0x43   :  { %831 = vmatmul.mubr.bf16.vlgmr.msra.gmra.mrb[8].mxu0 %v1299_v7 }
  0x44   :  { %1205 = vmatpush3.bf16.msra.mxu0 %v1303_v10  ;;  %880 = vmatmul.mubr.bf16.vlgmr.msra.gmra.mrb[8].mxu1 %v1304_v11 }
  0x45   :  { %1206 = vmatprep.subr.bf16.mxu0 %v1307_v13  ;;  %838 = vmatprep.mubr.bf16.mxu0 %v1308_v14 }
  0x46   :  { %887 = vmatprep.mubr.bf16.mxu1 %v1312_v17 }
  0x48   :  { %1207 = vmatpush3.bf16.msra.mxu0 %v1307_v13 }
  0x49   :  { %1208 = vmatprep.subr.bf16.mxu0 %v1311_v16 }
  0x4b   :  { %839 = vmatmul.mubr.bf16.gmra.mrb[12].mxu0 %v1310_v15 }
  0x4c   :  { %1209 = vmatpush3.bf16.msra.mxu0 %v1311_v16  ;;  %888 = vmatmul.mubr.bf16.gmra.mrb[12].mxu1 %v1314_v18 }
  0x4d   :  { %1210 = vmatprep.subr.bf16.mxu0 %v1315_v19  ;;  %1220 = vmatprep.mubr.bf16.mxu0 %v1320_v21 }
  0x50   :  { %1211 = vmatpush3.bf16.msra.mxu0 %v1315_v19 }
  0x51   :  { %1212 = vmatprep.subr.bf16.mxu0 %v1316_v20 }
  0x54   :  { %1213 = vmatpush3.bf16.msra.mxu0 %v1316_v20 }
  0x55   :  { %1214 = vmatprep.subr.bf16.mxu0 %v1317_v22 }
  0x58   :  { %1215 = vmatpush3.bf16.msra.mxu0 %v1317_v22 }
  0x59   :  { %1216 = vmatprep.subr.bf16.mxu0 %v1318_v23 }
  0x5c   :  { %1217 = vmatpush3.bf16.msra.mxu0 %v1318_v23 }
  0x5d   :  { %1218 = vmatprep.subr.bf16.mxu0 %v1319_v24 }
  0x60   :  { %1219 = vmatpush3.bf16.msra.mxu0 %v1319_v24 }
  0x63   :  { %1221 = vmatmul.mubr.bf16.vlgmr.msra.gmra.mrb[16].mxu0 %v1321_v25 }
  0xf6   :  { %v1098_v26 = vpop.f32.mrb[0].mxu0 }
  0xf7   :  { %v1126_v27 = vpop.f32.mrb[0].mxu1  ;;  %v1099_v28 = vpop.f32.mrb[1].mxu0 }
  0xf8   :  { %v1100_v29 = vadd.f32 %v1099_v28, %v1098_v26  ;;  %v1127_v30 = vpop.f32.mrb[1].mxu1  ;;  %v1101_v31 = vpop.f32.mrb[2].mxu0 }
  0xf9   :  { %v1128_v32 = vadd.f32 %v1127_v30, %v1126_v27  ;;  %v1129_v33 = vpop.f32.mrb[2].mxu1  ;;  %v1102_v34 = vpop.f32.mrb[3].mxu0 }
  0xfa   :  { %v1103_v35 = vadd.f32 %v1102_v34, %v1101_v31  ;;  %v1130_v36 = vpop.f32.mrb[3].mxu1 }
  0xfb   :  { %v784_v37 = vadd.f32 %v1128_v32, %v1100_v29  ;;  %v1131_v38 = vadd.f32 %v1130_v36, %v1129_v33 }
  0xfd   :  { %v787_v39 = vadd.f32 %v1131_v38, %v1103_v35 }
  0xfe   :  { %v1104_v40 = vpop.f32.mrb[4].mxu0 }
  0xff   :  { %v1132_v41 = vpop.f32.mrb[4].mxu1  ;;  %v1105_v42 = vpop.f32.mrb[5].mxu0 }
 0x100   :  { %v1133_v43 = vpop.f32.mrb[5].mxu1  ;;  %v1106_v44 = vadd.f32 %v1105_v42, %v1104_v40  ;;  %v1107_v46 = vpop.f32.mrb[6].mxu0 }
 0x101   :  { %v1134_v45 = vadd.f32 %v1133_v43, %v1132_v41  ;;  %v1135_v47 = vpop.f32.mrb[6].mxu1  ;;  %v1108_v48 = vpop.f32.mrb[7].mxu0 }
 0x102   :  { %v1136_v49 = vpop.f32.mrb[7].mxu1  ;;  %v1109_v51 = vadd.f32 %v1108_v48, %v1107_v46 }
 0x103   :  { %v792_v50 = vadd.f32 %v1134_v45, %v1106_v44  ;;  %v1137_v52 = vadd.f32 %v1136_v49, %v1135_v47 }
 0x105   :  { %v795_v53 = vadd.f32 %v1137_v52, %v1109_v51 }
 0x116   :  { %v1154_v54 = vpop.f32.mrb[8].mxu0 }
 0x117   :  { %v1155_v55 = vpop.f32.mrb[9].mxu0  ;;  %v1182_v58 = vpop.f32.mrb[8].mxu1 }
 0x118   :  { %v1156_v56 = vadd.f32 %v1155_v55, %v1154_v54  ;;  %v1157_v57 = vpop.f32.mrb[10].mxu0  ;;  %v1183_v62 = vpop.f32.mrb[9].mxu1 }
 0x119   :  { %v1158_v59 = vpop.f32.mrb[11].mxu0  ;;  %v1184_v63 = vadd.f32 %v1183_v62, %v1182_v58  ;;  %v1185_v0 = vpop.f32.mrb[10].mxu1 }
 0x11a   :  { %v833_v60 = vadd.f32 %v1156_v56, %v784_v37  ;;  %v1159_v61 = vadd.f32 %v1158_v59, %v1157_v57  ;;  %v1186_v2 = vpop.f32.mrb[11].mxu1 }
 0x11b   :  { %v1187_v3 = vadd.f32 %v1186_v2, %v1185_v0 }
 0x11c   :  { %v836_v1 = vadd.f32 %v1159_v61, %v787_v39  ;;  %v882_v4 = vadd.f32 %v1184_v63, %v833_v60 }
 0x11e   :  { %v1160_v5 = vpop.f32.mrb[12].mxu0  ;;  %v885_v7 = vadd.f32 %v1187_v3, %v836_v1 }
 0x11f   :  { %v1161_v6 = vpop.f32.mrb[13].mxu0  ;;  %v1188_v10 = vpop.f32.mrb[12].mxu1 }
 0x120   :  { %v1162_v8 = vadd.f32 %v1161_v6, %v1160_v5  ;;  %v1163_v9 = vpop.f32.mrb[14].mxu0  ;;  %v1189_v14 = vpop.f32.mrb[13].mxu1 }
 0x121   :  { %v1164_v11 = vpop.f32.mrb[15].mxu0  ;;  %v1190_v15 = vadd.f32 %v1189_v14, %v1188_v10  ;;  %v1191_v16 = vpop.f32.mrb[14].mxu1 }
 0x122   :  { %v841_v12 = vadd.f32 %v1162_v8, %v792_v50  ;;  %v1165_v13 = vadd.f32 %v1164_v11, %v1163_v9  ;;  %v1192_v18 = vpop.f32.mrb[15].mxu1 }
 0x123   :  { %v1193_v19 = vadd.f32 %v1192_v18, %v1191_v16 }
 0x124   :  { %v844_v17 = vadd.f32 %v1165_v13, %v795_v53  ;;  %v890_v20 = vadd.f32 %v1190_v15, %v841_v12 }
 0x126   :  { %v893_v21 = vadd.f32 %v1193_v19, %v844_v17 }
 0x136   :  { %v1222_v22 = vpop.f32.mrb[16].mxu0 }
 0x137   :  { %v939_v23 = vadd.f32 %v1222_v22, %v890_v20  ;;  %v930_v24 = vpop.f32.mrb[17].mxu0 }
 0x138   :  { %v931_v25 = vadd.f32 %v930_v24, %v882_v4  ;;  %v1223_v26 = vpop.f32.mrb[18].mxu0 }
 0x139   :  { %v942_v27 = vadd.f32 %v1223_v26, %v893_v21  ;;  %v933_v28 = vpop.f32.mrb[19].mxu0  ;;  %v947_v30 = vmax.f32 %v939_v23, 0.0 }
 0x13a   :  { %v934_v29 = vadd.f32 %v933_v28, %v885_v7  ;;  %v945_v32 = vmax.f32 %v931_v25, 0.0 }
 0x13b   :  { %v948_v31 = vmax.f32 %v942_v27, 0.0 }
 0x13c   :  { %v946_v33 = vmax.f32 %v934_v29, 0.0 }
 0x13d   :  { %v1079_v34 = vpack.c.bf16 %v948_v31, %v947_v30 }
 0x13e   :  { %v1074_v35 = vpack.c.bf16 %v946_v33, %v945_v32 }
 0x13f   :  { %1081 = vst [vmem:[%s1615_s2 + $0x8] sm:$0xff] %v1079_v34  }
 0x140   :  { %1075 = vst [vmem:[%s1615_s2] sm:$0xff] %v1074_v35  }

// kernel: resnet_qnn_forward.21
= control target key start
LH: loop header
LB: loop body
LE: loop exit
PB: predicated region body
PF: predicated region fallthrough
CT: control target
= control target key end

     0   :  { %v277_v28 = vlaneseq  ;;  %v1950_v36 = vmov 1966171168   ;;  %s2393_s0 = inlined_call_operand.vmem [shape: bf16[2,2048], index: 0, kind: input, shape index: {}]   ;;  %s2394_s1 = inlined_call_operand.vmem [shape: bf16[2048,128], index: 1, kind: input, shape index: {}]   ;;  %s2395_s2 = inlined_call_operand.hbm [shape: f32[2,128], index: 2, kind: output, shape index: {}]  }
   0x1   :  { %v1796_v0 = vld [vmem:[%s2394_s1 + $0x40] sm:$0xff]   ;;  %v1800_v4 = vld [vmem:[%s2394_s1 + $0x48] sm:$0xff]   ;;  %v1804_v8 = vld [vmem:[%s2394_s1 + $0x50] sm:$0xff]   ;;  %v275_v37 = vunpack.c.l.s4 %v1950_v36 }
   0x2   :  { %v1797_v1 = vld [vmem:[%s2394_s1 + $0xc0] sm:$0xff]   ;;  %1618 = vmatprep.subr.bf16.mxu0 %v1796_v0  ;;  %v1801_v5 = vld [vmem:[%s2394_s1 + $0xc8] sm:$0xff]   ;;  %v1805_v9 = vld [vmem:[%s2394_s1 + $0xd0] sm:$0xff]   ;;  %v278_v33 = vshrl.u32 %v277_v28, 7 }
   0x3   :  { %v1798_v2 = vld [vmem:[%s2394_s1] sm:$0xff]   ;;  %1640 = vmatprep.subr.bf16.mxu1 %v1797_v1  ;;  %v1802_v6 = vld [vmem:[%s2394_s1 + $0x8] sm:$0xff]   ;;  %v1806_v10 = vld [vmem:[%s2394_s1 + $0x10] sm:$0xff]   ;;  %v276_v40 = vunpack.c.0.s8 %v275_v37 }
   0x4   :  { %v1799_v3 = vld [vmem:[%s2394_s1 + $0x80] sm:$0xff]   ;;  %1619 = vmatpush3.bf16.msra.mxu0 %v1798_v2  ;;  %v1803_v7 = vld [vmem:[%s2394_s1 + $0x88] sm:$0xff]   ;;  %v1807_v11 = vld [vmem:[%s2394_s1 + $0x90] sm:$0xff]  }
   0x5   :  { %1641 = vmatpush3.bf16.msra.mxu1 %v1799_v3  ;;  %1620 = vmatprep.subr.bf16.mxu0 %v1800_v4  ;;  %v1808_v12 = vld [vmem:[%s2394_s1 + $0x58] sm:$0xff]   ;;  %v1812_v16 = vld [vmem:[%s2394_s1 + $0x60] sm:$0xff]   ;;  %v1816_v20 = vld [vmem:[%s2394_s1 + $0x68] sm:$0xff]   ;;  %v2072_v41 = vsub.s32 %v276_v40, %v278_v33 }
   0x6   :  { %1642 = vmatprep.subr.bf16.mxu1 %v1801_v5  ;;  %v1809_v13 = vld [vmem:[%s2394_s1 + $0xd8] sm:$0xff]   ;;  %v1813_v17 = vld [vmem:[%s2394_s1 + $0xe0] sm:$0xff]   ;;  %v1817_v21 = vld [vmem:[%s2394_s1 + $0xe8] sm:$0xff]  }
   0x7   :  { %v1810_v14 = vld [vmem:[%s2394_s1 + $0x18] sm:$0xff]   ;;  %v1814_v18 = vld [vmem:[%s2394_s1 + $0x20] sm:$0xff]   ;;  %v1818_v22 = vld [vmem:[%s2394_s1 + $0x28] sm:$0xff]  }
   0x8   :  { %1621 = vmatpush3.bf16.msra.mxu0 %v1802_v6  ;;  %v1811_v15 = vld [vmem:[%s2394_s1 + $0x98] sm:$0xff]   ;;  %v1815_v19 = vld [vmem:[%s2394_s1 + $0xa0] sm:$0xff]   ;;  %v1819_v23 = vld [vmem:[%s2394_s1 + $0xa8] sm:$0xff]  }
   0x9   :  { %1643 = vmatpush3.bf16.msra.mxu1 %v1803_v7  ;;  %1622 = vmatprep.subr.bf16.mxu0 %v1804_v8  ;;  %v1820_v24 = vld [vmem:[%s2394_s1 + $0x70] sm:$0xff]   ;;  %v1824_v29 = vld [vmem:[%s2394_s1 + $0x78] sm:$0xff]   ;;  %v13_v34 = vld [vmem:[%s2393_s0] sm:$0xff] }
   0xa   :  { %1644 = vmatprep.subr.bf16.mxu1 %v1805_v9  ;;  %v1821_v25 = vld [vmem:[%s2394_s1 + $0xf0] sm:$0xff]   ;;  %v1825_v30 = vld [vmem:[%s2394_s1 + $0xf8] sm:$0xff]   ;;  %v1829_v35 = vld [vmem:[%s2394_s1 + $0x140] sm:$0xff]   ;;  %v273_v39 = vcombine.high %v13_v34, %v13_v34  ;;  %v280_v42 = vrot.slane %v13_v34, %v2072_v41 }
   0xb   :  { %v1822_v26 = vld [vmem:[%s2394_s1 + $0x30] sm:$0xff]   ;;  %v1826_v31 = vld [vmem:[%s2394_s1 + $0x38] sm:$0xff]   ;;  %v1830_v38 = vld [vmem:[%s2394_s1 + $0x1c0] sm:$0xff]  }
   0xc   :  { %1623 = vmatpush3.bf16.msra.mxu0 %v1806_v10  ;;  %v1823_v27 = vld [vmem:[%s2394_s1 + $0xb0] sm:$0xff]   ;;  %v1827_v32 = vld [vmem:[%s2394_s1 + $0xb8] sm:$0xff]   ;;  %v2076_v43 = vrot.slane %v273_v39, %v2072_v41  ;;  %v288_v44 = vcombine.high %v280_v42, %v280_v42  ;;  %v296_v45 = vrot.slane %v280_v42, %v2072_v41  ;;  %v1831_v48 = vld [vmem:[%s2394_s1 + $0x100] sm:$0xff]  }
   0xd   :  { %1645 = vmatpush3.bf16.msra.mxu1 %v1807_v11  ;;  %1624 = vmatprep.subr.bf16.mxu0 %v1808_v12  ;;  %v1833_v51 = vld [vmem:[%s2394_s1 + $0x148] sm:$0xff]   ;;  %v1832_v53 = vld [vmem:[%s2394_s1 + $0x180] sm:$0xff]   ;;  %v1837_v57 = vld [vmem:[%s2394_s1 + $0x150] sm:$0xff]  }
   0xe   :  { %1646 = vmatprep.subr.bf16.mxu1 %v1809_v13  ;;  %v289_v46 = vcombine.high %v2076_v43, %v2076_v43  ;;  %v310_v47 = vrot.slane %v288_v44, %v2072_v41  ;;  %v318_v50 = vcombine.high %v296_v45, %v296_v45  ;;  %v1834_v54 = vld [vmem:[%s2394_s1 + $0x1c8] sm:$0xff]   ;;  %v1838_v59 = vld [vmem:[%s2394_s1 + $0x1d0] sm:$0xff]   ;;  %v1841_v61 = vld [vmem:[%s2394_s1 + $0x158] sm:$0xff]  }
   0xf   :  { %v1835_v56 = vld [vmem:[%s2394_s1 + $0x108] sm:$0xff]   ;;  %v1839_v60 = vld [vmem:[%s2394_s1 + $0x110] sm:$0xff]   ;;  %v1842_v63 = vld [vmem:[%s2394_s1 + $0x1d8] sm:$0xff]  }
  0x10   :  { %1625 = vmatpush3.bf16.msra.mxu0 %v1810_v14  ;;  %v317_v49 = vrot.slane %v289_v46, %v2072_v41  ;;  %1187 = vmatprep.mubr.bf16.mxu0 %v310_v47  ;;  %v320_v52 = vcombine.high %v310_v47, %v310_v47  ;;  %v1836_v58 = vld [vmem:[%s2394_s1 + $0x188] sm:$0xff]   ;;  %v1840_v62 = vld [vmem:[%s2394_s1 + $0x190] sm:$0xff]   ;;  %v1843_v0 = vld [vmem:[%s2394_s1 + $0x118] sm:$0xff]  }
  0x11   :  { %1647 = vmatpush3.bf16.msra.mxu1 %v1811_v15  ;;  %1626 = vmatprep.subr.bf16.mxu0 %v1812_v16  ;;  %v1845_v1 = vld [vmem:[%s2394_s1 + $0x160] sm:$0xff]   ;;  %v1844_v2 = vld [vmem:[%s2394_s1 + $0x198] sm:$0xff]   ;;  %v1849_v5 = vld [vmem:[%s2394_s1 + $0x168] sm:$0xff]  }
  0x12   :  { %1648 = vmatprep.subr.bf16.mxu1 %v1813_v17  ;;  %v321_v55 = vcombine.high %v317_v49, %v317_v49  ;;  %1227 = vmatprep.mubr.bf16.mxu1 %v320_v52  ;;  %v1846_v3 = vld [vmem:[%s2394_s1 + $0x1e0] sm:$0xff]   ;;  %v1850_v7 = vld [vmem:[%s2394_s1 + $0x1e8] sm:$0xff]   ;;  %v1853_v9 = vld [vmem:[%s2394_s1 + $0x170] sm:$0xff]   ;;  %v303_v17 = vrot.slane %v2076_v43, %v2072_v41 }
  0x13   :  { %v1847_v4 = vld [vmem:[%s2394_s1 + $0x120] sm:$0xff]   ;;  %v1851_v8 = vld [vmem:[%s2394_s1 + $0x128] sm:$0xff]   ;;  %v1854_v11 = vld [vmem:[%s2394_s1 + $0x1f0] sm:$0xff]  }
  0x14   :  { %1627 = vmatpush3.bf16.msra.mxu0 %v1814_v18  ;;  %v1848_v6 = vld [vmem:[%s2394_s1 + $0x1a0] sm:$0xff]   ;;  %v1852_v10 = vld [vmem:[%s2394_s1 + $0x1a8] sm:$0xff]   ;;  %v1855_v12 = vld [vmem:[%s2394_s1 + $0x130] sm:$0xff]  }
  0x15   :  { %1649 = vmatpush3.bf16.msra.mxu1 %v1815_v19  ;;  %1628 = vmatprep.subr.bf16.mxu0 %v1816_v20  ;;  %v1857_v13 = vld [vmem:[%s2394_s1 + $0x178] sm:$0xff]   ;;  %v1856_v14 = vld [vmem:[%s2394_s1 + $0x1b0] sm:$0xff]   ;;  %v1861_v18 = vld [vmem:[%s2394_s1 + $0x240] sm:$0xff]  }
  0x16   :  { %1650 = vmatprep.subr.bf16.mxu1 %v1817_v21  ;;  %v1858_v15 = vld [vmem:[%s2394_s1 + $0x1f8] sm:$0xff]   ;;  %v1862_v20 = vld [vmem:[%s2394_s1 + $0x2c0] sm:$0xff]   ;;  %v1868_v28 = vld [vmem:[%s2394_s1 + $0x288] sm:$0xff]  }
  0x17   :  { %v1859_v16 = vld [vmem:[%s2394_s1 + $0x138] sm:$0xff]   ;;  %v1863_v21 = vld [vmem:[%s2394_s1 + $0x200] sm:$0xff]   ;;  %v1881_v39 = vld [vmem:[%s2394_s1 + $0x268] sm:$0xff]  }
  0x18   :  { %1629 = vmatpush3.bf16.msra.mxu0 %v1818_v22  ;;  %v1860_v19 = vld [vmem:[%s2394_s1 + $0x1b8] sm:$0xff]   ;;  %v319_v22 = vcombine.high %v303_v17, %v303_v17  ;;  %v1878_v37 = vld [vmem:[%s2394_s1 + $0x2e0] sm:$0xff]   ;;  %v1882_v42 = vld [vmem:[%s2394_s1 + $0x2e8] sm:$0xff]  }
  0x19   :  { %1651 = vmatpush3.bf16.msra.mxu1 %v1819_v23  ;;  %1630 = vmatprep.subr.bf16.mxu0 %v1820_v24  ;;  %v1865_v23 = vld [vmem:[%s2394_s1 + $0x248] sm:$0xff]   ;;  %v1864_v24 = vld [vmem:[%s2394_s1 + $0x280] sm:$0xff]   ;;  %v1874_v33 = vld [vmem:[%s2394_s1 + $0x2d8] sm:$0xff]  }
  0x1a   :  { %1652 = vmatprep.subr.bf16.mxu1 %v1821_v25  ;;  %v1866_v25 = vld [vmem:[%s2394_s1 + $0x2c8] sm:$0xff]   ;;  %v1875_v34 = vld [vmem:[%s2394_s1 + $0x218] sm:$0xff]   ;;  %v1880_v40 = vld [vmem:[%s2394_s1 + $0x2a0] sm:$0xff]  }
  0x1b   :  { %v1876_v36 = vld [vmem:[%s2394_s1 + $0x298] sm:$0xff]   ;;  %v1883_v43 = vld [vmem:[%s2394_s1 + $0x228] sm:$0xff]   ;;  %v1885_v44 = vld [vmem:[%s2394_s1 + $0x270] sm:$0xff]  }
  0x1c   :  { %1631 = vmatpush3.bf16.msra.mxu0 %v1822_v26  ;;  %v1867_v26 = vld [vmem:[%s2394_s1 + $0x208] sm:$0xff]  }
  0x1d   :  { %1653 = vmatpush3.bf16.msra.mxu1 %v1823_v27  ;;  %1632 = vmatprep.subr.bf16.mxu0 %v1824_v29  ;;  %v1869_v27 = vld [vmem:[%s2394_s1 + $0x250] sm:$0xff]   ;;  %v1884_v46 = vld [vmem:[%s2394_s1 + $0x2a8] sm:$0xff]  }
  0x1e   :  { %1654 = vmatprep.subr.bf16.mxu1 %v1825_v30  ;;  %v1870_v29 = vld [vmem:[%s2394_s1 + $0x2d0] sm:$0xff]  }
  0x1f   :  { %v1871_v30 = vld [vmem:[%s2394_s1 + $0x210] sm:$0xff]  }
  0x20   :  { %1633 = vmatpush3.bf16.msra.mxu0 %v1826_v31  ;;  %v1873_v31 = vld [vmem:[%s2394_s1 + $0x258] sm:$0xff]  }
  0x21   :  { %1655 = vmatpush3.bf16.msra.mxu1 %v1827_v32  ;;  %1662 = vmatprep.subr.bf16.mxu0 %v1829_v35  ;;  %v1872_v32 = vld [vmem:[%s2394_s1 + $0x290] sm:$0xff]   ;;  %v1877_v35 = vld [vmem:[%s2394_s1 + $0x260] sm:$0xff]  }
  0x22   :  { %1684 = vmatprep.subr.bf16.mxu1 %v1830_v38  ;;  %v1879_v38 = vld [vmem:[%s2394_s1 + $0x220] sm:$0xff]  }
  0x23   :  { %1188 = vmatmul.mubr.bf16.vlgmr.msra.gmra.mrb[0].mxu0 %v296_v45  ;;  %v14_v45 = vld [vmem:[%s2393_s0 + $0x8] sm:$0xff] }
  0x24   :  { %1663 = vmatpush3.bf16.msra.mxu0 %v1831_v48  ;;  %1228 = vmatmul.mubr.bf16.vlgmr.msra.gmra.mrb[0].mxu1 %v318_v50  ;;  %v329_v47 = vrot.slane %v14_v45, %v2072_v41  ;;  %v322_v48 = vcombine.high %v14_v45, %v14_v45  ;;  %v1887_v50 = vld [vmem:[%s2394_s1 + $0x230] sm:$0xff]  }
  0x25   :  { %1664 = vmatprep.subr.bf16.mxu0 %v1833_v51  ;;  %1685 = vmatpush3.bf16.msra.mxu1 %v1832_v53  ;;  %v1889_v53 = vld [vmem:[%s2394_s1 + $0x278] sm:$0xff]  }
  0x26   :  { %1267 = vmatprep.mubr.bf16.mxu0 %v317_v49  ;;  %1686 = vmatprep.subr.bf16.mxu1 %v1834_v54  ;;  %v1886_v49 = vld [vmem:[%s2394_s1 + $0x2f0] sm:$0xff]   ;;  %v337_v51 = vcombine.high %v329_v47, %v329_v47  ;;  %v2261_v52 = vrot.slane %v322_v48, %v2072_v41 }
  0x27   :  { %1307 = vmatprep.mubr.bf16.mxu1 %v321_v55  ;;  %v1888_v54 = vld [vmem:[%s2394_s1 + $0x2b0] sm:$0xff]  }
  0x28   :  { %1665 = vmatpush3.bf16.msra.mxu0 %v1835_v56  ;;  %v359_v55 = vrot.slane %v337_v51, %v2072_v41  ;;  %v338_v56 = vcombine.high %v2261_v52, %v2261_v52 }
  0x29   :  { %1666 = vmatprep.subr.bf16.mxu0 %v1837_v57  ;;  %1687 = vmatpush3.bf16.msra.mxu1 %v1836_v58  ;;  %v1890_v57 = vld [vmem:[%s2394_s1 + $0x2f8] sm:$0xff]  }
  0x2a   :  { %1688 = vmatprep.subr.bf16.mxu1 %v1838_v59  ;;  %v1891_v58 = vld [vmem:[%s2394_s1 + $0x238] sm:$0xff]   ;;  %v369_v59 = vcombine.high %v359_v55, %v359_v55 }
  0x2c   :  { %1667 = vmatpush3.bf16.msra.mxu0 %v1839_v60  ;;  %v345_v60 = vrot.slane %v329_v47, %v2072_v41 }
  0x2d   :  { %1668 = vmatprep.subr.bf16.mxu0 %v1841_v61  ;;  %1689 = vmatpush3.bf16.msra.mxu1 %v1840_v62  ;;  %v1893_v61 = vld [vmem:[%s2394_s1 + $0x340] sm:$0xff]   ;;  %v1892_v62 = vld [vmem:[%s2394_s1 + $0x2b8] sm:$0xff]  }
  0x2e   :  { %1690 = vmatprep.subr.bf16.mxu1 %v1842_v63  ;;  %v366_v63 = vrot.slane %v338_v56, %v2072_v41 }
  0x30   :  { %1669 = vmatpush3.bf16.msra.mxu0 %v1843_v0  ;;  %v1894_v0 = vld [vmem:[%s2394_s1 + $0x3c0] sm:$0xff]  }
  0x31   :  { %1670 = vmatprep.subr.bf16.mxu0 %v1845_v1  ;;  %1691 = vmatpush3.bf16.msra.mxu1 %v1844_v2  ;;  %v1895_v1 = vld [vmem:[%s2394_s1 + $0x300] sm:$0xff]   ;;  %v367_v2 = vcombine.high %v345_v60, %v345_v60 }
  0x32   :  { %1692 = vmatprep.subr.bf16.mxu1 %v1846_v3  ;;  %v1897_v3 = vld [vmem:[%s2394_s1 + $0x348] sm:$0xff]  }
  0x34   :  { %1671 = vmatpush3.bf16.msra.mxu0 %v1847_v4  ;;  %v1896_v4 = vld [vmem:[%s2394_s1 + $0x380] sm:$0xff]  }
  0x35   :  { %1672 = vmatprep.subr.bf16.mxu0 %v1849_v5  ;;  %1693 = vmatpush3.bf16.msra.mxu1 %v1848_v6  ;;  %v370_v5 = vcombine.high %v366_v63, %v366_v63  ;;  %v1898_v6 = vld [vmem:[%s2394_s1 + $0x3c8] sm:$0xff]  }
  0x36   :  { %1694 = vmatprep.subr.bf16.mxu1 %v1850_v7  ;;  %v1899_v7 = vld [vmem:[%s2394_s1 + $0x308] sm:$0xff]  }
  0x38   :  { %1673 = vmatpush3.bf16.msra.mxu0 %v1851_v8  ;;  %v1901_v8 = vld [vmem:[%s2394_s1 + $0x350] sm:$0xff]  }
  0x39   :  { %1674 = vmatprep.subr.bf16.mxu0 %v1853_v9  ;;  %1695 = vmatpush3.bf16.msra.mxu1 %v1852_v10  ;;  %v1900_v9 = vld [vmem:[%s2394_s1 + $0x388] sm:$0xff]   ;;  %v1902_v10 = vld [vmem:[%s2394_s1 + $0x3d0] sm:$0xff]  }
  0x3a   :  { %1696 = vmatprep.subr.bf16.mxu1 %v1854_v11  ;;  %v1903_v11 = vld [vmem:[%s2394_s1 + $0x310] sm:$0xff]  }
  0x3c   :  { %1675 = vmatpush3.bf16.msra.mxu0 %v1855_v12  ;;  %v1905_v12 = vld [vmem:[%s2394_s1 + $0x358] sm:$0xff]  }
  0x3d   :  { %1676 = vmatprep.subr.bf16.mxu0 %v1857_v13  ;;  %1697 = vmatpush3.bf16.msra.mxu1 %v1856_v14  ;;  %v1904_v13 = vld [vmem:[%s2394_s1 + $0x390] sm:$0xff]   ;;  %v1906_v14 = vld [vmem:[%s2394_s1 + $0x3d8] sm:$0xff]  }
  0x3e   :  { %1698 = vmatprep.subr.bf16.mxu1 %v1858_v15  ;;  %v1907_v15 = vld [vmem:[%s2394_s1 + $0x318] sm:$0xff]  }
  0x40   :  { %1677 = vmatpush3.bf16.msra.mxu0 %v1859_v16  ;;  %v1909_v16 = vld [vmem:[%s2394_s1 + $0x360] sm:$0xff]  }
  0x41   :  { %1706 = vmatprep.subr.bf16.mxu0 %v1861_v18  ;;  %1699 = vmatpush3.bf16.msra.mxu1 %v1860_v19  ;;  %v1910_v18 = vld [vmem:[%s2394_s1 + $0x3e0] sm:$0xff]  }
  0x42   :  { %1728 = vmatprep.subr.bf16.mxu1 %v1862_v20  ;;  %v1911_v19 = vld [vmem:[%s2394_s1 + $0x320] sm:$0xff]   ;;  %v1913_v20 = vld [vmem:[%s2394_s1 + $0x368] sm:$0xff]  }
  0x43   :  { %1268 = vmatmul.mubr.bf16.vlgmr.msra.gmra.mrb[4].mxu0 %v303_v17  ;;  %v1908_v17 = vld [vmem:[%s2394_s1 + $0x398] sm:$0xff]  }
  0x44   :  { %1707 = vmatpush3.bf16.msra.mxu0 %v1863_v21  ;;  %1308 = vmatmul.mubr.bf16.vlgmr.msra.gmra.mrb[4].mxu1 %v319_v22  ;;  %v1912_v21 = vld [vmem:[%s2394_s1 + $0x3a0] sm:$0xff]   ;;  %v1914_v22 = vld [vmem:[%s2394_s1 + $0x3e8] sm:$0xff]  }
  0x45   :  { %1708 = vmatprep.subr.bf16.mxu0 %v1865_v23  ;;  %1729 = vmatpush3.bf16.msra.mxu1 %v1864_v24  ;;  %v1915_v23 = vld [vmem:[%s2394_s1 + $0x328] sm:$0xff]   ;;  %v1917_v24 = vld [vmem:[%s2394_s1 + $0x370] sm:$0xff]  }
  0x46   :  { %1730 = vmatprep.subr.bf16.mxu1 %v1866_v25  ;;  %1347 = vmatprep.mubr.bf16.mxu0 %v359_v55 }
  0x47   :  { %1387 = vmatprep.mubr.bf16.mxu1 %v369_v59 }
  0x48   :  { %1709 = vmatpush3.bf16.msra.mxu0 %v1867_v26 }
  0x49   :  { %1710 = vmatprep.subr.bf16.mxu0 %v1869_v27  ;;  %1731 = vmatpush3.bf16.msra.mxu1 %v1868_v28 }
  0x4a   :  { %1732 = vmatprep.subr.bf16.mxu1 %v1870_v29 }
  0x4c   :  { %1711 = vmatpush3.bf16.msra.mxu0 %v1871_v30 }
  0x4d   :  { %1712 = vmatprep.subr.bf16.mxu0 %v1873_v31  ;;  %1733 = vmatpush3.bf16.msra.mxu1 %v1872_v32 }
  0x4e   :  { %1734 = vmatprep.subr.bf16.mxu1 %v1874_v33 }
  0x50   :  { %1713 = vmatpush3.bf16.msra.mxu0 %v1875_v34 }
  0x51   :  { %1714 = vmatprep.subr.bf16.mxu0 %v1877_v35  ;;  %1735 = vmatpush3.bf16.msra.mxu1 %v1876_v36 }
  0x52   :  { %1736 = vmatprep.subr.bf16.mxu1 %v1878_v37 }
  0x54   :  { %1715 = vmatpush3.bf16.msra.mxu0 %v1879_v38 }
  0x55   :  { %1716 = vmatprep.subr.bf16.mxu0 %v1881_v39  ;;  %1737 = vmatpush3.bf16.msra.mxu1 %v1880_v40 }
  0x56   :  { %1738 = vmatprep.subr.bf16.mxu1 %v1882_v42 }
  0x58   :  { %1717 = vmatpush3.bf16.msra.mxu0 %v1883_v43 }
  0x59   :  { %1718 = vmatprep.subr.bf16.mxu0 %v1885_v44  ;;  %1739 = vmatpush3.bf16.msra.mxu1 %v1884_v46 }
  0x5a   :  { %1740 = vmatprep.subr.bf16.mxu1 %v1886_v49 }
  0x5c   :  { %1719 = vmatpush3.bf16.msra.mxu0 %v1887_v50 }
  0x5d   :  { %1720 = vmatprep.subr.bf16.mxu0 %v1889_v53  ;;  %1741 = vmatpush3.bf16.msra.mxu1 %v1888_v54 }
  0x5e   :  { %1742 = vmatprep.subr.bf16.mxu1 %v1890_v57 }
  0x60   :  { %1721 = vmatpush3.bf16.msra.mxu0 %v1891_v58 }
  0x61   :  { %1750 = vmatprep.subr.bf16.mxu0 %v1893_v61  ;;  %1743 = vmatpush3.bf16.msra.mxu1 %v1892_v62 }
  0x62   :  { %1772 = vmatprep.subr.bf16.mxu1 %v1894_v0 }
  0x63   :  { %1348 = vmatmul.mubr.bf16.vlgmr.msra.gmra.mrb[8].mxu0 %v345_v60 }
  0x64   :  { %1751 = vmatpush3.bf16.msra.mxu0 %v1895_v1  ;;  %1427 = vmatprep.mubr.bf16.mxu0 %v366_v63 }
  0x65   :  { %1388 = vmatmul.mubr.bf16.vlgmr.msra.gmra.mrb[8].mxu1 %v367_v2  ;;  %1752 = vmatprep.subr.bf16.mxu0 %v1897_v3 }
  0x66   :  { %1773 = vmatpush3.bf16.msra.mxu1 %v1896_v4  ;;  %1467 = vmatprep.mubr.bf16.mxu1 %v370_v5 }
  0x67   :  { %1774 = vmatprep.subr.bf16.mxu1 %v1898_v6 }
  0x68   :  { %1753 = vmatpush3.bf16.msra.mxu0 %v1899_v7 }
  0x69   :  { %1754 = vmatprep.subr.bf16.mxu0 %v1901_v8 }
  0x6a   :  { %1775 = vmatpush3.bf16.msra.mxu1 %v1900_v9 }
  0x6b   :  { %1776 = vmatprep.subr.bf16.mxu1 %v1902_v10 }
  0x6c   :  { %1755 = vmatpush3.bf16.msra.mxu0 %v1903_v11 }
  0x6d   :  { %1756 = vmatprep.subr.bf16.mxu0 %v1905_v12 }
  0x6e   :  { %1777 = vmatpush3.bf16.msra.mxu1 %v1904_v13 }
  0x6f   :  { %1778 = vmatprep.subr.bf16.mxu1 %v1906_v14 }
  0x70   :  { %1757 = vmatpush3.bf16.msra.mxu0 %v1907_v15 }
  0x71   :  { %1758 = vmatprep.subr.bf16.mxu0 %v1909_v16 }
  0x72   :  { %1779 = vmatpush3.bf16.msra.mxu1 %v1908_v17 }
  0x73   :  { %1780 = vmatprep.subr.bf16.mxu1 %v1910_v18 }
  0x74   :  { %1759 = vmatpush3.bf16.msra.mxu0 %v1911_v19 }
  0x75   :  { %1760 = vmatprep.subr.bf16.mxu0 %v1913_v20 }
  0x76   :  { %7 = vsyncpa [#allocation3], 0  ;;  %1781 = vmatpush3.bf16.msra.mxu1 %v1912_v21  ;;  %v1916_v25 = vld [vmem:[%s2394_s1 + $0x3a8] sm:$0xff]   ;;  %v1918_v26 = vld [vmem:[%s2394_s1 + $0x3f0] sm:$0xff]   ;;  %v352_v32 = vrot.slane %v2261_v52, %v2072_v41 }
  0x77   :  { %1782 = vmatprep.subr.bf16.mxu1 %v1914_v22  ;;  %v1919_v27 = vld [vmem:[%s2394_s1 + $0x330] sm:$0xff]   ;;  %v1921_v28 = vld [vmem:[%s2394_s1 + $0x378] sm:$0xff]  }
  0x78   :  { %1761 = vmatpush3.bf16.msra.mxu0 %v1915_v23  ;;  %v1920_v29 = vld [vmem:[%s2394_s1 + $0x3b0] sm:$0xff]   ;;  %v1922_v30 = vld [vmem:[%s2394_s1 + $0x3f8] sm:$0xff]   ;;  %v368_v34 = vcombine.high %v352_v32, %v352_v32 }
  0x79   :  { %1762 = vmatprep.subr.bf16.mxu0 %v1917_v24  ;;  %v1923_v31 = vld [vmem:[%s2394_s1 + $0x338] sm:$0xff]  }
  0x7a   :  { %1783 = vmatpush3.bf16.msra.mxu1 %v1916_v25  ;;  %v1924_v33 = vld [vmem:[%s2394_s1 + $0x3b8] sm:$0xff]   ;;  %s1951_s1 = smov [#allocation2]  }
  0x7b   :  { %1784 = vmatprep.subr.bf16.mxu1 %v1918_v26  ;;  %s1482_s14 = sshll.u32 %s1951_s1, 4  ;;  %s1483_s14 = int_to_ptr.vmem [resolvable:$true] %s1482_s14 }
  0x7c   :  { %1763 = vmatpush3.bf16.msra.mxu0 %v1919_v27  ;;  %s1926_s15 = scalar_lea.vmem %s1483_s14, 32  ;;  %p1931_p1 = scmp.lt.s32.totalorder %s1483_s14, %s1483_s14 }
  0x7d   :  { %1764 = vmatprep.subr.bf16.mxu0 %v1921_v28  ;;  %p1927_p0 = scmp.ne.s32.totalorder %s1483_s14, %s1926_s15  ;;  %p1932_p2 = scmp.lt.s32.totalorder %s1926_s15, %s1926_s15 }
  0x7e   :  { %1785 = vmatpush3.bf16.msra.mxu1 %v1920_v29 }
  0x7f   :  { %1786 = vmatprep.subr.bf16.mxu1 %v1922_v30  ;;  %p1933_p3 = por %p1932_p2, %p1931_p1 }
  0x80   :  { %1765 = vmatpush3.bf16.msra.mxu0 %v1923_v31 }
  0x81   :  { %p1934_p4 = pnand %p1933_p3, %p1927_p0 }
  0x82   :  { %1787 = vmatpush3.bf16.msra.mxu1 %v1924_v33 }
  0x83   :  { %1428 = vmatmul.mubr.bf16.vlgmr.msra.gmra.mrb[12].mxu0 %v352_v32 }
  0x85   :  { %1468 = vmatmul.mubr.bf16.vlgmr.msra.gmra.mrb[12].mxu1 %v368_v34 }
  0xf6   :  { %v1634_v35 = vpop.f32.mrb[0].mxu0 }
  0xf7   :  { %v1635_v36 = vpop.f32.mrb[1].mxu0  ;;  %v1656_v37 = vpop.f32.mrb[0].mxu1 }
  0xf8   :  { %v1636_v38 = vadd.f32 %v1635_v36, %v1634_v35  ;;  %v1637_v39 = vpop.f32.mrb[2].mxu0  ;;  %v1657_v40 = vpop.f32.mrb[1].mxu1 }
  0xf9   :  { %v1638_v42 = vpop.f32.mrb[3].mxu0  ;;  %v1658_v43 = vadd.f32 %v1657_v40, %v1656_v37  ;;  %v1659_v41 = vpop.f32.mrb[2].mxu1 }
  0xfa   :  { %v1660_v44 = vpop.f32.mrb[3].mxu1 }
  0xfb   :  { %v1230_v45 = vadd.f32 %v1658_v43, %v1636_v38 }
 0x116   :  { %v1678_v46 = vpop.f32.mrb[4].mxu0 }
 0x117   :  { %v1679_v47 = vpop.f32.mrb[5].mxu0  ;;  %v1700_v48 = vpop.f32.mrb[4].mxu1 }
 0x118   :  { %v1680_v49 = vadd.f32 %v1679_v47, %v1678_v46  ;;  %v1681_v50 = vpop.f32.mrb[6].mxu0  ;;  %v1701_v51 = vpop.f32.mrb[5].mxu1 }
 0x119   :  { %v1682_v52 = vpop.f32.mrb[7].mxu0  ;;  %v1702_v54 = vadd.f32 %v1701_v51, %v1700_v48  ;;  %v1703_v55 = vpop.f32.mrb[6].mxu1 }
 0x11a   :  { %v1270_v53 = vadd.f32 %v1680_v49, %v1230_v45  ;;  %v1704_v56 = vpop.f32.mrb[7].mxu1 }
 0x11c   :  { %v1310_v57 = vadd.f32 %v1702_v54, %v1270_v53 }
 0x136   :  { %v1722_v58 = vpop.f32.mrb[8].mxu0 }
 0x137   :  { %v1723_v59 = vpop.f32.mrb[9].mxu0 }
 0x138   :  { %v1744_v60 = vpop.f32.mrb[8].mxu1  ;;  %v1724_v61 = vadd.f32 %v1723_v59, %v1722_v58  ;;  %v1725_v62 = vpop.f32.mrb[10].mxu0 }
 0x139   :  { %v1745_v63 = vpop.f32.mrb[9].mxu1  ;;  %v1726_v0 = vpop.f32.mrb[11].mxu0 }
 0x13a   :  { %v1350_v1 = vadd.f32 %v1724_v61, %v1310_v57  ;;  %v1746_v2 = vadd.f32 %v1745_v63, %v1744_v60  ;;  %v1747_v3 = vpop.f32.mrb[10].mxu1 }
 0x13b   :  { %v1748_v4 = vpop.f32.mrb[11].mxu1 }
 0x13c   :  { %v1390_v5 = vadd.f32 %v1746_v2, %v1350_v1 }
 0x156   :  { %v1766_v6 = vpop.f32.mrb[12].mxu0 }
 0x157   :  { %v1767_v7 = vpop.f32.mrb[13].mxu0 }
 0x158   :  { %v1788_v8 = vpop.f32.mrb[12].mxu1  ;;  %v1768_v9 = vadd.f32 %v1767_v7, %v1766_v6  ;;  %v1769_v10 = vpop.f32.mrb[14].mxu0 }
 0x159   :  { %v1789_v11 = vpop.f32.mrb[13].mxu1  ;;  %v1770_v12 = vpop.f32.mrb[15].mxu0 }
 0x15a   :  { %v1430_v13 = vadd.f32 %v1768_v9, %v1390_v5  ;;  %v1790_v14 = vadd.f32 %v1789_v11, %v1788_v8  ;;  %v1791_v15 = vpop.f32.mrb[14].mxu1 }
 0x15b   :  { %v1792_v16 = vpop.f32.mrb[15].mxu1 }
 0x15c   :  { %v1470_v17 = vadd.f32 %v1790_v14, %v1430_v13 }
 0x15e   :  { %1475 = vst [vmem:[#allocation2] sm:$0x3] %v1470_v17 }
 0x15f   :  { %1937 = shalt.err (!%p1934_p4)
}
 0x160   :  { %s1938_s18 = scalar_lea.hbm %s2395_s2, 32 }
 0x161   :  { %p1939_p5 = scmp.ne.s32.totalorder %s2395_s2, %s1938_s18  ;;  %p1942_p6 = scmp.lt.u32.totalorder %s1938_s18, %s2395_s2 }
 0x163   :  { %p1944_p7 = pnand %p1942_p6, %p1939_p5 }
 0x165   :  { %1947 = shalt.err (!%p1944_p7)
}
 0x166   :  { %1485 = dma.vmem_to_hbm [thread:$0]  %s1483_s14, 32, %s2395_s2, [#allocation3]  }
 0x167   :  { %1948 = dma.done.wait [#allocation3], 32  }
 0x168   :  { %1949 = vsyncadd [#allocation3], 4294967264 }
 0x169   :  { %1489 = vsyncpa [#allocation3], 1 }

// kernel: resnet_qnn_forward.20
= control target key start
LH: loop header
LB: loop body
LE: loop exit
PB: predicated region body
PF: predicated region fallthrough
CT: control target
= control target key end

     0   :  { %s1644_s1 = inlined_call_operand.vmem [shape: bf16[1152,128], index: 1, kind: input, shape index: {}]   ;;  %s1645_s0 = inlined_call_operand.vmem [shape: bf16[32,1152], index: 0, kind: input, shape index: {}]   ;;  %s1646_s2 = inlined_call_operand.vmem [shape: bf16[32,128], index: 2, kind: input, shape index: {}]   ;;  %s1647_s3 = inlined_call_operand.vmem [shape: bf16[32,128], index: 3, kind: output, shape index: {}]  }
   0x1   :  { %v1244_v0 = vld [vmem:[%s1644_s1 + $0x40] sm:$0xff]   ;;  %v1248_v4 = vld [vmem:[%s1644_s1 + $0x48] sm:$0xff]   ;;  %v1252_v8 = vld [vmem:[%s1644_s1 + $0x50] sm:$0xff]  }
   0x2   :  { %v1245_v1 = vld [vmem:[%s1644_s1] sm:$0xff]   ;;  %1102 = vmatprep.subr.bf16.mxu0 %v1244_v0  ;;  %v1249_v5 = vld [vmem:[%s1644_s1 + $0x8] sm:$0xff]   ;;  %v1253_v9 = vld [vmem:[%s1644_s1 + $0x10] sm:$0xff]  }
   0x3   :  { %v1246_v2 = vld [vmem:[%s1644_s1 + $0xc0] sm:$0xff]   ;;  %1103 = vmatpush3.bf16.msra.mxu0 %v1245_v1  ;;  %v1250_v6 = vld [vmem:[%s1644_s1 + $0xc8] sm:$0xff]   ;;  %v1254_v10 = vld [vmem:[%s1644_s1 + $0xd0] sm:$0xff]  }
   0x4   :  { %v1247_v3 = vld [vmem:[%s1644_s1 + $0x80] sm:$0xff]   ;;  %1130 = vmatprep.subr.bf16.mxu1 %v1246_v2  ;;  %1104 = vmatprep.subr.bf16.mxu0 %v1248_v4  ;;  %v1251_v7 = vld [vmem:[%s1644_s1 + $0x88] sm:$0xff]   ;;  %v1255_v11 = vld [vmem:[%s1644_s1 + $0x90] sm:$0xff]  }
   0x5   :  { %1131 = vmatpush3.bf16.msra.mxu1 %v1247_v3  ;;  %v1256_v12 = vld [vmem:[%s1644_s1 + $0x58] sm:$0xff]   ;;  %v1260_v16 = vld [vmem:[%s1644_s1 + $0x60] sm:$0xff]   ;;  %v1264_v20 = vld [vmem:[%s1644_s1 + $0x68] sm:$0xff]  }
   0x6   :  { %1132 = vmatprep.subr.bf16.mxu1 %v1250_v6  ;;  %v1257_v13 = vld [vmem:[%s1644_s1 + $0x18] sm:$0xff]   ;;  %v1261_v17 = vld [vmem:[%s1644_s1 + $0x20] sm:$0xff]   ;;  %v1265_v21 = vld [vmem:[%s1644_s1 + $0x28] sm:$0xff]  }
   0x7   :  { %1105 = vmatpush3.bf16.msra.mxu0 %v1249_v5  ;;  %v1258_v14 = vld [vmem:[%s1644_s1 + $0xd8] sm:$0xff]   ;;  %v1262_v18 = vld [vmem:[%s1644_s1 + $0xe0] sm:$0xff]   ;;  %v1266_v22 = vld [vmem:[%s1644_s1 + $0xe8] sm:$0xff]  }
   0x8   :  { %1106 = vmatprep.subr.bf16.mxu0 %v1252_v8  ;;  %v1259_v15 = vld [vmem:[%s1644_s1 + $0x98] sm:$0xff]   ;;  %v1263_v19 = vld [vmem:[%s1644_s1 + $0xa0] sm:$0xff]   ;;  %v1267_v23 = vld [vmem:[%s1644_s1 + $0xa8] sm:$0xff]  }
   0x9   :  { %1133 = vmatpush3.bf16.msra.mxu1 %v1251_v7  ;;  %v1268_v24 = vld [vmem:[%s1644_s1 + $0x70] sm:$0xff]   ;;  %v1272_v28 = vld [vmem:[%s1644_s1 + $0x78] sm:$0xff]   ;;  %v1275_v31 = vld [vmem:[%s1645_s0] ss:$36 sps:$4 sm:$0xff]  }
   0xa   :  { %1134 = vmatprep.subr.bf16.mxu1 %v1254_v10  ;;  %v1269_v25 = vld [vmem:[%s1644_s1 + $0x30] sm:$0xff]   ;;  %v1273_v29 = vld [vmem:[%s1644_s1 + $0x38] sm:$0xff]   ;;  %v1277_v32 = vld [vmem:[%s1645_s0 + $0x4] ss:$36 sps:$4 sm:$0xff]  }
   0xb   :  { %1107 = vmatpush3.bf16.msra.mxu0 %v1253_v9  ;;  %v1270_v26 = vld [vmem:[%s1644_s1 + $0xf0] sm:$0xff]   ;;  %v1274_v30 = vld [vmem:[%s1644_s1 + $0xf8] sm:$0xff]   ;;  %743 = vmatprep.mubr.bf16.mxu0 %v1277_v32  ;;  %v1279_v34 = vld [vmem:[%s1644_s1 + $0x140] sm:$0xff]  }
   0xc   :  { %1108 = vmatprep.subr.bf16.mxu0 %v1256_v12  ;;  %v1271_v27 = vld [vmem:[%s1644_s1 + $0xb0] sm:$0xff]   ;;  %v1278_v33 = vld [vmem:[%s1644_s1 + $0xb8] sm:$0xff]   ;;  %v1280_v35 = vld [vmem:[%s1645_s0 + $0x8] ss:$36 sps:$4 sm:$0xff]  }
   0xd   :  { %1135 = vmatpush3.bf16.msra.mxu1 %v1255_v11  ;;  %v1282_v36 = vld [vmem:[%s1645_s0 + $0xc] ss:$36 sps:$4 sm:$0xff]   ;;  %v1283_v37 = vld [vmem:[%s1644_s1 + $0x100] sm:$0xff]   ;;  %v1294_v48 = vld [vmem:[%s1644_s1 + $0x158] sm:$0xff]  }
   0xe   :  { %1136 = vmatprep.subr.bf16.mxu1 %v1258_v14  ;;  %792 = vmatprep.mubr.bf16.mxu1 %v1282_v36  ;;  %v1284_v38 = vld [vmem:[%s1644_s1 + $0x1c0] sm:$0xff]   ;;  %v1286_v40 = vld [vmem:[%s1644_s1 + $0x148] sm:$0xff]   ;;  %v1290_v44 = vld [vmem:[%s1644_s1 + $0x150] sm:$0xff]  }
   0xf   :  { %1109 = vmatpush3.bf16.msra.mxu0 %v1257_v13  ;;  %v1285_v39 = vld [vmem:[%s1644_s1 + $0x180] sm:$0xff]   ;;  %v1287_v41 = vld [vmem:[%s1644_s1 + $0x108] sm:$0xff]   ;;  %v1291_v45 = vld [vmem:[%s1644_s1 + $0x110] sm:$0xff]  }
  0x10   :  { %1110 = vmatprep.subr.bf16.mxu0 %v1260_v16  ;;  %v1288_v42 = vld [vmem:[%s1644_s1 + $0x1c8] sm:$0xff]   ;;  %v1292_v46 = vld [vmem:[%s1644_s1 + $0x1d0] sm:$0xff]   ;;  %v1295_v49 = vld [vmem:[%s1644_s1 + $0x118] sm:$0xff]  }
  0x11   :  { %1137 = vmatpush3.bf16.msra.mxu1 %v1259_v15  ;;  %v1289_v43 = vld [vmem:[%s1644_s1 + $0x188] sm:$0xff]   ;;  %v1293_v47 = vld [vmem:[%s1644_s1 + $0x190] sm:$0xff]   ;;  %v1296_v50 = vld [vmem:[%s1644_s1 + $0x1d8] sm:$0xff]  }
  0x12   :  { %1138 = vmatprep.subr.bf16.mxu1 %v1262_v18  ;;  %v1297_v51 = vld [vmem:[%s1644_s1 + $0x198] sm:$0xff]   ;;  %v1298_v52 = vld [vmem:[%s1644_s1 + $0x160] sm:$0xff]   ;;  %v1302_v56 = vld [vmem:[%s1644_s1 + $0x168] sm:$0xff]  }
  0x13   :  { %1111 = vmatpush3.bf16.msra.mxu0 %v1261_v17  ;;  %v1299_v53 = vld [vmem:[%s1644_s1 + $0x120] sm:$0xff]   ;;  %v1303_v57 = vld [vmem:[%s1645_s0 + $0x4c] ss:$36 sps:$4 sm:$0xff]   ;;  %v1308_v61 = vld [vmem:[%s1645_s0 + $0x54] ss:$36 sps:$4 sm:$0xff]  }
  0x14   :  { %1112 = vmatprep.subr.bf16.mxu0 %v1264_v20  ;;  %v1300_v54 = vld [vmem:[%s1644_s1 + $0x1e0] sm:$0xff]   ;;  %v1305_v58 = vld [vmem:[%s1644_s1 + $0x128] sm:$0xff]   ;;  %v1311_v63 = vld [vmem:[%s1645_s0 + $0x50] ss:$36 sps:$4 sm:$0xff]  }
  0x15   :  { %1139 = vmatpush3.bf16.msra.mxu1 %v1263_v19  ;;  %v1301_v55 = vld [vmem:[%s1644_s1 + $0x1a0] sm:$0xff]   ;;  %v1306_v59 = vld [vmem:[%s1645_s0 + $0x48] ss:$36 sps:$4 sm:$0xff]   ;;  %v1312_v0 = vld [vmem:[%s1644_s1 + $0x170] sm:$0xff]  }
  0x16   :  { %1140 = vmatprep.subr.bf16.mxu1 %v1266_v22  ;;  %v1307_v60 = vld [vmem:[%s1644_s1 + $0x1e8] sm:$0xff]   ;;  %v1313_v1 = vld [vmem:[%s1644_s1 + $0x130] sm:$0xff]   ;;  %v1316_v4 = vld [vmem:[%s1644_s1 + $0x178] sm:$0xff]  }
  0x17   :  { %1113 = vmatpush3.bf16.msra.mxu0 %v1265_v21  ;;  %v1310_v62 = vld [vmem:[%s1644_s1 + $0x1a8] sm:$0xff]   ;;  %v1314_v2 = vld [vmem:[%s1644_s1 + $0x1f0] sm:$0xff]   ;;  %v1317_v5 = vld [vmem:[%s1644_s1 + $0x138] sm:$0xff]  }
  0x18   :  { %1114 = vmatprep.subr.bf16.mxu0 %v1268_v24  ;;  %v1315_v3 = vld [vmem:[%s1644_s1 + $0x1b0] sm:$0xff]   ;;  %v1318_v6 = vld [vmem:[%s1644_s1 + $0x1f8] sm:$0xff]   ;;  %v1323_v10 = vld [vmem:[%s1644_s1 + $0x200] sm:$0xff]  }
  0x19   :  { %1141 = vmatpush3.bf16.msra.mxu1 %v1267_v23  ;;  %v1319_v7 = vld [vmem:[%s1645_s0 + $0x10] ss:$36 sps:$4 sm:$0xff]   ;;  %v1322_v9 = vld [vmem:[%s1644_s1 + $0x1b8] sm:$0xff]   ;;  %v1327_v13 = vld [vmem:[%s1644_s1 + $0x208] sm:$0xff]  }
  0x1a   :  { %1142 = vmatprep.subr.bf16.mxu1 %v1270_v26  ;;  %v1321_v8 = vld [vmem:[%s1645_s0 + $0x14] ss:$36 sps:$4 sm:$0xff]   ;;  %v1326_v12 = vld [vmem:[%s1645_s0 + $0x1c] ss:$36 sps:$4 sm:$0xff]   ;;  %v1332_v17 = vld [vmem:[%s1645_s0 + $0x64] ss:$36 sps:$4 sm:$0xff]  }
  0x1b   :  { %1115 = vmatpush3.bf16.msra.mxu0 %v1269_v25  ;;  %v1324_v11 = vld [vmem:[%s1645_s0 + $0x18] ss:$36 sps:$4 sm:$0xff]   ;;  %v1331_v16 = vld [vmem:[%s1644_s1 + $0x210] sm:$0xff]   ;;  %v1334_v18 = vld [vmem:[%s1645_s0 + $0x60] ss:$36 sps:$4 sm:$0xff]  }
  0x1c   :  { %1116 = vmatprep.subr.bf16.mxu0 %v1272_v28  ;;  %v1328_v14 = vld [vmem:[%s1645_s0 + $0x5c] ss:$36 sps:$4 sm:$0xff]   ;;  %v1337_v22 = vld [vmem:[%s1644_s1 + $0x228] sm:$0xff]   ;;  %v1338_v23 = vld [vmem:[%s1644_s1 + $0x230] sm:$0xff]  }
  0x1d   :  { %1143 = vmatpush3.bf16.msra.mxu1 %v1271_v27  ;;  %v1330_v15 = vld [vmem:[%s1645_s0 + $0x58] ss:$36 sps:$4 sm:$0xff]   ;;  %v1336_v20 = vld [vmem:[%s1644_s1 + $0x220] sm:$0xff]   ;;  %v1341_v25 = vld [vmem:[%s1645_s0 + $0x68] ss:$36 sps:$4 sm:$0xff]  }
  0x1e   :  { %1144 = vmatprep.subr.bf16.mxu1 %v1274_v30  ;;  %v1335_v19 = vld [vmem:[%s1644_s1 + $0x218] sm:$0xff]   ;;  %v1340_v21 = vld [vmem:[%s1645_s0 + $0x20] ss:$36 sps:$4 sm:$0xff]  }
  0x1f   :  { %1117 = vmatpush3.bf16.msra.mxu0 %v1273_v29  ;;  %v1339_v24 = vld [vmem:[%s1644_s1 + $0x238] sm:$0xff]   ;;  %v1083_v26 = vld [vmem:[%s1646_s2] sm:$0xff]  }
  0x20   :  { %1158 = vmatprep.subr.bf16.mxu0 %v1279_v34  ;;  %v1084_v28 = vunpack.c.l.bf16 %v1083_v26  ;;  %v1085_v32 = vunpack.c.h.bf16 %v1083_v26 }
  0x21   :  { %1145 = vmatpush3.bf16.msra.mxu1 %v1278_v33 }
  0x22   :  { %744 = vmatmul.mubr.bf16.vlgmr.msra.gmra.mrb[0].mxu0 %v1275_v31  ;;  %1186 = vmatprep.subr.bf16.mxu1 %v1284_v38 }
  0x23   :  { %1159 = vmatpush3.bf16.msra.mxu0 %v1283_v37  ;;  %751 = vmatprep.mubr.bf16.mxu0 %v1303_v57 }
  0x24   :  { %793 = vmatmul.mubr.bf16.vlgmr.msra.gmra.mrb[0].mxu1 %v1280_v35  ;;  %1160 = vmatprep.subr.bf16.mxu0 %v1286_v40 }
  0x25   :  { %1187 = vmatpush3.bf16.msra.mxu1 %v1285_v39  ;;  %800 = vmatprep.mubr.bf16.mxu1 %v1308_v61 }
  0x26   :  { %1188 = vmatprep.subr.bf16.mxu1 %v1288_v42 }
  0x27   :  { %1161 = vmatpush3.bf16.msra.mxu0 %v1287_v41 }
  0x28   :  { %1162 = vmatprep.subr.bf16.mxu0 %v1290_v44 }
  0x29   :  { %1189 = vmatpush3.bf16.msra.mxu1 %v1289_v43 }
  0x2a   :  { %1190 = vmatprep.subr.bf16.mxu1 %v1292_v46  ;;  %752 = vmatmul.mubr.bf16.gmra.mrb[4].mxu0 %v1306_v59 }
  0x2b   :  { %1163 = vmatpush3.bf16.msra.mxu0 %v1291_v45  ;;  %841 = vmatprep.mubr.bf16.mxu0 %v1321_v8  ;;  %v1100_v45 = vld [vmem:[%s1646_s2 + $0x8] sm:$0xff]  }
  0x2c   :  { %1164 = vmatprep.subr.bf16.mxu0 %v1294_v48  ;;  %801 = vmatmul.mubr.bf16.gmra.mrb[4].mxu1 %v1311_v63 }
  0x2d   :  { %1191 = vmatpush3.bf16.msra.mxu1 %v1293_v47  ;;  %890 = vmatprep.mubr.bf16.mxu1 %v1326_v12  ;;  %v1088_v47 = vunpack.c.l.bf16 %v1100_v45 }
  0x2e   :  { %1192 = vmatprep.subr.bf16.mxu1 %v1296_v50 }
  0x2f   :  { %1165 = vmatpush3.bf16.msra.mxu0 %v1295_v49 }
  0x30   :  { %1166 = vmatprep.subr.bf16.mxu0 %v1298_v52 }
  0x31   :  { %1193 = vmatpush3.bf16.msra.mxu1 %v1297_v51  ;;  %v1089_v51 = vunpack.c.h.bf16 %v1100_v45 }
  0x32   :  { %1194 = vmatprep.subr.bf16.mxu1 %v1300_v54 }
  0x33   :  { %1167 = vmatpush3.bf16.msra.mxu0 %v1299_v53 }
  0x34   :  { %1168 = vmatprep.subr.bf16.mxu0 %v1302_v56 }
  0x35   :  { %1195 = vmatpush3.bf16.msra.mxu1 %v1301_v55 }
  0x36   :  { %1196 = vmatprep.subr.bf16.mxu1 %v1307_v60 }
  0x37   :  { %1169 = vmatpush3.bf16.msra.mxu0 %v1305_v58 }
  0x38   :  { %1170 = vmatprep.subr.bf16.mxu0 %v1312_v0 }
  0x39   :  { %1197 = vmatpush3.bf16.msra.mxu1 %v1310_v62 }
  0x3a   :  { %1198 = vmatprep.subr.bf16.mxu1 %v1314_v2 }
  0x3b   :  { %1171 = vmatpush3.bf16.msra.mxu0 %v1313_v1 }
  0x3c   :  { %1172 = vmatprep.subr.bf16.mxu0 %v1316_v4 }
  0x3d   :  { %1199 = vmatpush3.bf16.msra.mxu1 %v1315_v3 }
  0x3e   :  { %1200 = vmatprep.subr.bf16.mxu1 %v1318_v6 }
  0x3f   :  { %1173 = vmatpush3.bf16.msra.mxu0 %v1317_v5 }
  0x40   :  { %1224 = vmatprep.subr.bf16.mxu0 %v1323_v10 }
  0x41   :  { %1201 = vmatpush3.bf16.msra.mxu1 %v1322_v9 }
  0x42   :  { %842 = vmatmul.mubr.bf16.vlgmr.msra.gmra.mrb[8].mxu0 %v1319_v7 }
  0x43   :  { %1225 = vmatpush3.bf16.msra.mxu0 %v1323_v10  ;;  %849 = vmatprep.mubr.bf16.mxu0 %v1328_v14 }
  0x44   :  { %891 = vmatmul.mubr.bf16.vlgmr.msra.gmra.mrb[8].mxu1 %v1324_v11  ;;  %1226 = vmatprep.subr.bf16.mxu0 %v1327_v13 }
  0x45   :  { %898 = vmatprep.mubr.bf16.mxu1 %v1332_v17 }
  0x47   :  { %1227 = vmatpush3.bf16.msra.mxu0 %v1327_v13 }
  0x48   :  { %1228 = vmatprep.subr.bf16.mxu0 %v1331_v16 }
  0x4a   :  { %850 = vmatmul.mubr.bf16.gmra.mrb[12].mxu0 %v1330_v15 }
  0x4b   :  { %1229 = vmatpush3.bf16.msra.mxu0 %v1331_v16  ;;  %1240 = vmatprep.mubr.bf16.mxu0 %v1340_v21 }
  0x4c   :  { %899 = vmatmul.mubr.bf16.gmra.mrb[12].mxu1 %v1334_v18  ;;  %1230 = vmatprep.subr.bf16.mxu0 %v1335_v19 }
  0x4f   :  { %1231 = vmatpush3.bf16.msra.mxu0 %v1335_v19 }
  0x50   :  { %1232 = vmatprep.subr.bf16.mxu0 %v1336_v20 }
  0x53   :  { %1233 = vmatpush3.bf16.msra.mxu0 %v1336_v20 }
  0x54   :  { %1234 = vmatprep.subr.bf16.mxu0 %v1337_v22 }
  0x57   :  { %1235 = vmatpush3.bf16.msra.mxu0 %v1337_v22 }
  0x58   :  { %1236 = vmatprep.subr.bf16.mxu0 %v1338_v23 }
  0x5b   :  { %1237 = vmatpush3.bf16.msra.mxu0 %v1338_v23 }
  0x5c   :  { %1238 = vmatprep.subr.bf16.mxu0 %v1339_v24 }
  0x5f   :  { %1239 = vmatpush3.bf16.msra.mxu0 %v1339_v24 }
  0x62   :  { %1241 = vmatmul.mubr.bf16.vlgmr.msra.gmra.mrb[16].mxu0 %v1341_v25 }
  0xf5   :  { %v1118_v27 = vpop.f32.mrb[0].mxu0 }
  0xf6   :  { %v1119_v29 = vpop.f32.mrb[1].mxu0 }
  0xf7   :  { %v1120_v30 = vadd.f32 %v1119_v29, %v1118_v27  ;;  %v1121_v31 = vpop.f32.mrb[2].mxu0  ;;  %v1146_v33 = vpop.f32.mrb[0].mxu1 }
  0xf8   :  { %v1122_v34 = vpop.f32.mrb[3].mxu0  ;;  %v1147_v37 = vpop.f32.mrb[1].mxu1 }
  0xf9   :  { %v746_v35 = vadd.f32 %v1120_v30, %v1084_v28  ;;  %v1123_v36 = vadd.f32 %v1122_v34, %v1121_v31  ;;  %v1148_v38 = vadd.f32 %v1147_v37, %v1146_v33  ;;  %v1149_v39 = vpop.f32.mrb[2].mxu1 }
  0xfa   :  { %v1150_v41 = vpop.f32.mrb[3].mxu1 }
  0xfb   :  { %v749_v40 = vadd.f32 %v1123_v36, %v1085_v32  ;;  %v795_v42 = vadd.f32 %v1148_v38, %v746_v35  ;;  %v1151_v43 = vadd.f32 %v1150_v41, %v1149_v39 }
  0xfd   :  { %v798_v44 = vadd.f32 %v1151_v43, %v749_v40  ;;  %v1124_v46 = vpop.f32.mrb[4].mxu0 }
  0xfe   :  { %v1125_v48 = vpop.f32.mrb[5].mxu0 }
  0xff   :  { %v1126_v49 = vadd.f32 %v1125_v48, %v1124_v46  ;;  %v1127_v50 = vpop.f32.mrb[6].mxu0  ;;  %v1152_v52 = vpop.f32.mrb[4].mxu1 }
 0x100   :  { %v1128_v53 = vpop.f32.mrb[7].mxu0  ;;  %v1153_v56 = vpop.f32.mrb[5].mxu1 }
 0x101   :  { %v754_v54 = vadd.f32 %v1126_v49, %v1088_v47  ;;  %v1129_v55 = vadd.f32 %v1128_v53, %v1127_v50  ;;  %v1154_v57 = vadd.f32 %v1153_v56, %v1152_v52  ;;  %v1155_v58 = vpop.f32.mrb[6].mxu1 }
 0x102   :  { %v1156_v60 = vpop.f32.mrb[7].mxu1 }
 0x103   :  { %v757_v59 = vadd.f32 %v1129_v55, %v1089_v51  ;;  %v803_v61 = vadd.f32 %v1154_v57, %v754_v54  ;;  %v1157_v62 = vadd.f32 %v1156_v60, %v1155_v58 }
 0x105   :  { %v806_v63 = vadd.f32 %v1157_v62, %v757_v59 }
 0x115   :  { %v1174_v0 = vpop.f32.mrb[8].mxu0 }
 0x116   :  { %v1175_v1 = vpop.f32.mrb[9].mxu0 }
 0x117   :  { %v1176_v2 = vadd.f32 %v1175_v1, %v1174_v0  ;;  %v1177_v3 = vpop.f32.mrb[10].mxu0  ;;  %v1202_v4 = vpop.f32.mrb[8].mxu1 }
 0x118   :  { %v1178_v5 = vpop.f32.mrb[11].mxu0  ;;  %v1203_v8 = vpop.f32.mrb[9].mxu1 }
 0x119   :  { %v844_v6 = vadd.f32 %v1176_v2, %v795_v42  ;;  %v1179_v7 = vadd.f32 %v1178_v5, %v1177_v3  ;;  %v1204_v9 = vadd.f32 %v1203_v8, %v1202_v4  ;;  %v1205_v10 = vpop.f32.mrb[10].mxu1 }
 0x11a   :  { %v1206_v12 = vpop.f32.mrb[11].mxu1 }
 0x11b   :  { %v847_v11 = vadd.f32 %v1179_v7, %v798_v44  ;;  %v1207_v13 = vadd.f32 %v1206_v12, %v1205_v10  ;;  %v893_v14 = vadd.f32 %v1204_v9, %v844_v6 }
 0x11d   :  { %v1180_v15 = vpop.f32.mrb[12].mxu0  ;;  %v896_v17 = vadd.f32 %v1207_v13, %v847_v11 }
 0x11e   :  { %v1181_v16 = vpop.f32.mrb[13].mxu0 }
 0x11f   :  { %v1182_v18 = vadd.f32 %v1181_v16, %v1180_v15  ;;  %v1183_v19 = vpop.f32.mrb[14].mxu0  ;;  %v1208_v20 = vpop.f32.mrb[12].mxu1 }
 0x120   :  { %v1184_v21 = vpop.f32.mrb[15].mxu0  ;;  %v1209_v24 = vpop.f32.mrb[13].mxu1 }
 0x121   :  { %v852_v22 = vadd.f32 %v1182_v18, %v803_v61  ;;  %v1185_v23 = vadd.f32 %v1184_v21, %v1183_v19  ;;  %v1210_v25 = vadd.f32 %v1209_v24, %v1208_v20  ;;  %v1211_v26 = vpop.f32.mrb[14].mxu1 }
 0x122   :  { %v1212_v28 = vpop.f32.mrb[15].mxu1 }
 0x123   :  { %v855_v27 = vadd.f32 %v1185_v23, %v806_v63  ;;  %v1213_v29 = vadd.f32 %v1212_v28, %v1211_v26  ;;  %v901_v30 = vadd.f32 %v1210_v25, %v852_v22 }
 0x125   :  { %v904_v31 = vadd.f32 %v1213_v29, %v855_v27 }
 0x135   :  { %v1242_v32 = vpop.f32.mrb[16].mxu0 }
 0x136   :  { %v950_v33 = vadd.f32 %v1242_v32, %v901_v30  ;;  %v941_v34 = vpop.f32.mrb[17].mxu0 }
 0x137   :  { %v942_v35 = vadd.f32 %v941_v34, %v893_v14  ;;  %v1243_v36 = vpop.f32.mrb[18].mxu0 }
 0x138   :  { %v953_v37 = vadd.f32 %v1243_v36, %v904_v31  ;;  %v944_v38 = vpop.f32.mrb[19].mxu0  ;;  %v958_v40 = vmax.f32 %v950_v33, 0.0 }
 0x139   :  { %v945_v39 = vadd.f32 %v944_v38, %v896_v17  ;;  %v956_v42 = vmax.f32 %v942_v35, 0.0 }
 0x13a   :  { %v959_v41 = vmax.f32 %v953_v37, 0.0 }
 0x13b   :  { %v957_v43 = vmax.f32 %v945_v39, 0.0 }
 0x13c   :  { %v1098_v44 = vpack.c.bf16 %v959_v41, %v958_v40 }
 0x13d   :  { %v1093_v45 = vpack.c.bf16 %v957_v43, %v956_v42 }
 0x13e   :  { %1101 = vst [vmem:[%s1647_s3 + $0x8] sm:$0xff] %v1098_v44  }
 0x13f   :  { %1094 = vst [vmem:[%s1647_s3] sm:$0xff] %v1093_v45  }

</bundles_post_ra>
